<compile_context>
chip_gen: v6e
topology: v6e:2x2x1
jax: 0.10.0
libtpu: 0.0.40
codegen_flags: <defaults>
</compile_context>

<pallas_src>
import functools

import jax
import jax.numpy as jnp
from jax import lax
from jax.experimental import pallas as pl
from jax.experimental.pallas import tpu as pltpu

# ------------------------- configuration -------------------------
EMB = 32                       # emb_dim (768 in the original module)
IMG = 32                       # input image H = W
VIT_IMG = 16                   # transformer resize target (384 in the original)
PATCH = 4                      # patch size (16 in the original)
HEADS = 4                      # num_heads (12 in the original)
DEPTH = 5                      # only blocks 1..5 are observed (encoder_out=[1..5])
ENC_CH = (3, 8, 16, 24, 32, 48)            # stand-in for efficientnet-b5 out_channels
OUT_CH = [2 ** (8 + i) for i in range(4)]  # 256, 512, 1024, 2048 (faithful)
LN_EPS = 1e-5                  # nn.LayerNorm default


# ------------------------- small helpers -------------------------
def _erf(z):
    # Abramowitz & Stegun 7.1.26 polynomial, |abs err| <= 1.5e-7 (~f32 ulp).
    # TODO(synk): lax.erf is avoided inside kernels (no guaranteed Mosaic lowering);
    # this keeps GELU effectively exact at f32 precision.
    t = 1.0 / (1.0 + 0.3275911 * jnp.abs(z))
    poly = t * (0.254829592 + t * (-0.284496736 + t * (1.421413741
               + t * (-1.453152027 + t * 1.061405429))))
    e = 1.0 - poly * jnp.exp(-z * z)
    return jnp.where(z >= 0.0, e, -e)


def _gelu_exact(x):
    return 0.5 * x * (1.0 + _erf(x * 0.7071067811865476))


# ------------------------- tiled GEMM kernel (conv im2col / patch embed) ------------
def _matmul_kernel(a_ref, w_ref, b_ref, o_ref, acc_ref, *, act):
    @pl.when(pl.program_id(2) == 0)
    def _init():
        acc_ref[...] = jnp.zeros_like(acc_ref)

    acc_ref[...] += jnp.dot(a_ref[...], w_ref[...],
                            preferred_element_type=jnp.float32)

    @pl.when(pl.program_id(2) == pl.num_programs(2) - 1)
    def _finish():
        y = acc_ref[...] + b_ref[...]
        if act == "relu":
            y = jnp.maximum(y, 0.0)
        o_ref[...] = y.astype(o_ref.dtype)


def _tile(dim, target):
    # Use `target` only when it divides `dim` exactly; otherwise take the full dim
    # (full dims always satisfy the (8,128) BlockSpec constraint).
    return target if (dim > target and dim % target == 0) else dim


def pallas_matmul(a, w, b=None, act="none"):
    """a: (M, K) f32, w: (K, N) f32 GEMM-ready layout, fused bias (+ optional ReLU).
    f32 MXU operands, f32 accumulation (bf16 removed: not supported by the runtime's
    dot path and the shapes here are launch/DMA-bound anyway)."""
    M, K = a.shape
    N = w.shape[1]
    if b is None:
        b = jnp.zeros((N,), jnp.float32)
    b = b.reshape(1, N).astype(jnp.float32)
    tm, tn, tk = _tile(M, 256), _tile(N, 256), _tile(K, 512)
    grid = (M // tm, N // tn, K // tk)
    return pl.pallas_call(
        functools.partial(_matmul_kernel, act=act),
        out_shape=jax.ShapeDtypeStruct((M, N), jnp.float32),
        grid=grid,
        in_specs=[pl.BlockSpec((tm, tk), lambda i, j, k: (i, k)),
                  pl.BlockSpec((tk, tn), lambda i, j, k: (k, j)),
                  pl.BlockSpec((1, tn), lambda i, j, k: (0, j))],
        out_specs=pl.BlockSpec((tm, tn), lambda i, j, k: (i, j)),
        scratch_shapes=[pltpu.VMEM((tm, tn), jnp.float32)],
        compiler_params=pltpu.CompilerParams(
            dimension_semantics=("parallel", "parallel", "arbitrary")),
    )(a.astype(jnp.float32), w.astype(jnp.float32), b)


# ------------------------- NHWC conv glue (im2col + Pallas GEMM) ---------------------
def conv2d_nhwc(x, w2, b, kh, kw, stride, padding, act="none"):
    """PyTorch Conv2d semantics in NHWC. x: (B,H,W,C); w2: GEMM-ready (kh*kw*Cin, Cout)
    with rows ordered (di, dj, cin); b: (Cout,).
    # TODO(synk): patch extraction (im2col) stays in XLA glue; only the GEMM runs in
    # the tiled Pallas kernel. At faithful sizes the gather should be fused in-kernel."""
    B, H, W, C = x.shape
    Cout = w2.shape[1]
    xp = jnp.pad(x, ((0, 0), (padding, padding), (padding, padding), (0, 0)))
    Ho = (H + 2 * padding - kh) // stride + 1
    Wo = (W + 2 * padding - kw) // stride + 1
    cols = []
    for di in range(kh):
        for dj in range(kw):
            cols.append(lax.slice(
                xp, (0, di, dj, 0),
                (B, di + (Ho - 1) * stride + 1, dj + (Wo - 1) * stride + 1, C),
                (1, stride, stride, 1)))
    patches = jnp.concatenate(cols, axis=-1).reshape(B * Ho * Wo, kh * kw * C)
    y = pallas_matmul(patches, w2, b, act=act)
    return y.reshape(B, Ho, Wo, Cout)


# ------------------------- fused 5-block ViT stack + final LN kernel -----------------
def _vit_stack_kernel(x_ref, g1_ref, b1_ref, qw_ref, qb_ref, pw_ref, pb_ref,
                      g2_ref, b2_ref, f1w_ref, f1b_ref, f2w_ref, f2b_ref,
                      ng_ref, nb_ref, feat_ref, xres_ref, *, heads):
    d = pl.program_id(1)                               # depth step (arbitrary axis)
    L, E = xres_ref.shape
    dh = E // heads
    scale = dh ** -0.5

    # Residual stream stays resident in VMEM across the whole depth loop.
    @pl.when(d == 0)
    def _():
        xres_ref[...] = x_ref[...]

    x = xres_ref[...]

    def ln(v, g, b):                                   # f32 statistics (nn.LayerNorm)
        mu = jnp.mean(v, axis=-1, keepdims=True)
        vc = v - mu
        var = jnp.mean(vc * vc, axis=-1, keepdims=True)
        return vc * lax.rsqrt(var + LN_EPS) * g + b

    # ---- attention branch: one fused QKV matmul, per-head softmax, one proj matmul --
    h = ln(x, g1_ref[...], b1_ref[...])
    qkv = jnp.dot(h, qw_ref[...], preferred_element_type=jnp.float32) + qb_ref[...]
    head_outs = []
    for hd in range(heads):                            # static unroll (tiny dh/L)
        q = qkv[:, hd * dh:(hd + 1) * dh]
        k = qkv[:, E + hd * dh:E + (hd + 1) * dh]
        v = qkv[:, 2 * E + hd * dh:2 * E + (hd + 1) * dh]
        s = lax.dot_general(q, k, (((1,), (1,)), ((), ())),
                            preferred_element_type=jnp.float32) * scale
        s = s - jnp.max(s, axis=-1, keepdims=True)
        p = jnp.exp(s)
        p = p / jnp.sum(p, axis=-1, keepdims=True)
        head_outs.append(jnp.dot(p, v, preferred_element_type=jnp.float32))
    attn = jnp.concatenate(head_outs, axis=-1)         # concat(heads) -> (L, E)
    x = x + jnp.dot(attn, pw_ref[...],
                    preferred_element_type=jnp.float32) + pb_ref[...]

    # ---- MLP branch (GELU fused) ----
    h2 = ln(x, g2_ref[...], b2_ref[...])
    m = jnp.dot(h2, f1w_ref[...], preferred_element_type=jnp.float32) + f1b_ref[...]
    m = _gelu_exact(m)
    m = jnp.dot(m, f2w_ref[...], preferred_element_type=jnp.float32) + f2b_ref[...]
    x = x + m

    xres_ref[...] = x
    # Final self.norm applied to every collected feature -> fused per-depth epilogue.
    feat_ref[...] = ln(x, ng_ref[...], nb_ref[...]).astype(feat_ref.dtype)


def pallas_vit_stack(x, sp):
    """x: (B, L, E) tokens after patch-embed + cls + pos.
    Returns the 5 collected + final-normed features stacked as (DEPTH, B, L, E)."""
    B, L, E = x.shape
    D = sp["qkv_w"].shape[0]

    def wspec(a):
        if a.ndim == 3:                                # depth-stacked weight (D, r, c)
            return pl.BlockSpec((None,) + a.shape[1:], lambda b, d: (d, 0, 0))
        return pl.BlockSpec(a.shape, lambda b, d: (0, 0))

    args = (x, sp["ln1_g"], sp["ln1_b"], sp["qkv_w"], sp["qkv_b"],
            sp["proj_w"], sp["proj_b"], sp["ln2_g"], sp["ln2_b"],
            sp["fc1_w"], sp["fc1_b"], sp["fc2_w"], sp["fc2_b"],
            sp["norm_g"], sp["norm_b"])
    in_specs = ([pl.BlockSpec((None, L, E), lambda b, d: (b, 0, 0))]
                + [wspec(a) for a in args[1:]])
    return pl.pallas_call(
        functools.partial(_vit_stack_kernel, heads=HEADS),
        out_shape=jax.ShapeDtypeStruct((D, B, L, E), jnp.float32),
        grid=(B, D),
        in_specs=in_specs,
        out_specs=pl.BlockSpec((None, None, L, E), lambda b, d: (d, b, 0, 0)),
        scratch_shapes=[pltpu.VMEM((L, E), jnp.float32)],
        compiler_params=pltpu.CompilerParams(
            dimension_semantics=("parallel", "arbitrary")),
    )(*args)


# ------------------------- fused project() + output_conv kernel ----------------------
def _project_outconv_kernel(x_ref, t_ref, wq_ref, wk_ref, wo_ref, bo_ref, o_ref):
    x = x_ref[...]                                     # (P, E) conv tokens
    t = t_ref[...]                                     # (L, E) ViT tokens
    xwq = jnp.dot(x, wq_ref[...], preferred_element_type=jnp.float32)
    twk = jnp.dot(t, wk_ref[...], preferred_element_type=jnp.float32)
    # NOTE: the original Viteff.project applies NO 1/sqrt(E) scaling -- kept faithful.
    s = lax.dot_general(xwq, twk, (((1,), (1,)), ((), ())),
                        preferred_element_type=jnp.float32)
    s = s - jnp.max(s, axis=-1, keepdims=True)
    a = jnp.exp(s)
    a = a / jnp.sum(a, axis=-1, keepdims=True)
    proj = x + jnp.dot(a, t, preferred_element_type=jnp.float32)
    o_ref[...] = (jnp.dot(proj, wo_ref[...], preferred_element_type=jnp.float32)
                  + bo_ref[...]).astype(o_ref.dtype)


def pallas_project_outconv(x, t_all, level, wq, wk, wo, bo):
    """x: (B, P, E) conv tokens; t_all: (DEPTH, B, L, E) normed ViT features
    (this level selected directly by the BlockSpec index_map); wo: (E, Cout) 1x1 conv."""
    B, P, E = x.shape
    _, _, L, _ = t_all.shape
    C = wo.shape[1]
    return pl.pallas_call(
        _project_outconv_kernel,
        out_shape=jax.ShapeDtypeStruct((B, P, C), jnp.float32),
        grid=(B,),
        in_specs=[pl.BlockSpec((None, P, E), lambda b: (b, 0, 0)),
                  pl.BlockSpec((None, None, L, E), lambda b, _lv=level: (_lv, b, 0, 0)),
                  pl.BlockSpec((E, E), lambda b: (0, 0)),
                  pl.BlockSpec((E, E), lambda b: (0, 0)),
                  pl.BlockSpec((E, C), lambda b: (0, 0)),
                  pl.BlockSpec((1, C), lambda b: (0, 0))],
        out_specs=pl.BlockSpec((None, P, C), lambda b: (b, 0, 0)),
        compiler_params=pltpu.CompilerParams(dimension_semantics=("parallel",)),
    )(x, t_all, wq, wk, wo, bo)


# ------------------------- ViT (Transformer_Encoder) -------------------------
def vit_forward(image_nhwc, p):
    B = image_nhwc.shape[0]
    # F.interpolate(mode='nearest') 32->16: exact integer factor -> strided slice.
    x = image_nhwc[:, ::IMG // VIT_IMG, ::IMG // VIT_IMG, :]
    x = conv2d_nhwc(x, p["patch_w"], p["patch_b"], PATCH, PATCH,
                    stride=PATCH, padding=0)            # (B, gh, gw, E)
    x = x.reshape(B, -1, EMB)                           # same (h,w)-major token order
    cls = jnp.broadcast_to(p["cls_token"], (B, 1, EMB))
    x = jnp.concatenate([cls, x], axis=1) + p["pos_embed"]
    # One pallas_call: 5 blocks + final norm, residual resident in VMEM.
    return pallas_vit_stack(x, p["stack"])              # (DEPTH, B, L, E)


# ------------------------- Viteff forward -------------------------
def viteff_forward(image, params):
    image_nhwc = image.transpose(0, 2, 3, 1)             # single NCHW->NHWC convert

    # conv encoder: SMP-style feature list, features[0] is the input itself.
    feats = []
    x = image_nhwc
    for st in params["enc_stages"]:
        x = conv2d_nhwc(x, st["w"], st["b"], 3, 3, stride=2, padding=1, act="relu")
        feats.append(x)
    conv_features = [conv2d_nhwc(feats[i], params["conv_final"][i]["w"],
                                 params["conv_final"][i]["b"], 3, 3,
                                 stride=2, padding=1)
                     for i in range(len(feats))]

    t_feats = vit_forward(image_nhwc, params["vit"])      # (DEPTH, B, L, E), normed

    # project() + emb2img() + output_conv fused per level.  The original computes the
    # projection for all 5 levels but drops the last before output_conv, so level 4's
    # projection never affects the outputs -> it is skipped.
    outs = [image]
    for i in range(len(params["out_conv"])):
        cf = conv_features[i]                             # (B, H, W, E) NHWC
        B, H, W, E = cf.shape
        xf = cf.reshape(B, H * W, E)                      # == 'b c h w -> b (h w) c'
        wo = params["out_conv"][i]["w"]                   # (E, Cout)
        y = pallas_project_outconv(xf, t_feats, i, params["Wq"], params["Wk"],
                                   wo, params["out_conv"][i]["b"])
        Cout = wo.shape[1]
        outs.append(y.transpose(0, 2, 1).reshape(B, Cout, H, W))   # back to NCHW
    return outs


# ------------------------- deterministic parameter init -------------------------
def init_params(key):
    ks = iter(jax.random.split(key, 256))

    def n(shape, std=0.02):
        return jax.random.normal(next(ks), shape, jnp.float32) * std

    def zeros(shape):
        return jnp.zeros(shape, jnp.float32)

    def ones(shape):
        return jnp.ones(shape, jnp.float32)

    def conv_w(cout, cin, k):
        # PyTorch (Cout,Cin,kh,kw) -> GEMM-ready (kh*kw*Cin, Cout), rows ordered
        # (di, dj, cin) to match the NHWC im2col emitted by conv2d_nhwc.
        w = n((cout, cin, k, k))
        return w.transpose(2, 3, 1, 0).reshape(k * k * cin, cout)

    params = {}
    # TODO(synk): the timm-efficientnet-b5 encoder (MBConv/SE/SiLU, noisy-student
    # pretrained) is not reproduced; replaced by a 5-stage stride-2 conv+ReLU pyramid
    # with the same multi-scale feature-list structure as the SMP encoder.
    params["enc_stages"] = [{"w": conv_w(ENC_CH[i + 1], ENC_CH[i], 3),
                             "b": zeros((ENC_CH[i + 1],))} for i in range(5)]
    params["conv_final"] = [{"w": conv_w(EMB, ENC_CH[i], 3), "b": zeros((EMB,))}
                            for i in range(1, 6)]
    # 1x1 output_conv stored GEMM-ready (E, Cout) + (1, Cout) bias (lane-dense Cout).
    params["out_conv"] = [{"w": n((EMB, OUT_CH[i])), "b": zeros((1, OUT_CH[i]))}
                          for i in range(4)]
    # nn.Linear(emb, emb, bias=False): stored as weight.T -> (in, out)
    params["Wq"] = n((EMB, EMB))
    params["Wk"] = n((EMB, EMB))

    # TODO(synk): pretrained vit_base_patch16_384 weights are not loaded; synthetic
    # init at the scaled-down EMB=32 / depth=5 configuration.
    vit = {"patch_w": conv_w(EMB, 3, PATCH), "patch_b": zeros((EMB,)),
           "cls_token": n((1, 1, EMB)),
           "pos_embed": n((1, (VIT_IMG // PATCH) ** 2 + 1, EMB))}
    D, E = DEPTH, EMB
    # Per-block weights stacked along a leading depth axis for the fused stack kernel.
    vit["stack"] = {
        "ln1_g": ones((D, 1, E)), "ln1_b": zeros((D, 1, E)),
        "qkv_w": n((D, E, 3 * E)), "qkv_b": zeros((D, 1, 3 * E)),
        "proj_w": n((D, E, E)), "proj_b": zeros((D, 1, E)),
        "ln2_g": ones((D, 1, E)), "ln2_b": zeros((D, 1, E)),
        "fc1_w": n((D, E, 4 * E)), "fc1_b": zeros((D, 1, 4 * E)),
        "fc2_w": n((D, 4 * E, E)), "fc2_b": zeros((D, 1, E)),
        "norm_g": ones((1, E)), "norm_b": zeros((1, E)),
    }
    params["vit"] = vit
    return params


if __name__ == "__main__":
    image = jax.random.normal(jax.random.PRNGKey(0), (2, 3, IMG, IMG), jnp.float32)
    params = init_params(jax.random.PRNGKey(42))
    outs = jax.jit(viteff_forward)(image, params)
    outs = jax.block_until_ready(outs)
    expected = [(2, 3, 32, 32), (2, 256, 8, 8), (2, 512, 4, 4),
                (2, 1024, 2, 2), (2, 2048, 1, 1)]
    assert [tuple(o.shape) for o in outs] == expected, [o.shape for o in outs]
    assert all(bool(jnp.all(jnp.isfinite(o))) for o in outs)
    print("KERNEL_OK")
</pallas_src>

<mosaic_0001>
module attributes {stable_mosaic.version = 11 : i64} {
  func.func @_matmul_kernel(%arg0: i32, %arg1: i32, %arg2: i32, %arg3: memref<32x48xf32, #tpu.memory_space<vmem>>, %arg4: memref<48x32xf32, #tpu.memory_space<vmem>>, %arg5: memref<1x32xf32, #tpu.memory_space<vmem>>, %arg6: memref<32x32xf32, #tpu.memory_space<vmem>>, %arg7: memref<32x32xf32, #tpu.memory_space<vmem>>) attributes {dimension_semantics = [#tpu.dimension_semantics<parallel>, #tpu.dimension_semantics<parallel>, #tpu.dimension_semantics<arbitrary>], iteration_bounds = array<i64: 1, 1, 1>, scalar_prefetch = 0 : i64, scratch_operands = 1 : i64, tpu.core_type = #tpu.core_type<tc>, window_params = [{transform_indices = @transform_0, window_bounds = array<i64: 32, 48>}, {transform_indices = @transform_1, window_bounds = array<i64: 48, 32>}, {transform_indices = @transform_2, window_bounds = array<i64: 1, 32>}, {transform_indices = @transform_3, window_bounds = array<i64: 32, 32>}]} {
    %c0_i32 = arith.constant 0 : i32
    %0 = arith.cmpi eq, %arg2, %c0_i32 : i32
    %1 = arith.extui %0 : i1 to i32
    %c0_i32_0 = arith.constant 0 : i32
    %2 = arith.cmpi ne, %1, %c0_i32_0 : i32
    scf.if %2 {
      %cst_10 = arith.constant 0.000000e+00 : f32
      %12 = vector.broadcast %cst_10 : f32 to vector<32x32xf32>
      %c0_11 = arith.constant 0 : index
      %c0_12 = arith.constant 0 : index
      %13 = vector.load %arg7[%c0_11, %c0_12] : memref<32x32xf32, #tpu.memory_space<vmem>>, vector<32x32xf32>
      tpu.vector_store %arg7[%c0_11, %c0_12], %12 {strides = array<i32>} : memref<32x32xf32, #tpu.memory_space<vmem>>, vector<32x32xf32>,
    } else {
    }
    %c0 = arith.constant 0 : index
    %c0_1 = arith.constant 0 : index
    %3 = vector.load %arg7[%c0, %c0_1] : memref<32x32xf32, #tpu.memory_space<vmem>>, vector<32x32xf32>
    %c0_2 = arith.constant 0 : index
    %c0_3 = arith.constant 0 : index
    %4 = vector.load %arg3[%c0_2, %c0_3] : memref<32x48xf32, #tpu.memory_space<vmem>>, vector<32x48xf32>
    %c0_4 = arith.constant 0 : index
    %c0_5 = arith.constant 0 : index
    %5 = vector.load %arg4[%c0_4, %c0_5] : memref<48x32xf32, #tpu.memory_space<vmem>>, vector<48x32xf32>
    %cst = arith.constant dense<0.000000e+00> : vector<32x32xf32>
    %6 = tpu.matmul %4, %5, %cst {dimension_numbers = #tpu.dot_dimension_numbers<[1], [0], [0], [1], [0, 0, 1, 1], [], []>} : vector<32x48xf32>, vector<48x32xf32>, vector<32x32xf32> -> vector<32x32xf32>
    %7 = arith.addf %3, %6 : vector<32x32xf32>
    %c0_6 = arith.constant 0 : index
    %c0_7 = arith.constant 0 : index
    %8 = vector.load %arg7[%c0_6, %c0_7] : memref<32x32xf32, #tpu.memory_space<vmem>>, vector<32x32xf32>
    tpu.vector_store %arg7[%c0_6, %c0_7], %7 {strides = array<i32>} : memref<32x32xf32, #tpu.memory_space<vmem>>, vector<32x32xf32>,
    %c0_i32_8 = arith.constant 0 : i32
    %9 = arith.cmpi eq, %arg2, %c0_i32_8 : i32
    %10 = arith.extui %9 : i1 to i32
    %c0_i32_9 = arith.constant 0 : i32
    %11 = arith.cmpi ne, %10, %c0_i32_9 : i32
    scf.if %11 {
      %c0_10 = arith.constant 0 : index
      %c0_11 = arith.constant 0 : index
      %12 = vector.load %arg7[%c0_10, %c0_11] : memref<32x32xf32, #tpu.memory_space<vmem>>, vector<32x32xf32>
      %c0_12 = arith.constant 0 : index
      %c0_13 = arith.constant 0 : index
      %13 = vector.load %arg5[%c0_12, %c0_13] : memref<1x32xf32, #tpu.memory_space<vmem>>, vector<1x32xf32>
      %14 = vector.broadcast %13 : vector<1x32xf32> to vector<32x32xf32>
      %15 = arith.addf %12, %14 : vector<32x32xf32>
      %c0_14 = arith.constant 0 : index
      %c0_15 = arith.constant 0 : index
      %16 = vector.load %arg6[%c0_14, %c0_15] : memref<32x32xf32, #tpu.memory_space<vmem>>, vector<32x32xf32>
      tpu.vector_store %arg6[%c0_14, %c0_15], %15 {strides = array<i32>} : memref<32x32xf32, #tpu.memory_space<vmem>>, vector<32x32xf32>,
    } else {
    }
    return
  }
  func.func @transform_0(%arg0: i32, %arg1: i32, %arg2: i32) -> (i32, i32) {
    %c0_i32 = arith.constant 0 : i32
    return %arg0, %arg2 : i32, i32
  }
  func.func @transform_1(%arg0: i32, %arg1: i32, %arg2: i32) -> (i32, i32) {
    %c0_i32 = arith.constant 0 : i32
    return %arg2, %arg1 : i32, i32
  }
  func.func @transform_2(%arg0: i32, %arg1: i32, %arg2: i32) -> (i32, i32) {
    %c0_i32 = arith.constant 0 : i32
    %c0_i32_0 = arith.constant 0 : i32
    return %c0_i32, %arg1 : i32, i32
  }
  func.func @transform_3(%arg0: i32, %arg1: i32, %arg2: i32) -> (i32, i32) {
    %c0_i32 = arith.constant 0 : i32
    return %arg0, %arg1 : i32, i32
  }
}

module attributes {stable_mosaic.version = 11 : i64} {
  func.func @_vit_stack_kernel(%arg0: i32, %arg1: i32, %arg2: memref<1x17x32xf32, #tpu.memory_space<vmem>>, %arg3: memref<1x1x32xf32, #tpu.memory_space<vmem>>, %arg4: memref<1x1x32xf32, #tpu.memory_space<vmem>>, %arg5: memref<1x32x96xf32, #tpu.memory_space<vmem>>, %arg6: memref<1x1x96xf32, #tpu.memory_space<vmem>>, %arg7: memref<1x32x32xf32, #tpu.memory_space<vmem>>, %arg8: memref<1x1x32xf32, #tpu.memory_space<vmem>>, %arg9: memref<1x1x32xf32, #tpu.memory_space<vmem>>, %arg10: memref<1x1x32xf32, #tpu.memory_space<vmem>>, %arg11: memref<1x32x128xf32, #tpu.memory_space<vmem>>, %arg12: memref<1x1x128xf32, #tpu.memory_space<vmem>>, %arg13: memref<1x128x32xf32, #tpu.memory_space<vmem>>, %arg14: memref<1x1x32xf32, #tpu.memory_space<vmem>>, %arg15: memref<1x32xf32, #tpu.memory_space<vmem>>, %arg16: memref<1x32xf32, #tpu.memory_space<vmem>>, %arg17: memref<1x1x17x32xf32, #tpu.memory_space<vmem>>, %arg18: memref<17x32xf32, #tpu.memory_space<vmem>>) attributes {dimension_semantics = [#tpu.dimension_semantics<parallel>, #tpu.dimension_semantics<arbitrary>], iteration_bounds = array<i64: 2, 5>, scalar_prefetch = 0 : i64, scratch_operands = 1 : i64, tpu.core_type = #tpu.core_type<tc>, window_params = [{transform_indices = @transform_0, window_bounds = array<i64: 1, 17, 32>}, {transform_indices = @transform_1, window_bounds = array<i64: 1, 1, 32>}, {transform_indices = @transform_2, window_bounds = array<i64: 1, 1, 32>}, {transform_indices = @transform_3, window_bounds = array<i64: 1, 32, 96>}, {transform_indices = @transform_4, window_bounds = array<i64: 1, 1, 96>}, {transform_indices = @transform_5, window_bounds = array<i64: 1, 32, 32>}, {transform_indices = @transform_6, window_bounds = array<i64: 1, 1, 32>}, {transform_indices = @transform_7, window_bounds = array<i64: 1, 1, 32>}, {transform_indices = @transform_8, window_bounds = array<i64: 1, 1, 32>}, {transform_indices = @transform_9, window_bounds = array<i64: 1, 32, 128>}, {transform_indices = @transform_10, window_bounds = array<i64: 1, 1, 128>}, {transform_indices = @transform_11, window_bounds = array<i64: 1, 128, 32>}, {transform_indices = @transform_12, window_bounds = array<i64: 1, 1, 32>}, {pipeline_mode = #tpu.pipeline_mode<synchronous>, transform_indices = @transform_13, window_bounds = array<i64: 1, 32>}, {pipeline_mode = #tpu.pipeline_mode<synchronous>, transform_indices = @transform_14, window_bounds = array<i64: 1, 32>}, {transform_indices = @transform_15, window_bounds = array<i64: 1, 1, 17, 32>}]} {
    %c0_i32 = arith.constant 0 : i32
    %0 = arith.cmpi eq, %arg1, %c0_i32 : i32
    %1 = arith.extui %0 : i1 to i32
    %c0_i32_0 = arith.constant 0 : i32
    %2 = arith.cmpi ne, %1, %c0_i32_0 : i32
    scf.if %2 {
      %c0_101 = arith.constant 0 : index
      %c0_102 = arith.constant 0 : index
      %c0_103 = arith.constant 0 : index
      %213 = vector.load %arg2[%c0_101, %c0_102, %c0_103] : memref<1x17x32xf32, #tpu.memory_space<vmem>>, vector<1x17x32xf32>
      %214 = vector.shape_cast %213 : vector<1x17x32xf32> to vector<17x32xf32>
      %c0_104 = arith.constant 0 : index
      %c0_105 = arith.constant 0 : index
      %215 = vector.load %arg18[%c0_104, %c0_105] : memref<17x32xf32, #tpu.memory_space<vmem>>, vector<17x32xf32>
      tpu.vector_store %arg18[%c0_104, %c0_105], %214 {strides = array<i32>} : memref<17x32xf32, #tpu.memory_space<vmem>>, vector<17x32xf32>,
    } else {
    }
    %c0 = arith.constant 0 : index
    %c0_1 = arith.constant 0 : index
    %3 = vector.load %arg18[%c0, %c0_1] : memref<17x32xf32, #tpu.memory_space<vmem>>, vector<17x32xf32>
    %c0_2 = arith.constant 0 : index
    %c0_3 = arith.constant 0 : index
    %c0_4 = arith.constant 0 : index
    %4 = vector.load %arg3[%c0_2, %c0_3, %c0_4] : memref<1x1x32xf32, #tpu.memory_space<vmem>>, vector<1x1x32xf32>
    %5 = vector.shape_cast %4 : vector<1x1x32xf32> to vector<1x32xf32>
    %c0_5 = arith.constant 0 : index
    %c0_6 = arith.constant 0 : index
    %c0_7 = arith.constant 0 : index
    %6 = vector.load %arg4[%c0_5, %c0_6, %c0_7] : memref<1x1x32xf32, #tpu.memory_space<vmem>>, vector<1x1x32xf32>
    %7 = vector.shape_cast %6 : vector<1x1x32xf32> to vector<1x32xf32>
    %cst = arith.constant dense<0.000000e+00> : vector<17xf32>
    %8 = vector.multi_reduction <add>, %3, %cst [1] : vector<17x32xf32> to vector<17xf32>
    %9 = vector.shape_cast %8 : vector<17xf32> to vector<17x1xf32>
    %cst_8 = arith.constant 3.200000e+01 : f32
    %10 = vector.broadcast %cst_8 : f32 to vector<17x1xf32>
    %11 = arith.divf %9, %10 : vector<17x1xf32>
    %12 = vector.broadcast %11 : vector<17x1xf32> to vector<17x32xf32>
    %13 = arith.subf %3, %12 : vector<17x32xf32>
    %14 = arith.mulf %13, %13 : vector<17x32xf32>
    %cst_9 = arith.constant dense<0.000000e+00> : vector<17xf32>
    %15 = vector.multi_reduction <add>, %14, %cst_9 [1] : vector<17x32xf32> to vector<17xf32>
    %16 = vector.shape_cast %15 : vector<17xf32> to vector<17x1xf32>
    %cst_10 = arith.constant 3.200000e+01 : f32
    %17 = vector.broadcast %cst_10 : f32 to vector<17x1xf32>
    %18 = arith.divf %16, %17 : vector<17x1xf32>
    %cst_11 = arith.constant 9.99999974E-6 : f32
    %19 = vector.broadcast %cst_11 : f32 to vector<17x1xf32>
    %20 = arith.addf %18, %19 : vector<17x1xf32>
    %21 = math.rsqrt %20 : vector<17x1xf32>
    %22 = vector.broadcast %21 : vector<17x1xf32> to vector<17x32xf32>
    %23 = arith.mulf %13, %22 : vector<17x32xf32>
    %24 = vector.broadcast %5 : vector<1x32xf32> to vector<17x32xf32>
    %25 = arith.mulf %23, %24 : vector<17x32xf32>
    %26 = vector.broadcast %7 : vector<1x32xf32> to vector<17x32xf32>
    %27 = arith.addf %25, %26 : vector<17x32xf32>
    %c0_12 = arith.constant 0 : index
    %c0_13 = arith.constant 0 : index
    %c0_14 = arith.constant 0 : index
    %28 = vector.load %arg5[%c0_12, %c0_13, %c0_14] : memref<1x32x96xf32, #tpu.memory_space<vmem>>, vector<1x32x96xf32>
    %29 = vector.shape_cast %28 : vector<1x32x96xf32> to vector<32x96xf32>
    %cst_15 = arith.constant dense<0.000000e+00> : vector<17x96xf32>
    %30 = tpu.matmul %27, %29, %cst_15 {dimension_numbers = #tpu.dot_dimension_numbers<[1], [0], [0], [1], [0, 0, 1, 1], [], []>} : vector<17x32xf32>, vector<32x96xf32>, vector<17x96xf32> -> vector<17x96xf32>
    %c0_16 = arith.constant 0 : index
    %c0_17 = arith.constant 0 : index
    %c0_18 = arith.constant 0 : index
    %31 = vector.load %arg6[%c0_16, %c0_17, %c0_18] : memref<1x1x96xf32, #tpu.memory_space<vmem>>, vector<1x1x96xf32>
    %32 = vector.shape_cast %31 : vector<1x1x96xf32> to vector<1x96xf32>
    %33 = vector.broadcast %32 : vector<1x96xf32> to vector<17x96xf32>
    %34 = arith.addf %30, %33 : vector<17x96xf32>
    %35 = vector.extract_strided_slice %34 {offsets = [0, 0], sizes = [17, 8], strides = [1, 1]} : vector<17x96xf32> to vector<17x8xf32>
    %36 = vector.extract_strided_slice %34 {offsets = [0, 32], sizes = [17, 8], strides = [1, 1]} : vector<17x96xf32> to vector<17x8xf32>
    %37 = vector.extract_strided_slice %34 {offsets = [0, 64], sizes = [17, 8], strides = [1, 1]} : vector<17x96xf32> to vector<17x8xf32>
    %cst_19 = arith.constant dense<0.000000e+00> : vector<17x17xf32>
    %38 = tpu.matmul %35, %36, %cst_19 {dimension_numbers = #tpu.dot_dimension_numbers<[1], [1], [0], [0], [0, 0, 1, 0], [], []>} : vector<17x8xf32>, vector<17x8xf32>, vector<17x17xf32> -> vector<17x17xf32>
    %cst_20 = arith.constant 0.353553385 : f32
    %39 = vector.broadcast %cst_20 : f32 to vector<17x17xf32>
    %40 = arith.mulf %38, %39 : vector<17x17xf32>
    %cst_21 = arith.constant dense<0xFF800000> : vector<17xf32>
    %41 = vector.multi_reduction <maximumf>, %40, %cst_21 [1] : vector<17x17xf32> to vector<17xf32>
    %42 = vector.shape_cast %41 : vector<17xf32> to vector<17x1xf32>
    %43 = vector.broadcast %42 : vector<17x1xf32> to vector<17x17xf32>
    %44 = arith.subf %40, %43 : vector<17x17xf32>
    %45 = math.exp %44 : vector<17x17xf32>
    %cst_22 = arith.constant dense<0.000000e+00> : vector<17xf32>
    %46 = vector.multi_reduction <add>, %45, %cst_22 [1] : vector<17x17xf32> to vector<17xf32>
    %47 = vector.shape_cast %46 : vector<17xf32> to vector<17x1xf32>
    %48 = vector.broadcast %47 : vector<17x1xf32> to vector<17x17xf32>
    %49 = arith.divf %45, %48 : vector<17x17xf32>
    %cst_23 = arith.constant dense<0.000000e+00> : vector<17x8xf32>
    %50 = tpu.matmul %49, %37, %cst_23 {dimension_numbers = #tpu.dot_dimension_numbers<[1], [0], [0], [1], [0, 0, 1, 1], [], []>} : vector<17x17xf32>, vector<17x8xf32>, vector<17x8xf32> -> vector<17x8xf32>
    %51 = vector.extract_strided_slice %34 {offsets = [0, 8], sizes = [17, 8], strides = [1, 1]} : vector<17x96xf32> to vector<17x8xf32>
    %52 = vector.extract_strided_slice %34 {offsets = [0, 40], sizes = [17, 8], strides = [1, 1]} : vector<17x96xf32> to vector<17x8xf32>
    %53 = vector.extract_strided_slice %34 {offsets = [0, 72], sizes = [17, 8], strides = [1, 1]} : vector<17x96xf32> to vector<17x8xf32>
    %cst_24 = arith.constant dense<0.000000e+00> : vector<17x17xf32>
    %54 = tpu.matmul %51, %52, %cst_24 {dimension_numbers = #tpu.dot_dimension_numbers<[1], [1], [0], [0], [0, 0, 1, 0], [], []>} : vector<17x8xf32>, vector<17x8xf32>, vector<17x17xf32> -> vector<17x17xf32>
    %cst_25 = arith.constant 0.353553385 : f32
    %55 = vector.broadcast %cst_25 : f32 to vector<17x17xf32>
    %56 = arith.mulf %54, %55 : vector<17x17xf32>
    %cst_26 = arith.constant dense<0xFF800000> : vector<17xf32>
    %57 = vector.multi_reduction <maximumf>, %56, %cst_26 [1] : vector<17x17xf32> to vector<17xf32>
    %58 = vector.shape_cast %57 : vector<17xf32> to vector<17x1xf32>
    %59 = vector.broadcast %58 : vector<17x1xf32> to vector<17x17xf32>
    %60 = arith.subf %56, %59 : vector<17x17xf32>
    %61 = math.exp %60 : vector<17x17xf32>
    %cst_27 = arith.constant dense<0.000000e+00> : vector<17xf32>
    %62 = vector.multi_reduction <add>, %61, %cst_27 [1] : vector<17x17xf32> to vector<17xf32>
    %63 = vector.shape_cast %62 : vector<17xf32> to vector<17x1xf32>
    %64 = vector.broadcast %63 : vector<17x1xf32> to vector<17x17xf32>
    %65 = arith.divf %61, %64 : vector<17x17xf32>
    %cst_28 = arith.constant dense<0.000000e+00> : vector<17x8xf32>
    %66 = tpu.matmul %65, %53, %cst_28 {dimension_numbers = #tpu.dot_dimension_numbers<[1], [0], [0], [1], [0, 0, 1, 1], [], []>} : vector<17x17xf32>, vector<17x8xf32>, vector<17x8xf32> -> vector<17x8xf32>
    %67 = vector.extract_strided_slice %34 {offsets = [0, 16], sizes = [17, 8], strides = [1, 1]} : vector<17x96xf32> to vector<17x8xf32>
    %68 = vector.extract_strided_slice %34 {offsets = [0, 48], sizes = [17, 8], strides = [1, 1]} : vector<17x96xf32> to vector<17x8xf32>
    %69 = vector.extract_strided_slice %34 {offsets = [0, 80], sizes = [17, 8], strides = [1, 1]} : vector<17x96xf32> to vector<17x8xf32>
    %cst_29 = arith.constant dense<0.000000e+00> : vector<17x17xf32>
    %70 = tpu.matmul %67, %68, %cst_29 {dimension_numbers = #tpu.dot_dimension_numbers<[1], [1], [0], [0], [0, 0, 1, 0], [], []>} : vector<17x8xf32>, vector<17x8xf32>, vector<17x17xf32> -> vector<17x17xf32>
    %cst_30 = arith.constant 0.353553385 : f32
    %71 = vector.broadcast %cst_30 : f32 to vector<17x17xf32>
    %72 = arith.mulf %70, %71 : vector<17x17xf32>
    %cst_31 = arith.constant dense<0xFF800000> : vector<17xf32>
    %73 = vector.multi_reduction <maximumf>, %72, %cst_31 [1] : vector<17x17xf32> to vector<17xf32>
    %74 = vector.shape_cast %73 : vector<17xf32> to vector<17x1xf32>
    %75 = vector.broadcast %74 : vector<17x1xf32> to vector<17x17xf32>
    %76 = arith.subf %72, %75 : vector<17x17xf32>
    %77 = math.exp %76 : vector<17x17xf32>
    %cst_32 = arith.constant dense<0.000000e+00> : vector<17xf32>
    %78 = vector.multi_reduction <add>, %77, %cst_32 [1] : vector<17x17xf32> to vector<17xf32>
    %79 = vector.shape_cast %78 : vector<17xf32> to vector<17x1xf32>
    %80 = vector.broadcast %79 : vector<17x1xf32> to vector<17x17xf32>
    %81 = arith.divf %77, %80 : vector<17x17xf32>
    %cst_33 = arith.constant dense<0.000000e+00> : vector<17x8xf32>
    %82 = tpu.matmul %81, %69, %cst_33 {dimension_numbers = #tpu.dot_dimension_numbers<[1], [0], [0], [1], [0, 0, 1, 1], [], []>} : vector<17x17xf32>, vector<17x8xf32>, vector<17x8xf32> -> vector<17x8xf32>
    %83 = vector.extract_strided_slice %34 {offsets = [0, 24], sizes = [17, 8], strides = [1, 1]} : vector<17x96xf32> to vector<17x8xf32>
    %84 = vector.extract_strided_slice %34 {offsets = [0, 56], sizes = [17, 8], strides = [1, 1]} : vector<17x96xf32> to vector<17x8xf32>
    %85 = vector.extract_strided_slice %34 {offsets = [0, 88], sizes = [17, 8], strides = [1, 1]} : vector<17x96xf32> to vector<17x8xf32>
    %cst_34 = arith.constant dense<0.000000e+00> : vector<17x17xf32>
    %86 = tpu.matmul %83, %84, %cst_34 {dimension_numbers = #tpu.dot_dimension_numbers<[1], [1], [0], [0], [0, 0, 1, 0], [], []>} : vector<17x8xf32>, vector<17x8xf32>, vector<17x17xf32> -> vector<17x17xf32>
    %cst_35 = arith.constant 0.353553385 : f32
    %87 = vector.broadcast %cst_35 : f32 to vector<17x17xf32>
    %88 = arith.mulf %86, %87 : vector<17x17xf32>
    %cst_36 = arith.constant dense<0xFF800000> : vector<17xf32>
    %89 = vector.multi_reduction <maximumf>, %88, %cst_36 [1] : vector<17x17xf32> to vector<17xf32>
    %90 = vector.shape_cast %89 : vector<17xf32> to vector<17x1xf32>
    %91 = vector.broadcast %90 : vector<17x1xf32> to vector<17x17xf32>
    %92 = arith.subf %88, %91 : vector<17x17xf32>
    %93 = math.exp %92 : vector<17x17xf32>
    %cst_37 = arith.constant dense<0.000000e+00> : vector<17xf32>
    %94 = vector.multi_reduction <add>, %93, %cst_37 [1] : vector<17x17xf32> to vector<17xf32>
    %95 = vector.shape_cast %94 : vector<17xf32> to vector<17x1xf32>
    %96 = vector.broadcast %95 : vector<17x1xf32> to vector<17x17xf32>
    %97 = arith.divf %93, %96 : vector<17x17xf32>
    %cst_38 = arith.constant dense<0.000000e+00> : vector<17x8xf32>
    %98 = tpu.matmul %97, %85, %cst_38 {dimension_numbers = #tpu.dot_dimension_numbers<[1], [0], [0], [1], [0, 0, 1, 1], [], []>} : vector<17x17xf32>, vector<17x8xf32>, vector<17x8xf32> -> vector<17x8xf32>
    %99 = tpu.concatenate %50, %66, %82, %98 in 1 : vector<17x8xf32>, vector<17x8xf32>, vector<17x8xf32>, vector<17x8xf32> -> vector<17x32xf32>
    %c0_39 = arith.constant 0 : index
    %c0_40 = arith.constant 0 : index
    %c0_41 = arith.constant 0 : index
    %100 = vector.load %arg7[%c0_39, %c0_40, %c0_41] : memref<1x32x32xf32, #tpu.memory_space<vmem>>, vector<1x32x32xf32>
    %101 = vector.shape_cast %100 : vector<1x32x32xf32> to vector<32x32xf32>
    %cst_42 = arith.constant dense<0.000000e+00> : vector<17x32xf32>
    %102 = tpu.matmul %99, %101, %cst_42 {dimension_numbers = #tpu.dot_dimension_numbers<[1], [0], [0], [1], [0, 0, 1, 1], [], []>} : vector<17x32xf32>, vector<32x32xf32>, vector<17x32xf32> -> vector<17x32xf32>
    %103 = arith.addf %3, %102 : vector<17x32xf32>
    %c0_43 = arith.constant 0 : index
    %c0_44 = arith.constant 0 : index
    %c0_45 = arith.constant 0 : index
    %104 = vector.load %arg8[%c0_43, %c0_44, %c0_45] : memref<1x1x32xf32, #tpu.memory_space<vmem>>, vector<1x1x32xf32>
    %105 = vector.shape_cast %104 : vector<1x1x32xf32> to vector<1x32xf32>
    %106 = vector.broadcast %105 : vector<1x32xf32> to vector<17x32xf32>
    %107 = arith.addf %103, %106 : vector<17x32xf32>
    %c0_46 = arith.constant 0 : index
    %c0_47 = arith.constant 0 : index
    %c0_48 = arith.constant 0 : index
    %108 = vector.load %arg9[%c0_46, %c0_47, %c0_48] : memref<1x1x32xf32, #tpu.memory_space<vmem>>, vector<1x1x32xf32>
    %109 = vector.shape_cast %108 : vector<1x1x32xf32> to vector<1x32xf32>
    %c0_49 = arith.constant 0 : index
    %c0_50 = arith.constant 0 : index
    %c0_51 = arith.constant 0 : index
    %110 = vector.load %arg10[%c0_49, %c0_50, %c0_51] : memref<1x1x32xf32, #tpu.memory_space<vmem>>, vector<1x1x32xf32>
    %111 = vector.shape_cast %110 : vector<1x1x32xf32> to vector<1x32xf32>
    %cst_52 = arith.constant dense<0.000000e+00> : vector<17xf32>
    %112 = vector.multi_reduction <add>, %107, %cst_52 [1] : vector<17x32xf32> to vector<17xf32>
    %113 = vector.shape_cast %112 : vector<17xf32> to vector<17x1xf32>
    %cst_53 = arith.constant 3.200000e+01 : f32
    %114 = vector.broadcast %cst_53 : f32 to vector<17x1xf32>
    %115 = arith.divf %113, %114 : vector<17x1xf32>
    %116 = vector.broadcast %115 : vector<17x1xf32> to vector<17x32xf32>
    %117 = arith.subf %107, %116 : vector<17x32xf32>
    %118 = arith.mulf %117, %117 : vector<17x32xf32>
    %cst_54 = arith.constant dense<0.000000e+00> : vector<17xf32>
    %119 = vector.multi_reduction <add>, %118, %cst_54 [1] : vector<17x32xf32> to vector<17xf32>
    %120 = vector.shape_cast %119 : vector<17xf32> to vector<17x1xf32>
    %cst_55 = arith.constant 3.200000e+01 : f32
    %121 = vector.broadcast %cst_55 : f32 to vector<17x1xf32>
    %122 = arith.divf %120, %121 : vector<17x1xf32>
    %cst_56 = arith.constant 9.99999974E-6 : f32
    %123 = vector.broadcast %cst_56 : f32 to vector<17x1xf32>
    %124 = arith.addf %122, %123 : vector<17x1xf32>
    %125 = math.rsqrt %124 : vector<17x1xf32>
    %126 = vector.broadcast %125 : vector<17x1xf32> to vector<17x32xf32>
    %127 = arith.mulf %117, %126 : vector<17x32xf32>
    %128 = vector.broadcast %109 : vector<1x32xf32> to vector<17x32xf32>
    %129 = arith.mulf %127, %128 : vector<17x32xf32>
    %130 = vector.broadcast %111 : vector<1x32xf32> to vector<17x32xf32>
    %131 = arith.addf %129, %130 : vector<17x32xf32>
    %c0_57 = arith.constant 0 : index
    %c0_58 = arith.constant 0 : index
    %c0_59 = arith.constant 0 : index
    %132 = vector.load %arg11[%c0_57, %c0_58, %c0_59] : memref<1x32x128xf32, #tpu.memory_space<vmem>>, vector<1x32x128xf32>
    %133 = vector.shape_cast %132 : vector<1x32x128xf32> to vector<32x128xf32>
    %cst_60 = arith.constant dense<0.000000e+00> : vector<17x128xf32>
    %134 = tpu.matmul %131, %133, %cst_60 {dimension_numbers = #tpu.dot_dimension_numbers<[1], [0], [0], [1], [0, 0, 1, 1], [], []>} : vector<17x32xf32>, vector<32x128xf32>, vector<17x128xf32> -> vector<17x128xf32>
    %c0_61 = arith.constant 0 : index
    %c0_62 = arith.constant 0 : index
    %c0_63 = arith.constant 0 : index
    %135 = vector.load %arg12[%c0_61, %c0_62, %c0_63] : memref<1x1x128xf32, #tpu.memory_space<vmem>>, vector<1x1x128xf32>
    %136 = vector.shape_cast %135 : vector<1x1x128xf32> to vector<1x128xf32>
    %137 = vector.broadcast %136 : vector<1x128xf32> to vector<17x128xf32>
    %138 = arith.addf %134, %137 : vector<17x128xf32>
    %cst_64 = arith.constant 5.000000e-01 : f32
    %139 = vector.broadcast %cst_64 : f32 to vector<17x128xf32>
    %140 = arith.mulf %139, %138 : vector<17x128xf32>
    %cst_65 = arith.constant 0.707106769 : f32
    %141 = vector.broadcast %cst_65 : f32 to vector<17x128xf32>
    %142 = arith.mulf %138, %141 : vector<17x128xf32>
    %143 = math.absf %142 : vector<17x128xf32>
    %cst_66 = arith.constant 0.327591091 : f32
    %144 = vector.broadcast %cst_66 : f32 to vector<17x128xf32>
    %145 = arith.mulf %144, %143 : vector<17x128xf32>
    %cst_67 = arith.constant 1.000000e+00 : f32
    %146 = vector.broadcast %cst_67 : f32 to vector<17x128xf32>
    %147 = arith.addf %146, %145 : vector<17x128xf32>
    %cst_68 = arith.constant 1.000000e+00 : f32
    %148 = vector.broadcast %cst_68 : f32 to vector<17x128xf32>
    %149 = arith.divf %148, %147 : vector<17x128xf32>
    %cst_69 = arith.constant 1.06140542 : f32
    %150 = vector.broadcast %cst_69 : f32 to vector<17x128xf32>
    %151 = arith.mulf %149, %150 : vector<17x128xf32>
    %cst_70 = arith.constant -1.45315206 : f32
    %152 = vector.broadcast %cst_70 : f32 to vector<17x128xf32>
    %153 = arith.addf %152, %151 : vector<17x128xf32>
    %154 = arith.mulf %149, %153 : vector<17x128xf32>
    %cst_71 = arith.constant 1.42141378 : f32
    %155 = vector.broadcast %cst_71 : f32 to vector<17x128xf32>
    %156 = arith.addf %155, %154 : vector<17x128xf32>
    %157 = arith.mulf %149, %156 : vector<17x128xf32>
    %cst_72 = arith.constant -0.284496725 : f32
    %158 = vector.broadcast %cst_72 : f32 to vector<17x128xf32>
    %159 = arith.addf %158, %157 : vector<17x128xf32>
    %160 = arith.mulf %149, %159 : vector<17x128xf32>
    %cst_73 = arith.constant 0.254829586 : f32
    %161 = vector.broadcast %cst_73 : f32 to vector<17x128xf32>
    %162 = arith.addf %161, %160 : vector<17x128xf32>
    %163 = arith.mulf %149, %162 : vector<17x128xf32>
    %cst_74 = arith.constant 0.000000e+00 : f32
    %164 = vector.broadcast %cst_74 : f32 to vector<17x128xf32>
    %165 = arith.subf %164, %142 : vector<17x128xf32>
    %166 = arith.mulf %165, %142 : vector<17x128xf32>
    %167 = math.exp %166 : vector<17x128xf32>
    %168 = arith.mulf %163, %167 : vector<17x128xf32>
    %cst_75 = arith.constant 1.000000e+00 : f32
    %169 = vector.broadcast %cst_75 : f32 to vector<17x128xf32>
    %170 = arith.subf %169, %168 : vector<17x128xf32>
    %cst_76 = arith.constant 0.000000e+00 : f32
    %171 = vector.broadcast %cst_76 : f32 to vector<17x128xf32>
    %172 = arith.cmpf oge, %142, %171 : vector<17x128xf32>
    %cst_77 = arith.constant 0.000000e+00 : f32
    %173 = vector.broadcast %cst_77 : f32 to vector<17x128xf32>
    %174 = arith.subf %173, %170 : vector<17x128xf32>
    %175 = arith.select %172, %170, %174 : vector<17x128xi1>, vector<17x128xf32>
    %cst_78 = arith.constant 1.000000e+00 : f32
    %176 = vector.broadcast %cst_78 : f32 to vector<17x128xf32>
    %177 = arith.addf %176, %175 : vector<17x128xf32>
    %178 = arith.mulf %140, %177 : vector<17x128xf32>
    %c0_79 = arith.constant 0 : index
    %c0_80 = arith.constant 0 : index
    %c0_81 = arith.constant 0 : index
    %179 = vector.load %arg13[%c0_79, %c0_80, %c0_81] : memref<1x128x32xf32, #tpu.memory_space<vmem>>, vector<1x128x32xf32>
    %180 = vector.shape_cast %179 : vector<1x128x32xf32> to vector<128x32xf32>
    %cst_82 = arith.constant dense<0.000000e+00> : vector<17x32xf32>
    %181 = tpu.matmul %178, %180, %cst_82 {dimension_numbers = #tpu.dot_dimension_numbers<[1], [0], [0], [1], [0, 0, 1, 1], [], []>} : vector<17x128xf32>, vector<128x32xf32>, vector<17x32xf32> -> vector<17x32xf32>
    %c0_83 = arith.constant 0 : index
    %c0_84 = arith.constant 0 : index
    %c0_85 = arith.constant 0 : index
    %182 = vector.load %arg14[%c0_83, %c0_84, %c0_85] : memref<1x1x32xf32, #tpu.memory_space<vmem>>, vector<1x1x32xf32>
    %183 = vector.shape_cast %182 : vector<1x1x32xf32> to vector<1x32xf32>
    %184 = vector.broadcast %183 : vector<1x32xf32> to vector<17x32xf32>
    %185 = arith.addf %181, %184 : vector<17x32xf32>
    %186 = arith.addf %107, %185 : vector<17x32xf32>
    %c0_86 = arith.constant 0 : index
    %c0_87 = arith.constant 0 : index
    %187 = vector.load %arg18[%c0_86, %c0_87] : memref<17x32xf32, #tpu.memory_space<vmem>>, vector<17x32xf32>
    tpu.vector_store %arg18[%c0_86, %c0_87], %186 {strides = array<i32>} : memref<17x32xf32, #tpu.memory_space<vmem>>, vector<17x32xf32>,
    %c0_88 = arith.constant 0 : index
    %c0_89 = arith.constant 0 : index
    %188 = vector.load %arg15[%c0_88, %c0_89] : memref<1x32xf32, #tpu.memory_space<vmem>>, vector<1x32xf32>
    %c0_90 = arith.constant 0 : index
    %c0_91 = arith.constant 0 : index
    %189 = vector.load %arg16[%c0_90, %c0_91] : memref<1x32xf32, #tpu.memory_space<vmem>>, vector<1x32xf32>
    %cst_92 = arith.constant dense<0.000000e+00> : vector<17xf32>
    %190 = vector.multi_reduction <add>, %186, %cst_92 [1] : vector<17x32xf32> to vector<17xf32>
    %191 = vector.shape_cast %190 : vector<17xf32> to vector<17x1xf32>
    %cst_93 = arith.constant 3.200000e+01 : f32
    %192 = vector.broadcast %cst_93 : f32 to vector<17x1xf32>
    %193 = arith.divf %191, %192 : vector<17x1xf32>
    %194 = vector.broadcast %193 : vector<17x1xf32> to vector<17x32xf32>
    %195 = arith.subf %186, %194 : vector<17x32xf32>
    %196 = arith.mulf %195, %195 : vector<17x32xf32>
    %cst_94 = arith.constant dense<0.000000e+00> : vector<17xf32>
    %197 = vector.multi_reduction <add>, %196, %cst_94 [1] : vector<17x32xf32> to vector<17xf32>
    %198 = vector.shape_cast %197 : vector<17xf32> to vector<17x1xf32>
    %cst_95 = arith.constant 3.200000e+01 : f32
    %199 = vector.broadcast %cst_95 : f32 to vector<17x1xf32>
    %200 = arith.divf %198, %199 : vector<17x1xf32>
    %cst_96 = arith.constant 9.99999974E-6 : f32
    %201 = vector.broadcast %cst_96 : f32 to vector<17x1xf32>
    %202 = arith.addf %200, %201 : vector<17x1xf32>
    %203 = math.rsqrt %202 : vector<17x1xf32>
    %204 = vector.broadcast %203 : vector<17x1xf32> to vector<17x32xf32>
    %205 = arith.mulf %195, %204 : vector<17x32xf32>
    %206 = vector.broadcast %188 : vector<1x32xf32> to vector<17x32xf32>
    %207 = arith.mulf %205, %206 : vector<17x32xf32>
    %208 = vector.broadcast %189 : vector<1x32xf32> to vector<17x32xf32>
    %209 = arith.addf %207, %208 : vector<17x32xf32>
    %c0_97 = arith.constant 0 : index
    %c0_98 = arith.constant 0 : index
    %c0_99 = arith.constant 0 : index
    %c0_100 = arith.constant 0 : index
    %210 = vector.load %arg17[%c0_97, %c0_98, %c0_99, %c0_100] : memref<1x1x17x32xf32, #tpu.memory_space<vmem>>, vector<1x1x17x32xf32>
    %211 = vector.shape_cast %210 : vector<1x1x17x32xf32> to vector<17x32xf32>
    %212 = vector.shape_cast %209 : vector<17x32xf32> to vector<1x1x17x32xf32>
    tpu.vector_store %arg17[%c0_97, %c0_98, %c0_99, %c0_100], %212 {strides = array<i32>} : memref<1x1x17x32xf32, #tpu.memory_space<vmem>>, vector<1x1x17x32xf32>,
    return
  }
  func.func @transform_0(%arg0: i32, %arg1: i32) -> (i32, i32, i32) {
    %c0_i32 = arith.constant 0 : i32
    %c0_i32_0 = arith.constant 0 : i32
    %c0_i32_1 = arith.constant 0 : i32
    return %arg0, %c0_i32, %c0_i32_0 : i32, i32, i32
  }
  func.func @transform_1(%arg0: i32, %arg1: i32) -> (i32, i32, i32) {
    %c0_i32 = arith.constant 0 : i32
    %c0_i32_0 = arith.constant 0 : i32
    %c0_i32_1 = arith.constant 0 : i32
    return %arg1, %c0_i32, %c0_i32_0 : i32, i32, i32
  }
  func.func @transform_2(%arg0: i32, %arg1: i32) -> (i32, i32, i32) {
    %c0_i32 = arith.constant 0 : i32
    %c0_i32_0 = arith.constant 0 : i32
    %c0_i32_1 = arith.constant 0 : i32
    return %arg1, %c0_i32, %c0_i32_0 : i32, i32, i32
  }
  func.func @transform_3(%arg0: i32, %arg1: i32) -> (i32, i32, i32) {
    %c0_i32 = arith.constant 0 : i32
    %c0_i32_0 = arith.constant 0 : i32
    %c0_i32_1 = arith.constant 0 : i32
    return %arg1, %c0_i32, %c0_i32_0 : i32, i32, i32
  }
  func.func @transform_4(%arg0: i32, %arg1: i32) -> (i32, i32, i32) {
    %c0_i32 = arith.constant 0 : i32
    %c0_i32_0 = arith.constant 0 : i32
    %c0_i32_1 = arith.constant 0 : i32
    return %arg1, %c0_i32, %c0_i32_0 : i32, i32, i32
  }
  func.func @transform_5(%arg0: i32, %arg1: i32) -> (i32, i32, i32) {
    %c0_i32 = arith.constant 0 : i32
    %c0_i32_0 = arith.constant 0 : i32
    %c0_i32_1 = arith.constant 0 : i32
    return %arg1, %c0_i32, %c0_i32_0 : i32, i32, i32
  }
  func.func @transform_6(%arg0: i32, %arg1: i32) -> (i32, i32, i32) {
    %c0_i32 = arith.constant 0 : i32
    %c0_i32_0 = arith.constant 0 : i32
    %c0_i32_1 = arith.constant 0 : i32
    return %arg1, %c0_i32, %c0_i32_0 : i32, i32, i32
  }
  func.func @transform_7(%arg0: i32, %arg1: i32) -> (i32, i32, i32) {
    %c0_i32 = arith.constant 0 : i32
    %c0_i32_0 = arith.constant 0 : i32
    %c0_i32_1 = arith.constant 0 : i32
    return %arg1, %c0_i32, %c0_i32_0 : i32, i32, i32
  }
  func.func @transform_8(%arg0: i32, %arg1: i32) -> (i32, i32, i32) {
    %c0_i32 = arith.constant 0 : i32
    %c0_i32_0 = arith.constant 0 : i32
    %c0_i32_1 = arith.constant 0 : i32
    return %arg1, %c0_i32, %c0_i32_0 : i32, i32, i32
  }
  func.func @transform_9(%arg0: i32, %arg1: i32) -> (i32, i32, i32) {
    %c0_i32 = arith.constant 0 : i32
    %c0_i32_0 = arith.constant 0 : i32
    %c0_i32_1 = arith.constant 0 : i32
    return %arg1, %c0_i32, %c0_i32_0 : i32, i32, i32
  }
  func.func @transform_10(%arg0: i32, %arg1: i32) -> (i32, i32, i32) {
    %c0_i32 = arith.constant 0 : i32
    %c0_i32_0 = arith.constant 0 : i32
    %c0_i32_1 = arith.constant 0 : i32
    return %arg1, %c0_i32, %c0_i32_0 : i32, i32, i32
  }
  func.func @transform_11(%arg0: i32, %arg1: i32) -> (i32, i32, i32) {
    %c0_i32 = arith.constant 0 : i32
    %c0_i32_0 = arith.constant 0 : i32
    %c0_i32_1 = arith.constant 0 : i32
    return %arg1, %c0_i32, %c0_i32_0 : i32, i32, i32
  }
  func.func @transform_12(%arg0: i32, %arg1: i32) -> (i32, i32, i32) {
    %c0_i32 = arith.constant 0 : i32
    %c0_i32_0 = arith.constant 0 : i32
    %c0_i32_1 = arith.constant 0 : i32
    return %arg1, %c0_i32, %c0_i32_0 : i32, i32, i32
  }
  func.func @transform_13(%arg0: i32, %arg1: i32) -> (i32, i32) {
    %c0_i32 = arith.constant 0 : i32
    %c0_i32_0 = arith.constant 0 : i32
    %c0_i32_1 = arith.constant 0 : i32
    return %c0_i32, %c0_i32_0 : i32, i32
  }
  func.func @transform_14(%arg0: i32, %arg1: i32) -> (i32, i32) {
    %c0_i32 = arith.constant 0 : i32
    %c0_i32_0 = arith.constant 0 : i32
    %c0_i32_1 = arith.constant 0 : i32
    return %c0_i32, %c0_i32_0 : i32, i32
  }
  func.func @transform_15(%arg0: i32, %arg1: i32) -> (i32, i32, i32, i32) {
    %c0_i32 = arith.constant 0 : i32
    %c0_i32_0 = arith.constant 0 : i32
    %c0_i32_1 = arith.constant 0 : i32
    return %arg1, %arg0, %c0_i32, %c0_i32_0 : i32, i32, i32, i32
  }
}

module attributes {stable_mosaic.version = 11 : i64} {
  func.func @_matmul_kernel(%arg0: i32, %arg1: i32, %arg2: i32, %arg3: memref<256x27xf32, #tpu.memory_space<vmem>>, %arg4: memref<27x8xf32, #tpu.memory_space<vmem>>, %arg5: memref<1x8xf32, #tpu.memory_space<vmem>>, %arg6: memref<256x8xf32, #tpu.memory_space<vmem>>, %arg7: memref<256x8xf32, #tpu.memory_space<vmem>>) attributes {dimension_semantics = [#tpu.dimension_semantics<parallel>, #tpu.dimension_semantics<parallel>, #tpu.dimension_semantics<arbitrary>], iteration_bounds = array<i64: 2, 1, 1>, scalar_prefetch = 0 : i64, scratch_operands = 1 : i64, tpu.core_type = #tpu.core_type<tc>, window_params = [{transform_indices = @transform_0, window_bounds = array<i64: 256, 27>}, {transform_indices = @transform_1, window_bounds = array<i64: 27, 8>}, {transform_indices = @transform_2, window_bounds = array<i64: 1, 8>}, {transform_indices = @transform_3, window_bounds = array<i64: 256, 8>}]} {
    %c0_i32 = arith.constant 0 : i32
    %0 = arith.cmpi eq, %arg2, %c0_i32 : i32
    %1 = arith.extui %0 : i1 to i32
    %c0_i32_0 = arith.constant 0 : i32
    %2 = arith.cmpi ne, %1, %c0_i32_0 : i32
    scf.if %2 {
      %cst_10 = arith.constant 0.000000e+00 : f32
      %12 = vector.broadcast %cst_10 : f32 to vector<256x8xf32>
      %c0_11 = arith.constant 0 : index
      %c0_12 = arith.constant 0 : index
      %13 = vector.load %arg7[%c0_11, %c0_12] : memref<256x8xf32, #tpu.memory_space<vmem>>, vector<256x8xf32>
      tpu.vector_store %arg7[%c0_11, %c0_12], %12 {strides = array<i32>} : memref<256x8xf32, #tpu.memory_space<vmem>>, vector<256x8xf32>,
    } else {
    }
    %c0 = arith.constant 0 : index
    %c0_1 = arith.constant 0 : index
    %3 = vector.load %arg7[%c0, %c0_1] : memref<256x8xf32, #tpu.memory_space<vmem>>, vector<256x8xf32>
    %c0_2 = arith.constant 0 : index
    %c0_3 = arith.constant 0 : index
    %4 = vector.load %arg3[%c0_2, %c0_3] : memref<256x27xf32, #tpu.memory_space<vmem>>, vector<256x27xf32>
    %c0_4 = arith.constant 0 : index
    %c0_5 = arith.constant 0 : index
    %5 = vector.load %arg4[%c0_4, %c0_5] : memref<27x8xf32, #tpu.memory_space<vmem>>, vector<27x8xf32>
    %cst = arith.constant dense<0.000000e+00> : vector<256x8xf32>
    %6 = tpu.matmul %4, %5, %cst {dimension_numbers = #tpu.dot_dimension_numbers<[1], [0], [0], [1], [0, 0, 1, 1], [], []>} : vector<256x27xf32>, vector<27x8xf32>, vector<256x8xf32> -> vector<256x8xf32>
    %7 = arith.addf %3, %6 : vector<256x8xf32>
    %c0_6 = arith.constant 0 : index
    %c0_7 = arith.constant 0 : index
    %8 = vector.load %arg7[%c0_6, %c0_7] : memref<256x8xf32, #tpu.memory_space<vmem>>, vector<256x8xf32>
    tpu.vector_store %arg7[%c0_6, %c0_7], %7 {strides = array<i32>} : memref<256x8xf32, #tpu.memory_space<vmem>>, vector<256x8xf32>,
    %c0_i32_8 = arith.constant 0 : i32
    %9 = arith.cmpi eq, %arg2, %c0_i32_8 : i32
    %10 = arith.extui %9 : i1 to i32
    %c0_i32_9 = arith.constant 0 : i32
    %11 = arith.cmpi ne, %10, %c0_i32_9 : i32
    scf.if %11 {
      %c0_10 = arith.constant 0 : index
      %c0_11 = arith.constant 0 : index
      %12 = vector.load %arg7[%c0_10, %c0_11] : memref<256x8xf32, #tpu.memory_space<vmem>>, vector<256x8xf32>
      %c0_12 = arith.constant 0 : index
      %c0_13 = arith.constant 0 : index
      %13 = vector.load %arg5[%c0_12, %c0_13] : memref<1x8xf32, #tpu.memory_space<vmem>>, vector<1x8xf32>
      %14 = vector.broadcast %13 : vector<1x8xf32> to vector<256x8xf32>
      %15 = arith.addf %12, %14 : vector<256x8xf32>
      %cst_14 = arith.constant 0.000000e+00 : f32
      %16 = vector.broadcast %cst_14 : f32 to vector<256x8xf32>
      %17 = arith.maximumf %15, %16 : vector<256x8xf32>
      %c0_15 = arith.constant 0 : index
      %c0_16 = arith.constant 0 : index
      %18 = vector.load %arg6[%c0_15, %c0_16] : memref<256x8xf32, #tpu.memory_space<vmem>>, vector<256x8xf32>
      tpu.vector_store %arg6[%c0_15, %c0_16], %17 {strides = array<i32>} : memref<256x8xf32, #tpu.memory_space<vmem>>, vector<256x8xf32>,
    } else {
    }
    return
  }
  func.func @transform_0(%arg0: i32, %arg1: i32, %arg2: i32) -> (i32, i32) {
    %c0_i32 = arith.constant 0 : i32
    return %arg0, %arg2 : i32, i32
  }
  func.func @transform_1(%arg0: i32, %arg1: i32, %arg2: i32) -> (i32, i32) {
    %c0_i32 = arith.constant 0 : i32
    return %arg2, %arg1 : i32, i32
  }
  func.func @transform_2(%arg0: i32, %arg1: i32, %arg2: i32) -> (i32, i32) {
    %c0_i32 = arith.constant 0 : i32
    %c0_i32_0 = arith.constant 0 : i32
    return %c0_i32, %arg1 : i32, i32
  }
  func.func @transform_3(%arg0: i32, %arg1: i32, %arg2: i32) -> (i32, i32) {
    %c0_i32 = arith.constant 0 : i32
    return %arg0, %arg1 : i32, i32
  }
}

module attributes {stable_mosaic.version = 11 : i64} {
  func.func @_matmul_kernel(%arg0: i32, %arg1: i32, %arg2: i32, %arg3: memref<128x72xf32, #tpu.memory_space<vmem>>, %arg4: memref<72x16xf32, #tpu.memory_space<vmem>>, %arg5: memref<1x16xf32, #tpu.memory_space<vmem>>, %arg6: memref<128x16xf32, #tpu.memory_space<vmem>>, %arg7: memref<128x16xf32, #tpu.memory_space<vmem>>) attributes {dimension_semantics = [#tpu.dimension_semantics<parallel>, #tpu.dimension_semantics<parallel>, #tpu.dimension_semantics<arbitrary>], iteration_bounds = array<i64: 1, 1, 1>, scalar_prefetch = 0 : i64, scratch_operands = 1 : i64, tpu.core_type = #tpu.core_type<tc>, window_params = [{transform_indices = @transform_0, window_bounds = array<i64: 128, 72>}, {transform_indices = @transform_1, window_bounds = array<i64: 72, 16>}, {transform_indices = @transform_2, window_bounds = array<i64: 1, 16>}, {transform_indices = @transform_3, window_bounds = array<i64: 128, 16>}]} {
    %c0_i32 = arith.constant 0 : i32
    %0 = arith.cmpi eq, %arg2, %c0_i32 : i32
    %1 = arith.extui %0 : i1 to i32
    %c0_i32_0 = arith.constant 0 : i32
    %2 = arith.cmpi ne, %1, %c0_i32_0 : i32
    scf.if %2 {
      %cst_10 = arith.constant 0.000000e+00 : f32
      %12 = vector.broadcast %cst_10 : f32 to vector<128x16xf32>
      %c0_11 = arith.constant 0 : index
      %c0_12 = arith.constant 0 : index
      %13 = vector.load %arg7[%c0_11, %c0_12] : memref<128x16xf32, #tpu.memory_space<vmem>>, vector<128x16xf32>
      tpu.vector_store %arg7[%c0_11, %c0_12], %12 {strides = array<i32>} : memref<128x16xf32, #tpu.memory_space<vmem>>, vector<128x16xf32>,
    } else {
    }
    %c0 = arith.constant 0 : index
    %c0_1 = arith.constant 0 : index
    %3 = vector.load %arg7[%c0, %c0_1] : memref<128x16xf32, #tpu.memory_space<vmem>>, vector<128x16xf32>
    %c0_2 = arith.constant 0 : index
    %c0_3 = arith.constant 0 : index
    %4 = vector.load %arg3[%c0_2, %c0_3] : memref<128x72xf32, #tpu.memory_space<vmem>>, vector<128x72xf32>
    %c0_4 = arith.constant 0 : index
    %c0_5 = arith.constant 0 : index
    %5 = vector.load %arg4[%c0_4, %c0_5] : memref<72x16xf32, #tpu.memory_space<vmem>>, vector<72x16xf32>
    %cst = arith.constant dense<0.000000e+00> : vector<128x16xf32>
    %6 = tpu.matmul %4, %5, %cst {dimension_numbers = #tpu.dot_dimension_numbers<[1], [0], [0], [1], [0, 0, 1, 1], [], []>} : vector<128x72xf32>, vector<72x16xf32>, vector<128x16xf32> -> vector<128x16xf32>
    %7 = arith.addf %3, %6 : vector<128x16xf32>
    %c0_6 = arith.constant 0 : index
    %c0_7 = arith.constant 0 : index
    %8 = vector.load %arg7[%c0_6, %c0_7] : memref<128x16xf32, #tpu.memory_space<vmem>>, vector<128x16xf32>
    tpu.vector_store %arg7[%c0_6, %c0_7], %7 {strides = array<i32>} : memref<128x16xf32, #tpu.memory_space<vmem>>, vector<128x16xf32>,
    %c0_i32_8 = arith.constant 0 : i32
    %9 = arith.cmpi eq, %arg2, %c0_i32_8 : i32
    %10 = arith.extui %9 : i1 to i32
    %c0_i32_9 = arith.constant 0 : i32
    %11 = arith.cmpi ne, %10, %c0_i32_9 : i32
    scf.if %11 {
      %c0_10 = arith.constant 0 : index
      %c0_11 = arith.constant 0 : index
      %12 = vector.load %arg7[%c0_10, %c0_11] : memref<128x16xf32, #tpu.memory_space<vmem>>, vector<128x16xf32>
      %c0_12 = arith.constant 0 : index
      %c0_13 = arith.constant 0 : index
      %13 = vector.load %arg5[%c0_12, %c0_13] : memref<1x16xf32, #tpu.memory_space<vmem>>, vector<1x16xf32>
      %14 = vector.broadcast %13 : vector<1x16xf32> to vector<128x16xf32>
      %15 = arith.addf %12, %14 : vector<128x16xf32>
      %cst_14 = arith.constant 0.000000e+00 : f32
      %16 = vector.broadcast %cst_14 : f32 to vector<128x16xf32>
      %17 = arith.maximumf %15, %16 : vector<128x16xf32>
      %c0_15 = arith.constant 0 : index
      %c0_16 = arith.constant 0 : index
      %18 = vector.load %arg6[%c0_15, %c0_16] : memref<128x16xf32, #tpu.memory_space<vmem>>, vector<128x16xf32>
      tpu.vector_store %arg6[%c0_15, %c0_16], %17 {strides = array<i32>} : memref<128x16xf32, #tpu.memory_space<vmem>>, vector<128x16xf32>,
    } else {
    }
    return
  }
  func.func @transform_0(%arg0: i32, %arg1: i32, %arg2: i32) -> (i32, i32) {
    %c0_i32 = arith.constant 0 : i32
    return %arg0, %arg2 : i32, i32
  }
  func.func @transform_1(%arg0: i32, %arg1: i32, %arg2: i32) -> (i32, i32) {
    %c0_i32 = arith.constant 0 : i32
    return %arg2, %arg1 : i32, i32
  }
  func.func @transform_2(%arg0: i32, %arg1: i32, %arg2: i32) -> (i32, i32) {
    %c0_i32 = arith.constant 0 : i32
    %c0_i32_0 = arith.constant 0 : i32
    return %c0_i32, %arg1 : i32, i32
  }
  func.func @transform_3(%arg0: i32, %arg1: i32, %arg2: i32) -> (i32, i32) {
    %c0_i32 = arith.constant 0 : i32
    return %arg0, %arg1 : i32, i32
  }
}

module attributes {stable_mosaic.version = 11 : i64} {
  func.func @_matmul_kernel(%arg0: i32, %arg1: i32, %arg2: i32, %arg3: memref<128x72xf32, #tpu.memory_space<vmem>>, %arg4: memref<72x32xf32, #tpu.memory_space<vmem>>, %arg5: memref<1x32xf32, #tpu.memory_space<vmem>>, %arg6: memref<128x32xf32, #tpu.memory_space<vmem>>, %arg7: memref<128x32xf32, #tpu.memory_space<vmem>>) attributes {dimension_semantics = [#tpu.dimension_semantics<parallel>, #tpu.dimension_semantics<parallel>, #tpu.dimension_semantics<arbitrary>], iteration_bounds = array<i64: 1, 1, 1>, scalar_prefetch = 0 : i64, scratch_operands = 1 : i64, tpu.core_type = #tpu.core_type<tc>, window_params = [{transform_indices = @transform_0, window_bounds = array<i64: 128, 72>}, {transform_indices = @transform_1, window_bounds = array<i64: 72, 32>}, {transform_indices = @transform_2, window_bounds = array<i64: 1, 32>}, {transform_indices = @transform_3, window_bounds = array<i64: 128, 32>}]} {
    %c0_i32 = arith.constant 0 : i32
    %0 = arith.cmpi eq, %arg2, %c0_i32 : i32
    %1 = arith.extui %0 : i1 to i32
    %c0_i32_0 = arith.constant 0 : i32
    %2 = arith.cmpi ne, %1, %c0_i32_0 : i32
    scf.if %2 {
      %cst_10 = arith.constant 0.000000e+00 : f32
      %12 = vector.broadcast %cst_10 : f32 to vector<128x32xf32>
      %c0_11 = arith.constant 0 : index
      %c0_12 = arith.constant 0 : index
      %13 = vector.load %arg7[%c0_11, %c0_12] : memref<128x32xf32, #tpu.memory_space<vmem>>, vector<128x32xf32>
      tpu.vector_store %arg7[%c0_11, %c0_12], %12 {strides = array<i32>} : memref<128x32xf32, #tpu.memory_space<vmem>>, vector<128x32xf32>,
    } else {
    }
    %c0 = arith.constant 0 : index
    %c0_1 = arith.constant 0 : index
    %3 = vector.load %arg7[%c0, %c0_1] : memref<128x32xf32, #tpu.memory_space<vmem>>, vector<128x32xf32>
    %c0_2 = arith.constant 0 : index
    %c0_3 = arith.constant 0 : index
    %4 = vector.load %arg3[%c0_2, %c0_3] : memref<128x72xf32, #tpu.memory_space<vmem>>, vector<128x72xf32>
    %c0_4 = arith.constant 0 : index
    %c0_5 = arith.constant 0 : index
    %5 = vector.load %arg4[%c0_4, %c0_5] : memref<72x32xf32, #tpu.memory_space<vmem>>, vector<72x32xf32>
    %cst = arith.constant dense<0.000000e+00> : vector<128x32xf32>
    %6 = tpu.matmul %4, %5, %cst {dimension_numbers = #tpu.dot_dimension_numbers<[1], [0], [0], [1], [0, 0, 1, 1], [], []>} : vector<128x72xf32>, vector<72x32xf32>, vector<128x32xf32> -> vector<128x32xf32>
    %7 = arith.addf %3, %6 : vector<128x32xf32>
    %c0_6 = arith.constant 0 : index
    %c0_7 = arith.constant 0 : index
    %8 = vector.load %arg7[%c0_6, %c0_7] : memref<128x32xf32, #tpu.memory_space<vmem>>, vector<128x32xf32>
    tpu.vector_store %arg7[%c0_6, %c0_7], %7 {strides = array<i32>} : memref<128x32xf32, #tpu.memory_space<vmem>>, vector<128x32xf32>,
    %c0_i32_8 = arith.constant 0 : i32
    %9 = arith.cmpi eq, %arg2, %c0_i32_8 : i32
    %10 = arith.extui %9 : i1 to i32
    %c0_i32_9 = arith.constant 0 : i32
    %11 = arith.cmpi ne, %10, %c0_i32_9 : i32
    scf.if %11 {
      %c0_10 = arith.constant 0 : index
      %c0_11 = arith.constant 0 : index
      %12 = vector.load %arg7[%c0_10, %c0_11] : memref<128x32xf32, #tpu.memory_space<vmem>>, vector<128x32xf32>
      %c0_12 = arith.constant 0 : index
      %c0_13 = arith.constant 0 : index
      %13 = vector.load %arg5[%c0_12, %c0_13] : memref<1x32xf32, #tpu.memory_space<vmem>>, vector<1x32xf32>
      %14 = vector.broadcast %13 : vector<1x32xf32> to vector<128x32xf32>
      %15 = arith.addf %12, %14 : vector<128x32xf32>
      %c0_14 = arith.constant 0 : index
      %c0_15 = arith.constant 0 : index
      %16 = vector.load %arg6[%c0_14, %c0_15] : memref<128x32xf32, #tpu.memory_space<vmem>>, vector<128x32xf32>
      tpu.vector_store %arg6[%c0_14, %c0_15], %15 {strides = array<i32>} : memref<128x32xf32, #tpu.memory_space<vmem>>, vector<128x32xf32>,
    } else {
    }
    return
  }
  func.func @transform_0(%arg0: i32, %arg1: i32, %arg2: i32) -> (i32, i32) {
    %c0_i32 = arith.constant 0 : i32
    return %arg0, %arg2 : i32, i32
  }
  func.func @transform_1(%arg0: i32, %arg1: i32, %arg2: i32) -> (i32, i32) {
    %c0_i32 = arith.constant 0 : i32
    return %arg2, %arg1 : i32, i32
  }
  func.func @transform_2(%arg0: i32, %arg1: i32, %arg2: i32) -> (i32, i32) {
    %c0_i32 = arith.constant 0 : i32
    %c0_i32_0 = arith.constant 0 : i32
    return %c0_i32, %arg1 : i32, i32
  }
  func.func @transform_3(%arg0: i32, %arg1: i32, %arg2: i32) -> (i32, i32) {
    %c0_i32 = arith.constant 0 : i32
    return %arg0, %arg1 : i32, i32
  }
}

module attributes {stable_mosaic.version = 11 : i64} {
  func.func @_project_outconv_kernel(%arg0: i32, %arg1: memref<1x64x32xf32, #tpu.memory_space<vmem>>, %arg2: memref<1x1x17x32xf32, #tpu.memory_space<vmem>>, %arg3: memref<32x32xf32, #tpu.memory_space<vmem>>, %arg4: memref<32x32xf32, #tpu.memory_space<vmem>>, %arg5: memref<32x256xf32, #tpu.memory_space<vmem>>, %arg6: memref<1x256xf32, #tpu.memory_space<vmem>>, %arg7: memref<1x64x256xf32, #tpu.memory_space<vmem>>) attributes {dimension_semantics = [#tpu.dimension_semantics<parallel>], iteration_bounds = array<i64: 2>, scalar_prefetch = 0 : i64, scratch_operands = 0 : i64, tpu.core_type = #tpu.core_type<tc>, window_params = [{transform_indices = @transform_0, window_bounds = array<i64: 1, 64, 32>}, {transform_indices = @transform_1, window_bounds = array<i64: 1, 1, 17, 32>}, {pipeline_mode = #tpu.pipeline_mode<synchronous>, transform_indices = @transform_2, window_bounds = array<i64: 32, 32>}, {pipeline_mode = #tpu.pipeline_mode<synchronous>, transform_indices = @transform_3, window_bounds = array<i64: 32, 32>}, {pipeline_mode = #tpu.pipeline_mode<synchronous>, transform_indices = @transform_4, window_bounds = array<i64: 32, 256>}, {pipeline_mode = #tpu.pipeline_mode<synchronous>, transform_indices = @transform_5, window_bounds = array<i64: 1, 256>}, {transform_indices = @transform_6, window_bounds = array<i64: 1, 64, 256>}]} {
    %c0 = arith.constant 0 : index
    %c0_0 = arith.constant 0 : index
    %c0_1 = arith.constant 0 : index
    %0 = vector.load %arg1[%c0, %c0_0, %c0_1] : memref<1x64x32xf32, #tpu.memory_space<vmem>>, vector<1x64x32xf32>
    %1 = vector.shape_cast %0 : vector<1x64x32xf32> to vector<64x32xf32>
    %c0_2 = arith.constant 0 : index
    %c0_3 = arith.constant 0 : index
    %c0_4 = arith.constant 0 : index
    %c0_5 = arith.constant 0 : index
    %2 = vector.load %arg2[%c0_2, %c0_3, %c0_4, %c0_5] : memref<1x1x17x32xf32, #tpu.memory_space<vmem>>, vector<1x1x17x32xf32>
    %3 = vector.shape_cast %2 : vector<1x1x17x32xf32> to vector<17x32xf32>
    %c0_6 = arith.constant 0 : index
    %c0_7 = arith.constant 0 : index
    %4 = vector.load %arg3[%c0_6, %c0_7] : memref<32x32xf32, #tpu.memory_space<vmem>>, vector<32x32xf32>
    %cst = arith.constant dense<0.000000e+00> : vector<64x32xf32>
    %5 = tpu.matmul %1, %4, %cst {dimension_numbers = #tpu.dot_dimension_numbers<[1], [0], [0], [1], [0, 0, 1, 1], [], []>} : vector<64x32xf32>, vector<32x32xf32>, vector<64x32xf32> -> vector<64x32xf32>
    %c0_8 = arith.constant 0 : index
    %c0_9 = arith.constant 0 : index
    %6 = vector.load %arg4[%c0_8, %c0_9] : memref<32x32xf32, #tpu.memory_space<vmem>>, vector<32x32xf32>
    %cst_10 = arith.constant dense<0.000000e+00> : vector<17x32xf32>
    %7 = tpu.matmul %3, %6, %cst_10 {dimension_numbers = #tpu.dot_dimension_numbers<[1], [0], [0], [1], [0, 0, 1, 1], [], []>} : vector<17x32xf32>, vector<32x32xf32>, vector<17x32xf32> -> vector<17x32xf32>
    %cst_11 = arith.constant dense<0.000000e+00> : vector<64x17xf32>
    %8 = tpu.matmul %5, %7, %cst_11 {dimension_numbers = #tpu.dot_dimension_numbers<[1], [1], [0], [0], [0, 0, 1, 0], [], []>} : vector<64x32xf32>, vector<17x32xf32>, vector<64x17xf32> -> vector<64x17xf32>
    %cst_12 = arith.constant dense<0xFF800000> : vector<64xf32>
    %9 = vector.multi_reduction <maximumf>, %8, %cst_12 [1] : vector<64x17xf32> to vector<64xf32>
    %10 = vector.shape_cast %9 : vector<64xf32> to vector<64x1xf32>
    %11 = vector.broadcast %10 : vector<64x1xf32> to vector<64x17xf32>
    %12 = arith.subf %8, %11 : vector<64x17xf32>
    %13 = math.exp %12 : vector<64x17xf32>
    %cst_13 = arith.constant dense<0.000000e+00> : vector<64xf32>
    %14 = vector.multi_reduction <add>, %13, %cst_13 [1] : vector<64x17xf32> to vector<64xf32>
    %15 = vector.shape_cast %14 : vector<64xf32> to vector<64x1xf32>
    %16 = vector.broadcast %15 : vector<64x1xf32> to vector<64x17xf32>
    %17 = arith.divf %13, %16 : vector<64x17xf32>
    %cst_14 = arith.constant dense<0.000000e+00> : vector<64x32xf32>
    %18 = tpu.matmul %17, %3, %cst_14 {dimension_numbers = #tpu.dot_dimension_numbers<[1], [0], [0], [1], [0, 0, 1, 1], [], []>} : vector<64x17xf32>, vector<17x32xf32>, vector<64x32xf32> -> vector<64x32xf32>
    %19 = arith.addf %1, %18 : vector<64x32xf32>
    %c0_15 = arith.constant 0 : index
    %c0_16 = arith.constant 0 : index
    %20 = vector.load %arg5[%c0_15, %c0_16] : memref<32x256xf32, #tpu.memory_space<vmem>>, vector<32x256xf32>
    %cst_17 = arith.constant dense<0.000000e+00> : vector<64x256xf32>
    %21 = tpu.matmul %19, %20, %cst_17 {dimension_numbers = #tpu.dot_dimension_numbers<[1], [0], [0], [1], [0, 0, 1, 1], [], []>} : vector<64x32xf32>, vector<32x256xf32>, vector<64x256xf32> -> vector<64x256xf32>
    %c0_18 = arith.constant 0 : index
    %c0_19 = arith.constant 0 : index
    %22 = vector.load %arg6[%c0_18, %c0_19] : memref<1x256xf32, #tpu.memory_space<vmem>>, vector<1x256xf32>
    %23 = vector.broadcast %22 : vector<1x256xf32> to vector<64x256xf32>
    %24 = arith.addf %21, %23 : vector<64x256xf32>
    %c0_20 = arith.constant 0 : index
    %c0_21 = arith.constant 0 : index
    %c0_22 = arith.constant 0 : index
    %25 = vector.load %arg7[%c0_20, %c0_21, %c0_22] : memref<1x64x256xf32, #tpu.memory_space<vmem>>, vector<1x64x256xf32>
    %26 = vector.shape_cast %25 : vector<1x64x256xf32> to vector<64x256xf32>
    %27 = vector.shape_cast %24 : vector<64x256xf32> to vector<1x64x256xf32>
    tpu.vector_store %arg7[%c0_20, %c0_21, %c0_22], %27 {strides = array<i32>} : memref<1x64x256xf32, #tpu.memory_space<vmem>>, vector<1x64x256xf32>,
    return
  }
  func.func @transform_0(%arg0: i32) -> (i32, i32, i32) {
    %c0_i32 = arith.constant 0 : i32
    %c0_i32_0 = arith.constant 0 : i32
    %c0_i32_1 = arith.constant 0 : i32
    return %arg0, %c0_i32, %c0_i32_0 : i32, i32, i32
  }
  func.func @transform_1(%arg0: i32) -> (i32, i32, i32, i32) {
    %c0_i32 = arith.constant 0 : i32
    %c0_i32_0 = arith.constant 0 : i32
    %c0_i32_1 = arith.constant 0 : i32
    %c0_i32_2 = arith.constant 0 : i32
    return %c0_i32, %arg0, %c0_i32_0, %c0_i32_1 : i32, i32, i32, i32
  }
  func.func @transform_2(%arg0: i32) -> (i32, i32) {
    %c0_i32 = arith.constant 0 : i32
    %c0_i32_0 = arith.constant 0 : i32
    %c0_i32_1 = arith.constant 0 : i32
    return %c0_i32, %c0_i32_0 : i32, i32
  }
  func.func @transform_3(%arg0: i32) -> (i32, i32) {
    %c0_i32 = arith.constant 0 : i32
    %c0_i32_0 = arith.constant 0 : i32
    %c0_i32_1 = arith.constant 0 : i32
    return %c0_i32, %c0_i32_0 : i32, i32
  }
  func.func @transform_4(%arg0: i32) -> (i32, i32) {
    %c0_i32 = arith.constant 0 : i32
    %c0_i32_0 = arith.constant 0 : i32
    %c0_i32_1 = arith.constant 0 : i32
    return %c0_i32, %c0_i32_0 : i32, i32
  }
  func.func @transform_5(%arg0: i32) -> (i32, i32) {
    %c0_i32 = arith.constant 0 : i32
    %c0_i32_0 = arith.constant 0 : i32
    %c0_i32_1 = arith.constant 0 : i32
    return %c0_i32, %c0_i32_0 : i32, i32
  }
  func.func @transform_6(%arg0: i32) -> (i32, i32, i32) {
    %c0_i32 = arith.constant 0 : i32
    %c0_i32_0 = arith.constant 0 : i32
    %c0_i32_1 = arith.constant 0 : i32
    return %arg0, %c0_i32, %c0_i32_0 : i32, i32, i32
  }
}

module attributes {stable_mosaic.version = 11 : i64} {
  func.func @_matmul_kernel(%arg0: i32, %arg1: i32, %arg2: i32, %arg3: memref<32x144xf32, #tpu.memory_space<vmem>>, %arg4: memref<144x32xf32, #tpu.memory_space<vmem>>, %arg5: memref<1x32xf32, #tpu.memory_space<vmem>>, %arg6: memref<32x32xf32, #tpu.memory_space<vmem>>, %arg7: memref<32x32xf32, #tpu.memory_space<vmem>>) attributes {dimension_semantics = [#tpu.dimension_semantics<parallel>, #tpu.dimension_semantics<parallel>, #tpu.dimension_semantics<arbitrary>], iteration_bounds = array<i64: 1, 1, 1>, scalar_prefetch = 0 : i64, scratch_operands = 1 : i64, tpu.core_type = #tpu.core_type<tc>, window_params = [{transform_indices = @transform_0, window_bounds = array<i64: 32, 144>}, {transform_indices = @transform_1, window_bounds = array<i64: 144, 32>}, {transform_indices = @transform_2, window_bounds = array<i64: 1, 32>}, {transform_indices = @transform_3, window_bounds = array<i64: 32, 32>}]} {
    %c0_i32 = arith.constant 0 : i32
    %0 = arith.cmpi eq, %arg2, %c0_i32 : i32
    %1 = arith.extui %0 : i1 to i32
    %c0_i32_0 = arith.constant 0 : i32
    %2 = arith.cmpi ne, %1, %c0_i32_0 : i32
    scf.if %2 {
      %cst_10 = arith.constant 0.000000e+00 : f32
      %12 = vector.broadcast %cst_10 : f32 to vector<32x32xf32>
      %c0_11 = arith.constant 0 : index
      %c0_12 = arith.constant 0 : index
      %13 = vector.load %arg7[%c0_11, %c0_12] : memref<32x32xf32, #tpu.memory_space<vmem>>, vector<32x32xf32>
      tpu.vector_store %arg7[%c0_11, %c0_12], %12 {strides = array<i32>} : memref<32x32xf32, #tpu.memory_space<vmem>>, vector<32x32xf32>,
    } else {
    }
    %c0 = arith.constant 0 : index
    %c0_1 = arith.constant 0 : index
    %3 = vector.load %arg7[%c0, %c0_1] : memref<32x32xf32, #tpu.memory_space<vmem>>, vector<32x32xf32>
    %c0_2 = arith.constant 0 : index
    %c0_3 = arith.constant 0 : index
    %4 = vector.load %arg3[%c0_2, %c0_3] : memref<32x144xf32, #tpu.memory_space<vmem>>, vector<32x144xf32>
    %c0_4 = arith.constant 0 : index
    %c0_5 = arith.constant 0 : index
    %5 = vector.load %arg4[%c0_4, %c0_5] : memref<144x32xf32, #tpu.memory_space<vmem>>, vector<144x32xf32>
    %cst = arith.constant dense<0.000000e+00> : vector<32x32xf32>
    %6 = tpu.matmul %4, %5, %cst {dimension_numbers = #tpu.dot_dimension_numbers<[1], [0], [0], [1], [0, 0, 1, 1], [], []>} : vector<32x144xf32>, vector<144x32xf32>, vector<32x32xf32> -> vector<32x32xf32>
    %7 = arith.addf %3, %6 : vector<32x32xf32>
    %c0_6 = arith.constant 0 : index
    %c0_7 = arith.constant 0 : index
    %8 = vector.load %arg7[%c0_6, %c0_7] : memref<32x32xf32, #tpu.memory_space<vmem>>, vector<32x32xf32>
    tpu.vector_store %arg7[%c0_6, %c0_7], %7 {strides = array<i32>} : memref<32x32xf32, #tpu.memory_space<vmem>>, vector<32x32xf32>,
    %c0_i32_8 = arith.constant 0 : i32
    %9 = arith.cmpi eq, %arg2, %c0_i32_8 : i32
    %10 = arith.extui %9 : i1 to i32
    %c0_i32_9 = arith.constant 0 : i32
    %11 = arith.cmpi ne, %10, %c0_i32_9 : i32
    scf.if %11 {
      %c0_10 = arith.constant 0 : index
      %c0_11 = arith.constant 0 : index
      %12 = vector.load %arg7[%c0_10, %c0_11] : memref<32x32xf32, #tpu.memory_space<vmem>>, vector<32x32xf32>
      %c0_12 = arith.constant 0 : index
      %c0_13 = arith.constant 0 : index
      %13 = vector.load %arg5[%c0_12, %c0_13] : memref<1x32xf32, #tpu.memory_space<vmem>>, vector<1x32xf32>
      %14 = vector.broadcast %13 : vector<1x32xf32> to vector<32x32xf32>
      %15 = arith.addf %12, %14 : vector<32x32xf32>
      %c0_14 = arith.constant 0 : index
      %c0_15 = arith.constant 0 : index
      %16 = vector.load %arg6[%c0_14, %c0_15] : memref<32x32xf32, #tpu.memory_space<vmem>>, vector<32x32xf32>
      tpu.vector_store %arg6[%c0_14, %c0_15], %15 {strides = array<i32>} : memref<32x32xf32, #tpu.memory_space<vmem>>, vector<32x32xf32>,
    } else {
    }
    return
  }
  func.func @transform_0(%arg0: i32, %arg1: i32, %arg2: i32) -> (i32, i32) {
    %c0_i32 = arith.constant 0 : i32
    return %arg0, %arg2 : i32, i32
  }
  func.func @transform_1(%arg0: i32, %arg1: i32, %arg2: i32) -> (i32, i32) {
    %c0_i32 = arith.constant 0 : i32
    return %arg2, %arg1 : i32, i32
  }
  func.func @transform_2(%arg0: i32, %arg1: i32, %arg2: i32) -> (i32, i32) {
    %c0_i32 = arith.constant 0 : i32
    %c0_i32_0 = arith.constant 0 : i32
    return %c0_i32, %arg1 : i32, i32
  }
  func.func @transform_3(%arg0: i32, %arg1: i32, %arg2: i32) -> (i32, i32) {
    %c0_i32 = arith.constant 0 : i32
    return %arg0, %arg1 : i32, i32
  }
}

module attributes {stable_mosaic.version = 11 : i64} {
  func.func @_matmul_kernel(%arg0: i32, %arg1: i32, %arg2: i32, %arg3: memref<32x144xf32, #tpu.memory_space<vmem>>, %arg4: memref<144x24xf32, #tpu.memory_space<vmem>>, %arg5: memref<1x24xf32, #tpu.memory_space<vmem>>, %arg6: memref<32x24xf32, #tpu.memory_space<vmem>>, %arg7: memref<32x24xf32, #tpu.memory_space<vmem>>) attributes {dimension_semantics = [#tpu.dimension_semantics<parallel>, #tpu.dimension_semantics<parallel>, #tpu.dimension_semantics<arbitrary>], iteration_bounds = array<i64: 1, 1, 1>, scalar_prefetch = 0 : i64, scratch_operands = 1 : i64, tpu.core_type = #tpu.core_type<tc>, window_params = [{transform_indices = @transform_0, window_bounds = array<i64: 32, 144>}, {transform_indices = @transform_1, window_bounds = array<i64: 144, 24>}, {transform_indices = @transform_2, window_bounds = array<i64: 1, 24>}, {transform_indices = @transform_3, window_bounds = array<i64: 32, 24>}]} {
    %c0_i32 = arith.constant 0 : i32
    %0 = arith.cmpi eq, %arg2, %c0_i32 : i32
    %1 = arith.extui %0 : i1 to i32
    %c0_i32_0 = arith.constant 0 : i32
    %2 = arith.cmpi ne, %1, %c0_i32_0 : i32
    scf.if %2 {
      %cst_10 = arith.constant 0.000000e+00 : f32
      %12 = vector.broadcast %cst_10 : f32 to vector<32x24xf32>
      %c0_11 = arith.constant 0 : index
      %c0_12 = arith.constant 0 : index
      %13 = vector.load %arg7[%c0_11, %c0_12] : memref<32x24xf32, #tpu.memory_space<vmem>>, vector<32x24xf32>
      tpu.vector_store %arg7[%c0_11, %c0_12], %12 {strides = array<i32>} : memref<32x24xf32, #tpu.memory_space<vmem>>, vector<32x24xf32>,
    } else {
    }
    %c0 = arith.constant 0 : index
    %c0_1 = arith.constant 0 : index
    %3 = vector.load %arg7[%c0, %c0_1] : memref<32x24xf32, #tpu.memory_space<vmem>>, vector<32x24xf32>
    %c0_2 = arith.constant 0 : index
    %c0_3 = arith.constant 0 : index
    %4 = vector.load %arg3[%c0_2, %c0_3] : memref<32x144xf32, #tpu.memory_space<vmem>>, vector<32x144xf32>
    %c0_4 = arith.constant 0 : index
    %c0_5 = arith.constant 0 : index
    %5 = vector.load %arg4[%c0_4, %c0_5] : memref<144x24xf32, #tpu.memory_space<vmem>>, vector<144x24xf32>
    %cst = arith.constant dense<0.000000e+00> : vector<32x24xf32>
    %6 = tpu.matmul %4, %5, %cst {dimension_numbers = #tpu.dot_dimension_numbers<[1], [0], [0], [1], [0, 0, 1, 1], [], []>} : vector<32x144xf32>, vector<144x24xf32>, vector<32x24xf32> -> vector<32x24xf32>
    %7 = arith.addf %3, %6 : vector<32x24xf32>
    %c0_6 = arith.constant 0 : index
    %c0_7 = arith.constant 0 : index
    %8 = vector.load %arg7[%c0_6, %c0_7] : memref<32x24xf32, #tpu.memory_space<vmem>>, vector<32x24xf32>
    tpu.vector_store %arg7[%c0_6, %c0_7], %7 {strides = array<i32>} : memref<32x24xf32, #tpu.memory_space<vmem>>, vector<32x24xf32>,
    %c0_i32_8 = arith.constant 0 : i32
    %9 = arith.cmpi eq, %arg2, %c0_i32_8 : i32
    %10 = arith.extui %9 : i1 to i32
    %c0_i32_9 = arith.constant 0 : i32
    %11 = arith.cmpi ne, %10, %c0_i32_9 : i32
    scf.if %11 {
      %c0_10 = arith.constant 0 : index
      %c0_11 = arith.constant 0 : index
      %12 = vector.load %arg7[%c0_10, %c0_11] : memref<32x24xf32, #tpu.memory_space<vmem>>, vector<32x24xf32>
      %c0_12 = arith.constant 0 : index
      %c0_13 = arith.constant 0 : index
      %13 = vector.load %arg5[%c0_12, %c0_13] : memref<1x24xf32, #tpu.memory_space<vmem>>, vector<1x24xf32>
      %14 = vector.broadcast %13 : vector<1x24xf32> to vector<32x24xf32>
      %15 = arith.addf %12, %14 : vector<32x24xf32>
      %cst_14 = arith.constant 0.000000e+00 : f32
      %16 = vector.broadcast %cst_14 : f32 to vector<32x24xf32>
      %17 = arith.maximumf %15, %16 : vector<32x24xf32>
      %c0_15 = arith.constant 0 : index
      %c0_16 = arith.constant 0 : index
      %18 = vector.load %arg6[%c0_15, %c0_16] : memref<32x24xf32, #tpu.memory_space<vmem>>, vector<32x24xf32>
      tpu.vector_store %arg6[%c0_15, %c0_16], %17 {strides = array<i32>} : memref<32x24xf32, #tpu.memory_space<vmem>>, vector<32x24xf32>,
    } else {
    }
    return
  }
  func.func @transform_0(%arg0: i32, %arg1: i32, %arg2: i32) -> (i32, i32) {
    %c0_i32 = arith.constant 0 : i32
    return %arg0, %arg2 : i32, i32
  }
  func.func @transform_1(%arg0: i32, %arg1: i32, %arg2: i32) -> (i32, i32) {
    %c0_i32 = arith.constant 0 : i32
    return %arg2, %arg1 : i32, i32
  }
  func.func @transform_2(%arg0: i32, %arg1: i32, %arg2: i32) -> (i32, i32) {
    %c0_i32 = arith.constant 0 : i32
    %c0_i32_0 = arith.constant 0 : i32
    return %c0_i32, %arg1 : i32, i32
  }
  func.func @transform_3(%arg0: i32, %arg1: i32, %arg2: i32) -> (i32, i32) {
    %c0_i32 = arith.constant 0 : i32
    return %arg0, %arg1 : i32, i32
  }
}

module attributes {stable_mosaic.version = 11 : i64} {
  func.func @_matmul_kernel(%arg0: i32, %arg1: i32, %arg2: i32, %arg3: memref<8x216xf32, #tpu.memory_space<vmem>>, %arg4: memref<216x32xf32, #tpu.memory_space<vmem>>, %arg5: memref<1x32xf32, #tpu.memory_space<vmem>>, %arg6: memref<8x32xf32, #tpu.memory_space<vmem>>, %arg7: memref<8x32xf32, #tpu.memory_space<vmem>>) attributes {dimension_semantics = [#tpu.dimension_semantics<parallel>, #tpu.dimension_semantics<parallel>, #tpu.dimension_semantics<arbitrary>], iteration_bounds = array<i64: 1, 1, 1>, scalar_prefetch = 0 : i64, scratch_operands = 1 : i64, tpu.core_type = #tpu.core_type<tc>, window_params = [{transform_indices = @transform_0, window_bounds = array<i64: 8, 216>}, {transform_indices = @transform_1, window_bounds = array<i64: 216, 32>}, {transform_indices = @transform_2, window_bounds = array<i64: 1, 32>}, {transform_indices = @transform_3, window_bounds = array<i64: 8, 32>}]} {
    %c0_i32 = arith.constant 0 : i32
    %0 = arith.cmpi eq, %arg2, %c0_i32 : i32
    %1 = arith.extui %0 : i1 to i32
    %c0_i32_0 = arith.constant 0 : i32
    %2 = arith.cmpi ne, %1, %c0_i32_0 : i32
    scf.if %2 {
      %cst_10 = arith.constant 0.000000e+00 : f32
      %12 = vector.broadcast %cst_10 : f32 to vector<8x32xf32>
      %c0_11 = arith.constant 0 : index
      %c0_12 = arith.constant 0 : index
      %13 = vector.load %arg7[%c0_11, %c0_12] : memref<8x32xf32, #tpu.memory_space<vmem>>, vector<8x32xf32>
      tpu.vector_store %arg7[%c0_11, %c0_12], %12 {strides = array<i32>} : memref<8x32xf32, #tpu.memory_space<vmem>>, vector<8x32xf32>,
    } else {
    }
    %c0 = arith.constant 0 : index
    %c0_1 = arith.constant 0 : index
    %3 = vector.load %arg7[%c0, %c0_1] : memref<8x32xf32, #tpu.memory_space<vmem>>, vector<8x32xf32>
    %c0_2 = arith.constant 0 : index
    %c0_3 = arith.constant 0 : index
    %4 = vector.load %arg3[%c0_2, %c0_3] : memref<8x216xf32, #tpu.memory_space<vmem>>, vector<8x216xf32>
    %c0_4 = arith.constant 0 : index
    %c0_5 = arith.constant 0 : index
    %5 = vector.load %arg4[%c0_4, %c0_5] : memref<216x32xf32, #tpu.memory_space<vmem>>, vector<216x32xf32>
    %cst = arith.constant dense<0.000000e+00> : vector<8x32xf32>
    %6 = tpu.matmul %4, %5, %cst {dimension_numbers = #tpu.dot_dimension_numbers<[1], [0], [0], [1], [0, 0, 1, 1], [], []>} : vector<8x216xf32>, vector<216x32xf32>, vector<8x32xf32> -> vector<8x32xf32>
    %7 = arith.addf %3, %6 : vector<8x32xf32>
    %c0_6 = arith.constant 0 : index
    %c0_7 = arith.constant 0 : index
    %8 = vector.load %arg7[%c0_6, %c0_7] : memref<8x32xf32, #tpu.memory_space<vmem>>, vector<8x32xf32>
    tpu.vector_store %arg7[%c0_6, %c0_7], %7 {strides = array<i32>} : memref<8x32xf32, #tpu.memory_space<vmem>>, vector<8x32xf32>,
    %c0_i32_8 = arith.constant 0 : i32
    %9 = arith.cmpi eq, %arg2, %c0_i32_8 : i32
    %10 = arith.extui %9 : i1 to i32
    %c0_i32_9 = arith.constant 0 : i32
    %11 = arith.cmpi ne, %10, %c0_i32_9 : i32
    scf.if %11 {
      %c0_10 = arith.constant 0 : index
      %c0_11 = arith.constant 0 : index
      %12 = vector.load %arg7[%c0_10, %c0_11] : memref<8x32xf32, #tpu.memory_space<vmem>>, vector<8x32xf32>
      %c0_12 = arith.constant 0 : index
      %c0_13 = arith.constant 0 : index
      %13 = vector.load %arg5[%c0_12, %c0_13] : memref<1x32xf32, #tpu.memory_space<vmem>>, vector<1x32xf32>
      %14 = vector.broadcast %13 : vector<1x32xf32> to vector<8x32xf32>
      %15 = arith.addf %12, %14 : vector<8x32xf32>
      %cst_14 = arith.constant 0.000000e+00 : f32
      %16 = vector.broadcast %cst_14 : f32 to vector<8x32xf32>
      %17 = arith.maximumf %15, %16 : vector<8x32xf32>
      %c0_15 = arith.constant 0 : index
      %c0_16 = arith.constant 0 : index
      %18 = vector.load %arg6[%c0_15, %c0_16] : memref<8x32xf32, #tpu.memory_space<vmem>>, vector<8x32xf32>
      tpu.vector_store %arg6[%c0_15, %c0_16], %17 {strides = array<i32>} : memref<8x32xf32, #tpu.memory_space<vmem>>, vector<8x32xf32>,
    } else {
    }
    return
  }
  func.func @transform_0(%arg0: i32, %arg1: i32, %arg2: i32) -> (i32, i32) {
    %c0_i32 = arith.constant 0 : i32
    return %arg0, %arg2 : i32, i32
  }
  func.func @transform_1(%arg0: i32, %arg1: i32, %arg2: i32) -> (i32, i32) {
    %c0_i32 = arith.constant 0 : i32
    return %arg2, %arg1 : i32, i32
  }
  func.func @transform_2(%arg0: i32, %arg1: i32, %arg2: i32) -> (i32, i32) {
    %c0_i32 = arith.constant 0 : i32
    %c0_i32_0 = arith.constant 0 : i32
    return %c0_i32, %arg1 : i32, i32
  }
  func.func @transform_3(%arg0: i32, %arg1: i32, %arg2: i32) -> (i32, i32) {
    %c0_i32 = arith.constant 0 : i32
    return %arg0, %arg1 : i32, i32
  }
}

module attributes {stable_mosaic.version = 11 : i64} {
  func.func @_matmul_kernel(%arg0: i32, %arg1: i32, %arg2: i32, %arg3: memref<8x216xf32, #tpu.memory_space<vmem>>, %arg4: memref<216x32xf32, #tpu.memory_space<vmem>>, %arg5: memref<1x32xf32, #tpu.memory_space<vmem>>, %arg6: memref<8x32xf32, #tpu.memory_space<vmem>>, %arg7: memref<8x32xf32, #tpu.memory_space<vmem>>) attributes {dimension_semantics = [#tpu.dimension_semantics<parallel>, #tpu.dimension_semantics<parallel>, #tpu.dimension_semantics<arbitrary>], iteration_bounds = array<i64: 1, 1, 1>, scalar_prefetch = 0 : i64, scratch_operands = 1 : i64, tpu.core_type = #tpu.core_type<tc>, window_params = [{transform_indices = @transform_0, window_bounds = array<i64: 8, 216>}, {transform_indices = @transform_1, window_bounds = array<i64: 216, 32>}, {transform_indices = @transform_2, window_bounds = array<i64: 1, 32>}, {transform_indices = @transform_3, window_bounds = array<i64: 8, 32>}]} {
    %c0_i32 = arith.constant 0 : i32
    %0 = arith.cmpi eq, %arg2, %c0_i32 : i32
    %1 = arith.extui %0 : i1 to i32
    %c0_i32_0 = arith.constant 0 : i32
    %2 = arith.cmpi ne, %1, %c0_i32_0 : i32
    scf.if %2 {
      %cst_10 = arith.constant 0.000000e+00 : f32
      %12 = vector.broadcast %cst_10 : f32 to vector<8x32xf32>
      %c0_11 = arith.constant 0 : index
      %c0_12 = arith.constant 0 : index
      %13 = vector.load %arg7[%c0_11, %c0_12] : memref<8x32xf32, #tpu.memory_space<vmem>>, vector<8x32xf32>
      tpu.vector_store %arg7[%c0_11, %c0_12], %12 {strides = array<i32>} : memref<8x32xf32, #tpu.memory_space<vmem>>, vector<8x32xf32>,
    } else {
    }
    %c0 = arith.constant 0 : index
    %c0_1 = arith.constant 0 : index
    %3 = vector.load %arg7[%c0, %c0_1] : memref<8x32xf32, #tpu.memory_space<vmem>>, vector<8x32xf32>
    %c0_2 = arith.constant 0 : index
    %c0_3 = arith.constant 0 : index
    %4 = vector.load %arg3[%c0_2, %c0_3] : memref<8x216xf32, #tpu.memory_space<vmem>>, vector<8x216xf32>
    %c0_4 = arith.constant 0 : index
    %c0_5 = arith.constant 0 : index
    %5 = vector.load %arg4[%c0_4, %c0_5] : memref<216x32xf32, #tpu.memory_space<vmem>>, vector<216x32xf32>
    %cst = arith.constant dense<0.000000e+00> : vector<8x32xf32>
    %6 = tpu.matmul %4, %5, %cst {dimension_numbers = #tpu.dot_dimension_numbers<[1], [0], [0], [1], [0, 0, 1, 1], [], []>} : vector<8x216xf32>, vector<216x32xf32>, vector<8x32xf32> -> vector<8x32xf32>
    %7 = arith.addf %3, %6 : vector<8x32xf32>
    %c0_6 = arith.constant 0 : index
    %c0_7 = arith.constant 0 : index
    %8 = vector.load %arg7[%c0_6, %c0_7] : memref<8x32xf32, #tpu.memory_space<vmem>>, vector<8x32xf32>
    tpu.vector_store %arg7[%c0_6, %c0_7], %7 {strides = array<i32>} : memref<8x32xf32, #tpu.memory_space<vmem>>, vector<8x32xf32>,
    %c0_i32_8 = arith.constant 0 : i32
    %9 = arith.cmpi eq, %arg2, %c0_i32_8 : i32
    %10 = arith.extui %9 : i1 to i32
    %c0_i32_9 = arith.constant 0 : i32
    %11 = arith.cmpi ne, %10, %c0_i32_9 : i32
    scf.if %11 {
      %c0_10 = arith.constant 0 : index
      %c0_11 = arith.constant 0 : index
      %12 = vector.load %arg7[%c0_10, %c0_11] : memref<8x32xf32, #tpu.memory_space<vmem>>, vector<8x32xf32>
      %c0_12 = arith.constant 0 : index
      %c0_13 = arith.constant 0 : index
      %13 = vector.load %arg5[%c0_12, %c0_13] : memref<1x32xf32, #tpu.memory_space<vmem>>, vector<1x32xf32>
      %14 = vector.broadcast %13 : vector<1x32xf32> to vector<8x32xf32>
      %15 = arith.addf %12, %14 : vector<8x32xf32>
      %c0_14 = arith.constant 0 : index
      %c0_15 = arith.constant 0 : index
      %16 = vector.load %arg6[%c0_14, %c0_15] : memref<8x32xf32, #tpu.memory_space<vmem>>, vector<8x32xf32>
      tpu.vector_store %arg6[%c0_14, %c0_15], %15 {strides = array<i32>} : memref<8x32xf32, #tpu.memory_space<vmem>>, vector<8x32xf32>,
    } else {
    }
    return
  }
  func.func @transform_0(%arg0: i32, %arg1: i32, %arg2: i32) -> (i32, i32) {
    %c0_i32 = arith.constant 0 : i32
    return %arg0, %arg2 : i32, i32
  }
  func.func @transform_1(%arg0: i32, %arg1: i32, %arg2: i32) -> (i32, i32) {
    %c0_i32 = arith.constant 0 : i32
    return %arg2, %arg1 : i32, i32
  }
  func.func @transform_2(%arg0: i32, %arg1: i32, %arg2: i32) -> (i32, i32) {
    %c0_i32 = arith.constant 0 : i32
    %c0_i32_0 = arith.constant 0 : i32
    return %c0_i32, %arg1 : i32, i32
  }
  func.func @transform_3(%arg0: i32, %arg1: i32, %arg2: i32) -> (i32, i32) {
    %c0_i32 = arith.constant 0 : i32
    return %arg0, %arg1 : i32, i32
  }
}

module attributes {stable_mosaic.version = 11 : i64} {
  func.func @_matmul_kernel(%arg0: i32, %arg1: i32, %arg2: i32, %arg3: memref<2x288xf32, #tpu.memory_space<vmem>>, %arg4: memref<288x32xf32, #tpu.memory_space<vmem>>, %arg5: memref<1x32xf32, #tpu.memory_space<vmem>>, %arg6: memref<2x32xf32, #tpu.memory_space<vmem>>, %arg7: memref<2x32xf32, #tpu.memory_space<vmem>>) attributes {dimension_semantics = [#tpu.dimension_semantics<parallel>, #tpu.dimension_semantics<parallel>, #tpu.dimension_semantics<arbitrary>], iteration_bounds = array<i64: 1, 1, 1>, scalar_prefetch = 0 : i64, scratch_operands = 1 : i64, tpu.core_type = #tpu.core_type<tc>, window_params = [{transform_indices = @transform_0, window_bounds = array<i64: 2, 288>}, {transform_indices = @transform_1, window_bounds = array<i64: 288, 32>}, {transform_indices = @transform_2, window_bounds = array<i64: 1, 32>}, {transform_indices = @transform_3, window_bounds = array<i64: 2, 32>}]} {
    %c0_i32 = arith.constant 0 : i32
    %0 = arith.cmpi eq, %arg2, %c0_i32 : i32
    %1 = arith.extui %0 : i1 to i32
    %c0_i32_0 = arith.constant 0 : i32
    %2 = arith.cmpi ne, %1, %c0_i32_0 : i32
    scf.if %2 {
      %cst_10 = arith.constant 0.000000e+00 : f32
      %12 = vector.broadcast %cst_10 : f32 to vector<2x32xf32>
      %c0_11 = arith.constant 0 : index
      %c0_12 = arith.constant 0 : index
      %13 = vector.load %arg7[%c0_11, %c0_12] : memref<2x32xf32, #tpu.memory_space<vmem>>, vector<2x32xf32>
      tpu.vector_store %arg7[%c0_11, %c0_12], %12 {strides = array<i32>} : memref<2x32xf32, #tpu.memory_space<vmem>>, vector<2x32xf32>,
    } else {
    }
    %c0 = arith.constant 0 : index
    %c0_1 = arith.constant 0 : index
    %3 = vector.load %arg7[%c0, %c0_1] : memref<2x32xf32, #tpu.memory_space<vmem>>, vector<2x32xf32>
    %c0_2 = arith.constant 0 : index
    %c0_3 = arith.constant 0 : index
    %4 = vector.load %arg3[%c0_2, %c0_3] : memref<2x288xf32, #tpu.memory_space<vmem>>, vector<2x288xf32>
    %c0_4 = arith.constant 0 : index
    %c0_5 = arith.constant 0 : index
    %5 = vector.load %arg4[%c0_4, %c0_5] : memref<288x32xf32, #tpu.memory_space<vmem>>, vector<288x32xf32>
    %cst = arith.constant dense<0.000000e+00> : vector<2x32xf32>
    %6 = tpu.matmul %4, %5, %cst {dimension_numbers = #tpu.dot_dimension_numbers<[1], [0], [0], [1], [0, 0, 1, 1], [], []>} : vector<2x288xf32>, vector<288x32xf32>, vector<2x32xf32> -> vector<2x32xf32>
    %7 = arith.addf %3, %6 : vector<2x32xf32>
    %c0_6 = arith.constant 0 : index
    %c0_7 = arith.constant 0 : index
    %8 = vector.load %arg7[%c0_6, %c0_7] : memref<2x32xf32, #tpu.memory_space<vmem>>, vector<2x32xf32>
    tpu.vector_store %arg7[%c0_6, %c0_7], %7 {strides = array<i32>} : memref<2x32xf32, #tpu.memory_space<vmem>>, vector<2x32xf32>,
    %c0_i32_8 = arith.constant 0 : i32
    %9 = arith.cmpi eq, %arg2, %c0_i32_8 : i32
    %10 = arith.extui %9 : i1 to i32
    %c0_i32_9 = arith.constant 0 : i32
    %11 = arith.cmpi ne, %10, %c0_i32_9 : i32
    scf.if %11 {
      %c0_10 = arith.constant 0 : index
      %c0_11 = arith.constant 0 : index
      %12 = vector.load %arg7[%c0_10, %c0_11] : memref<2x32xf32, #tpu.memory_space<vmem>>, vector<2x32xf32>
      %c0_12 = arith.constant 0 : index
      %c0_13 = arith.constant 0 : index
      %13 = vector.load %arg5[%c0_12, %c0_13] : memref<1x32xf32, #tpu.memory_space<vmem>>, vector<1x32xf32>
      %14 = vector.broadcast %13 : vector<1x32xf32> to vector<2x32xf32>
      %15 = arith.addf %12, %14 : vector<2x32xf32>
      %c0_14 = arith.constant 0 : index
      %c0_15 = arith.constant 0 : index
      %16 = vector.load %arg6[%c0_14, %c0_15] : memref<2x32xf32, #tpu.memory_space<vmem>>, vector<2x32xf32>
      tpu.vector_store %arg6[%c0_14, %c0_15], %15 {strides = array<i32>} : memref<2x32xf32, #tpu.memory_space<vmem>>, vector<2x32xf32>,
    } else {
    }
    return
  }
  func.func @transform_0(%arg0: i32, %arg1: i32, %arg2: i32) -> (i32, i32) {
    %c0_i32 = arith.constant 0 : i32
    return %arg0, %arg2 : i32, i32
  }
  func.func @transform_1(%arg0: i32, %arg1: i32, %arg2: i32) -> (i32, i32) {
    %c0_i32 = arith.constant 0 : i32
    return %arg2, %arg1 : i32, i32
  }
  func.func @transform_2(%arg0: i32, %arg1: i32, %arg2: i32) -> (i32, i32) {
    %c0_i32 = arith.constant 0 : i32
    %c0_i32_0 = arith.constant 0 : i32
    return %c0_i32, %arg1 : i32, i32
  }
  func.func @transform_3(%arg0: i32, %arg1: i32, %arg2: i32) -> (i32, i32) {
    %c0_i32 = arith.constant 0 : i32
    return %arg0, %arg1 : i32, i32
  }
}

module attributes {stable_mosaic.version = 11 : i64} {
  func.func @_project_outconv_kernel(%arg0: i32, %arg1: memref<1x1x32xf32, #tpu.memory_space<vmem>>, %arg2: memref<1x1x17x32xf32, #tpu.memory_space<vmem>>, %arg3: memref<32x32xf32, #tpu.memory_space<vmem>>, %arg4: memref<32x32xf32, #tpu.memory_space<vmem>>, %arg5: memref<32x2048xf32, #tpu.memory_space<vmem>>, %arg6: memref<1x2048xf32, #tpu.memory_space<vmem>>, %arg7: memref<1x1x2048xf32, #tpu.memory_space<vmem>>) attributes {dimension_semantics = [#tpu.dimension_semantics<parallel>], iteration_bounds = array<i64: 2>, scalar_prefetch = 0 : i64, scratch_operands = 0 : i64, tpu.core_type = #tpu.core_type<tc>, window_params = [{transform_indices = @transform_0, window_bounds = array<i64: 1, 1, 32>}, {transform_indices = @transform_1, window_bounds = array<i64: 1, 1, 17, 32>}, {pipeline_mode = #tpu.pipeline_mode<synchronous>, transform_indices = @transform_2, window_bounds = array<i64: 32, 32>}, {pipeline_mode = #tpu.pipeline_mode<synchronous>, transform_indices = @transform_3, window_bounds = array<i64: 32, 32>}, {pipeline_mode = #tpu.pipeline_mode<synchronous>, transform_indices = @transform_4, window_bounds = array<i64: 32, 2048>}, {pipeline_mode = #tpu.pipeline_mode<synchronous>, transform_indices = @transform_5, window_bounds = array<i64: 1, 2048>}, {transform_indices = @transform_6, window_bounds = array<i64: 1, 1, 2048>}]} {
    %c0 = arith.constant 0 : index
    %c0_0 = arith.constant 0 : index
    %c0_1 = arith.constant 0 : index
    %0 = vector.load %arg1[%c0, %c0_0, %c0_1] : memref<1x1x32xf32, #tpu.memory_space<vmem>>, vector<1x1x32xf32>
    %1 = vector.shape_cast %0 : vector<1x1x32xf32> to vector<1x32xf32>
    %c0_2 = arith.constant 0 : index
    %c0_3 = arith.constant 0 : index
    %c0_4 = arith.constant 0 : index
    %c0_5 = arith.constant 0 : index
    %2 = vector.load %arg2[%c0_2, %c0_3, %c0_4, %c0_5] : memref<1x1x17x32xf32, #tpu.memory_space<vmem>>, vector<1x1x17x32xf32>
    %3 = vector.shape_cast %2 : vector<1x1x17x32xf32> to vector<17x32xf32>
    %c0_6 = arith.constant 0 : index
    %c0_7 = arith.constant 0 : index
    %4 = vector.load %arg3[%c0_6, %c0_7] : memref<32x32xf32, #tpu.memory_space<vmem>>, vector<32x32xf32>
    %cst = arith.constant dense<0.000000e+00> : vector<1x32xf32>
    %5 = tpu.matmul %1, %4, %cst {dimension_numbers = #tpu.dot_dimension_numbers<[1], [0], [0], [1], [0, 0, 1, 1], [], []>} : vector<1x32xf32>, vector<32x32xf32>, vector<1x32xf32> -> vector<1x32xf32>
    %c0_8 = arith.constant 0 : index
    %c0_9 = arith.constant 0 : index
    %6 = vector.load %arg4[%c0_8, %c0_9] : memref<32x32xf32, #tpu.memory_space<vmem>>, vector<32x32xf32>
    %cst_10 = arith.constant dense<0.000000e+00> : vector<17x32xf32>
    %7 = tpu.matmul %3, %6, %cst_10 {dimension_numbers = #tpu.dot_dimension_numbers<[1], [0], [0], [1], [0, 0, 1, 1], [], []>} : vector<17x32xf32>, vector<32x32xf32>, vector<17x32xf32> -> vector<17x32xf32>
    %cst_11 = arith.constant dense<0.000000e+00> : vector<1x17xf32>
    %8 = tpu.matmul %5, %7, %cst_11 {dimension_numbers = #tpu.dot_dimension_numbers<[1], [1], [0], [0], [0, 0, 1, 0], [], []>} : vector<1x32xf32>, vector<17x32xf32>, vector<1x17xf32> -> vector<1x17xf32>
    %cst_12 = arith.constant dense<0xFF800000> : vector<1xf32>
    %9 = vector.multi_reduction <maximumf>, %8, %cst_12 [1] : vector<1x17xf32> to vector<1xf32>
    %10 = vector.shape_cast %9 : vector<1xf32> to vector<1x1xf32>
    %11 = vector.broadcast %10 : vector<1x1xf32> to vector<1x17xf32>
    %12 = arith.subf %8, %11 : vector<1x17xf32>
    %13 = math.exp %12 : vector<1x17xf32>
    %cst_13 = arith.constant dense<0.000000e+00> : vector<1xf32>
    %14 = vector.multi_reduction <add>, %13, %cst_13 [1] : vector<1x17xf32> to vector<1xf32>
    %15 = vector.shape_cast %14 : vector<1xf32> to vector<1x1xf32>
    %16 = vector.broadcast %15 : vector<1x1xf32> to vector<1x17xf32>
    %17 = arith.divf %13, %16 : vector<1x17xf32>
    %cst_14 = arith.constant dense<0.000000e+00> : vector<1x32xf32>
    %18 = tpu.matmul %17, %3, %cst_14 {dimension_numbers = #tpu.dot_dimension_numbers<[1], [0], [0], [1], [0, 0, 1, 1], [], []>} : vector<1x17xf32>, vector<17x32xf32>, vector<1x32xf32> -> vector<1x32xf32>
    %19 = arith.addf %1, %18 : vector<1x32xf32>
    %c0_15 = arith.constant 0 : index
    %c0_16 = arith.constant 0 : index
    %20 = vector.load %arg5[%c0_15, %c0_16] : memref<32x2048xf32, #tpu.memory_space<vmem>>, vector<32x2048xf32>
    %cst_17 = arith.constant dense<0.000000e+00> : vector<1x2048xf32>
    %21 = tpu.matmul %19, %20, %cst_17 {dimension_numbers = #tpu.dot_dimension_numbers<[1], [0], [0], [1], [0, 0, 1, 1], [], []>} : vector<1x32xf32>, vector<32x2048xf32>, vector<1x2048xf32> -> vector<1x2048xf32>
    %c0_18 = arith.constant 0 : index
    %c0_19 = arith.constant 0 : index
    %22 = vector.load %arg6[%c0_18, %c0_19] : memref<1x2048xf32, #tpu.memory_space<vmem>>, vector<1x2048xf32>
    %23 = arith.addf %21, %22 : vector<1x2048xf32>
    %c0_20 = arith.constant 0 : index
    %c0_21 = arith.constant 0 : index
    %c0_22 = arith.constant 0 : index
    %24 = vector.load %arg7[%c0_20, %c0_21, %c0_22] : memref<1x1x2048xf32, #tpu.memory_space<vmem>>, vector<1x1x2048xf32>
    %25 = vector.shape_cast %24 : vector<1x1x2048xf32> to vector<1x2048xf32>
    %26 = vector.shape_cast %23 : vector<1x2048xf32> to vector<1x1x2048xf32>
    tpu.vector_store %arg7[%c0_20, %c0_21, %c0_22], %26 {strides = array<i32>} : memref<1x1x2048xf32, #tpu.memory_space<vmem>>, vector<1x1x2048xf32>,
    return
  }
  func.func @transform_0(%arg0: i32) -> (i32, i32, i32) {
    %c0_i32 = arith.constant 0 : i32
    %c0_i32_0 = arith.constant 0 : i32
    %c0_i32_1 = arith.constant 0 : i32
    return %arg0, %c0_i32, %c0_i32_0 : i32, i32, i32
  }
  func.func @transform_1(%arg0: i32) -> (i32, i32, i32, i32) {
    %c3_i32 = arith.constant 3 : i32
    %c0_i32 = arith.constant 0 : i32
    %c0_i32_0 = arith.constant 0 : i32
    %c0_i32_1 = arith.constant 0 : i32
    return %c3_i32, %arg0, %c0_i32, %c0_i32_0 : i32, i32, i32, i32
  }
  func.func @transform_2(%arg0: i32) -> (i32, i32) {
    %c0_i32 = arith.constant 0 : i32
    %c0_i32_0 = arith.constant 0 : i32
    %c0_i32_1 = arith.constant 0 : i32
    return %c0_i32, %c0_i32_0 : i32, i32
  }
  func.func @transform_3(%arg0: i32) -> (i32, i32) {
    %c0_i32 = arith.constant 0 : i32
    %c0_i32_0 = arith.constant 0 : i32
    %c0_i32_1 = arith.constant 0 : i32
    return %c0_i32, %c0_i32_0 : i32, i32
  }
  func.func @transform_4(%arg0: i32) -> (i32, i32) {
    %c0_i32 = arith.constant 0 : i32
    %c0_i32_0 = arith.constant 0 : i32
    %c0_i32_1 = arith.constant 0 : i32
    return %c0_i32, %c0_i32_0 : i32, i32
  }
  func.func @transform_5(%arg0: i32) -> (i32, i32) {
    %c0_i32 = arith.constant 0 : i32
    %c0_i32_0 = arith.constant 0 : i32
    %c0_i32_1 = arith.constant 0 : i32
    return %c0_i32, %c0_i32_0 : i32, i32
  }
  func.func @transform_6(%arg0: i32) -> (i32, i32, i32) {
    %c0_i32 = arith.constant 0 : i32
    %c0_i32_0 = arith.constant 0 : i32
    %c0_i32_1 = arith.constant 0 : i32
    return %arg0, %c0_i32, %c0_i32_0 : i32, i32, i32
  }
}

module attributes {stable_mosaic.version = 11 : i64} {
  func.func @_project_outconv_kernel(%arg0: i32, %arg1: memref<1x4x32xf32, #tpu.memory_space<vmem>>, %arg2: memref<1x1x17x32xf32, #tpu.memory_space<vmem>>, %arg3: memref<32x32xf32, #tpu.memory_space<vmem>>, %arg4: memref<32x32xf32, #tpu.memory_space<vmem>>, %arg5: memref<32x1024xf32, #tpu.memory_space<vmem>>, %arg6: memref<1x1024xf32, #tpu.memory_space<vmem>>, %arg7: memref<1x4x1024xf32, #tpu.memory_space<vmem>>) attributes {dimension_semantics = [#tpu.dimension_semantics<parallel>], iteration_bounds = array<i64: 2>, scalar_prefetch = 0 : i64, scratch_operands = 0 : i64, tpu.core_type = #tpu.core_type<tc>, window_params = [{transform_indices = @transform_0, window_bounds = array<i64: 1, 4, 32>}, {transform_indices = @transform_1, window_bounds = array<i64: 1, 1, 17, 32>}, {pipeline_mode = #tpu.pipeline_mode<synchronous>, transform_indices = @transform_2, window_bounds = array<i64: 32, 32>}, {pipeline_mode = #tpu.pipeline_mode<synchronous>, transform_indices = @transform_3, window_bounds = array<i64: 32, 32>}, {pipeline_mode = #tpu.pipeline_mode<synchronous>, transform_indices = @transform_4, window_bounds = array<i64: 32, 1024>}, {pipeline_mode = #tpu.pipeline_mode<synchronous>, transform_indices = @transform_5, window_bounds = array<i64: 1, 1024>}, {transform_indices = @transform_6, window_bounds = array<i64: 1, 4, 1024>}]} {
    %c0 = arith.constant 0 : index
    %c0_0 = arith.constant 0 : index
    %c0_1 = arith.constant 0 : index
    %0 = vector.load %arg1[%c0, %c0_0, %c0_1] : memref<1x4x32xf32, #tpu.memory_space<vmem>>, vector<1x4x32xf32>
    %1 = vector.shape_cast %0 : vector<1x4x32xf32> to vector<4x32xf32>
    %c0_2 = arith.constant 0 : index
    %c0_3 = arith.constant 0 : index
    %c0_4 = arith.constant 0 : index
    %c0_5 = arith.constant 0 : index
    %2 = vector.load %arg2[%c0_2, %c0_3, %c0_4, %c0_5] : memref<1x1x17x32xf32, #tpu.memory_space<vmem>>, vector<1x1x17x32xf32>
    %3 = vector.shape_cast %2 : vector<1x1x17x32xf32> to vector<17x32xf32>
    %c0_6 = arith.constant 0 : index
    %c0_7 = arith.constant 0 : index
    %4 = vector.load %arg3[%c0_6, %c0_7] : memref<32x32xf32, #tpu.memory_space<vmem>>, vector<32x32xf32>
    %cst = arith.constant dense<0.000000e+00> : vector<4x32xf32>
    %5 = tpu.matmul %1, %4, %cst {dimension_numbers = #tpu.dot_dimension_numbers<[1], [0], [0], [1], [0, 0, 1, 1], [], []>} : vector<4x32xf32>, vector<32x32xf32>, vector<4x32xf32> -> vector<4x32xf32>
    %c0_8 = arith.constant 0 : index
    %c0_9 = arith.constant 0 : index
    %6 = vector.load %arg4[%c0_8, %c0_9] : memref<32x32xf32, #tpu.memory_space<vmem>>, vector<32x32xf32>
    %cst_10 = arith.constant dense<0.000000e+00> : vector<17x32xf32>
    %7 = tpu.matmul %3, %6, %cst_10 {dimension_numbers = #tpu.dot_dimension_numbers<[1], [0], [0], [1], [0, 0, 1, 1], [], []>} : vector<17x32xf32>, vector<32x32xf32>, vector<17x32xf32> -> vector<17x32xf32>
    %cst_11 = arith.constant dense<0.000000e+00> : vector<4x17xf32>
    %8 = tpu.matmul %5, %7, %cst_11 {dimension_numbers = #tpu.dot_dimension_numbers<[1], [1], [0], [0], [0, 0, 1, 0], [], []>} : vector<4x32xf32>, vector<17x32xf32>, vector<4x17xf32> -> vector<4x17xf32>
    %cst_12 = arith.constant dense<0xFF800000> : vector<4xf32>
    %9 = vector.multi_reduction <maximumf>, %8, %cst_12 [1] : vector<4x17xf32> to vector<4xf32>
    %10 = vector.shape_cast %9 : vector<4xf32> to vector<4x1xf32>
    %11 = vector.broadcast %10 : vector<4x1xf32> to vector<4x17xf32>
    %12 = arith.subf %8, %11 : vector<4x17xf32>
    %13 = math.exp %12 : vector<4x17xf32>
    %cst_13 = arith.constant dense<0.000000e+00> : vector<4xf32>
    %14 = vector.multi_reduction <add>, %13, %cst_13 [1] : vector<4x17xf32> to vector<4xf32>
    %15 = vector.shape_cast %14 : vector<4xf32> to vector<4x1xf32>
    %16 = vector.broadcast %15 : vector<4x1xf32> to vector<4x17xf32>
    %17 = arith.divf %13, %16 : vector<4x17xf32>
    %cst_14 = arith.constant dense<0.000000e+00> : vector<4x32xf32>
    %18 = tpu.matmul %17, %3, %cst_14 {dimension_numbers = #tpu.dot_dimension_numbers<[1], [0], [0], [1], [0, 0, 1, 1], [], []>} : vector<4x17xf32>, vector<17x32xf32>, vector<4x32xf32> -> vector<4x32xf32>
    %19 = arith.addf %1, %18 : vector<4x32xf32>
    %c0_15 = arith.constant 0 : index
    %c0_16 = arith.constant 0 : index
    %20 = vector.load %arg5[%c0_15, %c0_16] : memref<32x1024xf32, #tpu.memory_space<vmem>>, vector<32x1024xf32>
    %cst_17 = arith.constant dense<0.000000e+00> : vector<4x1024xf32>
    %21 = tpu.matmul %19, %20, %cst_17 {dimension_numbers = #tpu.dot_dimension_numbers<[1], [0], [0], [1], [0, 0, 1, 1], [], []>} : vector<4x32xf32>, vector<32x1024xf32>, vector<4x1024xf32> -> vector<4x1024xf32>
    %c0_18 = arith.constant 0 : index
    %c0_19 = arith.constant 0 : index
    %22 = vector.load %arg6[%c0_18, %c0_19] : memref<1x1024xf32, #tpu.memory_space<vmem>>, vector<1x1024xf32>
    %23 = vector.broadcast %22 : vector<1x1024xf32> to vector<4x1024xf32>
    %24 = arith.addf %21, %23 : vector<4x1024xf32>
    %c0_20 = arith.constant 0 : index
    %c0_21 = arith.constant 0 : index
    %c0_22 = arith.constant 0 : index
    %25 = vector.load %arg7[%c0_20, %c0_21, %c0_22] : memref<1x4x1024xf32, #tpu.memory_space<vmem>>, vector<1x4x1024xf32>
    %26 = vector.shape_cast %25 : vector<1x4x1024xf32> to vector<4x1024xf32>
    %27 = vector.shape_cast %24 : vector<4x1024xf32> to vector<1x4x1024xf32>
    tpu.vector_store %arg7[%c0_20, %c0_21, %c0_22], %27 {strides = array<i32>} : memref<1x4x1024xf32, #tpu.memory_space<vmem>>, vector<1x4x1024xf32>,
    return
  }
  func.func @transform_0(%arg0: i32) -> (i32, i32, i32) {
    %c0_i32 = arith.constant 0 : i32
    %c0_i32_0 = arith.constant 0 : i32
    %c0_i32_1 = arith.constant 0 : i32
    return %arg0, %c0_i32, %c0_i32_0 : i32, i32, i32
  }
  func.func @transform_1(%arg0: i32) -> (i32, i32, i32, i32) {
    %c2_i32 = arith.constant 2 : i32
    %c0_i32 = arith.constant 0 : i32
    %c0_i32_0 = arith.constant 0 : i32
    %c0_i32_1 = arith.constant 0 : i32
    return %c2_i32, %arg0, %c0_i32, %c0_i32_0 : i32, i32, i32, i32
  }
  func.func @transform_2(%arg0: i32) -> (i32, i32) {
    %c0_i32 = arith.constant 0 : i32
    %c0_i32_0 = arith.constant 0 : i32
    %c0_i32_1 = arith.constant 0 : i32
    return %c0_i32, %c0_i32_0 : i32, i32
  }
  func.func @transform_3(%arg0: i32) -> (i32, i32) {
    %c0_i32 = arith.constant 0 : i32
    %c0_i32_0 = arith.constant 0 : i32
    %c0_i32_1 = arith.constant 0 : i32
    return %c0_i32, %c0_i32_0 : i32, i32
  }
  func.func @transform_4(%arg0: i32) -> (i32, i32) {
    %c0_i32 = arith.constant 0 : i32
    %c0_i32_0 = arith.constant 0 : i32
    %c0_i32_1 = arith.constant 0 : i32
    return %c0_i32, %c0_i32_0 : i32, i32
  }
  func.func @transform_5(%arg0: i32) -> (i32, i32) {
    %c0_i32 = arith.constant 0 : i32
    %c0_i32_0 = arith.constant 0 : i32
    %c0_i32_1 = arith.constant 0 : i32
    return %c0_i32, %c0_i32_0 : i32, i32
  }
  func.func @transform_6(%arg0: i32) -> (i32, i32, i32) {
    %c0_i32 = arith.constant 0 : i32
    %c0_i32_0 = arith.constant 0 : i32
    %c0_i32_1 = arith.constant 0 : i32
    return %arg0, %c0_i32, %c0_i32_0 : i32, i32, i32
  }
}

module attributes {stable_mosaic.version = 11 : i64} {
  func.func @_project_outconv_kernel(%arg0: i32, %arg1: memref<1x16x32xf32, #tpu.memory_space<vmem>>, %arg2: memref<1x1x17x32xf32, #tpu.memory_space<vmem>>, %arg3: memref<32x32xf32, #tpu.memory_space<vmem>>, %arg4: memref<32x32xf32, #tpu.memory_space<vmem>>, %arg5: memref<32x512xf32, #tpu.memory_space<vmem>>, %arg6: memref<1x512xf32, #tpu.memory_space<vmem>>, %arg7: memref<1x16x512xf32, #tpu.memory_space<vmem>>) attributes {dimension_semantics = [#tpu.dimension_semantics<parallel>], iteration_bounds = array<i64: 2>, scalar_prefetch = 0 : i64, scratch_operands = 0 : i64, tpu.core_type = #tpu.core_type<tc>, window_params = [{transform_indices = @transform_0, window_bounds = array<i64: 1, 16, 32>}, {transform_indices = @transform_1, window_bounds = array<i64: 1, 1, 17, 32>}, {pipeline_mode = #tpu.pipeline_mode<synchronous>, transform_indices = @transform_2, window_bounds = array<i64: 32, 32>}, {pipeline_mode = #tpu.pipeline_mode<synchronous>, transform_indices = @transform_3, window_bounds = array<i64: 32, 32>}, {pipeline_mode = #tpu.pipeline_mode<synchronous>, transform_indices = @transform_4, window_bounds = array<i64: 32, 512>}, {pipeline_mode = #tpu.pipeline_mode<synchronous>, transform_indices = @transform_5, window_bounds = array<i64: 1, 512>}, {transform_indices = @transform_6, window_bounds = array<i64: 1, 16, 512>}]} {
    %c0 = arith.constant 0 : index
    %c0_0 = arith.constant 0 : index
    %c0_1 = arith.constant 0 : index
    %0 = vector.load %arg1[%c0, %c0_0, %c0_1] : memref<1x16x32xf32, #tpu.memory_space<vmem>>, vector<1x16x32xf32>
    %1 = vector.shape_cast %0 : vector<1x16x32xf32> to vector<16x32xf32>
    %c0_2 = arith.constant 0 : index
    %c0_3 = arith.constant 0 : index
    %c0_4 = arith.constant 0 : index
    %c0_5 = arith.constant 0 : index
    %2 = vector.load %arg2[%c0_2, %c0_3, %c0_4, %c0_5] : memref<1x1x17x32xf32, #tpu.memory_space<vmem>>, vector<1x1x17x32xf32>
    %3 = vector.shape_cast %2 : vector<1x1x17x32xf32> to vector<17x32xf32>
    %c0_6 = arith.constant 0 : index
    %c0_7 = arith.constant 0 : index
    %4 = vector.load %arg3[%c0_6, %c0_7] : memref<32x32xf32, #tpu.memory_space<vmem>>, vector<32x32xf32>
    %cst = arith.constant dense<0.000000e+00> : vector<16x32xf32>
    %5 = tpu.matmul %1, %4, %cst {dimension_numbers = #tpu.dot_dimension_numbers<[1], [0], [0], [1], [0, 0, 1, 1], [], []>} : vector<16x32xf32>, vector<32x32xf32>, vector<16x32xf32> -> vector<16x32xf32>
    %c0_8 = arith.constant 0 : index
    %c0_9 = arith.constant 0 : index
    %6 = vector.load %arg4[%c0_8, %c0_9] : memref<32x32xf32, #tpu.memory_space<vmem>>, vector<32x32xf32>
    %cst_10 = arith.constant dense<0.000000e+00> : vector<17x32xf32>
    %7 = tpu.matmul %3, %6, %cst_10 {dimension_numbers = #tpu.dot_dimension_numbers<[1], [0], [0], [1], [0, 0, 1, 1], [], []>} : vector<17x32xf32>, vector<32x32xf32>, vector<17x32xf32> -> vector<17x32xf32>
    %cst_11 = arith.constant dense<0.000000e+00> : vector<16x17xf32>
    %8 = tpu.matmul %5, %7, %cst_11 {dimension_numbers = #tpu.dot_dimension_numbers<[1], [1], [0], [0], [0, 0, 1, 0], [], []>} : vector<16x32xf32>, vector<17x32xf32>, vector<16x17xf32> -> vector<16x17xf32>
    %cst_12 = arith.constant dense<0xFF800000> : vector<16xf32>
    %9 = vector.multi_reduction <maximumf>, %8, %cst_12 [1] : vector<16x17xf32> to vector<16xf32>
    %10 = vector.shape_cast %9 : vector<16xf32> to vector<16x1xf32>
    %11 = vector.broadcast %10 : vector<16x1xf32> to vector<16x17xf32>
    %12 = arith.subf %8, %11 : vector<16x17xf32>
    %13 = math.exp %12 : vector<16x17xf32>
    %cst_13 = arith.constant dense<0.000000e+00> : vector<16xf32>
    %14 = vector.multi_reduction <add>, %13, %cst_13 [1] : vector<16x17xf32> to vector<16xf32>
    %15 = vector.shape_cast %14 : vector<16xf32> to vector<16x1xf32>
    %16 = vector.broadcast %15 : vector<16x1xf32> to vector<16x17xf32>
    %17 = arith.divf %13, %16 : vector<16x17xf32>
    %cst_14 = arith.constant dense<0.000000e+00> : vector<16x32xf32>
    %18 = tpu.matmul %17, %3, %cst_14 {dimension_numbers = #tpu.dot_dimension_numbers<[1], [0], [0], [1], [0, 0, 1, 1], [], []>} : vector<16x17xf32>, vector<17x32xf32>, vector<16x32xf32> -> vector<16x32xf32>
    %19 = arith.addf %1, %18 : vector<16x32xf32>
    %c0_15 = arith.constant 0 : index
    %c0_16 = arith.constant 0 : index
    %20 = vector.load %arg5[%c0_15, %c0_16] : memref<32x512xf32, #tpu.memory_space<vmem>>, vector<32x512xf32>
    %cst_17 = arith.constant dense<0.000000e+00> : vector<16x512xf32>
    %21 = tpu.matmul %19, %20, %cst_17 {dimension_numbers = #tpu.dot_dimension_numbers<[1], [0], [0], [1], [0, 0, 1, 1], [], []>} : vector<16x32xf32>, vector<32x512xf32>, vector<16x512xf32> -> vector<16x512xf32>
    %c0_18 = arith.constant 0 : index
    %c0_19 = arith.constant 0 : index
    %22 = vector.load %arg6[%c0_18, %c0_19] : memref<1x512xf32, #tpu.memory_space<vmem>>, vector<1x512xf32>
    %23 = vector.broadcast %22 : vector<1x512xf32> to vector<16x512xf32>
    %24 = arith.addf %21, %23 : vector<16x512xf32>
    %c0_20 = arith.constant 0 : index
    %c0_21 = arith.constant 0 : index
    %c0_22 = arith.constant 0 : index
    %25 = vector.load %arg7[%c0_20, %c0_21, %c0_22] : memref<1x16x512xf32, #tpu.memory_space<vmem>>, vector<1x16x512xf32>
    %26 = vector.shape_cast %25 : vector<1x16x512xf32> to vector<16x512xf32>
    %27 = vector.shape_cast %24 : vector<16x512xf32> to vector<1x16x512xf32>
    tpu.vector_store %arg7[%c0_20, %c0_21, %c0_22], %27 {strides = array<i32>} : memref<1x16x512xf32, #tpu.memory_space<vmem>>, vector<1x16x512xf32>,
    return
  }
  func.func @transform_0(%arg0: i32) -> (i32, i32, i32) {
    %c0_i32 = arith.constant 0 : i32
    %c0_i32_0 = arith.constant 0 : i32
    %c0_i32_1 = arith.constant 0 : i32
    return %arg0, %c0_i32, %c0_i32_0 : i32, i32, i32
  }
  func.func @transform_1(%arg0: i32) -> (i32, i32, i32, i32) {
    %c1_i32 = arith.constant 1 : i32
    %c0_i32 = arith.constant 0 : i32
    %c0_i32_0 = arith.constant 0 : i32
    %c0_i32_1 = arith.constant 0 : i32
    return %c1_i32, %arg0, %c0_i32, %c0_i32_0 : i32, i32, i32, i32
  }
  func.func @transform_2(%arg0: i32) -> (i32, i32) {
    %c0_i32 = arith.constant 0 : i32
    %c0_i32_0 = arith.constant 0 : i32
    %c0_i32_1 = arith.constant 0 : i32
    return %c0_i32, %c0_i32_0 : i32, i32
  }
  func.func @transform_3(%arg0: i32) -> (i32, i32) {
    %c0_i32 = arith.constant 0 : i32
    %c0_i32_0 = arith.constant 0 : i32
    %c0_i32_1 = arith.constant 0 : i32
    return %c0_i32, %c0_i32_0 : i32, i32
  }
  func.func @transform_4(%arg0: i32) -> (i32, i32) {
    %c0_i32 = arith.constant 0 : i32
    %c0_i32_0 = arith.constant 0 : i32
    %c0_i32_1 = arith.constant 0 : i32
    return %c0_i32, %c0_i32_0 : i32, i32
  }
  func.func @transform_5(%arg0: i32) -> (i32, i32) {
    %c0_i32 = arith.constant 0 : i32
    %c0_i32_0 = arith.constant 0 : i32
    %c0_i32_1 = arith.constant 0 : i32
    return %c0_i32, %c0_i32_0 : i32, i32
  }
  func.func @transform_6(%arg0: i32) -> (i32, i32, i32) {
    %c0_i32 = arith.constant 0 : i32
    %c0_i32_0 = arith.constant 0 : i32
    %c0_i32_1 = arith.constant 0 : i32
    return %arg0, %c0_i32, %c0_i32_0 : i32, i32, i32
  }
}

</mosaic_0001>

<bundles_post_ra>
// kernel: viteff_forward.22
= control target key start
LH: loop header
LB: loop body
LE: loop exit
PB: predicated region body
PF: predicated region fallthrough
CT: control target
= control target key end

     0   :  { %vm18_vm0 = vcmask 261120   ;;  %v216_v2 = vmov 0.0   ;;  %vm37_vm1 = vcmask 392192   ;;  %s294_s1 = inlined_call_operand.vmem [shape: f32[48,32], index: 1, kind: input, shape index: {}]   ;;  %s295_s0 = inlined_call_operand.vmem [shape: f32[32,48], index: 0, kind: input, shape index: {}]   ;;  %s296_s2 = inlined_call_operand.vmem [shape: f32[1,32], index: 2, kind: input, shape index: {}]   ;;  %s297_s3 = inlined_call_operand.vmem [shape: f32[32,32], index: 3, kind: output, shape index: {}]  }
   0x1   :  { %v36_v0 = vld [vmem:[%s294_s1 + $0x28] sm:$0xff]  ;;  %v35_v1 = vld [vmem:[%s294_s1 + $0x20] sm:$0xff]  ;;  %20 = vst.msk [vmem:[#allocation2 + $0x8] sm:$0xff] %vm18_vm0, %v216_v2  ;;  %19 = vst.msk [vmem:[#allocation2] sm:$0xff] %vm18_vm0, %v216_v2 }
   0x2   :  { %21 = vst.msk [vmem:[#allocation2 + $0x10] sm:$0xff] %vm18_vm0, %v216_v2  ;;  %22 = vst.msk [vmem:[#allocation2 + $0x18] sm:$0xff] %vm18_vm0, %v216_v2  ;;  %185 = vmatprep.subr.mxu0 %v36_v0  ;;  %203 = vmatprep.subr.mxu1 %v36_v0  ;;  %v34_v3 = vld [vmem:[%s294_s1 + $0x18] sm:$0xff]  ;;  %v33_v4 = vld [vmem:[%s294_s1 + $0x10] sm:$0xff] }
   0x3   :  { %186 = vmatpush3.msra.mxu0 %v36_v0  ;;  %209 = vmatpush3.msra.mxu1 %v36_v0  ;;  %v32_v5 = vld [vmem:[%s294_s1 + $0x8] sm:$0xff]  ;;  %v31_v6 = vld [vmem:[%s294_s1] sm:$0xff]  ;;  %v29_v8 = vld [vmem:[%s295_s0 + $0x10] sm:$0xff] }
   0x4   :  { %187 = vmatprep.subr.mxu0 %v35_v1  ;;  %204 = vmatprep.subr.mxu1 %v35_v1  ;;  %v27_v7 = vld [vmem:[%s295_s0] sm:$0xff]  ;;  %v28_v9 = vld [vmem:[%s295_s0 + $0x8] sm:$0xff]  ;;  %v30_v10 = vld [vmem:[%s295_s0 + $0x18] sm:$0xff] }
   0x5   :  { %188 = vmatpush3.msra.mxu0 %v35_v1  ;;  %210 = vmatpush3.msra.mxu1 %v35_v1  ;;  %v174_v23 = vld [vmem:[%s296_s2] ss:$0 sm:$0xff] }
   0x6   :  { %189 = vmatprep.subr.mxu0 %v34_v3  ;;  %205 = vmatprep.subr.mxu1 %v34_v3 }
   0x7   :  { %190 = vmatpush3.msra.mxu0 %v34_v3  ;;  %211 = vmatpush3.msra.mxu1 %v34_v3 }
   0x8   :  { %191 = vmatprep.subr.mxu0 %v33_v4  ;;  %206 = vmatprep.subr.mxu1 %v33_v4  ;;  %v24_v11 = vld [vmem:[#allocation2 + $0x8] sm:$0xff]  ;;  %v23_v15 = vld [vmem:[#allocation2] sm:$0xff] }
   0x9   :  { %192 = vmatpush3.msra.mxu0 %v33_v4  ;;  %212 = vmatpush3.msra.mxu1 %v33_v4  ;;  %v26_v12 = vld [vmem:[#allocation2 + $0x18] sm:$0xff]  ;;  %v25_v16 = vld [vmem:[#allocation2 + $0x10] sm:$0xff] }
   0xa   :  { %193 = vmatprep.subr.mxu0 %v32_v5  ;;  %207 = vmatprep.subr.mxu1 %v32_v5 }
   0xb   :  { %194 = vmatpush3.msra.mxu0 %v32_v5  ;;  %213 = vmatpush3.msra.mxu1 %v32_v5 }
   0xc   :  { %195 = vmatprep.subr.mxu0 %v31_v6  ;;  %208 = vmatprep.subr.mxu1 %v31_v6 }
   0xd   :  { %196 = vmatpush3.msra.mxu0 %v31_v6  ;;  %214 = vmatpush3.msra.mxu1 %v31_v6 }
   0xe   :  { %197 = vmatprep.mubr.msk.f32.mxu0 %vm37_vm1, %v27_v7  ;;  %200 = vmatprep.mubr.msk.f32.mxu1 %vm37_vm1, %v29_v8 }
   0xf   :  { %198 = vmatmul.mubr.msk.f32.vlgmr.msra.gmra.mxu0 %vm37_vm1, %v28_v9  ;;  %201 = vmatmul.mubr.msk.f32.vlgmr.msra.gmra.mxu1 %vm37_vm1, %v30_v10 }
  0xcf   :  { %v199_v13 = vpop.f32.mrf.mxu0  ;;  %v202_v14 = vpop.f32.mrf.mxu1 }
  0xd0   :  { %v136_v17 = vadd.f32 %v199_v13, %v24_v11  ;;  %v138_v18 = vadd.f32 %v202_v14, %v26_v12 }
  0xd1   :  { %v116_v19 = vpop.f32.mrf.mxu0  ;;  %v126_v20 = vpop.f32.mrf.mxu1 }
  0xd2   :  { %141 = vst.msk [vmem:[#allocation2 + $0x8] sm:$0xff] %vm18_vm0, %v136_v17  ;;  %143 = vst.msk [vmem:[#allocation2 + $0x18] sm:$0xff] %vm18_vm0, %v138_v18  ;;  %v135_v21 = vadd.f32 %v116_v19, %v23_v15  ;;  %v137_v22 = vadd.f32 %v126_v20, %v25_v16 }
  0xd4   :  { %140 = vst.msk [vmem:[#allocation2] sm:$0xff] %vm18_vm0, %v135_v21  ;;  %142 = vst.msk [vmem:[#allocation2 + $0x10] sm:$0xff] %vm18_vm0, %v137_v22 }
  0xd9   :  { %v148_v24 = vld [vmem:[#allocation2 + $0x8] sm:$0xff]  ;;  %v150_v25 = vld [vmem:[#allocation2 + $0x18] sm:$0xff] }
  0xda   :  { %v159_v26 = vadd.f32 %v174_v23, %v148_v24  ;;  %v161_v27 = vadd.f32 %v174_v23, %v150_v25 }
  0xdb   :  { %v147_v28 = vld [vmem:[#allocation2] sm:$0xff]  ;;  %v149_v29 = vld [vmem:[#allocation2 + $0x10] sm:$0xff] }
  0xdc   :  { %163 = vst.msk [vmem:[%s297_s3 + $0x8] sm:$0xff] %vm18_vm0, %v159_v26  ;;  %165 = vst.msk [vmem:[%s297_s3 + $0x18] sm:$0xff] %vm18_vm0, %v161_v27  ;;  %v158_v30 = vadd.f32 %v174_v23, %v147_v28  ;;  %v160_v31 = vadd.f32 %v174_v23, %v149_v29 }
  0xde   :  { %162 = vst.msk [vmem:[%s297_s3] sm:$0xff] %vm18_vm0, %v158_v30  ;;  %164 = vst.msk [vmem:[%s297_s3 + $0x10] sm:$0xff] %vm18_vm0, %v160_v31 }

// kernel: viteff_forward.23
= control target key start
LH: loop header
LB: loop body
LE: loop exit
PB: predicated region body
PF: predicated region fallthrough
CT: control target
= control target key end

     0   :  { %s3270_s18 = smov 0   ;;  %s3272_s19 = smov 0   ;;  %s3890_s0 = inlined_call_operand.vmem [shape: f32[2,17,32], index: 0, kind: input, shape index: {}]   ;;  %s3891_s1 = inlined_call_operand.vmem [shape: f32[5,1,32], index: 1, kind: input, shape index: {}]   ;;  %s3892_s2 = inlined_call_operand.vmem [shape: f32[5,1,32], index: 2, kind: input, shape index: {}]   ;;  %s3893_s3 = inlined_call_operand.vmem [shape: f32[5,32,96], index: 3, kind: input, shape index: {}]   ;;  %s3894_s4 = inlined_call_operand.vmem [shape: f32[5,1,96], index: 4, kind: input, shape index: {}]   ;;  %s3895_s5 = inlined_call_operand.vmem [shape: f32[5,32,32], index: 5, kind: input, shape index: {}]   ;;  %s3896_s6 = inlined_call_operand.vmem [shape: f32[5,1,32], index: 6, kind: input, shape index: {}]   ;;  %s3897_s7 = inlined_call_operand.vmem [shape: f32[5,1,32], index: 7, kind: input, shape index: {}]   ;;  %s3898_s8 = inlined_call_operand.vmem [shape: f32[5,1,32], index: 8, kind: input, shape index: {}]   ;;  %s3899_s9 = inlined_call_operand.vmem [shape: f32[5,32,128], index: 9, kind: input, shape index: {}]   ;;  %s3900_s10 = inlined_call_operand.vmem [shape: f32[5,1,128], index: 10, kind: input, shape index: {}]   ;;  %s3901_s11 = inlined_call_operand.vmem [shape: f32[5,128,32], index: 11, kind: input, shape index: {}]   ;;  %s3902_s12 = inlined_call_operand.vmem [shape: f32[5,1,32], index: 12, kind: input, shape index: {}]   ;;  %s3903_s13 = inlined_call_operand.vmem [shape: f32[1,32], index: 13, kind: input, shape index: {}]   ;;  %s3904_s14 = inlined_call_operand.vmem [shape: f32[1,32], index: 14, kind: input, shape index: {}]   ;;  %s3905_s15 = inlined_call_operand.vmem [shape: f32[5,2,17,32], index: 15, kind: output, shape index: {}]  }
   0x1   :  { %3910 = sst [smem:[#allocation9_spill]] %s3890_s0  ;;  %s3274_s20 = smov 0  }
   0x2   :  { %3911 = sst [smem:[#allocation10_spill]] %s3892_s2  ;;  %s3276_s21 = smov 0  }
   0x3   :  { %3912 = sst [smem:[#allocation11_spill]] %s3893_s3  ;;  %s3278_s22 = smov 0  }
   0x4   :  { %3913 = sst [smem:[#allocation12_spill]] %s3895_s5 }
   0x5   :  { %3914 = sst [smem:[#allocation13_spill]] %s3898_s8 }
   0x6   :  { %3915 = sst [smem:[#allocation14_spill]] %s3899_s9 }
   0x7   :  { %3916 = sst [smem:[#allocation15_spill]] %s3903_s13 }
   0x8   :  { %3917 = sst [smem:[#allocation16_spill]] %s3904_s14 }
   0x9   :  { %3918 = sst [smem:[#allocation17_spill]] %s3905_s15 }
   0xa LB: > { %3919 = sst [smem:[#allocation3_spill]] %s3156_s18  ;;  %s34_s23 = sadd.s32 1, %s3164_s20  ;;  %s3172_s22 = sphi %s3278_s22, %s25_s22   ;;  %s3168_s21 = sphi %s3276_s21, %s3947_s21   ;;  %s3164_s20 = sphi %s3274_s20, %s3946_s20   ;;  %s3160_s19 = sphi %s3272_s19, %s3945_s19   ;;  %s3156_s18 = sphi %s3270_s18, %s3944_s18  }
   0xb   : > { %3920 = sst [smem:[#allocation4_spill]] %s3164_s20  ;;  %s37_s24 = sadd.s32 1, %s3168_s21 }
   0xc   : > { %3921 = sst [smem:[#allocation5_spill]] %s3168_s21  ;;  %p35_p0 = scmp.ge.s32.totalorder %s34_s23, 5 }
   0xd   : > { %3922 = sst [smem:[#allocation6_spill]] %s3172_s22  ;;  %p2617_p1 = scmp.ge.s32.totalorder %s3172_s22, 1 }
   0xe   : > { %p555_p2 = scmp.lt.s32.totalorder %s3172_s22, 11  ;;  %s3949_s23 = smov (%p35_p0, %s34_s23), 0 }
   0xf   : > { %3923 = sst [smem:[#allocation7_spill]] %s3949_s23  ;;  %s3951_s24 = smov (!%p35_p0, %s37_s24), %s3168_s21 }
  0x10   : > { %p556_p3 = pnand %p2617_p1, %p555_p2  ;;  %p39_p4 = scmp.ge.s32.totalorder %s3951_s24, 2 }
  0x11   : > { %p651_p5 = scmp.lt.s32.totalorder (!%p556_p3), %s3160_s19, 1  ;;  %p656_p6 = scmp.lt.s32.totalorder (!%p556_p3), %s3156_s18, 4 }
  0x12   : > { %s3953_s24 = smov (%p39_p4, %s3951_s24), 0  ;;  %559 = sbr.rel (%p556_p3) target bundleno = 2886 (0xb46), region = 80 }
  0x13   : > { %3924 = sst [smem:[#allocation8_spill]] %s3953_s24 }
  0x14   : > { %s3926_s0 = sld [smem:[#allocation9_spill]] (!%p556_p3) }
  0x15   : > { %s3927_s3 = sld [smem:[#allocation11_spill]] (!%p556_p3) }
  0x16   : > { %s3928_s5 = sld [smem:[#allocation12_spill]] (!%p556_p3) }
  0x17   : > { %s3955_s19 = smov (!%p651_p5, %s3160_s19), 1  ;;  %s3930_s9 = sld [smem:[#allocation14_spill]] }
  0x18   : > { %s3304_s25 = scalar_select %p656_p6, %s3156_s18, 4 }
  0x19   : > { %s2994_s26 = smul.u32 24, %s3955_s19  ;;  %s3932_s29 = sld [smem:[#allocation3_spill]] }
  0x1a   : > { %s2690_s20 = sshll.u32 %s3304_s25, 5  ;;  %s691_s27 = scalar_lea.vmem %s3900_s10, %s3304_s25 }
  0x1b   : > { %s655_s21 = scalar_lea.vmem %s3926_s0, %s2994_s26  ;;  %s3321_s13 = scalar_lea.vmem %s3927_s3, %s2690_s20 }
  0x1c   : > { %s3330_s30 = scalar_lea.vmem %s3928_s5, %s2690_s20  ;;  %s2693_s5 = sshll.u32 %s3304_s25, 7 }
  0x1d   : > { %s3347_s18 = scalar_lea.vmem %s3930_s9, %s2690_s20  ;;  %s699_s23 = scalar_lea.vmem %s3902_s12, %s3304_s25 }
  0x1e   : > { %s3361_s0 = scalar_lea.vmem %s3901_s11, %s2693_s5  ;;  %s2995_s14 = smul.u32 3, %s3955_s19 }
  0x1f   : > { %s2996_s22 = smul.u32 6, %s3304_s25  ;;  %s3931_s9 = sld [smem:[#allocation17_spill]] }
  0x20   : > { %p2628_p7 = scmp.ne.s32.totalorder %s3932_s29, 0 }
  0x21   : > { %s706_s3 = sadd.s32 %s2996_s22, %s2995_s14 }
  0x22   : > { %s2627_s2 = sshll.u32 %s706_s3, 3  ;;  %712 = sbr.rel (%p2628_p7) target bundleno = 42 (0x2a), region = 84 }
  0x25   : > { %s3367_s8 = scalar_lea.vmem %s3931_s9, %s2627_s2 }
  0x27   : > { %v713_v0 = vld [vmem:[%s655_s21] sm:$0xff]  ;;  %vm716_vm0 = vcmask 261120   ;;  %v714_v1 = vld [vmem:[%s655_s21 + $0x8] sm:$0xff]  ;;  %v715_v2 = vld [vmem:[%s655_s21 + $0x10] sm:$0x1]  ;;  %vm719_vm1 = vcmask 253952  }
  0x28   : > { %717 = vst.msk [vmem:[#allocation2] sm:$0xff] %vm716_vm0, %v713_v0  ;;  %718 = vst.msk [vmem:[#allocation2 + $0x8] sm:$0xff] %vm716_vm0, %v714_v1 }
  0x29   : > { %720 = vst.msk [vmem:[#allocation2 + $0x10] sm:$0x1] %vm719_vm1, %v715_v2 }
  0x2a PF: > { %vm726_vm2 = vcmask 261120   ;;  %vm733_vm3 = vcmask 253952   ;;  %v789_v24 = vld [vmem:[%s3321_s13 + $0x18] sm:$0xff]  ;;  %v3174_v25 = vmov 0.0   ;;  %v788_v26 = vld [vmem:[%s3321_s13 + $0x10] sm:$0xff]  ;;  %vm3175_vm4 = vmmov 0   ;;  %s3933_s9 = scalar_lea.vmem %s3891_s1, %s3304_s25  ;;  %s3936_s24 = scalar_lea.vmem %s3894_s4, %s3304_s25 }
  0x2b   : > { %2782 = vmatprep.subr.mxu0 %v3174_v25  ;;  %2790 = vmatprep.mubr.msk.f32.mxu0 %vm3175_vm4, %v3174_v25  ;;  %v787_v27 = vld [vmem:[%s3321_s13 + $0x8] sm:$0xff]  ;;  %v786_v28 = vld [vmem:[%s3321_s13] sm:$0xff]  ;;  %s3934_s21 = sld [smem:[#allocation10_spill]]  ;;  %s3176_s26 = smov 96   ;;  %vm895_vm5 = vcmask 64512   ;;  %vm1043_vm6 = vcmask 1040384  }
  0x2c   : > { %2783 = vmatpush3.msra.mxu0 %v789_v24  ;;  %2829 = vmatprep.subr.mxu1 %v3174_v25  ;;  %v2629_v39 = vld [vmem:[%s3933_s9] ss:$0 sm:$0xff]  ;;  %s3177_s14 = smov 88   ;;  %s3178_s22 = smov 120   ;;  %vm991_vm7 = vcmask 138240   ;;  %vm998_vm8 = vcmask 131072  }
  0x2d   : > { %2784 = vmatprep.subr.mxu0 %v3174_v25  ;;  %2835 = vmatprep.mubr.msk.f32.mxu1 %vm3175_vm4, %v3174_v25  ;;  %v2631_v54 = vld [vmem:[%s3936_s24] ss:$0 sm:$0xff]  ;;  %s3179_s2 = smov 80   ;;  %s3180_s20 = smov 112   ;;  %vm1882_vm9 = vcmask 130048   ;;  %vm1886_vm10 = vcmask 195584  }
  0x2e   : > { %2785 = vmatpush3.msra.mxu0 %v788_v26  ;;  %s3181_s15 = smov 72   ;;  %s3182_s29 = smov 104  }
  0x2f   : > { %v721_v3 = vld [vmem:[#allocation2] sm:$0xff]  ;;  %v722_v5 = vld [vmem:[#allocation2 + $0x8] sm:$0xff]  ;;  %2786 = vmatprep.subr.mxu0 %v3174_v25  ;;  %s3183_s3 = smov 64   ;;  %s3184_s5 = smov 56  }
  0x30   : > { %v723_v4 = vld [vmem:[#allocation2 + $0x10] sm:$0x1]  ;;  %v727_v6 = vsel %vm726_vm2, %v721_v3, 0.0  ;;  %v730_v8 = vsel %vm726_vm2, %v722_v5, 0.0  ;;  %2787 = vmatpush3.msra.mxu0 %v787_v27  ;;  %s3185_s9 = smov 48   ;;  %s3186_s13 = smov 40  }
  0x31   : > { %v734_v7 = vsel %vm733_vm3, %v723_v4, 0.0  ;;  %728 = vadd.xlane.f32.xlu0 %v727_v6  ;;  %2788 = vmatprep.subr.mxu0 %v3174_v25  ;;  %s3935_s28 = scalar_lea.vmem %s3934_s21, %s3304_s25  ;;  %s3187_s19 = smov 8  }
  0x32   : > { %735 = vadd.xlane.f32.xlu1 %v734_v7  ;;  %2789 = vmatpush3.msra.mxu0 %v786_v28  ;;  %v2630_v41 = vld [vmem:[%s3935_s28] ss:$0 sm:$0xff]  ;;  %s3188_s21 = smov 16   ;;  %s3189_s28 = smov 24  }
  0x33   : > { %2799 = vmatprep.subr.mxu0 %v3174_v25  ;;  %s3937_s16 = scalar_lea.vmem %s3896_s6, %s3304_s25 }
  0x35   : > { %731 = vadd.xlane.f32.xlu0 %v730_v8 }
  0xba   : > { %v729_v9 = vpop.xlane.xlu0 %728 }
  0xbb   : > { %v736_v10 = vpop.xlane.xlu1 %735  ;;  %v738_v11 = vmul.f32 0.03125, %v729_v9 }
  0xbc   : > { %v740_v12 = vmul.f32 0.03125, %v736_v10 }
  0xbd   : > { %v741_v13 = vsub.f32 %v721_v3, %v738_v11 }
  0xbe   : > { %v743_v14 = vsub.f32 %v723_v4, %v740_v12  ;;  %v732_v15 = vpop.xlane.xlu0 %731 }
  0xbf   : > { %v739_v16 = vmul.f32 0.03125, %v732_v15  ;;  %v744_v17 = vmul.f32 %v741_v13, %v741_v13 }
  0xc0   : > { %v746_v18 = vmul.f32 %v743_v14, %v743_v14 }
  0xc1   : > { %v742_v19 = vsub.f32 %v722_v5, %v739_v16  ;;  %v747_v20 = vsel %vm726_vm2, %v744_v17, 0.0 }
  0xc2   : > { %748 = vadd.xlane.f32.xlu1 %v747_v20  ;;  %v753_v21 = vsel %vm733_vm3, %v746_v18, 0.0 }
  0xc3   : > { %v745_v22 = vmul.f32 %v742_v19, %v742_v19 }
  0xc5   : > { %v750_v23 = vsel %vm726_vm2, %v745_v22, 0.0 }
  0xc6   : > { %754 = vadd.xlane.f32.xlu1 %v753_v21  ;;  %751 = vadd.xlane.f32.xlu0 %v750_v23 }
 0x14b   : > { %v749_v29 = vpop.xlane.xlu1 %748 }
 0x14c   : > { %v756_v30 = vmul.f32 0.03125, %v749_v29 }
 0x14e   : > { %v759_v31 = vadd.f32 1e-05, %v756_v30 }
 0x14f   : > { %v755_v32 = vpop.xlane.xlu1 %754  ;;  %v752_v33 = vpop.xlane.xlu0 %751 }
 0x150   : > { %3053 = vrsqrt.f32 %v759_v31  ;;  %v758_v34 = vmul.f32 0.03125, %v755_v32  ;;  %v757_v35 = vmul.f32 0.03125, %v752_v33 }
 0x152   : > { %v761_v36 = vadd.f32 1e-05, %v758_v34  ;;  %v760_v37 = vadd.f32 1e-05, %v757_v35 }
 0x154   : > { %3055 = vrsqrt.f32 %v761_v36 }
 0x155   : > { %3057 = vrsqrt.f32 %v760_v37 }
 0x15d   : > { %v3054_v38 = vpop.eup %3053 }
 0x15e   : > { %v765_v40 = vmul.f32 %v3054_v38, %v741_v13 }
 0x160   : > { %v774_v42 = vmul.f32 %v2629_v39, %v765_v40 }
 0x161   : > { %v3056_v43 = vpop.eup %3055 }
 0x162   : > { %v3058_v44 = vpop.eup %3057  ;;  %v783_v45 = vadd.f32 %v2630_v41, %v774_v42  ;;  %v767_v47 = vmul.f32 %v3056_v43, %v743_v14 }
 0x163   : > { %v766_v46 = vmul.f32 %v3058_v44, %v742_v19 }
 0x164   : > { %2791 = vmatmul.mubr.msk.f32.vlgmr.msra.gmra.mxu0 %vm726_vm2, %v783_v45  ;;  %v776_v50 = vmul.f32 %v2629_v39, %v767_v47 }
 0x165   : > { %2793 = vmatprep.mubr.msk.f32.mxu0 %vm3175_vm4, %v3174_v25  ;;  %v775_v48 = vmul.f32 %v2629_v39, %v766_v46 }
 0x166   : > { %v785_v51 = vadd.f32 %v2630_v41, %v776_v50 }
 0x167   : > { %v784_v49 = vadd.f32 %v2630_v41, %v775_v48 }
 0x169   : > { %2794 = vmatmul.mubr.msk.f32.gmra.mxu0 %vm726_vm2, %v784_v49 }
 0x16a   : > { %2796 = vmatprep.mubr.msk.f32.mxu0 %vm3175_vm4, %v3174_v25 }
 0x16d   : > { %2797 = vmatmul.mubr.msk.f32.gmra.mxu0 %vm726_vm2, %v785_v51 }
 0x16e   : > { %2805 = vmatprep.mubr.msk.f32.mxu0 %vm3175_vm4, %v3174_v25 }
 0x224   : > { %v872_v52 = vpop.f32.mrf.mxu0 }
 0x225   : > { %v3417_v59 = vadd.f32 %v2631_v54, %v872_v52 }
 0x226   : > { %v2792_v53 = vpop.f32.mrf.mxu0 }
 0x229   : > { %v877_v55 = vpop.f32.mrf.mxu0 }
 0x22a   : > { %v3414_v56 = vadd.f32 %v2631_v54, %v877_v55 }
 0x22b   : > { %v2795_v57 = vpop.f32.mrf.mxu0 }
 0x22c   : > { %891 = vrot.lane.b32.xlu1 %v3414_v56, %s3176_s26 }
 0x22d   : > { %v882_v58 = vpop.f32.mrf.mxu0 }
 0x22e   : > { %v3419_v60 = vadd.f32 %v2631_v54, %v882_v58 }
 0x22f   : > { %v2798_v61 = vpop.f32.mrf.mxu0 }
 0x230   : > { %889 = vrot.lane.b32.xlu1 %v3417_v59, %s3176_s26  ;;  %893 = vrot.lane.b32.xlu0 %v3419_v60, %s3176_s26  ;;  %s3938_s26 = scalar_lea.vmem %s3897_s7, %s3304_s25 }
 0x234   : > { %1136 = vrot.lane.b32.xlu1 %v3419_v60, %s3177_s14  ;;  %1134 = vrot.lane.b32.xlu0 %v3414_v56, %s3177_s14 }
 0x238   : > { %1132 = vrot.lane.b32.xlu1 %v3417_v59, %s3177_s14  ;;  %1126 = vrot.lane.b32.xlu0 %v3417_v59, %s3178_s22 }
 0x23c   : > { %1375 = vrot.lane.b32.xlu1 %v3419_v60, %s3179_s2  ;;  %1128 = vrot.lane.b32.xlu0 %v3414_v56, %s3178_s22 }
 0x240   : > { %1373 = vrot.lane.b32.xlu1 %v3414_v56, %s3179_s2  ;;  %1130 = vrot.lane.b32.xlu0 %v3419_v60, %s3178_s22 }
 0x244   : > { %1371 = vrot.lane.b32.xlu1 %v3417_v59, %s3179_s2  ;;  %1365 = vrot.lane.b32.xlu0 %v3417_v59, %s3180_s20  ;;  %s3939_s2 = sld [smem:[#allocation13_spill]] }
 0x248   : > { %1614 = vrot.lane.b32.xlu1 %v3419_v60, %s3181_s15  ;;  %1367 = vrot.lane.b32.xlu0 %v3414_v56, %s3180_s20 }
 0x24c   : > { %1612 = vrot.lane.b32.xlu1 %v3414_v56, %s3181_s15  ;;  %1369 = vrot.lane.b32.xlu0 %v3419_v60, %s3180_s20  ;;  %s3940_s20 = scalar_lea.vmem %s3939_s2, %s3304_s25 }
 0x250   : > { %1610 = vrot.lane.b32.xlu1 %v3417_v59, %s3181_s15  ;;  %1604 = vrot.lane.b32.xlu0 %v3417_v59, %s3182_s29 }
 0x254   : > { %1606 = vrot.lane.b32.xlu1 %v3414_v56, %s3182_s29  ;;  %1608 = vrot.lane.b32.xlu0 %v3419_v60, %s3182_s29 }
 0x258   : > { %1026 = vrot.lane.b32.xlu1 %v3417_v59, %s3183_s3  ;;  %1028 = vrot.lane.b32.xlu0 %v3414_v56, %s3183_s3 }
 0x25c   : > { %1030 = vrot.lane.b32.xlu1 %v3419_v60, %s3183_s3  ;;  %s3941_s3 = sld [smem:[#allocation15_spill]] }
 0x260   : > { %1270 = vrot.lane.b32.xlu1 %v3419_v60, %s3184_s5 }
 0x29e   : > { %v892_v62 = vpop.permute.xlu1 %891 }
 0x2a2   : > { %v890_v63 = vpop.permute.xlu1 %889  ;;  %v894_v0 = vpop.permute.xlu0 %893 }
 0x2a3   : > { %2800 = vmatpush3.xpose.msk.msra.mxu0 %vm895_vm5, %v894_v0 }
 0x2a4   : > { %2801 = vmatprep.subr.mxu0 %v3174_v25 }
 0x2a6   : > { %v1137_v1 = vpop.permute.xlu1 %1136  ;;  %v1135_v2 = vpop.permute.xlu0 %1134 }
 0x2a7   : > { %2802 = vmatpush3.xpose.msk.msra.mxu0 %vm895_vm5, %v892_v62  ;;  %2830 = vmatpush3.xpose.msk.msra.mxu1 %vm895_vm5, %v1137_v1 }
 0x2a8   : > { %2831 = vmatprep.subr.mxu1 %v3174_v25  ;;  %2803 = vmatprep.subr.mxu0 %v3174_v25 }
 0x2aa   : > { %v1133_v3 = vpop.permute.xlu1 %1132  ;;  %v1127_v4 = vpop.permute.xlu0 %1126 }
 0x2ab   : > { %2804 = vmatpush3.xpose.msk.msra.mxu0 %vm895_vm5, %v890_v63  ;;  %2832 = vmatpush3.xpose.msk.msra.mxu1 %vm895_vm5, %v1135_v2 }
 0x2ac   : > { %2833 = vmatprep.subr.mxu1 %v3174_v25  ;;  %2814 = vmatprep.subr.mxu0 %v3174_v25 }
 0x2ae   : > { %v1376_v5 = vpop.permute.xlu1 %1375  ;;  %2806 = vmatmul.mubr.msk.f32.vlgmr.msra.gmra.mxu0 %vm895_vm5, %v3417_v59  ;;  %v1129_v6 = vpop.permute.xlu0 %1128 }
 0x2af   : > { %2834 = vmatpush3.xpose.msk.msra.mxu1 %vm895_vm5, %v1133_v3  ;;  %2808 = vmatprep.mubr.msk.f32.mxu0 %vm3175_vm4, %v3174_v25 }
 0x2b0   : > { %2859 = vmatprep.subr.mxu1 %v3174_v25 }
 0x2b2   : > { %v1374_v7 = vpop.permute.xlu1 %1373  ;;  %2809 = vmatmul.mubr.msk.f32.gmra.mxu0 %vm895_vm5, %v3414_v56  ;;  %2836 = vmatmul.mubr.msk.f32.vlgmr.msra.gmra.mxu1 %vm895_vm5, %v1127_v4  ;;  %v1131_v8 = vpop.permute.xlu0 %1130 }
 0x2b3   : > { %2860 = vmatpush3.xpose.msk.msra.mxu1 %vm895_vm5, %v1376_v5  ;;  %2811 = vmatprep.mubr.msk.f32.mxu0 %vm3175_vm4, %v3174_v25 }
 0x2b4   : > { %2838 = vmatprep.mubr.msk.f32.mxu1 %vm3175_vm4, %v3174_v25  ;;  %2861 = vmatprep.subr.mxu1 %v3174_v25 }
 0x2b6   : > { %v1372_v9 = vpop.permute.xlu1 %1371  ;;  %2812 = vmatmul.mubr.msk.f32.gmra.mxu0 %vm895_vm5, %v3419_v60  ;;  %2839 = vmatmul.mubr.msk.f32.gmra.mxu1 %vm895_vm5, %v1129_v6  ;;  %v1366_v10 = vpop.permute.xlu0 %1365 }
 0x2b7   : > { %2862 = vmatpush3.xpose.msk.msra.mxu1 %vm895_vm5, %v1374_v7  ;;  %2841 = vmatprep.mubr.msk.f32.mxu1 %vm3175_vm4, %v3174_v25 }
 0x2b8   : > { %2863 = vmatprep.subr.mxu1 %v3174_v25  ;;  %2820 = vmatprep.mubr.msk.f32.mxu0 %vm3175_vm4, %v3174_v25 }
 0x2ba   : > { %v1615_v11 = vpop.permute.xlu1 %1614  ;;  %2842 = vmatmul.mubr.msk.f32.gmra.mxu1 %vm895_vm5, %v1131_v8  ;;  %v1368_v12 = vpop.permute.xlu0 %1367 }
 0x2bb   : > { %2864 = vmatpush3.xpose.msk.msra.mxu1 %vm895_vm5, %v1372_v9  ;;  %2865 = vmatprep.mubr.msk.f32.mxu1 %vm3175_vm4, %v3174_v25 }
 0x2bc   : > { %2889 = vmatprep.subr.mxu1 %v3174_v25 }
 0x2be   : > { %v1613_v13 = vpop.permute.xlu1 %1612  ;;  %2866 = vmatmul.mubr.msk.f32.vlgmr.msra.gmra.mxu1 %vm895_vm5, %v1366_v10  ;;  %v1370_v14 = vpop.permute.xlu0 %1369 }
 0x2bf   : > { %2890 = vmatpush3.xpose.msk.msra.mxu1 %vm895_vm5, %v1615_v11  ;;  %2868 = vmatprep.mubr.msk.f32.mxu1 %vm3175_vm4, %v3174_v25 }
 0x2c0   : > { %2891 = vmatprep.subr.mxu1 %v3174_v25 }
 0x2c2   : > { %v1611_v15 = vpop.permute.xlu1 %1610  ;;  %2869 = vmatmul.mubr.msk.f32.gmra.mxu1 %vm895_vm5, %v1368_v12  ;;  %v1605_v16 = vpop.permute.xlu0 %1604 }
 0x2c3   : > { %2892 = vmatpush3.xpose.msk.msra.mxu1 %vm895_vm5, %v1613_v13  ;;  %2871 = vmatprep.mubr.msk.f32.mxu1 %vm3175_vm4, %v3174_v25 }
 0x2c4   : > { %2893 = vmatprep.subr.mxu1 %v3174_v25 }
 0x2c6   : > { %v1607_v17 = vpop.permute.xlu1 %1606  ;;  %2872 = vmatmul.mubr.msk.f32.gmra.mxu1 %vm895_vm5, %v1370_v14  ;;  %v1609_v18 = vpop.permute.xlu0 %1608 }
 0x2c7   : > { %2894 = vmatpush3.xpose.msk.msra.mxu1 %vm895_vm5, %v1611_v15  ;;  %2895 = vmatprep.mubr.msk.f32.mxu1 %vm3175_vm4, %v3174_v25 }
 0x2c8   : > { %2919 = vmatprep.subr.mxu1 %v3174_v25 }
 0x2ca   : > { %v1027_v19 = vpop.permute.xlu1 %1026  ;;  %2896 = vmatmul.mubr.msk.f32.vlgmr.msra.gmra.mxu1 %vm895_vm5, %v1605_v16  ;;  %v1029_v21 = vpop.permute.xlu0 %1028 }
 0x2cb   : > { %2898 = vmatprep.mubr.msk.f32.mxu1 %vm3175_vm4, %v3174_v25 }
 0x2ce   : > { %v1031_v20 = vpop.permute.xlu1 %1030  ;;  %2899 = vmatmul.mubr.msk.f32.gmra.mxu1 %vm895_vm5, %v1607_v17 }
 0x2cf   : > { %2815 = vmatpush3.msk.msra.mxu0 %vm1043_vm6, %v1031_v20  ;;  %2901 = vmatprep.mubr.msk.f32.mxu1 %vm3175_vm4, %v3174_v25 }
 0x2d0   : > { %2816 = vmatprep.subr.mxu0 %v3174_v25 }
 0x2d1   : > { %2817 = vmatpush3.msra.mxu0 %v1029_v21 }
 0x2d2   : > { %2818 = vmatprep.subr.mxu0 %v3174_v25  ;;  %2902 = vmatmul.mubr.msk.f32.gmra.mxu1 %vm895_vm5, %v1609_v18  ;;  %v3567_v10 = vpop.permute.xlu1 %1270 }
 0x2d3   : > { %2819 = vmatpush3.msra.mxu0 %v1027_v19  ;;  %2927 = vmatprep.mubr.msk.f32.mxu1 %vm3175_vm4, %v3174_v25 }
 0x2d4   : > { %2844 = vmatprep.subr.mxu0 %v3174_v25 }
 0x36e   : > { %v974_v22 = vpop.f32.mrf.mxu0 }
 0x36f   : > { %v3513_v23 = vmul.f32 0.35355338, %v974_v22 }
 0x370   : > { %v2807_v24 = vpop.f32.mrf.mxu0 }
 0x371   : > { %v992_v26 = vsel %vm991_vm7, %v3513_v23, -inf }
 0x372   : > { %v1216_v27 = vpop.f32.mrf.mxu1  ;;  %993 = vmax.xlane.f32.xlu1 %v992_v26  ;;  %v979_v28 = vpop.f32.mrf.mxu0 }
 0x373   : > { %v3517_v29 = vmul.f32 0.35355338, %v1216_v27  ;;  %v3519_v32 = vmul.f32 0.35355338, %v979_v28 }
 0x374   : > { %v2810_v30 = vpop.f32.mrf.mxu0  ;;  %v2837_v31 = vpop.f32.mrf.mxu1 }
 0x375   : > { %v1233_v33 = vsel %vm991_vm7, %v3517_v29, -inf  ;;  %v995_v41 = vsel %vm991_vm7, %v3519_v32, -inf }
 0x376   : > { %1234 = vmax.xlane.f32.xlu0 %v1233_v33  ;;  %v984_v34 = vpop.f32.mrf.mxu0  ;;  %v1221_v35 = vpop.f32.mrf.mxu1 }
 0x377   : > { %v3523_v36 = vmul.f32 0.35355338, %v1221_v35  ;;  %v3525_v39 = vmul.f32 0.35355338, %v984_v34 }
 0x378   : > { %v2813_v37 = vpop.f32.mrf.mxu0  ;;  %v2840_v38 = vpop.f32.mrf.mxu1 }
 0x379   : > { %v1236_v40 = vsel %vm991_vm7, %v3523_v36, -inf  ;;  %v999_v45 = vsel %vm998_vm8, %v3525_v39, -inf }
 0x37a   : > { %v1226_v42 = vpop.f32.mrf.mxu1  ;;  %1237 = vmax.xlane.f32.xlu1 %v1236_v40  ;;  %996 = vmax.xlane.f32.xlu0 %v995_v41 }
 0x37b   : > { %v3531_v44 = vmul.f32 0.35355338, %v1226_v42 }
 0x37c   : > { %v2843_v43 = vpop.f32.mrf.mxu1 }
 0x37d   : > { %v1239_v50 = vsel %vm998_vm8, %v3531_v44, -inf }
 0x37e   : > { %v1455_v46 = vpop.f32.mrf.mxu1  ;;  %1000 = vmax.xlane.f32.xlu0 %v999_v45 }
 0x37f   : > { %v3535_v47 = vmul.f32 0.35355338, %v1455_v46 }
 0x380   : > { %v2867_v48 = vpop.f32.mrf.mxu1 }
 0x381   : > { %v1472_v49 = vsel %vm991_vm7, %v3535_v47, -inf }
 0x382   : > { %v1460_v51 = vpop.f32.mrf.mxu1  ;;  %1473 = vmax.xlane.f32.xlu1 %v1472_v49  ;;  %1240 = vmax.xlane.f32.xlu0 %v1239_v50 }
 0x383   : > { %v3541_v52 = vmul.f32 0.35355338, %v1460_v51 }
 0x384   : > { %v2870_v53 = vpop.f32.mrf.mxu1 }
 0x385   : > { %v1475_v54 = vsel %vm991_vm7, %v3541_v52, -inf }
 0x386   : > { %v1465_v55 = vpop.f32.mrf.mxu1  ;;  %1476 = vmax.xlane.f32.xlu0 %v1475_v54 }
 0x387   : > { %v3545_v57 = vmul.f32 0.35355338, %v1465_v55 }
 0x388   : > { %v2873_v58 = vpop.f32.mrf.mxu1 }
 0x389   : > { %v1478_v61 = vsel %vm998_vm8, %v3545_v57, -inf }
 0x38a   : > { %v1694_v62 = vpop.f32.mrf.mxu1  ;;  %1479 = vmax.xlane.f32.xlu1 %v1478_v61 }
 0x38b   : > { %v3549_v63 = vmul.f32 0.35355338, %v1694_v62 }
 0x38c   : > { %v2897_v0 = vpop.f32.mrf.mxu1 }
 0x38d   : > { %v1711_v1 = vsel %vm991_vm7, %v3549_v63, -inf }
 0x38e   : > { %v1699_v2 = vpop.f32.mrf.mxu1  ;;  %1712 = vmax.xlane.f32.xlu0 %v1711_v1 }
 0x38f   : > { %v3559_v6 = vmul.f32 0.35355338, %v1699_v2 }
 0x390   : > { %v2900_v3 = vpop.f32.mrf.mxu1 }
 0x391   : > { %v1714_v8 = vsel %vm991_vm7, %v3559_v6, -inf }
 0x392   : > { %v1704_v4 = vpop.f32.mrf.mxu1 }
 0x393   : > { %v3561_v7 = vmul.f32 0.35355338, %v1704_v4 }
 0x394   : > { %v2903_v5 = vpop.f32.mrf.mxu1 }
 0x395   : > { %v1717_v9 = vsel %vm998_vm8, %v3561_v7, -inf }
 0x39b   : > { %1266 = vrot.lane.b32.xlu1 %v3417_v59, %s3184_s5 }
 0x39f   : > { %1509 = vrot.lane.b32.xlu1 %v3419_v60, %s3185_s9 }
 0x3a4   : > { %1268 = vrot.lane.b32.xlu0 %v3414_v56, %s3184_s5 }
 0x3c3   : > { %1715 = vmax.xlane.f32.xlu1 %v1714_v8  ;;  %1718 = vmax.xlane.f32.xlu0 %v1717_v9 }
 0x3fb   : > { %v994_v11 = vpop.xlane.xlu1 %993 }
 0x3fc   : > { %v1002_v12 = vsub.f32 %v3513_v23, %v994_v11 }
 0x3fe   : > { %v1005_v13 = vmul.f32 1.442695, %v1002_v12 }
 0x3ff   : > { %v1235_v14 = vpop.xlane.xlu0 %1234 }
 0x400   : > { %3059 = vpow2.f32 %v1005_v13  ;;  %v1242_v15 = vsub.f32 %v3517_v29, %v1235_v14 }
 0x402   : > { %v1245_v16 = vmul.f32 1.442695, %v1242_v15 }
 0x403   : > { %v997_v17 = vpop.xlane.xlu0 %996  ;;  %v1238_v27 = vpop.xlane.xlu1 %1237 }
 0x404   : > { %3061 = vpow2.f32 %v1245_v16  ;;  %v1003_v18 = vsub.f32 %v3519_v32, %v997_v17  ;;  %v1243_v28 = vsub.f32 %v3523_v36, %v1238_v27 }
 0x406   : > { %v1007_v19 = vmul.f32 1.442695, %v1003_v18  ;;  %v1247_v30 = vmul.f32 1.442695, %v1243_v28 }
 0x407   : > { %v1001_v29 = vpop.xlane.xlu0 %1000 }
 0x408   : > { %3063 = vpow2.f32 %v1007_v19  ;;  %v1004_v31 = vsub.f32 %v3525_v39, %v1001_v29 }
 0x409   : > { %3065 = vpow2.f32 %v1247_v30 }
 0x40a   : > { %v1009_v33 = vmul.f32 1.442695, %v1004_v31 }
 0x40b   : > { %v1241_v32 = vpop.xlane.xlu0 %1240  ;;  %v1474_v35 = vpop.xlane.xlu1 %1473 }
 0x40c   : > { %v1244_v34 = vsub.f32 %v3531_v44, %v1241_v32  ;;  %3067 = vpow2.f32 %v1009_v33  ;;  %v1481_v37 = vsub.f32 %v3535_v47, %v1474_v35 }
 0x40d   : > { %v3572_v20 = vpop.eup %3059 }
 0x40e   : > { %v1011_v21 = vsel %vm991_vm7, %v3572_v20, 0.0  ;;  %v1249_v38 = vmul.f32 1.442695, %v1244_v34  ;;  %v1484_v36 = vmul.f32 1.442695, %v1481_v37 }
 0x40f   : > { %1012 = vadd.xlane.f32.xlu1 %v1011_v21  ;;  %v1477_v40 = vpop.xlane.xlu0 %1476 }
 0x410   : > { %3069 = vpow2.f32 %v1249_v38 }
 0x411   : > { %v3576_v22 = vpop.eup %3061  ;;  %3071 = vpow2.f32 %v1484_v36 }
 0x412   : > { %v1251_v23 = vsel %vm991_vm7, %v3576_v22, 0.0 }
 0x413   : > { %1252 = vadd.xlane.f32.xlu0 %v1251_v23  ;;  %v1480_v41 = vpop.xlane.xlu1 %1479 }
 0x414   : > { %v1483_v42 = vsub.f32 %v3545_v57, %v1480_v41 }
 0x415   : > { %v3580_v24 = vpop.eup %3063 }
 0x416   : > { %v1014_v26 = vsel %vm991_vm7, %v3580_v24, 0.0  ;;  %v3593_v45 = vpop.eup %3065  ;;  %v1488_v39 = vmul.f32 1.442695, %v1483_v42 }
 0x417   : > { %1015 = vadd.xlane.f32.xlu0 %v1014_v26  ;;  %v1713_v43 = vpop.xlane.xlu0 %1712  ;;  %v1254_v44 = vsel %vm991_vm7, %v3593_v45, 0.0  ;;  %v1267_v2 = vpop.permute.xlu1 %1266 }
 0x418   : > { %v1720_v46 = vsub.f32 %v3549_v63, %v1713_v43  ;;  %3073 = vpow2.f32 %v1488_v39 }
 0x419   : > { %v3598_v48 = vpop.eup %3067 }
 0x41a   : > { %v1723_v47 = vmul.f32 1.442695, %v1720_v46  ;;  %v1017_v49 = vsel %vm998_vm8, %v3598_v48, 0.0 }
 0x41b   : > { %v1269_v50 = vpop.permute.xlu0 %1268  ;;  %v1510_v5 = vpop.permute.xlu1 %1509 }
 0x41c   : > { %3075 = vpow2.f32 %v1723_v47 }
 0x41d   : > { %v3602_v51 = vpop.eup %3069 }
 0x41e   : > { %v1257_v53 = vsel %vm998_vm8, %v3602_v51, 0.0  ;;  %v3606_v55 = vpop.eup %3071 }
 0x41f   : > { %v1490_v61 = vsel %vm991_vm7, %v3606_v55, 0.0 }
 0x420   : > { %1505 = vrot.lane.b32.xlu1 %v3417_v59, %s3185_s9 }
 0x425   : > { %v3611_v62 = vpop.eup %3073 }
 0x426   : > { %v1496_v63 = vsel %vm998_vm8, %v3611_v62, 0.0 }
 0x429   : > { %v3615_v0 = vpop.eup %3075 }
 0x42a   : > { %v1729_v1 = vsel %vm991_vm7, %v3615_v0, 0.0 }
 0x42d   : > { %1507 = vrot.lane.b32.xlu0 %v3414_v56, %s3185_s9 }
 0x444   : > { %1255 = vadd.xlane.f32.xlu1 %v1254_v44 }
 0x448   : > { %1018 = vadd.xlane.f32.xlu1 %v1017_v49 }
 0x44c   : > { %v1719_v54 = vpop.xlane.xlu0 %1718  ;;  %1258 = vadd.xlane.f32.xlu0 %v1257_v53  ;;  %v1716_v8 = vpop.xlane.xlu1 %1715 }
 0x44d   : > { %v1722_v57 = vsub.f32 %v3561_v7, %v1719_v54  ;;  %v1482_v7 = vsub.f32 %v3541_v52, %v1477_v40  ;;  %v1721_v11 = vsub.f32 %v3559_v6, %v1716_v8 }
 0x44f   : > { %v1727_v58 = vmul.f32 1.442695, %v1722_v57  ;;  %v1486_v9 = vmul.f32 1.442695, %v1482_v7  ;;  %v1725_v12 = vmul.f32 1.442695, %v1721_v11 }
 0x450   : > { %1491 = vadd.xlane.f32.xlu0 %v1490_v61  ;;  %v1891_v11 = vld [vmem:[%s3330_s30 + $0x8] sm:$0xff] }
 0x451   : > { %3077 = vpow2.f32 %v1727_v58 }
 0x452   : > { %3079 = vpow2.f32 %v1486_v9  ;;  %v1892_v9 = vld [vmem:[%s3330_s30 + $0x10] sm:$0xff] }
 0x453   : > { %3081 = vpow2.f32 %v1725_v12  ;;  %v1890_v12 = vld [vmem:[%s3330_s30] sm:$0xff] }
 0x454   : > { %1497 = vadd.xlane.f32.xlu0 %v1496_v63 }
 0x458   : > { %1730 = vadd.xlane.f32.xlu0 %v1729_v1 }
 0x459   : > { %1748 = vrot.lane.b32.xlu1 %v3419_v60, %s3186_s13 }
 0x45e   : > { %v3620_v3 = vpop.eup %3077 }
 0x45f   : > { %v1735_v4 = vsel %vm998_vm8, %v3620_v3, 0.0  ;;  %v3627_v60 = vpop.eup %3079 }
 0x460   : > { %1736 = vadd.xlane.f32.xlu0 %v1735_v4  ;;  %v1493_v13 = vsel %vm991_vm7, %v3627_v60, 0.0  ;;  %v3631_v14 = vpop.eup %3081 }
 0x461   : > { %v1732_v52 = vsel %vm991_vm7, %v3631_v14, 0.0 }
 0x476   : > { %1744 = vrot.lane.b32.xlu0 %v3417_v59, %s3186_s13 }
 0x47d   : > { %1494 = vadd.xlane.f32.xlu1 %v1493_v13 }
 0x481   : > { %1733 = vadd.xlane.f32.xlu1 %v1732_v52 }
 0x492   : > { %1746 = vrot.lane.b32.xlu1 %v3414_v56, %s3186_s13  ;;  %s3942_s13 = sld [smem:[#allocation16_spill]] }
 0x498   : > { %v1013_v6 = vpop.xlane.xlu1 %1012 }
 0x499   : > { %3083 = vrcp.f32 %v1013_v6 }
 0x49c   : > { %v1253_v15 = vpop.xlane.xlu0 %1252 }
 0x4a0   : > { %v1016_v16 = vpop.xlane.xlu0 %1015 }
 0x4a1   : > { %3085 = vrcp.f32 %v1016_v16 }
 0x4a4   : > { %v1508_v21 = vpop.permute.xlu0 %1507 }
 0x4a6   : > { %v3084_v59 = vpop.eup %3083 }
 0x4a7   : > { %v1021_v17 = vmul.f32 %v3084_v59, %v3572_v20 }
 0x4a9   : > { %2821 = vmatmul.mubr.msk.f32.vlgmr.msra.gmra.mxu0 %vm991_vm7, %v1021_v17 }
 0x4aa   : > { %2845 = vmatpush3.msk.msra.mxu0 %vm1043_vm6, %v3567_v10  ;;  %2823 = vmatprep.mubr.msk.f32.mxu0 %vm3175_vm4, %v3174_v25  ;;  %v1506_v10 = vpop.permute.xlu1 %1505 }
 0x4ab   : > { %2846 = vmatprep.subr.mxu0 %v3174_v25 }
 0x4ac   : > { %2847 = vmatpush3.msra.mxu0 %v1269_v50 }
 0x4ad   : > { %2848 = vmatprep.subr.mxu0 %v3174_v25 }
 0x4ae   : > { %2849 = vmatpush3.msra.mxu0 %v1267_v2  ;;  %v3086_v56 = vpop.eup %3085 }
 0x4af   : > { %2874 = vmatprep.subr.mxu0 %v3174_v25  ;;  %v1023_v18 = vmul.f32 %v3086_v56, %v3580_v24 }
 0x4b1   : > { %2824 = vmatmul.mubr.msk.f32.gmra.mxu0 %vm991_vm7, %v1023_v18 }
 0x4b2   : > { %2826 = vmatprep.mubr.msk.f32.mxu0 %vm3175_vm4, %v3174_v25 }
 0x4cd   : > { %v1256_v19 = vpop.xlane.xlu1 %1255 }
 0x4d1   : > { %v1019_v20 = vpop.xlane.xlu1 %1018 }
 0x4d2   : > { %3087 = vrcp.f32 %v1019_v20 }
 0x4d3   : > { %3089 = vrcp.f32 %v1253_v15 }
 0x4d4   : > { %3091 = vrcp.f32 %v1256_v19 }
 0x4d5   : > { %v1259_v23 = vpop.xlane.xlu0 %1258  ;;  %v1749_v35 = vpop.permute.xlu1 %1748 }
 0x4d6   : > { %3093 = vrcp.f32 %v1259_v23 }
 0x4d9   : > { %v1492_v26 = vpop.xlane.xlu0 %1491 }
 0x4da   : > { %3095 = vrcp.f32 %v1492_v26 }
 0x4dd   : > { %v1498_v37 = vpop.xlane.xlu0 %1497 }
 0x4df   : > { %v3088_v27 = vpop.eup %3087 }
 0x4e0   : > { %v1025_v28 = vmul.f32 %v3088_v27, %v3598_v48  ;;  %v3090_v24 = vpop.eup %3089 }
 0x4e1   : > { %v1261_v29 = vmul.f32 %v3090_v24, %v3576_v22  ;;  %v3092_v30 = vpop.eup %3091  ;;  %v1731_v38 = vpop.xlane.xlu0 %1730 }
 0x4e2   : > { %2827 = vmatmul.mubr.msk.f32.gmra.mxu0 %vm991_vm7, %v1025_v28  ;;  %v1263_v31 = vmul.f32 %v3092_v30, %v3593_v45 }
 0x4e3   : > { %2850 = vmatprep.mubr.msk.f32.mxu0 %vm3175_vm4, %v3174_v25  ;;  %v3094_v32 = vpop.eup %3093 }
 0x4e4   : > { %v1265_v22 = vmul.f32 %v3094_v32, %v3602_v51 }
 0x4e6   : > { %2851 = vmatmul.mubr.msk.f32.vlgmr.msra.gmra.mxu0 %vm991_vm7, %v1261_v29 }
 0x4e7   : > { %2875 = vmatpush3.msk.msra.mxu0 %vm1043_vm6, %v1510_v5  ;;  %2853 = vmatprep.mubr.msk.f32.mxu0 %vm3175_vm4, %v3174_v25  ;;  %v3096_v33 = vpop.eup %3095 }
 0x4e8   : > { %2876 = vmatprep.subr.mxu0 %v3174_v25  ;;  %v1500_v34 = vmul.f32 %v3096_v33, %v3606_v55 }
 0x4e9   : > { %2877 = vmatpush3.msra.mxu0 %v1508_v21  ;;  %v1737_v41 = vpop.xlane.xlu0 %1736 }
 0x4ea   : > { %2878 = vmatprep.subr.mxu0 %v3174_v25  ;;  %2854 = vmatmul.mubr.msk.f32.gmra.mxu0 %vm991_vm7, %v1263_v31 }
 0x4eb   : > { %2879 = vmatpush3.msra.mxu0 %v1506_v10  ;;  %2856 = vmatprep.mubr.msk.f32.mxu0 %vm3175_vm4, %v3174_v25 }
 0x4ec   : > { %2904 = vmatprep.subr.mxu0 %v3174_v25 }
 0x4ed   : > { %v1745_v43 = vpop.permute.xlu0 %1744 }
 0x4ee   : > { %2857 = vmatmul.mubr.msk.f32.gmra.mxu0 %vm991_vm7, %v1265_v22 }
 0x4ef   : > { %2880 = vmatprep.mubr.msk.f32.mxu0 %vm3175_vm4, %v3174_v25 }
 0x4f2   : > { %2881 = vmatmul.mubr.msk.f32.vlgmr.msra.gmra.mxu0 %vm991_vm7, %v1500_v34 }
 0x4f3   : > { %2905 = vmatpush3.msk.msra.mxu0 %vm1043_vm6, %v1749_v35  ;;  %2883 = vmatprep.mubr.msk.f32.mxu0 %vm3175_vm4, %v3174_v25 }
 0x4f4   : > { %2906 = vmatprep.subr.mxu0 %v3174_v25 }
 0x506   : > { %v1495_v40 = vpop.xlane.xlu1 %1494 }
 0x507   : > { %3097 = vrcp.f32 %v1495_v40  ;;  %v3131_v40 = vld [vmem:[#allocation2] sm:$0xff] }
 0x508   : > { %3099 = vrcp.f32 %v1498_v37 }
 0x509   : > { %3101 = vrcp.f32 %v1731_v38  ;;  %v2678_v38 = vld [vmem:[%s3937_s16] ss:$0 sm:$0xff] }
 0x50a   : > { %v1734_v36 = vpop.xlane.xlu1 %1733 }
 0x50b   : > { %3103 = vrcp.f32 %v1734_v36 }
 0x50c   : > { %3105 = vrcp.f32 %v1737_v41 }
 0x50e   : > { %v1747_v42 = vpop.permute.xlu1 %1746 }
 0x50f   : > { %2907 = vmatpush3.msra.mxu0 %v1747_v42 }
 0x510   : > { %2908 = vmatprep.subr.mxu0 %v3174_v25 }
 0x511   : > { %2909 = vmatpush3.msra.mxu0 %v1745_v43 }
 0x512   : > { %2936 = vmatprep.subr.mxu0 %v3174_v25 }
 0x514   : > { %v3098_v45 = vpop.eup %3097 }
 0x515   : > { %v1502_v39 = vmul.f32 %v3098_v45, %v3627_v60  ;;  %v3100_v46 = vpop.eup %3099  ;;  %v3132_v45 = vld [vmem:[#allocation2 + $0x8] sm:$0xff] }
 0x516   : > { %v1504_v44 = vmul.f32 %v3100_v46, %v3611_v62  ;;  %v3102_v48 = vpop.eup %3101 }
 0x517   : > { %2884 = vmatmul.mubr.msk.f32.gmra.mxu0 %vm991_vm7, %v1502_v39  ;;  %v1739_v47 = vmul.f32 %v3102_v48, %v3615_v0  ;;  %v1893_v0 = vld [vmem:[%s3330_s30 + $0x18] sm:$0xff] }
 0x518   : > { %2886 = vmatprep.mubr.msk.f32.mxu0 %vm3175_vm4, %v3174_v25  ;;  %v3104_v49 = vpop.eup %3103  ;;  %2920 = vmatpush3.msra.mxu1 %v1893_v0 }
 0x519   : > { %v1741_v50 = vmul.f32 %v3104_v49, %v3631_v14  ;;  %v3106_v51 = vpop.eup %3105  ;;  %2921 = vmatprep.subr.mxu1 %v3174_v25 }
 0x51a   : > { %v1743_v53 = vmul.f32 %v3106_v51, %v3620_v3  ;;  %2922 = vmatpush3.msra.mxu1 %v1892_v9 }
 0x51b   : > { %2887 = vmatmul.mubr.msk.f32.gmra.mxu0 %vm991_vm7, %v1504_v44  ;;  %2923 = vmatprep.subr.mxu1 %v3174_v25 }
 0x51c   : > { %2910 = vmatprep.mubr.msk.f32.mxu0 %vm3175_vm4, %v3174_v25  ;;  %2924 = vmatpush3.msra.mxu1 %v1891_v11 }
 0x51d   : > { %2925 = vmatprep.subr.mxu1 %v3174_v25 }
 0x51e   : > { %2926 = vmatpush3.msra.mxu1 %v1890_v12  ;;  %v2058_v12 = vld [vmem:[%s3347_s18 + $0x18] sm:$0xff] }
 0x51f   : > { %2911 = vmatmul.mubr.msk.f32.vlgmr.msra.gmra.mxu0 %vm991_vm7, %v1739_v47  ;;  %2953 = vmatprep.subr.mxu1 %v3174_v25 }
 0x520   : > { %2913 = vmatprep.mubr.msk.f32.mxu0 %vm3175_vm4, %v3174_v25  ;;  %2937 = vmatpush3.msra.mxu0 %v2058_v12 }
 0x521   : > { %2938 = vmatprep.subr.mxu0 %v3174_v25 }
 0x523   : > { %2914 = vmatmul.mubr.msk.f32.gmra.mxu0 %vm991_vm7, %v1741_v50  ;;  %v3133_v50 = vld [vmem:[#allocation2 + $0x10] sm:$0x1] }
 0x524   : > { %2916 = vmatprep.mubr.msk.f32.mxu0 %vm3175_vm4, %v3174_v25 }
 0x527   : > { %2917 = vmatmul.mubr.msk.f32.gmra.mxu0 %vm991_vm7, %v1743_v53 }
 0x528   : > { %2944 = vmatprep.mubr.msk.f32.mxu0 %vm3175_vm4, %v3174_v25 }
 0x569   : > { %v1112_v54 = vpop.f32.mrf.mxu0 }
 0x56b   : > { %v2822_v55 = vpop.f32.mrf.mxu0 }
 0x571   : > { %v1117_v57 = vpop.f32.mrf.mxu0 }
 0x573   : > { %v2825_v58 = vpop.f32.mrf.mxu0 }
 0x5a2   : > { %v3697_v61 = vpop.f32.mrf.mxu0 }
 0x5a4   : > { %v2828_v62 = vpop.f32.mrf.mxu0 }
 0x5a6   : > { %v1351_v63 = vpop.f32.mrf.mxu0 }
 0x5a7   : > { %1846 = vrot.lane.b32.xlu1 %v1351_v63, %s3187_s19 }
 0x5a8   : > { %v2852_v1 = vpop.f32.mrf.mxu0 }
 0x5aa   : > { %v1356_v2 = vpop.f32.mrf.mxu0 }
 0x5ab   : > { %1848 = vrot.lane.b32.xlu0 %v1356_v2, %s3187_s19 }
 0x5ac   : > { %v2855_v3 = vpop.f32.mrf.mxu0 }
 0x5ae   : > { %v1361_v4 = vpop.f32.mrf.mxu0 }
 0x5b0   : > { %v2858_v5 = vpop.f32.mrf.mxu0 }
 0x5b2   : > { %v1590_v7 = vpop.f32.mrf.mxu0 }
 0x5b3   : > { %1858 = vrot.lane.b32.xlu0 %v1590_v7, %s3188_s21 }
 0x5b4   : > { %v2882_v8 = vpop.f32.mrf.mxu0 }
 0x5d7   : > { %v1595_v60 = vpop.f32.mrf.mxu0 }
 0x5d8   : > { %1860 = vrot.lane.b32.xlu1 %v1595_v60, %s3188_s21  ;;  %v2057_v60 = vld [vmem:[%s3347_s18 + $0x10] sm:$0xff] }
 0x5d9   : > { %v2885_v13 = vpop.f32.mrf.mxu0  ;;  %2939 = vmatpush3.msra.mxu0 %v2057_v60 }
 0x5da   : > { %v2056_v13 = vld [vmem:[%s3347_s18 + $0x8] sm:$0xff]  ;;  %2940 = vmatprep.subr.mxu0 %v3174_v25 }
 0x5db   : > { %v1600_v14 = vpop.f32.mrf.mxu0  ;;  %2941 = vmatpush3.msra.mxu0 %v2056_v13 }
 0x5dc   : > { %2942 = vmatprep.subr.mxu0 %v3174_v25 }
 0x5dd   : > { %v2888_v52 = vpop.f32.mrf.mxu0 }
 0x5df   : > { %v1829_v6 = vpop.f32.mrf.mxu0 }
 0x5e0   : > { %1870 = vrot.lane.b32.xlu1 %v1829_v6, %s3189_s28 }
 0x5e1   : > { %v2912_v15 = vpop.f32.mrf.mxu0 }
 0x5e3   : > { %v1834_v16 = vpop.f32.mrf.mxu0 }
 0x5e4   : > { %1850 = vrot.lane.b32.xlu1 %v1361_v4, %s3187_s19  ;;  %1872 = vrot.lane.b32.xlu0 %v1834_v16, %s3189_s28 }
 0x5e5   : > { %v2915_v59 = vpop.f32.mrf.mxu0 }
 0x5e7   : > { %v1839_v17 = vpop.f32.mrf.mxu0 }
 0x5e8   : > { %1862 = vrot.lane.b32.xlu0 %v1600_v14, %s3188_s21  ;;  %1874 = vrot.lane.b32.xlu1 %v1839_v17, %s3189_s28  ;;  %v2055_v14 = vld [vmem:[%s3347_s18] sm:$0xff] }
 0x5e9   : > { %v2918_v56 = vpop.f32.mrf.mxu0  ;;  %2943 = vmatpush3.msra.mxu0 %v2055_v14 }
 0x619   : > { %v1847_v18 = vpop.permute.xlu1 %1846 }
 0x61a   : > { %v1879_v21 = vsel %vm895_vm5, %v1112_v54, %v1847_v18 }
 0x61d   : > { %v1849_v10 = vpop.permute.xlu0 %1848 }
 0x61e   : > { %v1880_v28 = vsel %vm895_vm5, %v1117_v57, %v1849_v10 }
 0x625   : > { %v1859_v20 = vpop.permute.xlu0 %1858 }
 0x626   : > { %v1883_v23 = vsel %vm1882_vm9, %v1879_v21, %v1859_v20  ;;  %v2679_v20 = vld [vmem:[%s3938_s26] ss:$0 sm:$0xff] }
 0x64a   : > { %v1861_v19 = vpop.permute.xlu1 %1860 }
 0x64b   : > { %v1884_v24 = vsel %vm1882_vm9, %v1880_v28, %v1861_v19 }
 0x652   : > { %v1871_v26 = vpop.permute.xlu1 %1870 }
 0x653   : > { %v1887_v27 = vsel %vm1886_vm10, %v1883_v23, %v1871_v26  ;;  %v2680_v23 = vld [vmem:[%s3940_s20] ss:$0 sm:$0xff] }
 0x654   : > { %2928 = vmatmul.mubr.msk.f32.vlgmr.msra.gmra.mxu1 %vm726_vm2, %v1887_v27 }
 0x655   : > { %2930 = vmatprep.mubr.msk.f32.mxu1 %vm3175_vm4, %v3174_v25 }
 0x656   : > { %v1851_v29 = vpop.permute.xlu1 %1850  ;;  %v1873_v30 = vpop.permute.xlu0 %1872 }
 0x657   : > { %v1888_v31 = vsel %vm1886_vm10, %v1884_v24, %v1873_v30  ;;  %v1881_v32 = vsel %vm895_vm5, %v3697_v61, %v1851_v29 }
 0x658   : > { %2931 = vmatmul.mubr.msk.f32.gmra.mxu1 %vm726_vm2, %v1888_v31 }
 0x659   : > { %2933 = vmatprep.mubr.msk.f32.mxu1 %vm3175_vm4, %v3174_v25 }
 0x65a   : > { %v1863_v22 = vpop.permute.xlu0 %1862  ;;  %v1875_v33 = vpop.permute.xlu1 %1874 }
 0x65b   : > { %v1885_v34 = vsel %vm1882_vm9, %v1881_v32, %v1863_v22 }
 0x65c   : > { %v1889_v35 = vsel %vm1886_vm10, %v1885_v34, %v1875_v33  ;;  %v2251_v34 = vld [vmem:[%s3361_s0 + $0x78] sm:$0xff] }
 0x65d   : > { %2934 = vmatmul.mubr.msk.f32.gmra.mxu1 %vm726_vm2, %v1889_v35  ;;  %v2250_v35 = vld [vmem:[%s3361_s0 + $0x70] sm:$0xff] }
 0x65e   : > { %2985 = vmatprep.mubr.msk.f32.mxu1 %vm3175_vm4, %v3174_v25  ;;  %2954 = vmatpush3.msra.mxu1 %v2251_v34 }
 0x65f   : > { %2955 = vmatprep.subr.mxu1 %v3174_v25 }
 0x660   : > { %2956 = vmatpush3.msra.mxu1 %v2250_v35 }
 0x661   : > { %2957 = vmatprep.subr.mxu1 %v3174_v25 }
 0x714   : > { %v1969_v37 = vpop.f32.mrf.mxu1 }
 0x715   : > { %v1983_v41 = vadd.f32 %v3131_v40, %v1969_v37  ;;  %v2249_v37 = vld [vmem:[%s3361_s0 + $0x68] sm:$0xff]  ;;  %v2247_v40 = vld [vmem:[%s3361_s0 + $0x58] sm:$0xff] }
 0x716   : > { %v2929_v36 = vpop.f32.mrf.mxu1  ;;  %2958 = vmatpush3.msra.mxu1 %v2249_v37 }
 0x717   : > { %v3734_v42 = vadd.f32 %v2678_v38, %v1983_v41  ;;  %2959 = vmatprep.subr.mxu1 %v3174_v25  ;;  %v2246_v41 = vld [vmem:[%s3361_s0 + $0x50] sm:$0xff]  ;;  %v2245_v36 = vld [vmem:[%s3361_s0 + $0x48] sm:$0xff] }
 0x718   : > { %v1974_v43 = vpop.f32.mrf.mxu1 }
 0x719   : > { %v1984_v39 = vadd.f32 %v3132_v45, %v1974_v43  ;;  %v1998_v46 = vsel %vm726_vm2, %v3734_v42, 0.0  ;;  %v2244_v43 = vld [vmem:[%s3361_s0 + $0x40] sm:$0xff]  ;;  %v2243_v45 = vld [vmem:[%s3361_s0 + $0x38] sm:$0xff] }
 0x71a   : > { %1999 = vadd.xlane.f32.xlu0 %v1998_v46  ;;  %v2932_v44 = vpop.f32.mrf.mxu1  ;;  %v2241_v46 = vld [vmem:[%s3361_s0 + $0x28] sm:$0xff] }
 0x71b   : > { %v3738_v48 = vadd.f32 %v2678_v38, %v1984_v39  ;;  %v2242_v39 = vld [vmem:[%s3361_s0 + $0x30] sm:$0xff]  ;;  %v2240_v44 = vld [vmem:[%s3361_s0 + $0x20] sm:$0xff] }
 0x71d   : > { %v1979_v47 = vpop.f32.mrf.mxu1  ;;  %v2001_v49 = vsel %vm726_vm2, %v3738_v48, 0.0 }
 0x71e   : > { %v1985_v51 = vadd.f32 %v3133_v50, %v1979_v47  ;;  %2002 = vadd.xlane.f32.xlu1 %v2001_v49  ;;  %v2239_v47 = vld [vmem:[%s3361_s0 + $0x18] sm:$0xff]  ;;  %v2238_v49 = vld [vmem:[%s3361_s0 + $0x10] sm:$0xff]  ;;  %v2237_v50 = vld [vmem:[%s3361_s0 + $0x8] sm:$0xff] }
 0x71f   : > { %v2935_v53 = vpop.f32.mrf.mxu1 }
 0x720   : > { %v3742_v54 = vadd.f32 %v2678_v38, %v1985_v51  ;;  %v2248_v38 = vld [vmem:[%s3361_s0 + $0x60] sm:$0xff] }
 0x721   : > { %2960 = vmatpush3.msra.mxu1 %v2248_v38  ;;  %v2236_v51 = vld [vmem:[%s3361_s0] sm:$0xff] }
 0x722   : > { %v2004_v55 = vsel %vm733_vm3, %v3742_v54, 0.0  ;;  %2961 = vmatprep.subr.mxu1 %v3174_v25  ;;  %v2681_v53 = vld [vmem:[%s691_s27] ss:$0 sm:$0xff] }
 0x723   : > { %2005 = vadd.xlane.f32.xlu0 %v2004_v55  ;;  %2962 = vmatpush3.msra.mxu1 %v2247_v40 }
 0x724   : > { %2963 = vmatprep.subr.mxu1 %v3174_v25 }
 0x725   : > { %2964 = vmatpush3.msra.mxu1 %v2246_v41 }
 0x726   : > { %2965 = vmatprep.subr.mxu1 %v3174_v25 }
 0x727   : > { %2966 = vmatpush3.msra.mxu1 %v2245_v36 }
 0x728   : > { %2967 = vmatprep.subr.mxu1 %v3174_v25 }
 0x729   : > { %2968 = vmatpush3.msra.mxu1 %v2244_v43 }
 0x72a   : > { %2969 = vmatprep.subr.mxu1 %v3174_v25 }
 0x72b   : > { %2970 = vmatpush3.msra.mxu1 %v2243_v45 }
 0x72c   : > { %2971 = vmatprep.subr.mxu1 %v3174_v25 }
 0x72d   : > { %2972 = vmatpush3.msra.mxu1 %v2242_v39 }
 0x72e   : > { %2973 = vmatprep.subr.mxu1 %v3174_v25 }
 0x72f   : > { %2974 = vmatpush3.msra.mxu1 %v2241_v46 }
 0x730   : > { %2975 = vmatprep.subr.mxu1 %v3174_v25 }
 0x731   : > { %2976 = vmatpush3.msra.mxu1 %v2240_v44 }
 0x732   : > { %2977 = vmatprep.subr.mxu1 %v3174_v25 }
 0x733   : > { %2978 = vmatpush3.msra.mxu1 %v2239_v47 }
 0x734   : > { %2979 = vmatprep.subr.mxu1 %v3174_v25 }
 0x735   : > { %2980 = vmatpush3.msra.mxu1 %v2238_v49 }
 0x736   : > { %2981 = vmatprep.subr.mxu1 %v3174_v25 }
 0x737   : > { %2982 = vmatpush3.msra.mxu1 %v2237_v50 }
 0x738   : > { %2983 = vmatprep.subr.mxu1 %v3174_v25 }
 0x739   : > { %2984 = vmatpush3.msra.mxu1 %v2236_v51 }
 0x7a3   : > { %v2000_v57 = vpop.xlane.xlu0 %1999 }
 0x7a4   : > { %v2007_v58 = vmul.f32 0.03125, %v2000_v57 }
 0x7a6   : > { %v2010_v61 = vsub.f32 %v3734_v42, %v2007_v58 }
 0x7a7   : > { %v2003_v62 = vpop.xlane.xlu1 %2002 }
 0x7a8   : > { %v2008_v63 = vmul.f32 0.03125, %v2003_v62  ;;  %v2013_v0 = vmul.f32 %v2010_v61, %v2010_v61 }
 0x7aa   : > { %v2011_v1 = vsub.f32 %v3738_v48, %v2008_v63  ;;  %v2016_v2 = vsel %vm726_vm2, %v2013_v0, 0.0 }
 0x7ab   : > { %2017 = vadd.xlane.f32.xlu0 %v2016_v2 }
 0x7ac   : > { %v2006_v3 = vpop.xlane.xlu0 %2005  ;;  %v2014_v4 = vmul.f32 %v2011_v1, %v2011_v1 }
 0x7ad   : > { %v2009_v5 = vmul.f32 0.03125, %v2006_v3 }
 0x7ae   : > { %v2019_v7 = vsel %vm726_vm2, %v2014_v4, 0.0 }
 0x7af   : > { %v2012_v8 = vsub.f32 %v3742_v54, %v2009_v5  ;;  %2020 = vadd.xlane.f32.xlu0 %v2019_v7 }
 0x7b1   : > { %v2015_v9 = vmul.f32 %v2012_v8, %v2012_v8 }
 0x7b3   : > { %v2022_v11 = vsel %vm733_vm3, %v2015_v9, 0.0 }
 0x7b4   : > { %2023 = vadd.xlane.f32.xlu1 %v2022_v11 }
 0x834   : > { %v2018_v52 = vpop.xlane.xlu0 %2017 }
 0x835   : > { %v2025_v6 = vmul.f32 0.03125, %v2018_v52 }
 0x837   : > { %v2028_v15 = vadd.f32 1e-05, %v2025_v6 }
 0x838   : > { %v2021_v16 = vpop.xlane.xlu0 %2020 }
 0x839   : > { %3107 = vrsqrt.f32 %v2028_v15  ;;  %v2026_v59 = vmul.f32 0.03125, %v2021_v16 }
 0x83b   : > { %v2029_v17 = vadd.f32 1e-05, %v2026_v59 }
 0x83d   : > { %3109 = vrsqrt.f32 %v2029_v17  ;;  %v2024_v56 = vpop.xlane.xlu1 %2023 }
 0x83e   : > { %v2027_v18 = vmul.f32 0.03125, %v2024_v56 }
 0x840   : > { %v2030_v10 = vadd.f32 1e-05, %v2027_v18 }
 0x842   : > { %3111 = vrsqrt.f32 %v2030_v10 }
 0x846   : > { %v3108_v19 = vpop.eup %3107 }
 0x847   : > { %v2034_v21 = vmul.f32 %v3108_v19, %v2010_v61 }
 0x849   : > { %v2043_v26 = vmul.f32 %v2679_v20, %v2034_v21 }
 0x84a   : > { %v3110_v27 = vpop.eup %3109 }
 0x84b   : > { %v2052_v28 = vadd.f32 %v2680_v23, %v2043_v26  ;;  %v2035_v24 = vmul.f32 %v3110_v27, %v2011_v1 }
 0x84d   : > { %2945 = vmatmul.mubr.msk.f32.vlgmr.msra.gmra.mxu0 %vm726_vm2, %v2052_v28  ;;  %v2044_v29 = vmul.f32 %v2679_v20, %v2035_v24 }
 0x84e   : > { %2947 = vmatprep.mubr.msk.f32.mxu0 %vm3175_vm4, %v3174_v25 }
 0x84f   : > { %v3112_v30 = vpop.eup %3111  ;;  %v2053_v31 = vadd.f32 %v2680_v23, %v2044_v29 }
 0x850   : > { %v2036_v32 = vmul.f32 %v3112_v30, %v2012_v8 }
 0x851   : > { %2948 = vmatmul.mubr.msk.f32.gmra.mxu0 %vm726_vm2, %v2053_v31 }
 0x852   : > { %2950 = vmatprep.mubr.msk.f32.mxu0 %vm3175_vm4, %v3174_v25  ;;  %v2045_v22 = vmul.f32 %v2679_v20, %v2036_v32 }
 0x854   : > { %v2054_v33 = vadd.f32 %v2680_v23, %v2045_v22 }
 0x856   : > { %2951 = vmatmul.mubr.msk.f32.gmra.mxu0 %vm726_vm2, %v2054_v33 }
 0x90d   : > { %v2141_v55 = vpop.f32.mrf.mxu0 }
 0x90e   : > { %v3812_v57 = vadd.f32 %v2681_v53, %v2141_v55 }
 0x90f   : > { %v2946_v58 = vpop.f32.mrf.mxu0 }
 0x910   : > { %v3815_v61 = vmul.f32 0.70710677, %v3812_v57 }
 0x911   : > { %v2146_v62 = vpop.f32.mrf.mxu0 }
 0x912   : > { %v2161_v63 = vand.u32 2147483647, %v3815_v61  ;;  %v3818_v0 = vadd.f32 %v2681_v53, %v2146_v62  ;;  %v2203_v52 = vsub.f32 0.0, %v3815_v61  ;;  %vm2221_vm11 = vcmp.ge.f32.partialorder %v3815_v61, 0.0 }
 0x913   : > { %v2949_v1 = vpop.f32.mrf.mxu0 }
 0x914   : > { %v2164_v2 = vmul.f32 0.3275911, %v2161_v63  ;;  %v3821_v3 = vmul.f32 0.70710677, %v3818_v0  ;;  %v2206_v15 = vmul.f32 %v2203_v52, %v3815_v61 }
 0x916   : > { %v2167_v4 = vadd.f32 1.0, %v2164_v2  ;;  %v2162_v5 = vand.u32 2147483647, %v3821_v3  ;;  %v2151_v7 = vpop.f32.mrf.mxu0  ;;  %v2204_v16 = vsub.f32 0.0, %v3821_v3  ;;  %v2209_v56 = vmul.f32 1.442695, %v2206_v15 }
 0x917   : > { %v3824_v8 = vadd.f32 %v2681_v53, %v2151_v7  ;;  %vm2222_vm12 = vcmp.ge.f32.partialorder %v3821_v3, 0.0 }
 0x918   : > { %3113 = vrcp.f32 %v2167_v4  ;;  %v2165_v9 = vmul.f32 0.3275911, %v2162_v5  ;;  %v2952_v11 = vpop.f32.mrf.mxu0  ;;  %v2207_v18 = vmul.f32 %v2204_v16, %v3821_v3  ;;  %v2155_v5 = vmul.f32 0.5, %v3812_v57 }
 0x919   : > { %v3827_v12 = vmul.f32 0.70710677, %v3824_v8 }
 0x91a   : > { %v2168_v60 = vadd.f32 1.0, %v2165_v9  ;;  %v2211_v23 = vmul.f32 1.442695, %v2207_v18 }
 0x91b   : > { %v2163_v13 = vand.u32 2147483647, %v3827_v12  ;;  %v2205_v10 = vsub.f32 0.0, %v3827_v12  ;;  %vm2223_vm13 = vcmp.ge.f32.partialorder %v3827_v12, 0.0 }
 0x91c   : > { %3115 = vrcp.f32 %v2168_v60 }
 0x91d   : > { %v2166_v14 = vmul.f32 0.3275911, %v2163_v13  ;;  %v2208_v27 = vmul.f32 %v2205_v10, %v3827_v12 }
 0x91f   : > { %v2169_v6 = vadd.f32 1.0, %v2166_v14  ;;  %v2213_v32 = vmul.f32 1.442695, %v2208_v27 }
 0x921   : > { %3117 = vrcp.f32 %v2169_v6  ;;  %v2156_v6 = vmul.f32 0.5, %v3818_v0  ;;  %v2685_v0 = vld [vmem:[%s699_s23] ss:$0 sm:$0xff] }
 0x922   : > { %3119 = vpow2.f32 %v2209_v56 }
 0x923   : > { %3121 = vpow2.f32 %v2211_v23 }
 0x924   : > { %3123 = vpow2.f32 %v2213_v32 }
 0x925   : > { %v3114_v59 = vpop.eup %3113 }
 0x926   : > { %v2176_v17 = vmul.f32 1.0614054, %v3114_v59 }
 0x928   : > { %v2179_v19 = vadd.f32 -1.4531521, %v2176_v17  ;;  %v2157_v17 = vmul.f32 0.5, %v3824_v8 }
 0x929   : > { %v3116_v20 = vpop.eup %3115 }
 0x92a   : > { %v2182_v21 = vmul.f32 %v3114_v59, %v2179_v19  ;;  %v2177_v26 = vmul.f32 1.0614054, %v3116_v20 }
 0x92c   : > { %v2185_v28 = vadd.f32 1.4214138, %v2182_v21  ;;  %v2180_v24 = vadd.f32 -1.4531521, %v2177_v26 }
 0x92e   : > { %v3118_v29 = vpop.eup %3117  ;;  %v2188_v30 = vmul.f32 %v3114_v59, %v2185_v28  ;;  %v2183_v31 = vmul.f32 %v3116_v20, %v2180_v24 }
 0x92f   : > { %v2178_v22 = vmul.f32 1.0614054, %v3118_v29  ;;  %v3120_v46 = vpop.eup %3119 }
 0x930   : > { %v2191_v33 = vadd.f32 -0.28449672, %v2188_v30  ;;  %v2186_v34 = vadd.f32 1.4214138, %v2183_v31  ;;  %v3122_v55 = vpop.eup %3121 }
 0x931   : > { %v2181_v35 = vadd.f32 -1.4531521, %v2178_v22  ;;  %v3124_v11 = vpop.eup %3123 }
 0x932   : > { %v2194_v37 = vmul.f32 %v3114_v59, %v2191_v33  ;;  %v2189_v38 = vmul.f32 %v3116_v20, %v2186_v34 }
 0x933   : > { %v2184_v40 = vmul.f32 %v3118_v29, %v2181_v35 }
 0x934   : > { %v2197_v41 = vadd.f32 0.2548296, %v2194_v37  ;;  %v2192_v36 = vadd.f32 -0.28449672, %v2189_v38 }
 0x935   : > { %v2187_v43 = vadd.f32 1.4214138, %v2184_v40 }
 0x936   : > { %v2200_v45 = vmul.f32 %v3114_v59, %v2197_v41  ;;  %v2195_v39 = vmul.f32 %v3116_v20, %v2192_v36 }
 0x937   : > { %v2190_v44 = vmul.f32 %v3118_v29, %v2187_v43 }
 0x938   : > { %v2215_v47 = vmul.f32 %v3120_v46, %v2200_v45  ;;  %v2198_v49 = vadd.f32 0.2548296, %v2195_v39 }
 0x939   : > { %v2193_v50 = vadd.f32 -0.28449672, %v2190_v44 }
 0x93a   : > { %v2218_v51 = vsub.f32 1.0, %v2215_v47  ;;  %v2201_v53 = vmul.f32 %v3116_v20, %v2198_v49 }
 0x93b   : > { %v2196_v58 = vmul.f32 %v3118_v29, %v2193_v50 }
 0x93c   : > { %v2224_v62 = vsub.f32 0.0, %v2218_v51  ;;  %v2216_v63 = vmul.f32 %v3122_v55, %v2201_v53 }
 0x93d   : > { %v2199_v1 = vadd.f32 0.2548296, %v2196_v58  ;;  %v2686_v58 = vld [vmem:[%s3941_s3] ss:$0 sm:$0xff] }
 0x93e   : > { %v2227_v2 = vsel %vm2221_vm11, %v2218_v51, %v2224_v62  ;;  %v2219_v4 = vsub.f32 1.0, %v2216_v63  ;;  %v2687_v63 = vld [vmem:[%s3942_s13] ss:$0 sm:$0xff] }
 0x93f   : > { %v2230_v7 = vadd.f32 1.0, %v2227_v2  ;;  %v2202_v9 = vmul.f32 %v3118_v29, %v2199_v1 }
 0x940   : > { %v2225_v60 = vsub.f32 0.0, %v2219_v4 }
 0x941   : > { %v2233_v13 = vmul.f32 %v2230_v7, %v2155_v5  ;;  %v2217_v14 = vmul.f32 %v3124_v11, %v2202_v9 }
 0x942   : > { %v2228_v52 = vsel %vm2222_vm12, %v2219_v4, %v2225_v60 }
 0x943   : > { %2986 = vmatmul.mubr.f32.vlgmr.msra.gmra.mxu1 %v2233_v13  ;;  %v2231_v15 = vadd.f32 1.0, %v2228_v52  ;;  %v2220_v61 = vsub.f32 1.0, %v2217_v14 }
 0x944   : > { %2988 = vmatprep.mubr.msk.f32.mxu1 %vm3175_vm4, %v3174_v25 }
 0x945   : > { %v2234_v16 = vmul.f32 %v2231_v15, %v2156_v6  ;;  %v2226_v57 = vsub.f32 0.0, %v2220_v61 }
 0x947   : > { %2989 = vmatmul.mubr.f32.gmra.mxu1 %v2234_v16  ;;  %v2229_v59 = vsel %vm2223_vm13, %v2220_v61, %v2226_v57 }
 0x948   : > { %2991 = vmatprep.mubr.msk.f32.mxu1 %vm3175_vm4, %v3174_v25  ;;  %v2232_v3 = vadd.f32 1.0, %v2229_v59 }
 0x94a   : > { %v2235_v56 = vmul.f32 %v2232_v3, %v2157_v17 }
 0x94c   : > { %2992 = vmatmul.mubr.f32.gmra.mxu1 %v2235_v56 }
 0xa03   : > { %v2325_v18 = vpop.f32.mrf.mxu1 }
 0xa04   : > { %v2326_v10 = vadd.f32 %v2685_v0, %v2325_v18 }
 0xa05   : > { %v2987_v19 = vpop.f32.mrf.mxu1 }
 0xa06   : > { %v2339_v12 = vadd.f32 %v2326_v10, %v3734_v42 }
 0xa07   : > { %v2330_v20 = vpop.f32.mrf.mxu1 }
 0xa08   : > { %2342 = vst.msk [vmem:[#allocation2] sm:$0xff] %vm726_vm2, %v2339_v12  ;;  %v2331_v8 = vadd.f32 %v2685_v0, %v2330_v20  ;;  %v2347_v21 = vsel %vm726_vm2, %v2339_v12, 0.0 }
 0xa09   : > { %2348 = vadd.xlane.f32.xlu0 %v2347_v21  ;;  %v2990_v25 = vpop.f32.mrf.mxu1 }
 0xa0a   : > { %v2340_v23 = vadd.f32 %v2331_v8, %v3738_v48 }
 0xa0c   : > { %2343 = vst.msk [vmem:[#allocation2 + $0x8] sm:$0xff] %vm726_vm2, %v2340_v23  ;;  %v2335_v26 = vpop.f32.mrf.mxu1  ;;  %v2350_v27 = vsel %vm726_vm2, %v2340_v23, 0.0 }
 0xa0d   : > { %v2336_v28 = vadd.f32 %v2685_v0, %v2335_v26  ;;  %2351 = vadd.xlane.f32.xlu1 %v2350_v27 }
 0xa0e   : > { %v2993_v24 = vpop.f32.mrf.mxu1 }
 0xa0f   : > { %v2341_v42 = vadd.f32 %v2336_v28, %v3742_v54 }
 0xa11   : > { %2344 = vst.msk [vmem:[#allocation2 + $0x10] sm:$0x1] %vm733_vm3, %v2341_v42  ;;  %v2353_v29 = vsel %vm733_vm3, %v2341_v42, 0.0 }
 0xa12   : > { %2354 = vadd.xlane.f32.xlu0 %v2353_v29 }
 0xa92   : > { %v2349_v30 = vpop.xlane.xlu0 %2348 }
 0xa93   : > { %v2356_v31 = vmul.f32 0.03125, %v2349_v30 }
 0xa95   : > { %v2359_v32 = vsub.f32 %v2339_v12, %v2356_v31 }
 0xa96   : > { %v2352_v22 = vpop.xlane.xlu1 %2351 }
 0xa97   : > { %v2357_v48 = vmul.f32 0.03125, %v2352_v22  ;;  %v2362_v33 = vmul.f32 %v2359_v32, %v2359_v32 }
 0xa99   : > { %v2360_v34 = vsub.f32 %v2340_v23, %v2357_v48  ;;  %v2365_v35 = vsel %vm726_vm2, %v2362_v33, 0.0 }
 0xa9a   : > { %2366 = vadd.xlane.f32.xlu1 %v2365_v35 }
 0xa9b   : > { %v2355_v37 = vpop.xlane.xlu0 %2354  ;;  %v2363_v38 = vmul.f32 %v2360_v34, %v2360_v34 }
 0xa9c   : > { %v2358_v40 = vmul.f32 0.03125, %v2355_v37 }
 0xa9d   : > { %v2368_v54 = vsel %vm726_vm2, %v2363_v38, 0.0 }
 0xa9e   : > { %v2361_v41 = vsub.f32 %v2341_v42, %v2358_v40  ;;  %2369 = vadd.xlane.f32.xlu0 %v2368_v54 }
 0xaa0   : > { %v2364_v36 = vmul.f32 %v2361_v41, %v2361_v41 }
 0xaa2   : > { %v2371_v43 = vsel %vm733_vm3, %v2364_v36, 0.0 }
 0xaa3   : > { %2372 = vadd.xlane.f32.xlu1 %v2371_v43 }
 0xb23   : > { %v2367_v45 = vpop.xlane.xlu1 %2366 }
 0xb24   : > { %v2374_v39 = vmul.f32 0.03125, %v2367_v45 }
 0xb26   : > { %v2377_v46 = vadd.f32 1e-05, %v2374_v39 }
 0xb27   : > { %v2370_v44 = vpop.xlane.xlu0 %2369 }
 0xb28   : > { %3125 = vrsqrt.f32 %v2377_v46  ;;  %v2375_v47 = vmul.f32 0.03125, %v2370_v44 }
 0xb2a   : > { %v2378_v49 = vadd.f32 1e-05, %v2375_v47 }
 0xb2c   : > { %3127 = vrsqrt.f32 %v2378_v49  ;;  %v2373_v50 = vpop.xlane.xlu1 %2372 }
 0xb2d   : > { %v2376_v51 = vmul.f32 0.03125, %v2373_v50 }
 0xb2f   : > { %v2379_v53 = vadd.f32 1e-05, %v2376_v51 }
 0xb31   : > { %3129 = vrsqrt.f32 %v2379_v53 }
 0xb35   : > { %v3126_v55 = vpop.eup %3125 }
 0xb36   : > { %v2383_v62 = vmul.f32 %v3126_v55, %v2359_v32 }
 0xb38   : > { %v2392_v1 = vmul.f32 %v2686_v58, %v2383_v62 }
 0xb39   : > { %v3128_v2 = vpop.eup %3127 }
 0xb3a   : > { %v2401_v4 = vadd.f32 %v2687_v63, %v2392_v1  ;;  %v2384_v5 = vmul.f32 %v3128_v2, %v2360_v34 }
 0xb3c   : > { %2404 = vst.msk [vmem:[%s3367_s8] sm:$0xff] %vm726_vm2, %v2401_v4  ;;  %v2393_v7 = vmul.f32 %v2686_v58, %v2384_v5 }
 0xb3e   : > { %v3130_v9 = vpop.eup %3129  ;;  %v2402_v11 = vadd.f32 %v2687_v63, %v2393_v7 }
 0xb3f   : > { %v2385_v60 = vmul.f32 %v3130_v9, %v2361_v41 }
 0xb40   : > { %2405 = vst.msk [vmem:[%s3367_s8 + $0x8] sm:$0xff] %vm726_vm2, %v2402_v11 }
 0xb41   : > { %v2394_v13 = vmul.f32 %v2686_v58, %v2385_v60 }
 0xb43   : > { %v2403_v14 = vadd.f32 %v2687_v63, %v2394_v13 }
 0xb45   : > { %2406 = vst.msk [vmem:[%s3367_s8 + $0x10] sm:$0x1] %vm733_vm3, %v2403_v14 }
 0xb46 PF: > { %s3943_s19 = sld [smem:[#allocation6_spill]] }
 0xb47   : > { %s3944_s18 = sld [smem:[#allocation4_spill]] }
 0xb48   : > { %s3946_s20 = sld [smem:[#allocation7_spill]] }
 0xb49   : > { %s3947_s21 = sld [smem:[#allocation8_spill]] }
 0xb4c   : > { %s25_s22 = sadd.s32 1, %s3943_s19   ;;  %s3945_s19 = sld [smem:[#allocation5_spill]] }
 0xb4d   : > { %p22_p8 = scmp.ge.s32.totalorder %s25_s22, 12  }
 0xb4f   :  { %24 = sbr.rel (!%p22_p8) target bundleno = 10 (0xa), region = 150 }

// kernel: viteff_forward.14
= control target key start
LH: loop header
LB: loop body
LE: loop exit
PB: predicated region body
PF: predicated region fallthrough
CT: control target
= control target key end

     0   :  { %s1221_s12 = smov 0   ;;  %s1223_s13 = smov 0   ;;  %s1519_s0 = inlined_call_operand.vmem [shape: f32[512,27], index: 0, kind: input, shape index: {}]   ;;  %s1520_s1 = inlined_call_operand.vmem [shape: f32[27,8], index: 1, kind: input, shape index: {}]   ;;  %s1521_s2 = inlined_call_operand.vmem [shape: f32[1,8], index: 2, kind: input, shape index: {}]   ;;  %s1522_s3 = inlined_call_operand.vmem [shape: f32[512,8], index: 3, kind: output, shape index: {}]  }
   0x1   :  { %s1225_s14 = smov 0  }
   0x2 LB: > { %s32_s15 = sadd.s32 1, %s1194_s13  ;;  %p1010_p0 = scmp.ge.s32.totalorder %s1198_s14, 1  ;;  %s1198_s14 = sphi %s1225_s14, %s13_s14   ;;  %s1194_s13 = sphi %s1223_s13, %s1525_s13   ;;  %s1190_s12 = sphi %s1221_s12, %s1524_s12  }
   0x3   : > { %p34_p1 = scmp.ge.s32.totalorder %s32_s15, 2  ;;  %p188_p2 = scmp.lt.s32.totalorder %s1198_s14, 3 }
   0x5   : > { %s1527_s15 = smov (%p34_p1, %s32_s15), 0  ;;  %p189_p3 = pnand %p1010_p0, %p188_p2 }
   0x6   : > { %s1011_s20 = sshll.u32 (!%p189_p3), %s1190_s12, 5 }
   0x7   : > { %192 = sbr.rel (%p189_p3) target bundleno = 261 (0x105), region = 32  ;;  %p1250_p4 = scmp.lt.s32.totalorder (!%p189_p3), %s1011_s20, 63 }
   0xc   : > { %v363_v0 = vld [vmem:[%s1520_s1 + $0x18] sm:$0x7]  ;;  %vm461_vm0 = vcmask 1042432   ;;  %v362_v1 = vld [vmem:[%s1520_s1 + $0x10] sm:$0xff]  ;;  %vm263_vm1 = vcmask 64512   ;;  %v361_v2 = vld [vmem:[%s1520_s1 + $0x8] sm:$0xff] }
   0xd   : > { %1087 = vmatprep.subr.msk.mxu0 %vm461_vm0, %v363_v0  ;;  %1143 = vmatprep.subr.msk.mxu1 %vm461_vm0, %v363_v0  ;;  %v1200_v3 = vmov 0.0   ;;  %s1529_s20 = smov (!%p1250_p4, %s1011_s20), 63  ;;  %v360_v4 = vld [vmem:[%s1520_s1] sm:$0xff]  ;;  %vm364_vm2 = vcmask 220160  }
   0xe   : > { %1088 = vmatpush3.msk.msra.mxu0 %vm461_vm0, %v363_v0  ;;  %1147 = vmatpush3.msk.msra.mxu1 %vm461_vm0, %v363_v0  ;;  %265 = vst.msk [vmem:[#allocation2 + $0x8] sm:$0xff] %vm263_vm1, %v1200_v3  ;;  %264 = vst.msk [vmem:[#allocation2] sm:$0xff] %vm263_vm1, %v1200_v3  ;;  %s1012_s26 = sshll.u32 %s1529_s20, 3  ;;  %v1379_v63 = vld [vmem:[%s1521_s2] ss:$0 sm:$0xff] }
   0xf   : > { %266 = vst.msk [vmem:[#allocation2 + $0x10] sm:$0xff] %vm263_vm1, %v1200_v3  ;;  %267 = vst.msk [vmem:[#allocation2 + $0x18] sm:$0xff] %vm263_vm1, %v1200_v3  ;;  %1089 = vmatprep.subr.mxu0 %v362_v1  ;;  %1144 = vmatprep.subr.mxu1 %v362_v1  ;;  %s1304_s29 = scalar_lea.vmem %s1519_s0, %s1012_s26  ;;  %s1392_s7 = scalar_lea.vmem %s1522_s3, %s1012_s26 }
  0x10   : > { %268 = vst.msk [vmem:[#allocation2 + $0x20] sm:$0xff] %vm263_vm1, %v1200_v3  ;;  %269 = vst.msk [vmem:[#allocation2 + $0x28] sm:$0xff] %vm263_vm1, %v1200_v3  ;;  %1090 = vmatpush3.msra.mxu0 %v362_v1  ;;  %1148 = vmatpush3.msra.mxu1 %v362_v1  ;;  %v328_v5 = vld [vmem:[%s1304_s29] sm:$0xff]  ;;  %v329_v7 = vld [vmem:[%s1304_s29 + $0x8] sm:$0xff] }
  0x11   : > { %270 = vst.msk [vmem:[#allocation2 + $0x30] sm:$0xff] %vm263_vm1, %v1200_v3  ;;  %271 = vst.msk [vmem:[#allocation2 + $0x38] sm:$0xff] %vm263_vm1, %v1200_v3  ;;  %1091 = vmatprep.subr.mxu0 %v361_v2  ;;  %1145 = vmatprep.subr.mxu1 %v361_v2  ;;  %v344_v6 = vld [vmem:[%s1304_s29 + $0x80] sm:$0xff]  ;;  %v345_v8 = vld [vmem:[%s1304_s29 + $0x88] sm:$0xff] }
  0x12   : > { %272 = vst.msk [vmem:[#allocation2 + $0x40] sm:$0xff] %vm263_vm1, %v1200_v3  ;;  %273 = vst.msk [vmem:[#allocation2 + $0x48] sm:$0xff] %vm263_vm1, %v1200_v3  ;;  %1092 = vmatpush3.msra.mxu0 %v361_v2  ;;  %1149 = vmatpush3.msra.mxu1 %v361_v2  ;;  %v330_v9 = vld [vmem:[%s1304_s29 + $0x10] sm:$0xff]  ;;  %v331_v11 = vld [vmem:[%s1304_s29 + $0x18] sm:$0xff] }
  0x13   : > { %274 = vst.msk [vmem:[#allocation2 + $0x50] sm:$0xff] %vm263_vm1, %v1200_v3  ;;  %275 = vst.msk [vmem:[#allocation2 + $0x58] sm:$0xff] %vm263_vm1, %v1200_v3  ;;  %1093 = vmatprep.subr.mxu0 %v360_v4  ;;  %1146 = vmatprep.subr.mxu1 %v360_v4  ;;  %v346_v10 = vld [vmem:[%s1304_s29 + $0x90] sm:$0xff]  ;;  %v347_v12 = vld [vmem:[%s1304_s29 + $0x98] sm:$0xff] }
  0x14   : > { %276 = vst.msk [vmem:[#allocation2 + $0x60] sm:$0xff] %vm263_vm1, %v1200_v3  ;;  %277 = vst.msk [vmem:[#allocation2 + $0x68] sm:$0xff] %vm263_vm1, %v1200_v3  ;;  %1094 = vmatpush3.msra.mxu0 %v360_v4  ;;  %1150 = vmatpush3.msra.mxu1 %v360_v4  ;;  %v332_v13 = vld [vmem:[%s1304_s29 + $0x20] sm:$0xff]  ;;  %v333_v15 = vld [vmem:[%s1304_s29 + $0x28] sm:$0xff] }
  0x15   : > { %278 = vst.msk [vmem:[#allocation2 + $0x70] sm:$0xff] %vm263_vm1, %v1200_v3  ;;  %279 = vst.msk [vmem:[#allocation2 + $0x78] sm:$0xff] %vm263_vm1, %v1200_v3  ;;  %1095 = vmatprep.mubr.msk.f32.mxu0 %vm364_vm2, %v328_v5  ;;  %1119 = vmatprep.mubr.msk.f32.mxu1 %vm364_vm2, %v344_v6  ;;  %v348_v14 = vld [vmem:[%s1304_s29 + $0xa0] sm:$0xff]  ;;  %v349_v16 = vld [vmem:[%s1304_s29 + $0xa8] sm:$0xff] }
  0x16   : > { %280 = vst.msk [vmem:[#allocation2 + $0x80] sm:$0xff] %vm263_vm1, %v1200_v3  ;;  %281 = vst.msk [vmem:[#allocation2 + $0x88] sm:$0xff] %vm263_vm1, %v1200_v3  ;;  %1096 = vmatmul.mubr.msk.f32.vlgmr.msra.gmra.mxu0 %vm364_vm2, %v329_v7  ;;  %1120 = vmatmul.mubr.msk.f32.vlgmr.msra.gmra.mxu1 %vm364_vm2, %v345_v8  ;;  %v334_v17 = vld [vmem:[%s1304_s29 + $0x30] sm:$0xff]  ;;  %v335_v19 = vld [vmem:[%s1304_s29 + $0x38] sm:$0xff] }
  0x17   : > { %282 = vst.msk [vmem:[#allocation2 + $0x90] sm:$0xff] %vm263_vm1, %v1200_v3  ;;  %283 = vst.msk [vmem:[#allocation2 + $0x98] sm:$0xff] %vm263_vm1, %v1200_v3  ;;  %1098 = vmatprep.mubr.msk.f32.mxu0 %vm364_vm2, %v330_v9  ;;  %1122 = vmatprep.mubr.msk.f32.mxu1 %vm364_vm2, %v346_v10  ;;  %v350_v18 = vld [vmem:[%s1304_s29 + $0xb0] sm:$0xff]  ;;  %v351_v20 = vld [vmem:[%s1304_s29 + $0xb8] sm:$0xff] }
  0x18   : > { %284 = vst.msk [vmem:[#allocation2 + $0xa0] sm:$0xff] %vm263_vm1, %v1200_v3  ;;  %285 = vst.msk [vmem:[#allocation2 + $0xa8] sm:$0xff] %vm263_vm1, %v1200_v3  ;;  %v336_v21 = vld [vmem:[%s1304_s29 + $0x40] sm:$0xff]  ;;  %v337_v23 = vld [vmem:[%s1304_s29 + $0x48] sm:$0xff] }
  0x19   : > { %286 = vst.msk [vmem:[#allocation2 + $0xb0] sm:$0xff] %vm263_vm1, %v1200_v3  ;;  %287 = vst.msk [vmem:[#allocation2 + $0xb8] sm:$0xff] %vm263_vm1, %v1200_v3  ;;  %v352_v22 = vld [vmem:[%s1304_s29 + $0xc0] sm:$0xff]  ;;  %v353_v24 = vld [vmem:[%s1304_s29 + $0xc8] sm:$0xff] }
  0x1a   : > { %288 = vst.msk [vmem:[#allocation2 + $0xc0] sm:$0xff] %vm263_vm1, %v1200_v3  ;;  %289 = vst.msk [vmem:[#allocation2 + $0xc8] sm:$0xff] %vm263_vm1, %v1200_v3  ;;  %1099 = vmatmul.mubr.msk.f32.gmra.mxu0 %vm364_vm2, %v331_v11  ;;  %1123 = vmatmul.mubr.msk.f32.gmra.mxu1 %vm364_vm2, %v347_v12  ;;  %v338_v25 = vld [vmem:[%s1304_s29 + $0x50] sm:$0xff]  ;;  %v339_v27 = vld [vmem:[%s1304_s29 + $0x58] sm:$0xff] }
  0x1b   : > { %290 = vst.msk [vmem:[#allocation2 + $0xd0] sm:$0xff] %vm263_vm1, %v1200_v3  ;;  %291 = vst.msk [vmem:[#allocation2 + $0xd8] sm:$0xff] %vm263_vm1, %v1200_v3  ;;  %1101 = vmatprep.mubr.msk.f32.mxu0 %vm364_vm2, %v332_v13  ;;  %1125 = vmatprep.mubr.msk.f32.mxu1 %vm364_vm2, %v348_v14  ;;  %v354_v26 = vld [vmem:[%s1304_s29 + $0xd0] sm:$0xff]  ;;  %v355_v28 = vld [vmem:[%s1304_s29 + $0xd8] sm:$0xff] }
  0x1c   : > { %292 = vst.msk [vmem:[#allocation2 + $0xe0] sm:$0xff] %vm263_vm1, %v1200_v3  ;;  %293 = vst.msk [vmem:[#allocation2 + $0xe8] sm:$0xff] %vm263_vm1, %v1200_v3  ;;  %v340_v29 = vld [vmem:[%s1304_s29 + $0x60] sm:$0xff]  ;;  %v341_v31 = vld [vmem:[%s1304_s29 + $0x68] sm:$0xff] }
  0x1d   : > { %294 = vst.msk [vmem:[#allocation2 + $0xf0] sm:$0xff] %vm263_vm1, %v1200_v3  ;;  %295 = vst.msk [vmem:[#allocation2 + $0xf8] sm:$0xff] %vm263_vm1, %v1200_v3  ;;  %v356_v30 = vld [vmem:[%s1304_s29 + $0xe0] sm:$0xff]  ;;  %v357_v32 = vld [vmem:[%s1304_s29 + $0xe8] sm:$0xff] }
  0x1e   : > { %1102 = vmatmul.mubr.msk.f32.gmra.mxu0 %vm364_vm2, %v333_v15  ;;  %1126 = vmatmul.mubr.msk.f32.gmra.mxu1 %vm364_vm2, %v349_v16  ;;  %v342_v33 = vld [vmem:[%s1304_s29 + $0x70] sm:$0xff]  ;;  %v343_v35 = vld [vmem:[%s1304_s29 + $0x78] sm:$0xff]  ;;  %v297_v37 = vld [vmem:[#allocation2 + $0x8] sm:$0xff] }
  0x1f   : > { %1104 = vmatprep.mubr.msk.f32.mxu0 %vm364_vm2, %v334_v17  ;;  %1128 = vmatprep.mubr.msk.f32.mxu1 %vm364_vm2, %v350_v18  ;;  %v358_v34 = vld [vmem:[%s1304_s29 + $0xf0] sm:$0xff]  ;;  %v359_v36 = vld [vmem:[%s1304_s29 + $0xf8] sm:$0xff]  ;;  %v313_v38 = vld [vmem:[#allocation2 + $0x88] sm:$0xff] }
  0x20   : > { %v296_v41 = vld [vmem:[#allocation2] sm:$0xff]  ;;  %v299_v47 = vld [vmem:[#allocation2 + $0x18] sm:$0xff]  ;;  %v298_v53 = vld [vmem:[#allocation2 + $0x10] sm:$0xff] }
  0x21   : > { %v312_v42 = vld [vmem:[#allocation2 + $0x80] sm:$0xff]  ;;  %v315_v48 = vld [vmem:[#allocation2 + $0x98] sm:$0xff]  ;;  %v314_v54 = vld [vmem:[#allocation2 + $0x90] sm:$0xff] }
  0x22   : > { %1105 = vmatmul.mubr.msk.f32.gmra.mxu0 %vm364_vm2, %v335_v19  ;;  %1129 = vmatmul.mubr.msk.f32.gmra.mxu1 %vm364_vm2, %v351_v20  ;;  %v301_v59 = vld [vmem:[#allocation2 + $0x28] sm:$0xff]  ;;  %v300_v2 = vld [vmem:[#allocation2 + $0x20] sm:$0xff]  ;;  %v303_v14 = vld [vmem:[#allocation2 + $0x38] sm:$0xff] }
  0x23   : > { %1107 = vmatprep.mubr.msk.f32.mxu0 %vm364_vm2, %v336_v21  ;;  %1131 = vmatprep.mubr.msk.f32.mxu1 %vm364_vm2, %v352_v22  ;;  %v317_v60 = vld [vmem:[#allocation2 + $0xa8] sm:$0xff]  ;;  %v316_v3 = vld [vmem:[#allocation2 + $0xa0] sm:$0xff]  ;;  %v319_v15 = vld [vmem:[#allocation2 + $0xb8] sm:$0xff] }
  0x26   : > { %1108 = vmatmul.mubr.msk.f32.gmra.mxu0 %vm364_vm2, %v337_v23  ;;  %1132 = vmatmul.mubr.msk.f32.gmra.mxu1 %vm364_vm2, %v353_v24  ;;  %v302_v24 = vld [vmem:[#allocation2 + $0x30] sm:$0xff] }
  0x27   : > { %1110 = vmatprep.mubr.msk.f32.mxu0 %vm364_vm2, %v338_v25  ;;  %1134 = vmatprep.mubr.msk.f32.mxu1 %vm364_vm2, %v354_v26  ;;  %v318_v25 = vld [vmem:[#allocation2 + $0xb0] sm:$0xff] }
  0x2a   : > { %1111 = vmatmul.mubr.msk.f32.gmra.mxu0 %vm364_vm2, %v339_v27  ;;  %1135 = vmatmul.mubr.msk.f32.gmra.mxu1 %vm364_vm2, %v355_v28 }
  0x2b   : > { %1113 = vmatprep.mubr.msk.f32.mxu0 %vm364_vm2, %v340_v29  ;;  %1137 = vmatprep.mubr.msk.f32.mxu1 %vm364_vm2, %v356_v30 }
  0x2e   : > { %1114 = vmatmul.mubr.msk.f32.gmra.mxu0 %vm364_vm2, %v341_v31  ;;  %1138 = vmatmul.mubr.msk.f32.gmra.mxu1 %vm364_vm2, %v357_v32 }
  0x2f   : > { %1116 = vmatprep.mubr.msk.f32.mxu0 %vm364_vm2, %v342_v33  ;;  %1140 = vmatprep.mubr.msk.f32.mxu1 %vm364_vm2, %v358_v34 }
  0x32   : > { %1117 = vmatmul.mubr.msk.f32.gmra.mxu0 %vm364_vm2, %v343_v35  ;;  %1141 = vmatmul.mubr.msk.f32.gmra.mxu1 %vm364_vm2, %v359_v36  ;;  %v305_v36 = vld [vmem:[#allocation2 + $0x48] sm:$0xff] }
  0xd6   : > { %v1097_v39 = vpop.f32.mrf.mxu0  ;;  %v1121_v40 = vpop.f32.mrf.mxu1 }
  0xd7   : > { %v691_v43 = vadd.f32 %v1097_v39, %v297_v37  ;;  %v707_v44 = vadd.f32 %v1121_v40, %v313_v38  ;;  %v321_v37 = vld [vmem:[#allocation2 + $0xc8] sm:$0xff] }
  0xd8   : > { %v531_v45 = vpop.f32.mrf.mxu0  ;;  %v611_v46 = vpop.f32.mrf.mxu1 }
  0xd9   : > { %724 = vst.msk [vmem:[#allocation2 + $0x8] sm:$0xff] %vm263_vm1, %v691_v43  ;;  %740 = vst.msk [vmem:[#allocation2 + $0x88] sm:$0xff] %vm263_vm1, %v707_v44  ;;  %v690_v49 = vadd.f32 %v531_v45, %v296_v41  ;;  %v706_v50 = vadd.f32 %v611_v46, %v312_v42 }
  0xda   : > { %v1100_v51 = vpop.f32.mrf.mxu0  ;;  %v1124_v52 = vpop.f32.mrf.mxu1 }
  0xdb   : > { %723 = vst.msk [vmem:[#allocation2] sm:$0xff] %vm263_vm1, %v690_v49  ;;  %739 = vst.msk [vmem:[#allocation2 + $0x80] sm:$0xff] %vm263_vm1, %v706_v50  ;;  %v693_v55 = vadd.f32 %v1100_v51, %v299_v47  ;;  %v709_v56 = vadd.f32 %v1124_v52, %v315_v48  ;;  %v304_v48 = vld [vmem:[#allocation2 + $0x40] sm:$0xff] }
  0xdc   : > { %v541_v57 = vpop.f32.mrf.mxu0  ;;  %v621_v58 = vpop.f32.mrf.mxu1  ;;  %v320_v49 = vld [vmem:[#allocation2 + $0xc0] sm:$0xff] }
  0xdd   : > { %726 = vst.msk [vmem:[#allocation2 + $0x18] sm:$0xff] %vm263_vm1, %v693_v55  ;;  %742 = vst.msk [vmem:[#allocation2 + $0x98] sm:$0xff] %vm263_vm1, %v709_v56  ;;  %v692_v61 = vadd.f32 %v541_v57, %v298_v53  ;;  %v708_v62 = vadd.f32 %v621_v58, %v314_v54 }
  0xde   : > { %v1103_v0 = vpop.f32.mrf.mxu0  ;;  %v1127_v1 = vpop.f32.mrf.mxu1 }
  0xdf   : > { %725 = vst.msk [vmem:[#allocation2 + $0x10] sm:$0xff] %vm263_vm1, %v692_v61  ;;  %741 = vst.msk [vmem:[#allocation2 + $0x90] sm:$0xff] %vm263_vm1, %v708_v62  ;;  %v695_v4 = vadd.f32 %v1103_v0, %v301_v59  ;;  %v711_v5 = vadd.f32 %v1127_v1, %v317_v60  ;;  %v307_v60 = vld [vmem:[#allocation2 + $0x58] sm:$0xff]  ;;  %v306_v62 = vld [vmem:[#allocation2 + $0x50] sm:$0xff] }
  0xe0   : > { %v759_v6 = vld [vmem:[#allocation2 + $0x8] sm:$0xff]  ;;  %v551_v8 = vpop.f32.mrf.mxu0  ;;  %v631_v9 = vpop.f32.mrf.mxu1  ;;  %v323_v61 = vld [vmem:[#allocation2 + $0xd8] sm:$0xff] }
  0xe1   : > { %v775_v7 = vld [vmem:[#allocation2 + $0x88] sm:$0xff]  ;;  %v798_v10 = vadd.f32 %v1379_v63, %v759_v6  ;;  %728 = vst.msk [vmem:[#allocation2 + $0x28] sm:$0xff] %vm263_vm1, %v695_v4  ;;  %744 = vst.msk [vmem:[#allocation2 + $0xa8] sm:$0xff] %vm263_vm1, %v711_v5  ;;  %v694_v12 = vadd.f32 %v551_v8, %v300_v2  ;;  %v710_v13 = vadd.f32 %v631_v9, %v316_v3  ;;  %v322_v6 = vld [vmem:[#allocation2 + $0xd0] sm:$0xff] }
  0xe2   : > { %v814_v11 = vadd.f32 %v1379_v63, %v775_v7  ;;  %v758_v16 = vld [vmem:[#allocation2] sm:$0xff]  ;;  %v1106_v18 = vpop.f32.mrf.mxu0  ;;  %v1130_v19 = vpop.f32.mrf.mxu1 }
  0xe3   : > { %v774_v17 = vld [vmem:[#allocation2 + $0x80] sm:$0xff]  ;;  %v830_v20 = vmax.f32 %v798_v10, 0.0  ;;  %v797_v22 = vadd.f32 %v1379_v63, %v758_v16  ;;  %727 = vst.msk [vmem:[#allocation2 + $0x20] sm:$0xff] %vm263_vm1, %v694_v12  ;;  %743 = vst.msk [vmem:[#allocation2 + $0xa0] sm:$0xff] %vm263_vm1, %v710_v13  ;;  %v697_v28 = vadd.f32 %v1106_v18, %v303_v14  ;;  %v713_v29 = vadd.f32 %v1130_v19, %v319_v15  ;;  %v309_v15 = vld [vmem:[#allocation2 + $0x68] sm:$0xff] }
  0xe4   : > { %v846_v21 = vmax.f32 %v814_v11, 0.0  ;;  %v813_v23 = vadd.f32 %v1379_v63, %v774_v17  ;;  %v761_v26 = vld [vmem:[#allocation2 + $0x18] sm:$0xff]  ;;  %v561_v30 = vpop.f32.mrf.mxu0  ;;  %v641_v31 = vpop.f32.mrf.mxu1  ;;  %v325_v16 = vld [vmem:[#allocation2 + $0xe8] sm:$0xff] }
  0xe5   : > { %v777_v27 = vld [vmem:[#allocation2 + $0x98] sm:$0xff]  ;;  %862 = vst.msk [vmem:[%s1392_s7 + $0x8] sm:$0xff] %vm263_vm1, %v830_v20  ;;  %v829_v32 = vmax.f32 %v797_v22, 0.0  ;;  %v800_v34 = vadd.f32 %v1379_v63, %v761_v26  ;;  %730 = vst.msk [vmem:[#allocation2 + $0x38] sm:$0xff] %vm263_vm1, %v697_v28  ;;  %v696_v40 = vadd.f32 %v561_v30, %v302_v24  ;;  %v712_v41 = vadd.f32 %v641_v31, %v318_v25  ;;  %v324_v28 = vld [vmem:[#allocation2 + $0xe0] sm:$0xff] }
  0xe6   : > { %878 = vst.msk [vmem:[%s1392_s7 + $0x88] sm:$0xff] %vm263_vm1, %v846_v21  ;;  %v845_v33 = vmax.f32 %v813_v23, 0.0  ;;  %v816_v35 = vadd.f32 %v1379_v63, %v777_v27  ;;  %v760_v38 = vld [vmem:[#allocation2 + $0x10] sm:$0xff]  ;;  %746 = vst.msk [vmem:[#allocation2 + $0xb8] sm:$0xff] %vm263_vm1, %v713_v29  ;;  %v1109_v42 = vpop.f32.mrf.mxu0  ;;  %v1133_v43 = vpop.f32.mrf.mxu1  ;;  %v308_v27 = vld [vmem:[#allocation2 + $0x60] sm:$0xff] }
  0xe7   : > { %v776_v39 = vld [vmem:[#allocation2 + $0x90] sm:$0xff]  ;;  %861 = vst.msk [vmem:[%s1392_s7] sm:$0xff] %vm263_vm1, %v829_v32  ;;  %v832_v44 = vmax.f32 %v800_v34, 0.0  ;;  %v799_v46 = vadd.f32 %v1379_v63, %v760_v38  ;;  %729 = vst.msk [vmem:[#allocation2 + $0x30] sm:$0xff] %vm263_vm1, %v696_v40  ;;  %v699_v52 = vadd.f32 %v1109_v42, %v305_v36  ;;  %v715_v53 = vadd.f32 %v1133_v43, %v321_v37  ;;  %v327_v40 = vld [vmem:[#allocation2 + $0xf8] sm:$0xff] }
  0xe8   : > { %877 = vst.msk [vmem:[%s1392_s7 + $0x80] sm:$0xff] %vm263_vm1, %v845_v33  ;;  %v848_v45 = vmax.f32 %v816_v35, 0.0  ;;  %v815_v47 = vadd.f32 %v1379_v63, %v776_v39  ;;  %v763_v50 = vld [vmem:[#allocation2 + $0x28] sm:$0xff]  ;;  %745 = vst.msk [vmem:[#allocation2 + $0xb0] sm:$0xff] %vm263_vm1, %v712_v41  ;;  %v571_v54 = vpop.f32.mrf.mxu0  ;;  %v651_v55 = vpop.f32.mrf.mxu1  ;;  %v311_v39 = vld [vmem:[#allocation2 + $0x78] sm:$0xff] }
  0xe9   : > { %v779_v51 = vld [vmem:[#allocation2 + $0xa8] sm:$0xff]  ;;  %864 = vst.msk [vmem:[%s1392_s7 + $0x18] sm:$0xff] %vm263_vm1, %v832_v44  ;;  %v831_v56 = vmax.f32 %v799_v46, 0.0  ;;  %v802_v58 = vadd.f32 %v1379_v63, %v763_v50  ;;  %732 = vst.msk [vmem:[#allocation2 + $0x48] sm:$0xff] %vm263_vm1, %v699_v52  ;;  %v698_v2 = vadd.f32 %v571_v54, %v304_v48  ;;  %v714_v3 = vadd.f32 %v651_v55, %v320_v49  ;;  %v326_v52 = vld [vmem:[#allocation2 + $0xf0] sm:$0xff] }
  0xea   : > { %880 = vst.msk [vmem:[%s1392_s7 + $0x98] sm:$0xff] %vm263_vm1, %v848_v45  ;;  %v847_v57 = vmax.f32 %v815_v47, 0.0  ;;  %v818_v59 = vadd.f32 %v1379_v63, %v779_v51  ;;  %v762_v0 = vld [vmem:[#allocation2 + $0x20] sm:$0xff]  ;;  %748 = vst.msk [vmem:[#allocation2 + $0xc8] sm:$0xff] %vm263_vm1, %v715_v53  ;;  %v1112_v4 = vpop.f32.mrf.mxu0  ;;  %v1136_v5 = vpop.f32.mrf.mxu1  ;;  %v310_v51 = vld [vmem:[#allocation2 + $0x70] sm:$0xff] }
  0xeb   : > { %v778_v1 = vld [vmem:[#allocation2 + $0xa0] sm:$0xff]  ;;  %863 = vst.msk [vmem:[%s1392_s7 + $0x10] sm:$0xff] %vm263_vm1, %v831_v56  ;;  %v834_v7 = vmax.f32 %v802_v58, 0.0  ;;  %v801_v9 = vadd.f32 %v1379_v63, %v762_v0  ;;  %731 = vst.msk [vmem:[#allocation2 + $0x40] sm:$0xff] %vm263_vm1, %v698_v2  ;;  %v701_v11 = vadd.f32 %v1112_v4, %v307_v60  ;;  %v717_v12 = vadd.f32 %v1136_v5, %v323_v61 }
  0xec   : > { %879 = vst.msk [vmem:[%s1392_s7 + $0x90] sm:$0xff] %vm263_vm1, %v847_v57  ;;  %v850_v8 = vmax.f32 %v818_v59, 0.0  ;;  %v817_v10 = vadd.f32 %v1379_v63, %v778_v1  ;;  %747 = vst.msk [vmem:[#allocation2 + $0xc0] sm:$0xff] %vm263_vm1, %v714_v3  ;;  %v581_v13 = vpop.f32.mrf.mxu0  ;;  %v661_v14 = vpop.f32.mrf.mxu1  ;;  %v765_v19 = vld [vmem:[#allocation2 + $0x38] sm:$0xff] }
  0xed   : > { %866 = vst.msk [vmem:[%s1392_s7 + $0x28] sm:$0xff] %vm263_vm1, %v834_v7  ;;  %v833_v17 = vmax.f32 %v801_v9, 0.0  ;;  %v781_v20 = vld [vmem:[#allocation2 + $0xb8] sm:$0xff]  ;;  %v700_v21 = vadd.f32 %v581_v13, %v306_v62  ;;  %v716_v22 = vadd.f32 %v661_v14, %v322_v6  ;;  %v804_v23 = vadd.f32 %v1379_v63, %v765_v19  ;;  %734 = vst.msk [vmem:[#allocation2 + $0x58] sm:$0xff] %vm263_vm1, %v701_v11 }
  0xee   : > { %882 = vst.msk [vmem:[%s1392_s7 + $0xa8] sm:$0xff] %vm263_vm1, %v850_v8  ;;  %v849_v18 = vmax.f32 %v817_v10, 0.0  ;;  %v820_v24 = vadd.f32 %v1379_v63, %v781_v20  ;;  %750 = vst.msk [vmem:[#allocation2 + $0xd8] sm:$0xff] %vm263_vm1, %v717_v12  ;;  %v1115_v25 = vpop.f32.mrf.mxu0  ;;  %v1139_v26 = vpop.f32.mrf.mxu1  ;;  %v764_v29 = vld [vmem:[#allocation2 + $0x30] sm:$0xff] }
  0xef   : > { %865 = vst.msk [vmem:[%s1392_s7 + $0x20] sm:$0xff] %vm263_vm1, %v833_v17  ;;  %v780_v30 = vld [vmem:[#allocation2 + $0xb0] sm:$0xff]  ;;  %733 = vst.msk [vmem:[#allocation2 + $0x50] sm:$0xff] %vm263_vm1, %v700_v21  ;;  %v703_v31 = vadd.f32 %v1115_v25, %v309_v15  ;;  %v719_v32 = vadd.f32 %v1139_v26, %v325_v16  ;;  %v836_v33 = vmax.f32 %v804_v23, 0.0  ;;  %v803_v35 = vadd.f32 %v1379_v63, %v764_v29 }
  0xf0   : > { %881 = vst.msk [vmem:[%s1392_s7 + $0xa0] sm:$0xff] %vm263_vm1, %v849_v18  ;;  %749 = vst.msk [vmem:[#allocation2 + $0xd0] sm:$0xff] %vm263_vm1, %v716_v22  ;;  %v852_v34 = vmax.f32 %v820_v24, 0.0  ;;  %v819_v36 = vadd.f32 %v1379_v63, %v780_v30  ;;  %v591_v37 = vpop.f32.mrf.mxu0  ;;  %v671_v38 = vpop.f32.mrf.mxu1  ;;  %v767_v41 = vld [vmem:[#allocation2 + $0x48] sm:$0xff] }
  0xf1   : > { %v783_v42 = vld [vmem:[#allocation2 + $0xc8] sm:$0xff]  ;;  %736 = vst.msk [vmem:[#allocation2 + $0x68] sm:$0xff] %vm263_vm1, %v703_v31  ;;  %752 = vst.msk [vmem:[#allocation2 + $0xe8] sm:$0xff] %vm263_vm1, %v719_v32  ;;  %v702_v43 = vadd.f32 %v591_v37, %v308_v27  ;;  %v718_v44 = vadd.f32 %v671_v38, %v324_v28  ;;  %v835_v45 = vmax.f32 %v803_v35, 0.0  ;;  %v806_v47 = vadd.f32 %v1379_v63, %v767_v41 }
  0xf2   : > { %868 = vst.msk [vmem:[%s1392_s7 + $0x38] sm:$0xff] %vm263_vm1, %v836_v33  ;;  %884 = vst.msk [vmem:[%s1392_s7 + $0xb8] sm:$0xff] %vm263_vm1, %v852_v34  ;;  %v851_v46 = vmax.f32 %v819_v36, 0.0  ;;  %v822_v48 = vadd.f32 %v1379_v63, %v783_v42  ;;  %v1118_v49 = vpop.f32.mrf.mxu0  ;;  %v1142_v50 = vpop.f32.mrf.mxu1  ;;  %v766_v53 = vld [vmem:[#allocation2 + $0x40] sm:$0xff] }
  0xf3   : > { %v782_v54 = vld [vmem:[#allocation2 + $0xc0] sm:$0xff]  ;;  %735 = vst.msk [vmem:[#allocation2 + $0x60] sm:$0xff] %vm263_vm1, %v702_v43  ;;  %751 = vst.msk [vmem:[#allocation2 + $0xe0] sm:$0xff] %vm263_vm1, %v718_v44  ;;  %v705_v55 = vadd.f32 %v1118_v49, %v311_v39  ;;  %v721_v56 = vadd.f32 %v1142_v50, %v327_v40  ;;  %v838_v57 = vmax.f32 %v806_v47, 0.0  ;;  %v805_v59 = vadd.f32 %v1379_v63, %v766_v53 }
  0xf4   : > { %867 = vst.msk [vmem:[%s1392_s7 + $0x30] sm:$0xff] %vm263_vm1, %v835_v45  ;;  %883 = vst.msk [vmem:[%s1392_s7 + $0xb0] sm:$0xff] %vm263_vm1, %v851_v46  ;;  %v854_v58 = vmax.f32 %v822_v48, 0.0  ;;  %v821_v60 = vadd.f32 %v1379_v63, %v782_v54  ;;  %v601_v61 = vpop.f32.mrf.mxu0  ;;  %v681_v62 = vpop.f32.mrf.mxu1  ;;  %v769_v0 = vld [vmem:[#allocation2 + $0x58] sm:$0xff] }
  0xf5   : > { %v785_v1 = vld [vmem:[#allocation2 + $0xd8] sm:$0xff]  ;;  %738 = vst.msk [vmem:[#allocation2 + $0x78] sm:$0xff] %vm263_vm1, %v705_v55  ;;  %754 = vst.msk [vmem:[#allocation2 + $0xf8] sm:$0xff] %vm263_vm1, %v721_v56  ;;  %v704_v2 = vadd.f32 %v601_v61, %v310_v51  ;;  %v720_v3 = vadd.f32 %v681_v62, %v326_v52  ;;  %v837_v4 = vmax.f32 %v805_v59, 0.0  ;;  %v808_v6 = vadd.f32 %v1379_v63, %v769_v0 }
  0xf6   : > { %870 = vst.msk [vmem:[%s1392_s7 + $0x48] sm:$0xff] %vm263_vm1, %v838_v57  ;;  %886 = vst.msk [vmem:[%s1392_s7 + $0xc8] sm:$0xff] %vm263_vm1, %v854_v58  ;;  %v853_v5 = vmax.f32 %v821_v60, 0.0  ;;  %v824_v7 = vadd.f32 %v1379_v63, %v785_v1  ;;  %v768_v8 = vld [vmem:[#allocation2 + $0x50] sm:$0xff] }
  0xf7   : > { %v784_v9 = vld [vmem:[#allocation2 + $0xd0] sm:$0xff]  ;;  %v807_v10 = vadd.f32 %v1379_v63, %v768_v8  ;;  %737 = vst.msk [vmem:[#allocation2 + $0x70] sm:$0xff] %vm263_vm1, %v704_v2  ;;  %753 = vst.msk [vmem:[#allocation2 + $0xf0] sm:$0xff] %vm263_vm1, %v720_v3  ;;  %v840_v12 = vmax.f32 %v808_v6, 0.0 }
  0xf8   : > { %v823_v11 = vadd.f32 %v1379_v63, %v784_v9  ;;  %869 = vst.msk [vmem:[%s1392_s7 + $0x40] sm:$0xff] %vm263_vm1, %v837_v4  ;;  %885 = vst.msk [vmem:[%s1392_s7 + $0xc0] sm:$0xff] %vm263_vm1, %v853_v5  ;;  %v856_v13 = vmax.f32 %v824_v7, 0.0  ;;  %v771_v14 = vld [vmem:[#allocation2 + $0x68] sm:$0xff] }
  0xf9   : > { %v787_v15 = vld [vmem:[#allocation2 + $0xe8] sm:$0xff]  ;;  %v839_v16 = vmax.f32 %v807_v10, 0.0  ;;  %v810_v18 = vadd.f32 %v1379_v63, %v771_v14  ;;  %872 = vst.msk [vmem:[%s1392_s7 + $0x58] sm:$0xff] %vm263_vm1, %v840_v12 }
  0xfa   : > { %v855_v17 = vmax.f32 %v823_v11, 0.0  ;;  %v826_v19 = vadd.f32 %v1379_v63, %v787_v15  ;;  %888 = vst.msk [vmem:[%s1392_s7 + $0xd8] sm:$0xff] %vm263_vm1, %v856_v13  ;;  %v770_v20 = vld [vmem:[#allocation2 + $0x60] sm:$0xff] }
  0xfb   : > { %v786_v21 = vld [vmem:[#allocation2 + $0xe0] sm:$0xff]  ;;  %871 = vst.msk [vmem:[%s1392_s7 + $0x50] sm:$0xff] %vm263_vm1, %v839_v16  ;;  %v842_v22 = vmax.f32 %v810_v18, 0.0  ;;  %v809_v24 = vadd.f32 %v1379_v63, %v770_v20 }
  0xfc   : > { %887 = vst.msk [vmem:[%s1392_s7 + $0xd0] sm:$0xff] %vm263_vm1, %v855_v17  ;;  %v858_v23 = vmax.f32 %v826_v19, 0.0  ;;  %v825_v25 = vadd.f32 %v1379_v63, %v786_v21  ;;  %v773_v26 = vld [vmem:[#allocation2 + $0x78] sm:$0xff] }
  0xfd   : > { %v789_v27 = vld [vmem:[#allocation2 + $0xf8] sm:$0xff]  ;;  %874 = vst.msk [vmem:[%s1392_s7 + $0x68] sm:$0xff] %vm263_vm1, %v842_v22  ;;  %v841_v28 = vmax.f32 %v809_v24, 0.0  ;;  %v812_v30 = vadd.f32 %v1379_v63, %v773_v26 }
  0xfe   : > { %890 = vst.msk [vmem:[%s1392_s7 + $0xe8] sm:$0xff] %vm263_vm1, %v858_v23  ;;  %v857_v29 = vmax.f32 %v825_v25, 0.0  ;;  %v828_v31 = vadd.f32 %v1379_v63, %v789_v27  ;;  %v772_v32 = vld [vmem:[#allocation2 + $0x70] sm:$0xff] }
  0xff   : > { %v788_v33 = vld [vmem:[#allocation2 + $0xf0] sm:$0xff]  ;;  %873 = vst.msk [vmem:[%s1392_s7 + $0x60] sm:$0xff] %vm263_vm1, %v841_v28  ;;  %v844_v34 = vmax.f32 %v812_v30, 0.0  ;;  %v811_v36 = vadd.f32 %v1379_v63, %v772_v32 }
 0x100   : > { %889 = vst.msk [vmem:[%s1392_s7 + $0xe0] sm:$0xff] %vm263_vm1, %v857_v29  ;;  %v860_v35 = vmax.f32 %v828_v31, 0.0  ;;  %v827_v37 = vadd.f32 %v1379_v63, %v788_v33 }
 0x101   : > { %876 = vst.msk [vmem:[%s1392_s7 + $0x78] sm:$0xff] %vm263_vm1, %v844_v34  ;;  %v843_v38 = vmax.f32 %v811_v36, 0.0 }
 0x102   : > { %892 = vst.msk [vmem:[%s1392_s7 + $0xf8] sm:$0xff] %vm263_vm1, %v860_v35  ;;  %v859_v39 = vmax.f32 %v827_v37, 0.0 }
 0x103   : > { %875 = vst.msk [vmem:[%s1392_s7 + $0x70] sm:$0xff] %vm263_vm1, %v843_v38 }
 0x104   : > { %891 = vst.msk [vmem:[%s1392_s7 + $0xf0] sm:$0xff] %vm263_vm1, %v859_v39 }
 0x105 PF: > { %s13_s14 = sadd.s32 1, %s1198_s14   ;;  %s1524_s12 = smov %s1194_s13 }
 0x106   : > { %p10_p5 = scmp.ge.s32.totalorder %s13_s14, 4   ;;  %s1525_s13 = smov %s1527_s15 }
 0x108   :  { %12 = sbr.rel (!%p10_p5) target bundleno = 2 (0x2), region = 76 }

// kernel: viteff_forward.15
= control target key start
LH: loop header
LB: loop body
LE: loop exit
PB: predicated region body
PF: predicated region fallthrough
CT: control target
= control target key end

     0   :  { %vm18_vm0 = vcmask 130048   ;;  %v484_v2 = vmov 0.0   ;;  %vm76_vm1 = vcmask 588800   ;;  %s713_s1 = inlined_call_operand.vmem [shape: f32[72,16], index: 1, kind: input, shape index: {}]   ;;  %s714_s0 = inlined_call_operand.vmem [shape: f32[128,72], index: 0, kind: input, shape index: {}]   ;;  %s715_s2 = inlined_call_operand.vmem [shape: f32[1,16], index: 2, kind: input, shape index: {}]   ;;  %s716_s3 = inlined_call_operand.vmem [shape: f32[128,16], index: 3, kind: output, shape index: {}]  }
   0x1   :  { %v75_v0 = vld [vmem:[%s713_s1 + $0x40] sm:$0xff]  ;;  %v74_v1 = vld [vmem:[%s713_s1 + $0x38] sm:$0xff]  ;;  %20 = vst.msk [vmem:[#allocation2 + $0x8] sm:$0xff] %vm18_vm0, %v484_v2  ;;  %19 = vst.msk [vmem:[#allocation2] sm:$0xff] %vm18_vm0, %v484_v2 }
   0x2   :  { %21 = vst.msk [vmem:[#allocation2 + $0x10] sm:$0xff] %vm18_vm0, %v484_v2  ;;  %22 = vst.msk [vmem:[#allocation2 + $0x18] sm:$0xff] %vm18_vm0, %v484_v2  ;;  %423 = vmatprep.subr.mxu0 %v75_v0  ;;  %465 = vmatprep.subr.mxu1 %v75_v0  ;;  %v73_v3 = vld [vmem:[%s713_s1 + $0x30] sm:$0xff]  ;;  %v72_v4 = vld [vmem:[%s713_s1 + $0x28] sm:$0xff] }
   0x3   :  { %23 = vst.msk [vmem:[#allocation2 + $0x20] sm:$0xff] %vm18_vm0, %v484_v2  ;;  %24 = vst.msk [vmem:[#allocation2 + $0x28] sm:$0xff] %vm18_vm0, %v484_v2  ;;  %424 = vmatpush3.msra.mxu0 %v75_v0  ;;  %474 = vmatpush3.msra.mxu1 %v75_v0  ;;  %v71_v5 = vld [vmem:[%s713_s1 + $0x20] sm:$0xff]  ;;  %v70_v6 = vld [vmem:[%s713_s1 + $0x18] sm:$0xff] }
   0x4   :  { %25 = vst.msk [vmem:[#allocation2 + $0x30] sm:$0xff] %vm18_vm0, %v484_v2  ;;  %26 = vst.msk [vmem:[#allocation2 + $0x38] sm:$0xff] %vm18_vm0, %v484_v2  ;;  %425 = vmatprep.subr.mxu0 %v74_v1  ;;  %466 = vmatprep.subr.mxu1 %v74_v1  ;;  %v69_v7 = vld [vmem:[%s713_s1 + $0x10] sm:$0xff]  ;;  %v68_v8 = vld [vmem:[%s713_s1 + $0x8] sm:$0xff] }
   0x5   :  { %27 = vst.msk [vmem:[#allocation2 + $0x40] sm:$0xff] %vm18_vm0, %v484_v2  ;;  %28 = vst.msk [vmem:[#allocation2 + $0x48] sm:$0xff] %vm18_vm0, %v484_v2  ;;  %426 = vmatpush3.msra.mxu0 %v74_v1  ;;  %475 = vmatpush3.msra.mxu1 %v74_v1  ;;  %v67_v9 = vld [vmem:[%s713_s1] sm:$0xff]  ;;  %v52_v12 = vld [vmem:[%s714_s0 + $0x8] sm:$0xff] }
   0x6   :  { %29 = vst.msk [vmem:[#allocation2 + $0x50] sm:$0xff] %vm18_vm0, %v484_v2  ;;  %30 = vst.msk [vmem:[#allocation2 + $0x58] sm:$0xff] %vm18_vm0, %v484_v2  ;;  %427 = vmatprep.subr.mxu0 %v73_v3  ;;  %467 = vmatprep.subr.mxu1 %v73_v3  ;;  %v51_v10 = vld [vmem:[%s714_s0] sm:$0xff]  ;;  %v60_v13 = vld [vmem:[%s714_s0 + $0x48] sm:$0xff] }
   0x7   :  { %31 = vst.msk [vmem:[#allocation2 + $0x60] sm:$0xff] %vm18_vm0, %v484_v2  ;;  %32 = vst.msk [vmem:[#allocation2 + $0x68] sm:$0xff] %vm18_vm0, %v484_v2  ;;  %428 = vmatpush3.msra.mxu0 %v73_v3  ;;  %476 = vmatpush3.msra.mxu1 %v73_v3  ;;  %v59_v11 = vld [vmem:[%s714_s0 + $0x40] sm:$0xff]  ;;  %v53_v14 = vld [vmem:[%s714_s0 + $0x10] sm:$0xff] }
   0x8   :  { %33 = vst.msk [vmem:[#allocation2 + $0x70] sm:$0xff] %vm18_vm0, %v484_v2  ;;  %34 = vst.msk [vmem:[#allocation2 + $0x78] sm:$0xff] %vm18_vm0, %v484_v2  ;;  %429 = vmatprep.subr.mxu0 %v72_v4  ;;  %468 = vmatprep.subr.mxu1 %v72_v4  ;;  %v61_v15 = vld [vmem:[%s714_s0 + $0x50] sm:$0xff]  ;;  %v54_v16 = vld [vmem:[%s714_s0 + $0x18] sm:$0xff] }
   0x9   :  { %430 = vmatpush3.msra.mxu0 %v72_v4  ;;  %477 = vmatpush3.msra.mxu1 %v72_v4  ;;  %v62_v17 = vld [vmem:[%s714_s0 + $0x58] sm:$0xff]  ;;  %v55_v18 = vld [vmem:[%s714_s0 + $0x20] sm:$0xff]  ;;  %v56_v20 = vld [vmem:[%s714_s0 + $0x28] sm:$0xff] }
   0xa   :  { %431 = vmatprep.subr.mxu0 %v71_v5  ;;  %469 = vmatprep.subr.mxu1 %v71_v5  ;;  %v63_v19 = vld [vmem:[%s714_s0 + $0x60] sm:$0xff]  ;;  %v64_v21 = vld [vmem:[%s714_s0 + $0x68] sm:$0xff]  ;;  %v57_v22 = vld [vmem:[%s714_s0 + $0x30] sm:$0xff] }
   0xb   :  { %432 = vmatpush3.msra.mxu0 %v71_v5  ;;  %478 = vmatpush3.msra.mxu1 %v71_v5  ;;  %v65_v23 = vld [vmem:[%s714_s0 + $0x70] sm:$0xff]  ;;  %v58_v24 = vld [vmem:[%s714_s0 + $0x38] sm:$0xff]  ;;  %v36_v26 = vld [vmem:[#allocation2 + $0x8] sm:$0xff] }
   0xc   :  { %433 = vmatprep.subr.mxu0 %v70_v6  ;;  %470 = vmatprep.subr.mxu1 %v70_v6  ;;  %v66_v25 = vld [vmem:[%s714_s0 + $0x78] sm:$0xff]  ;;  %v44_v27 = vld [vmem:[#allocation2 + $0x48] sm:$0xff]  ;;  %v35_v30 = vld [vmem:[#allocation2] sm:$0xff] }
   0xd   :  { %434 = vmatpush3.msra.mxu0 %v70_v6  ;;  %479 = vmatpush3.msra.mxu1 %v70_v6  ;;  %v43_v31 = vld [vmem:[#allocation2 + $0x40] sm:$0xff]  ;;  %v38_v36 = vld [vmem:[#allocation2 + $0x18] sm:$0xff]  ;;  %v37_v42 = vld [vmem:[#allocation2 + $0x10] sm:$0xff] }
   0xe   :  { %435 = vmatprep.subr.mxu0 %v69_v7  ;;  %471 = vmatprep.subr.mxu1 %v69_v7  ;;  %v46_v37 = vld [vmem:[#allocation2 + $0x58] sm:$0xff]  ;;  %v45_v43 = vld [vmem:[#allocation2 + $0x50] sm:$0xff]  ;;  %v40_v48 = vld [vmem:[#allocation2 + $0x28] sm:$0xff] }
   0xf   :  { %436 = vmatpush3.msra.mxu0 %v69_v7  ;;  %480 = vmatpush3.msra.mxu1 %v69_v7  ;;  %v48_v49 = vld [vmem:[#allocation2 + $0x68] sm:$0xff]  ;;  %v621_v52 = vld [vmem:[%s715_s2] ss:$0 sm:$0xff]  ;;  %v42_v3 = vld [vmem:[#allocation2 + $0x38] sm:$0xff] }
  0x10   :  { %437 = vmatprep.subr.mxu0 %v68_v8  ;;  %472 = vmatprep.subr.mxu1 %v68_v8  ;;  %v39_v55 = vld [vmem:[#allocation2 + $0x20] sm:$0xff]  ;;  %v50_v4 = vld [vmem:[#allocation2 + $0x78] sm:$0xff] }
  0x11   :  { %438 = vmatpush3.msra.mxu0 %v68_v8  ;;  %481 = vmatpush3.msra.mxu1 %v68_v8  ;;  %v47_v56 = vld [vmem:[#allocation2 + $0x60] sm:$0xff] }
  0x12   :  { %439 = vmatprep.subr.mxu0 %v67_v9  ;;  %473 = vmatprep.subr.mxu1 %v67_v9 }
  0x13   :  { %440 = vmatpush3.msra.mxu0 %v67_v9  ;;  %482 = vmatpush3.msra.mxu1 %v67_v9 }
  0x14   :  { %441 = vmatprep.mubr.msk.f32.mxu0 %vm76_vm1, %v51_v10  ;;  %453 = vmatprep.mubr.msk.f32.mxu1 %vm76_vm1, %v59_v11 }
  0x15   :  { %442 = vmatmul.mubr.msk.f32.vlgmr.msra.gmra.mxu0 %vm76_vm1, %v52_v12  ;;  %454 = vmatmul.mubr.msk.f32.vlgmr.msra.gmra.mxu1 %vm76_vm1, %v60_v13  ;;  %v41_v13 = vld [vmem:[#allocation2 + $0x30] sm:$0xff] }
  0x16   :  { %444 = vmatprep.mubr.msk.f32.mxu0 %vm76_vm1, %v53_v14  ;;  %456 = vmatprep.mubr.msk.f32.mxu1 %vm76_vm1, %v61_v15  ;;  %v49_v14 = vld [vmem:[#allocation2 + $0x70] sm:$0xff] }
  0x19   :  { %445 = vmatmul.mubr.msk.f32.gmra.mxu0 %vm76_vm1, %v54_v16  ;;  %457 = vmatmul.mubr.msk.f32.gmra.mxu1 %vm76_vm1, %v62_v17 }
  0x1a   :  { %447 = vmatprep.mubr.msk.f32.mxu0 %vm76_vm1, %v55_v18  ;;  %459 = vmatprep.mubr.msk.f32.mxu1 %vm76_vm1, %v63_v19 }
  0x1d   :  { %448 = vmatmul.mubr.msk.f32.gmra.mxu0 %vm76_vm1, %v56_v20  ;;  %460 = vmatmul.mubr.msk.f32.gmra.mxu1 %vm76_vm1, %v64_v21 }
  0x1e   :  { %450 = vmatprep.mubr.msk.f32.mxu0 %vm76_vm1, %v57_v22  ;;  %462 = vmatprep.mubr.msk.f32.mxu1 %vm76_vm1, %v65_v23 }
  0x21   :  { %451 = vmatmul.mubr.msk.f32.gmra.mxu0 %vm76_vm1, %v58_v24  ;;  %463 = vmatmul.mubr.msk.f32.gmra.mxu1 %vm76_vm1, %v66_v25 }
  0xd5   :  { %v443_v28 = vpop.f32.mrf.mxu0  ;;  %v455_v29 = vpop.f32.mrf.mxu1 }
  0xd6   :  { %v271_v32 = vadd.f32 %v443_v28, %v36_v26  ;;  %v279_v33 = vadd.f32 %v455_v29, %v44_v27 }
  0xd7   :  { %v191_v34 = vpop.f32.mrf.mxu0  ;;  %v231_v35 = vpop.f32.mrf.mxu1 }
  0xd8   :  { %288 = vst.msk [vmem:[#allocation2 + $0x8] sm:$0xff] %vm18_vm0, %v271_v32  ;;  %296 = vst.msk [vmem:[#allocation2 + $0x48] sm:$0xff] %vm18_vm0, %v279_v33  ;;  %v270_v38 = vadd.f32 %v191_v34, %v35_v30  ;;  %v278_v39 = vadd.f32 %v231_v35, %v43_v31 }
  0xd9   :  { %v446_v40 = vpop.f32.mrf.mxu0  ;;  %v458_v41 = vpop.f32.mrf.mxu1 }
  0xda   :  { %287 = vst.msk [vmem:[#allocation2] sm:$0xff] %vm18_vm0, %v270_v38  ;;  %295 = vst.msk [vmem:[#allocation2 + $0x40] sm:$0xff] %vm18_vm0, %v278_v39  ;;  %v273_v44 = vadd.f32 %v446_v40, %v38_v36  ;;  %v281_v45 = vadd.f32 %v458_v41, %v46_v37 }
  0xdb   :  { %v201_v46 = vpop.f32.mrf.mxu0  ;;  %v241_v47 = vpop.f32.mrf.mxu1 }
  0xdc   :  { %290 = vst.msk [vmem:[#allocation2 + $0x18] sm:$0xff] %vm18_vm0, %v273_v44  ;;  %298 = vst.msk [vmem:[#allocation2 + $0x58] sm:$0xff] %vm18_vm0, %v281_v45  ;;  %v272_v50 = vadd.f32 %v201_v46, %v37_v42  ;;  %v280_v51 = vadd.f32 %v241_v47, %v45_v43 }
  0xdd   :  { %v449_v53 = vpop.f32.mrf.mxu0  ;;  %v461_v54 = vpop.f32.mrf.mxu1 }
  0xde   :  { %289 = vst.msk [vmem:[#allocation2 + $0x10] sm:$0xff] %vm18_vm0, %v272_v50  ;;  %297 = vst.msk [vmem:[#allocation2 + $0x50] sm:$0xff] %vm18_vm0, %v280_v51  ;;  %v275_v57 = vadd.f32 %v449_v53, %v40_v48  ;;  %v283_v58 = vadd.f32 %v461_v54, %v48_v49 }
  0xdf   :  { %v307_v59 = vld [vmem:[#allocation2 + $0x8] sm:$0xff]  ;;  %v211_v61 = vpop.f32.mrf.mxu0  ;;  %v251_v62 = vpop.f32.mrf.mxu1 }
  0xe0   :  { %v315_v60 = vld [vmem:[#allocation2 + $0x48] sm:$0xff]  ;;  %v330_v63 = vadd.f32 %v621_v52, %v307_v59  ;;  %292 = vst.msk [vmem:[#allocation2 + $0x28] sm:$0xff] %vm18_vm0, %v275_v57  ;;  %300 = vst.msk [vmem:[#allocation2 + $0x68] sm:$0xff] %vm18_vm0, %v283_v58  ;;  %v274_v1 = vadd.f32 %v211_v61, %v39_v55  ;;  %v282_v2 = vadd.f32 %v251_v62, %v47_v56 }
  0xe1   :  { %v338_v0 = vadd.f32 %v621_v52, %v315_v60  ;;  %v306_v5 = vld [vmem:[#allocation2] sm:$0xff]  ;;  %v452_v7 = vpop.f32.mrf.mxu0  ;;  %v464_v8 = vpop.f32.mrf.mxu1 }
  0xe2   :  { %v314_v6 = vld [vmem:[#allocation2 + $0x40] sm:$0xff]  ;;  %v346_v9 = vmax.f32 %v330_v63, 0.0  ;;  %v329_v11 = vadd.f32 %v621_v52, %v306_v5  ;;  %291 = vst.msk [vmem:[#allocation2 + $0x20] sm:$0xff] %vm18_vm0, %v274_v1  ;;  %299 = vst.msk [vmem:[#allocation2 + $0x60] sm:$0xff] %vm18_vm0, %v282_v2  ;;  %v277_v17 = vadd.f32 %v452_v7, %v42_v3  ;;  %v285_v18 = vadd.f32 %v464_v8, %v50_v4 }
  0xe3   :  { %v354_v10 = vmax.f32 %v338_v0, 0.0  ;;  %v337_v12 = vadd.f32 %v621_v52, %v314_v6  ;;  %v309_v15 = vld [vmem:[#allocation2 + $0x18] sm:$0xff]  ;;  %v221_v19 = vpop.f32.mrf.mxu0  ;;  %v261_v20 = vpop.f32.mrf.mxu1 }
  0xe4   :  { %v317_v16 = vld [vmem:[#allocation2 + $0x58] sm:$0xff]  ;;  %362 = vst.msk [vmem:[%s716_s3 + $0x8] sm:$0xff] %vm18_vm0, %v346_v9  ;;  %v345_v21 = vmax.f32 %v329_v11, 0.0  ;;  %v332_v23 = vadd.f32 %v621_v52, %v309_v15  ;;  %294 = vst.msk [vmem:[#allocation2 + $0x38] sm:$0xff] %vm18_vm0, %v277_v17  ;;  %v276_v27 = vadd.f32 %v221_v19, %v41_v13  ;;  %v284_v28 = vadd.f32 %v261_v20, %v49_v14 }
  0xe5   :  { %370 = vst.msk [vmem:[%s716_s3 + $0x48] sm:$0xff] %vm18_vm0, %v354_v10  ;;  %v353_v22 = vmax.f32 %v337_v12, 0.0  ;;  %v340_v24 = vadd.f32 %v621_v52, %v317_v16  ;;  %v308_v25 = vld [vmem:[#allocation2 + $0x10] sm:$0xff]  ;;  %302 = vst.msk [vmem:[#allocation2 + $0x78] sm:$0xff] %vm18_vm0, %v285_v18 }
  0xe6   :  { %v316_v26 = vld [vmem:[#allocation2 + $0x50] sm:$0xff]  ;;  %361 = vst.msk [vmem:[%s716_s3] sm:$0xff] %vm18_vm0, %v345_v21  ;;  %v348_v29 = vmax.f32 %v332_v23, 0.0  ;;  %v331_v31 = vadd.f32 %v621_v52, %v308_v25  ;;  %293 = vst.msk [vmem:[#allocation2 + $0x30] sm:$0xff] %vm18_vm0, %v276_v27 }
  0xe7   :  { %369 = vst.msk [vmem:[%s716_s3 + $0x40] sm:$0xff] %vm18_vm0, %v353_v22  ;;  %v356_v30 = vmax.f32 %v340_v24, 0.0  ;;  %v339_v32 = vadd.f32 %v621_v52, %v316_v26  ;;  %v311_v33 = vld [vmem:[#allocation2 + $0x28] sm:$0xff]  ;;  %301 = vst.msk [vmem:[#allocation2 + $0x70] sm:$0xff] %vm18_vm0, %v284_v28 }
  0xe8   :  { %v319_v34 = vld [vmem:[#allocation2 + $0x68] sm:$0xff]  ;;  %364 = vst.msk [vmem:[%s716_s3 + $0x18] sm:$0xff] %vm18_vm0, %v348_v29  ;;  %v347_v35 = vmax.f32 %v331_v31, 0.0  ;;  %v334_v37 = vadd.f32 %v621_v52, %v311_v33 }
  0xe9   :  { %372 = vst.msk [vmem:[%s716_s3 + $0x58] sm:$0xff] %vm18_vm0, %v356_v30  ;;  %v355_v36 = vmax.f32 %v339_v32, 0.0  ;;  %v342_v38 = vadd.f32 %v621_v52, %v319_v34  ;;  %v310_v39 = vld [vmem:[#allocation2 + $0x20] sm:$0xff] }
  0xea   :  { %v318_v40 = vld [vmem:[#allocation2 + $0x60] sm:$0xff]  ;;  %363 = vst.msk [vmem:[%s716_s3 + $0x10] sm:$0xff] %vm18_vm0, %v347_v35  ;;  %v350_v41 = vmax.f32 %v334_v37, 0.0  ;;  %v333_v43 = vadd.f32 %v621_v52, %v310_v39 }
  0xeb   :  { %371 = vst.msk [vmem:[%s716_s3 + $0x50] sm:$0xff] %vm18_vm0, %v355_v36  ;;  %v358_v42 = vmax.f32 %v342_v38, 0.0  ;;  %v341_v44 = vadd.f32 %v621_v52, %v318_v40  ;;  %v313_v47 = vld [vmem:[#allocation2 + $0x38] sm:$0xff] }
  0xec   :  { %366 = vst.msk [vmem:[%s716_s3 + $0x28] sm:$0xff] %vm18_vm0, %v350_v41  ;;  %v349_v45 = vmax.f32 %v333_v43, 0.0  ;;  %v321_v48 = vld [vmem:[#allocation2 + $0x78] sm:$0xff]  ;;  %v336_v49 = vadd.f32 %v621_v52, %v313_v47 }
  0xed   :  { %374 = vst.msk [vmem:[%s716_s3 + $0x68] sm:$0xff] %vm18_vm0, %v358_v42  ;;  %v357_v46 = vmax.f32 %v341_v44, 0.0  ;;  %v344_v50 = vadd.f32 %v621_v52, %v321_v48  ;;  %v312_v51 = vld [vmem:[#allocation2 + $0x30] sm:$0xff] }
  0xee   :  { %365 = vst.msk [vmem:[%s716_s3 + $0x20] sm:$0xff] %vm18_vm0, %v349_v45  ;;  %v320_v53 = vld [vmem:[#allocation2 + $0x70] sm:$0xff]  ;;  %v352_v54 = vmax.f32 %v336_v49, 0.0  ;;  %v335_v56 = vadd.f32 %v621_v52, %v312_v51 }
  0xef   :  { %373 = vst.msk [vmem:[%s716_s3 + $0x60] sm:$0xff] %vm18_vm0, %v357_v46  ;;  %v360_v55 = vmax.f32 %v344_v50, 0.0  ;;  %v343_v57 = vadd.f32 %v621_v52, %v320_v53 }
  0xf0   :  { %368 = vst.msk [vmem:[%s716_s3 + $0x38] sm:$0xff] %vm18_vm0, %v352_v54  ;;  %v351_v58 = vmax.f32 %v335_v56, 0.0 }
  0xf1   :  { %376 = vst.msk [vmem:[%s716_s3 + $0x78] sm:$0xff] %vm18_vm0, %v360_v55  ;;  %v359_v59 = vmax.f32 %v343_v57, 0.0 }
  0xf2   :  { %367 = vst.msk [vmem:[%s716_s3 + $0x30] sm:$0xff] %vm18_vm0, %v351_v58 }
  0xf3   :  { %375 = vst.msk [vmem:[%s716_s3 + $0x70] sm:$0xff] %vm18_vm0, %v359_v59 }

// kernel: viteff_forward.18
= control target key start
LH: loop header
LB: loop body
LE: loop exit
PB: predicated region body
PF: predicated region fallthrough
CT: control target
= control target key end

     0   :  { %vm18_vm0 = vcmask 261120   ;;  %v468_v2 = vmov 0.0   ;;  %vm76_vm1 = vcmask 588800   ;;  %s697_s1 = inlined_call_operand.vmem [shape: f32[72,32], index: 1, kind: input, shape index: {}]   ;;  %s698_s0 = inlined_call_operand.vmem [shape: f32[128,72], index: 0, kind: input, shape index: {}]   ;;  %s699_s2 = inlined_call_operand.vmem [shape: f32[1,32], index: 2, kind: input, shape index: {}]   ;;  %s700_s3 = inlined_call_operand.vmem [shape: f32[128,32], index: 3, kind: output, shape index: {}]  }
   0x1   :  { %v75_v0 = vld [vmem:[%s697_s1 + $0x40] sm:$0xff]  ;;  %v74_v1 = vld [vmem:[%s697_s1 + $0x38] sm:$0xff]  ;;  %20 = vst.msk [vmem:[#allocation2 + $0x8] sm:$0xff] %vm18_vm0, %v468_v2  ;;  %19 = vst.msk [vmem:[#allocation2] sm:$0xff] %vm18_vm0, %v468_v2 }
   0x2   :  { %21 = vst.msk [vmem:[#allocation2 + $0x10] sm:$0xff] %vm18_vm0, %v468_v2  ;;  %22 = vst.msk [vmem:[#allocation2 + $0x18] sm:$0xff] %vm18_vm0, %v468_v2  ;;  %407 = vmatprep.subr.mxu0 %v75_v0  ;;  %449 = vmatprep.subr.mxu1 %v75_v0  ;;  %v73_v3 = vld [vmem:[%s697_s1 + $0x30] sm:$0xff]  ;;  %v72_v4 = vld [vmem:[%s697_s1 + $0x28] sm:$0xff] }
   0x3   :  { %23 = vst.msk [vmem:[#allocation2 + $0x20] sm:$0xff] %vm18_vm0, %v468_v2  ;;  %24 = vst.msk [vmem:[#allocation2 + $0x28] sm:$0xff] %vm18_vm0, %v468_v2  ;;  %408 = vmatpush3.msra.mxu0 %v75_v0  ;;  %458 = vmatpush3.msra.mxu1 %v75_v0  ;;  %v71_v5 = vld [vmem:[%s697_s1 + $0x20] sm:$0xff]  ;;  %v70_v6 = vld [vmem:[%s697_s1 + $0x18] sm:$0xff] }
   0x4   :  { %25 = vst.msk [vmem:[#allocation2 + $0x30] sm:$0xff] %vm18_vm0, %v468_v2  ;;  %26 = vst.msk [vmem:[#allocation2 + $0x38] sm:$0xff] %vm18_vm0, %v468_v2  ;;  %409 = vmatprep.subr.mxu0 %v74_v1  ;;  %450 = vmatprep.subr.mxu1 %v74_v1  ;;  %v69_v7 = vld [vmem:[%s697_s1 + $0x10] sm:$0xff]  ;;  %v68_v8 = vld [vmem:[%s697_s1 + $0x8] sm:$0xff] }
   0x5   :  { %27 = vst.msk [vmem:[#allocation2 + $0x40] sm:$0xff] %vm18_vm0, %v468_v2  ;;  %28 = vst.msk [vmem:[#allocation2 + $0x48] sm:$0xff] %vm18_vm0, %v468_v2  ;;  %410 = vmatpush3.msra.mxu0 %v74_v1  ;;  %459 = vmatpush3.msra.mxu1 %v74_v1  ;;  %v67_v9 = vld [vmem:[%s697_s1] sm:$0xff]  ;;  %v52_v12 = vld [vmem:[%s698_s0 + $0x8] sm:$0xff] }
   0x6   :  { %29 = vst.msk [vmem:[#allocation2 + $0x50] sm:$0xff] %vm18_vm0, %v468_v2  ;;  %30 = vst.msk [vmem:[#allocation2 + $0x58] sm:$0xff] %vm18_vm0, %v468_v2  ;;  %411 = vmatprep.subr.mxu0 %v73_v3  ;;  %451 = vmatprep.subr.mxu1 %v73_v3  ;;  %v51_v10 = vld [vmem:[%s698_s0] sm:$0xff]  ;;  %v60_v13 = vld [vmem:[%s698_s0 + $0x48] sm:$0xff] }
   0x7   :  { %31 = vst.msk [vmem:[#allocation2 + $0x60] sm:$0xff] %vm18_vm0, %v468_v2  ;;  %32 = vst.msk [vmem:[#allocation2 + $0x68] sm:$0xff] %vm18_vm0, %v468_v2  ;;  %412 = vmatpush3.msra.mxu0 %v73_v3  ;;  %460 = vmatpush3.msra.mxu1 %v73_v3  ;;  %v59_v11 = vld [vmem:[%s698_s0 + $0x40] sm:$0xff]  ;;  %v53_v14 = vld [vmem:[%s698_s0 + $0x10] sm:$0xff] }
   0x8   :  { %33 = vst.msk [vmem:[#allocation2 + $0x70] sm:$0xff] %vm18_vm0, %v468_v2  ;;  %34 = vst.msk [vmem:[#allocation2 + $0x78] sm:$0xff] %vm18_vm0, %v468_v2  ;;  %413 = vmatprep.subr.mxu0 %v72_v4  ;;  %452 = vmatprep.subr.mxu1 %v72_v4  ;;  %v61_v15 = vld [vmem:[%s698_s0 + $0x50] sm:$0xff]  ;;  %v54_v16 = vld [vmem:[%s698_s0 + $0x18] sm:$0xff] }
   0x9   :  { %414 = vmatpush3.msra.mxu0 %v72_v4  ;;  %461 = vmatpush3.msra.mxu1 %v72_v4  ;;  %v62_v17 = vld [vmem:[%s698_s0 + $0x58] sm:$0xff]  ;;  %v55_v18 = vld [vmem:[%s698_s0 + $0x20] sm:$0xff]  ;;  %v56_v20 = vld [vmem:[%s698_s0 + $0x28] sm:$0xff] }
   0xa   :  { %415 = vmatprep.subr.mxu0 %v71_v5  ;;  %453 = vmatprep.subr.mxu1 %v71_v5  ;;  %v63_v19 = vld [vmem:[%s698_s0 + $0x60] sm:$0xff]  ;;  %v64_v21 = vld [vmem:[%s698_s0 + $0x68] sm:$0xff]  ;;  %v57_v22 = vld [vmem:[%s698_s0 + $0x30] sm:$0xff] }
   0xb   :  { %416 = vmatpush3.msra.mxu0 %v71_v5  ;;  %462 = vmatpush3.msra.mxu1 %v71_v5  ;;  %v65_v23 = vld [vmem:[%s698_s0 + $0x70] sm:$0xff]  ;;  %v58_v24 = vld [vmem:[%s698_s0 + $0x38] sm:$0xff]  ;;  %v36_v26 = vld [vmem:[#allocation2 + $0x8] sm:$0xff] }
   0xc   :  { %417 = vmatprep.subr.mxu0 %v70_v6  ;;  %454 = vmatprep.subr.mxu1 %v70_v6  ;;  %v66_v25 = vld [vmem:[%s698_s0 + $0x78] sm:$0xff]  ;;  %v44_v27 = vld [vmem:[#allocation2 + $0x48] sm:$0xff]  ;;  %v35_v30 = vld [vmem:[#allocation2] sm:$0xff] }
   0xd   :  { %418 = vmatpush3.msra.mxu0 %v70_v6  ;;  %463 = vmatpush3.msra.mxu1 %v70_v6  ;;  %v43_v31 = vld [vmem:[#allocation2 + $0x40] sm:$0xff]  ;;  %v38_v36 = vld [vmem:[#allocation2 + $0x18] sm:$0xff]  ;;  %v37_v42 = vld [vmem:[#allocation2 + $0x10] sm:$0xff] }
   0xe   :  { %419 = vmatprep.subr.mxu0 %v69_v7  ;;  %455 = vmatprep.subr.mxu1 %v69_v7  ;;  %v46_v37 = vld [vmem:[#allocation2 + $0x58] sm:$0xff]  ;;  %v45_v43 = vld [vmem:[#allocation2 + $0x50] sm:$0xff]  ;;  %v40_v48 = vld [vmem:[#allocation2 + $0x28] sm:$0xff] }
   0xf   :  { %420 = vmatpush3.msra.mxu0 %v69_v7  ;;  %464 = vmatpush3.msra.mxu1 %v69_v7  ;;  %v48_v49 = vld [vmem:[#allocation2 + $0x68] sm:$0xff]  ;;  %v605_v52 = vld [vmem:[%s699_s2] ss:$0 sm:$0xff]  ;;  %v42_v59 = vld [vmem:[#allocation2 + $0x38] sm:$0xff] }
  0x10   :  { %421 = vmatprep.subr.mxu0 %v68_v8  ;;  %456 = vmatprep.subr.mxu1 %v68_v8  ;;  %v39_v55 = vld [vmem:[#allocation2 + $0x20] sm:$0xff]  ;;  %v50_v0 = vld [vmem:[#allocation2 + $0x78] sm:$0xff]  ;;  %v41_v5 = vld [vmem:[#allocation2 + $0x30] sm:$0xff] }
  0x11   :  { %422 = vmatpush3.msra.mxu0 %v68_v8  ;;  %465 = vmatpush3.msra.mxu1 %v68_v8  ;;  %v47_v56 = vld [vmem:[#allocation2 + $0x60] sm:$0xff] }
  0x12   :  { %423 = vmatprep.subr.mxu0 %v67_v9  ;;  %457 = vmatprep.subr.mxu1 %v67_v9 }
  0x13   :  { %424 = vmatpush3.msra.mxu0 %v67_v9  ;;  %466 = vmatpush3.msra.mxu1 %v67_v9 }
  0x14   :  { %425 = vmatprep.mubr.msk.f32.mxu0 %vm76_vm1, %v51_v10  ;;  %437 = vmatprep.mubr.msk.f32.mxu1 %vm76_vm1, %v59_v11  ;;  %v49_v10 = vld [vmem:[#allocation2 + $0x70] sm:$0xff] }
  0x15   :  { %426 = vmatmul.mubr.msk.f32.vlgmr.msra.gmra.mxu0 %vm76_vm1, %v52_v12  ;;  %438 = vmatmul.mubr.msk.f32.vlgmr.msra.gmra.mxu1 %vm76_vm1, %v60_v13 }
  0x16   :  { %428 = vmatprep.mubr.msk.f32.mxu0 %vm76_vm1, %v53_v14  ;;  %440 = vmatprep.mubr.msk.f32.mxu1 %vm76_vm1, %v61_v15 }
  0x19   :  { %429 = vmatmul.mubr.msk.f32.gmra.mxu0 %vm76_vm1, %v54_v16  ;;  %441 = vmatmul.mubr.msk.f32.gmra.mxu1 %vm76_vm1, %v62_v17 }
  0x1a   :  { %431 = vmatprep.mubr.msk.f32.mxu0 %vm76_vm1, %v55_v18  ;;  %443 = vmatprep.mubr.msk.f32.mxu1 %vm76_vm1, %v63_v19 }
  0x1d   :  { %432 = vmatmul.mubr.msk.f32.gmra.mxu0 %vm76_vm1, %v56_v20  ;;  %444 = vmatmul.mubr.msk.f32.gmra.mxu1 %vm76_vm1, %v64_v21 }
  0x1e   :  { %434 = vmatprep.mubr.msk.f32.mxu0 %vm76_vm1, %v57_v22  ;;  %446 = vmatprep.mubr.msk.f32.mxu1 %vm76_vm1, %v65_v23 }
  0x21   :  { %435 = vmatmul.mubr.msk.f32.gmra.mxu0 %vm76_vm1, %v58_v24  ;;  %447 = vmatmul.mubr.msk.f32.gmra.mxu1 %vm76_vm1, %v66_v25 }
  0xd5   :  { %v427_v28 = vpop.f32.mrf.mxu0  ;;  %v439_v29 = vpop.f32.mrf.mxu1 }
  0xd6   :  { %v271_v32 = vadd.f32 %v427_v28, %v36_v26  ;;  %v279_v33 = vadd.f32 %v439_v29, %v44_v27 }
  0xd7   :  { %v191_v34 = vpop.f32.mrf.mxu0  ;;  %v231_v35 = vpop.f32.mrf.mxu1 }
  0xd8   :  { %288 = vst.msk [vmem:[#allocation2 + $0x8] sm:$0xff] %vm18_vm0, %v271_v32  ;;  %296 = vst.msk [vmem:[#allocation2 + $0x48] sm:$0xff] %vm18_vm0, %v279_v33  ;;  %v270_v38 = vadd.f32 %v191_v34, %v35_v30  ;;  %v278_v39 = vadd.f32 %v231_v35, %v43_v31 }
  0xd9   :  { %v430_v40 = vpop.f32.mrf.mxu0  ;;  %v442_v41 = vpop.f32.mrf.mxu1 }
  0xda   :  { %287 = vst.msk [vmem:[#allocation2] sm:$0xff] %vm18_vm0, %v270_v38  ;;  %295 = vst.msk [vmem:[#allocation2 + $0x40] sm:$0xff] %vm18_vm0, %v278_v39  ;;  %v273_v44 = vadd.f32 %v430_v40, %v38_v36  ;;  %v281_v45 = vadd.f32 %v442_v41, %v46_v37 }
  0xdb   :  { %v201_v46 = vpop.f32.mrf.mxu0  ;;  %v241_v47 = vpop.f32.mrf.mxu1 }
  0xdc   :  { %290 = vst.msk [vmem:[#allocation2 + $0x18] sm:$0xff] %vm18_vm0, %v273_v44  ;;  %298 = vst.msk [vmem:[#allocation2 + $0x58] sm:$0xff] %vm18_vm0, %v281_v45  ;;  %v272_v50 = vadd.f32 %v201_v46, %v37_v42  ;;  %v280_v51 = vadd.f32 %v241_v47, %v45_v43 }
  0xdd   :  { %v433_v53 = vpop.f32.mrf.mxu0  ;;  %v445_v54 = vpop.f32.mrf.mxu1 }
  0xde   :  { %289 = vst.msk [vmem:[#allocation2 + $0x10] sm:$0xff] %vm18_vm0, %v272_v50  ;;  %297 = vst.msk [vmem:[#allocation2 + $0x50] sm:$0xff] %vm18_vm0, %v280_v51  ;;  %v275_v57 = vadd.f32 %v433_v53, %v40_v48  ;;  %v283_v58 = vadd.f32 %v445_v54, %v48_v49 }
  0xdf   :  { %v307_v60 = vld [vmem:[#allocation2 + $0x8] sm:$0xff]  ;;  %v211_v62 = vpop.f32.mrf.mxu0  ;;  %v251_v63 = vpop.f32.mrf.mxu1 }
  0xe0   :  { %v315_v61 = vld [vmem:[#allocation2 + $0x48] sm:$0xff]  ;;  %v330_v1 = vadd.f32 %v605_v52, %v307_v60  ;;  %292 = vst.msk [vmem:[#allocation2 + $0x28] sm:$0xff] %vm18_vm0, %v275_v57  ;;  %300 = vst.msk [vmem:[#allocation2 + $0x68] sm:$0xff] %vm18_vm0, %v283_v58  ;;  %v274_v3 = vadd.f32 %v211_v62, %v39_v55  ;;  %v282_v4 = vadd.f32 %v251_v63, %v47_v56 }
  0xe1   :  { %v338_v2 = vadd.f32 %v605_v52, %v315_v61  ;;  %v306_v6 = vld [vmem:[#allocation2] sm:$0xff]  ;;  %v436_v8 = vpop.f32.mrf.mxu0  ;;  %v448_v9 = vpop.f32.mrf.mxu1 }
  0xe2   :  { %v314_v7 = vld [vmem:[#allocation2 + $0x40] sm:$0xff]  ;;  %346 = vst.msk [vmem:[%s700_s3 + $0x8] sm:$0xff] %vm18_vm0, %v330_v1  ;;  %v329_v11 = vadd.f32 %v605_v52, %v306_v6  ;;  %291 = vst.msk [vmem:[#allocation2 + $0x20] sm:$0xff] %vm18_vm0, %v274_v3  ;;  %v277_v13 = vadd.f32 %v436_v8, %v42_v59  ;;  %v285_v14 = vadd.f32 %v448_v9, %v50_v0 }
  0xe3   :  { %354 = vst.msk [vmem:[%s700_s3 + $0x48] sm:$0xff] %vm18_vm0, %v338_v2  ;;  %v337_v12 = vadd.f32 %v605_v52, %v314_v7  ;;  %299 = vst.msk [vmem:[#allocation2 + $0x60] sm:$0xff] %vm18_vm0, %v282_v4  ;;  %v309_v15 = vld [vmem:[#allocation2 + $0x18] sm:$0xff]  ;;  %v221_v17 = vpop.f32.mrf.mxu0  ;;  %v261_v18 = vpop.f32.mrf.mxu1 }
  0xe4   :  { %v317_v16 = vld [vmem:[#allocation2 + $0x58] sm:$0xff]  ;;  %345 = vst.msk [vmem:[%s700_s3] sm:$0xff] %vm18_vm0, %v329_v11  ;;  %v332_v19 = vadd.f32 %v605_v52, %v309_v15  ;;  %294 = vst.msk [vmem:[#allocation2 + $0x38] sm:$0xff] %vm18_vm0, %v277_v13  ;;  %v276_v21 = vadd.f32 %v221_v17, %v41_v5  ;;  %v284_v22 = vadd.f32 %v261_v18, %v49_v10 }
  0xe5   :  { %353 = vst.msk [vmem:[%s700_s3 + $0x40] sm:$0xff] %vm18_vm0, %v337_v12  ;;  %v340_v20 = vadd.f32 %v605_v52, %v317_v16  ;;  %302 = vst.msk [vmem:[#allocation2 + $0x78] sm:$0xff] %vm18_vm0, %v285_v14  ;;  %v308_v23 = vld [vmem:[#allocation2 + $0x10] sm:$0xff] }
  0xe6   :  { %v316_v24 = vld [vmem:[#allocation2 + $0x50] sm:$0xff]  ;;  %348 = vst.msk [vmem:[%s700_s3 + $0x18] sm:$0xff] %vm18_vm0, %v332_v19  ;;  %v331_v25 = vadd.f32 %v605_v52, %v308_v23  ;;  %293 = vst.msk [vmem:[#allocation2 + $0x30] sm:$0xff] %vm18_vm0, %v276_v21 }
  0xe7   :  { %356 = vst.msk [vmem:[%s700_s3 + $0x58] sm:$0xff] %vm18_vm0, %v340_v20  ;;  %v339_v26 = vadd.f32 %v605_v52, %v316_v24  ;;  %301 = vst.msk [vmem:[#allocation2 + $0x70] sm:$0xff] %vm18_vm0, %v284_v22  ;;  %v311_v27 = vld [vmem:[#allocation2 + $0x28] sm:$0xff] }
  0xe8   :  { %v319_v28 = vld [vmem:[#allocation2 + $0x68] sm:$0xff]  ;;  %347 = vst.msk [vmem:[%s700_s3 + $0x10] sm:$0xff] %vm18_vm0, %v331_v25  ;;  %v334_v29 = vadd.f32 %v605_v52, %v311_v27 }
  0xe9   :  { %355 = vst.msk [vmem:[%s700_s3 + $0x50] sm:$0xff] %vm18_vm0, %v339_v26  ;;  %v342_v30 = vadd.f32 %v605_v52, %v319_v28  ;;  %v310_v31 = vld [vmem:[#allocation2 + $0x20] sm:$0xff] }
  0xea   :  { %v318_v32 = vld [vmem:[#allocation2 + $0x60] sm:$0xff]  ;;  %350 = vst.msk [vmem:[%s700_s3 + $0x28] sm:$0xff] %vm18_vm0, %v334_v29  ;;  %v333_v33 = vadd.f32 %v605_v52, %v310_v31 }
  0xeb   :  { %358 = vst.msk [vmem:[%s700_s3 + $0x68] sm:$0xff] %vm18_vm0, %v342_v30  ;;  %v341_v34 = vadd.f32 %v605_v52, %v318_v32  ;;  %v313_v35 = vld [vmem:[#allocation2 + $0x38] sm:$0xff] }
  0xec   :  { %v321_v36 = vld [vmem:[#allocation2 + $0x78] sm:$0xff]  ;;  %349 = vst.msk [vmem:[%s700_s3 + $0x20] sm:$0xff] %vm18_vm0, %v333_v33  ;;  %v336_v37 = vadd.f32 %v605_v52, %v313_v35 }
  0xed   :  { %357 = vst.msk [vmem:[%s700_s3 + $0x60] sm:$0xff] %vm18_vm0, %v341_v34  ;;  %v344_v38 = vadd.f32 %v605_v52, %v321_v36  ;;  %v312_v39 = vld [vmem:[#allocation2 + $0x30] sm:$0xff] }
  0xee   :  { %v320_v40 = vld [vmem:[#allocation2 + $0x70] sm:$0xff]  ;;  %352 = vst.msk [vmem:[%s700_s3 + $0x38] sm:$0xff] %vm18_vm0, %v336_v37  ;;  %v335_v41 = vadd.f32 %v605_v52, %v312_v39 }
  0xef   :  { %360 = vst.msk [vmem:[%s700_s3 + $0x78] sm:$0xff] %vm18_vm0, %v344_v38  ;;  %v343_v42 = vadd.f32 %v605_v52, %v320_v40 }
  0xf0   :  { %351 = vst.msk [vmem:[%s700_s3 + $0x30] sm:$0xff] %vm18_vm0, %v335_v41 }
  0xf1   :  { %359 = vst.msk [vmem:[%s700_s3 + $0x70] sm:$0xff] %vm18_vm0, %v343_v42 }

// kernel: viteff_forward.24
= control target key start
LH: loop header
LB: loop body
LE: loop exit
PB: predicated region body
PF: predicated region fallthrough
CT: control target
= control target key end

     0   :  { %11 = vsyncpa [#allocation3], 0  ;;  %s1793_s0 = inlined_call_operand.vmem [shape: f32[2,64,32], index: 0, kind: input, shape index: {}]   ;;  %s1794_s1 = inlined_call_operand.vmem [shape: f32[5,2,17,32], index: 1, kind: input, shape index: {}]   ;;  %s1795_s2 = inlined_call_operand.vmem [shape: f32[32,32], index: 2, kind: input, shape index: {}]   ;;  %s1796_s3 = inlined_call_operand.vmem [shape: f32[32,32], index: 3, kind: input, shape index: {}]   ;;  %s1797_s4 = inlined_call_operand.vmem [shape: f32[32,256], index: 4, kind: input, shape index: {}]   ;;  %s1798_s5 = inlined_call_operand.vmem [shape: f32[1,256], index: 5, kind: input, shape index: {}]   ;;  %s1799_s6 = inlined_call_operand.hbm [shape: f32[2,64,256], index: 6, kind: output, shape index: {}]  }
   0x1   :  { %13 = vsyncpa [#allocation3 + $0x1], 0  ;;  %s1482_s21 = smov 0   ;;  %s1484_s22 = smov 0  }
   0x2   :  { %s1486_s23 = smov 0   ;;  %s1488_s24 = smov 0  }
   0x3 LB: > { %s1503_s25 = sadd.s32 4294967295, %s1440_s24   ;;  %s1136_s26 = sadd.s32 4294967294, %s1440_s24   ;;  %s1440_s24 = sphi %s1488_s24, %s1805_s24   ;;  %s1436_s23 = sphi %s1486_s23, %s1804_s23   ;;  %s1432_s22 = sphi %s1484_s22, %s1803_s22   ;;  %s1428_s21 = sphi %s1482_s21, %s1802_s21  }
   0x4   : > { %s1507_s27 = sadd.s32 1, %s1440_s24   ;;  %s162_s28 = sadd.s32 1, %s1436_s23 }
   0x5   : > { %s159_s29 = ssub.s32 %s1440_s24, %s1507_s27  ;;  %p172_p0 = scmp.ne.s32.totalorder %s1436_s23, %s1432_s22 }
   0x6   : > { %p160_p1 = scmp.eq.s32.totalorder %s159_s29, 0  ;;  %p173_p2 = scmp.eq.s32.totalorder %s1503_s25, 1 }
   0x7   : > { %p178_p3 = scmp.ne.s32.totalorder %s1432_s22, %s1428_s21  ;;  %p179_p4 = scmp.eq.s32.totalorder %s1136_s26, 1 }
   0x8   : > { %s1518_s30 = scalar_select %p160_p1, %s1436_s23, %s162_s28  }
   0x9   : > { %p1520_p5 = por %p173_p2, %p172_p0  ;;  %p1524_p6 = por %p179_p4, %p178_p3 }
   0xa   : > { %p1139_p7 = scmp.ge.s32.totalorder %s1440_s24, 1  ;;  %p225_p8 = scmp.lt.s32.totalorder %s1440_s24, 3 }
   0xc   : > { %p226_p9 = pnand %p1139_p7, %p225_p8 }
   0xd   : > { %p260_p10 = scmp.lt.s32.totalorder (!%p226_p9), %s1503_s25, 1  ;;  %s257_s20 = sand.u32 (!%p226_p9), 1, %s1432_s22  }
   0xe   : > { %229 = sbr.rel (%p226_p9) target bundleno = 1188 (0x4a4), region = 44  ;;  %s1189_s10 = sshll.u32 (!%p226_p9), %s1503_s25, 11 }
   0xf   : > { %s1745_s14 = scalar_lea.hbm (!%p226_p9), %s1799_s6, %s1189_s10  ;;  %s1444_s16 = smov (!%p226_p9), [#allocation2]  }
  0x13   : > { %v418_v0 = vld [vmem:[%s1796_s3 + $0x18] sm:$0xff]  ;;  %v1442_v1 = vmov 0.0   ;;  %v417_v2 = vld [vmem:[%s1796_s3 + $0x10] sm:$0xff]  ;;  %vm1443_vm0 = vmmov 0   ;;  %s261_s17 = scalar_select %p260_p10, %s1503_s25, 1  ;;  %v416_v5 = vld [vmem:[%s1796_s3 + $0x8] sm:$0xff] }
  0x14   : > { %1251 = vmatprep.subr.mxu1 %v1442_v1  ;;  %1259 = vmatprep.mubr.msk.f32.mxu1 %vm1443_vm0, %v1442_v1  ;;  %v284_v3 = vld [vmem:[%s1795_s2 + $0x18] sm:$0xff]  ;;  %v283_v4 = vld [vmem:[%s1795_s2 + $0x10] sm:$0xff]  ;;  %v282_v6 = vld [vmem:[%s1795_s2 + $0x8] sm:$0xff]  ;;  %vm285_vm1 = vcmask 261120   ;;  %vm646_vm2 = vcmask 138240   ;;  %vm759_vm3 = vcmask 1040384  }
  0x15   : > { %1252 = vmatpush3.msra.mxu1 %v418_v0  ;;  %1231 = vmatprep.subr.mxu0 %v284_v3  ;;  %s1188_s28 = sshll.u32 %s261_s17, 6  ;;  %s1304_s29 = smul.u32 24, %s261_s17  ;;  %v415_v7 = vld [vmem:[%s1796_s3] sm:$0xff] }
  0x16   : > { %1253 = vmatprep.subr.mxu1 %v1442_v1  ;;  %1232 = vmatpush3.msra.mxu0 %v284_v3  ;;  %s1561_s13 = scalar_lea.vmem %s1793_s0, %s1188_s28  ;;  %v281_v8 = vld [vmem:[%s1795_s2] sm:$0xff]  ;;  %s1753_s25 = scalar_lea.sflag [#allocation3], %s257_s20 }
  0x17   : > { %1254 = vmatpush3.msra.mxu1 %v417_v2  ;;  %1233 = vmatprep.subr.mxu0 %v283_v4  ;;  %s269_s18 = scalar_lea.vmem %s1794_s1, %s1304_s29  ;;  %v1573_v10 = vld [vmem:[%s1561_s13] sm:$0xff]  ;;  %v1576_v11 = vld [vmem:[%s1561_s13 + $0x8] sm:$0xff]  ;;  %v1581_v12 = vld [vmem:[%s1561_s13 + $0x10] sm:$0xff]  ;;  %s1140_s29 = sshll.u32 %s257_s20, 7 }
  0x18   : > { %1255 = vmatprep.subr.mxu1 %v1442_v1  ;;  %1234 = vmatpush3.msra.mxu0 %v283_v4  ;;  %v1570_v9 = vld [vmem:[%s269_s18] sm:$0xff]  ;;  %v1585_v13 = vld [vmem:[%s269_s18 + $0x8] sm:$0xff]  ;;  %v1594_v14 = vld [vmem:[%s1561_s13 + $0x18] sm:$0xff]  ;;  %s1724_s9 = scalar_lea.vmem [#allocation2], %s1140_s29  ;;  %s1384_s17 = sshll.u32 %s1444_s16, 4  ;;  %s1385_s17 = int_to_ptr.vmem [resolvable:$false] %s1384_s17 }
  0x19   : > { %1256 = vmatpush3.msra.mxu1 %v416_v5  ;;  %1235 = vmatprep.subr.mxu0 %v282_v6  ;;  %v1599_v15 = vld [vmem:[%s1561_s13 + $0x20] sm:$0xff]  ;;  %v1603_v16 = vld [vmem:[%s269_s18 + $0x10] sm:$0x1]  ;;  %v1610_v17 = vld [vmem:[%s1561_s13 + $0x28] sm:$0xff]  ;;  %s1062_s11 = sshll.u32 %s1724_s9, 4  ;;  %s1386_s18 = scalar_lea.vmem %s1385_s17, 4096  ;;  %s1747_s11 = int_to_ptr.vmem [resolvable:$true] %s1062_s11 }
  0x1a   : > { %1257 = vmatprep.subr.mxu1 %v1442_v1  ;;  %1236 = vmatpush3.msra.mxu0 %v282_v6  ;;  %v1615_v18 = vld [vmem:[%s1561_s13 + $0x30] sm:$0xff]  ;;  %v1623_v19 = vld [vmem:[%s1561_s13 + $0x38] sm:$0xff]  ;;  %s1380_s15 = scalar_lea.vmem %s1747_s11, 2048  ;;  %p1387_p0 = scmp.lt.s32.totalorder %s1747_s11, %s1385_s17 }
  0x1b   : > { %1258 = vmatpush3.msra.mxu1 %v415_v7  ;;  %1237 = vmatprep.subr.mxu0 %v281_v8  ;;  %p1381_p11 = scmp.ne.s32.totalorder %s1747_s11, %s1380_s15  ;;  %p1388_p1 = scmp.lt.s32.totalorder %s1386_s18, %s1380_s15 }
  0x1c   : > { %1260 = vmatmul.mubr.msk.f32.vlgmr.msra.gmra.mxu1 %vm285_vm1, %v1570_v9  ;;  %1238 = vmatpush3.msra.mxu0 %v281_v8 }
  0x1d   : > { %1262 = vmatprep.mubr.msk.f32.mxu1 %vm1443_vm0, %v1442_v1  ;;  %1239 = vmatprep.mubr.msk.f32.mxu0 %vm285_vm1, %v1573_v10  ;;  %p1382_p12 = pnand %p1381_p11, %p1520_p5  ;;  %p1389_p2 = por %p1388_p1, %p1387_p0 }
  0x1e   : > { %1240 = vmatmul.mubr.msk.f32.vlgmr.msra.gmra.mxu0 %vm285_vm1, %v1576_v11 }
  0x1f   : > { %1242 = vmatprep.mubr.msk.f32.mxu0 %vm285_vm1, %v1581_v12  ;;  %p1383_p13 = pneg %p1382_p12 }
  0x20   : > { %1263 = vmatmul.mubr.msk.f32.gmra.mxu1 %vm285_vm1, %v1585_v13 }
  0x21   : > { %1265 = vmatprep.mubr.msk.f32.mxu1 %vm1443_vm0, %v1442_v1  ;;  %p1390_p3 = pnand %p1389_p2, %p1383_p13 }
  0x22   : > { %1243 = vmatmul.mubr.msk.f32.gmra.mxu0 %vm285_vm1, %v1594_v14 }
  0x23   : > { %1245 = vmatprep.mubr.msk.f32.mxu0 %vm285_vm1, %v1599_v15 }
  0x24   : > { %1266 = vmatmul.mubr.msk.f32.gmra.mxu1 %vm285_vm1, %v1603_v16 }
  0x25   : > { %983 = vmatprep.mubr.f32.mxu1 %v1442_v1 }
  0x26   : > { %1246 = vmatmul.mubr.msk.f32.gmra.mxu0 %vm285_vm1, %v1610_v17 }
  0x27   : > { %1248 = vmatprep.mubr.msk.f32.mxu0 %vm285_vm1, %v1615_v18 }
  0x2a   : > { %1249 = vmatmul.mubr.msk.f32.gmra.mxu0 %vm285_vm1, %v1623_v19 }
  0xdc   : > { %v494_v20 = vpop.f32.mrf.mxu1 }
  0xde   : > { %v1261_v21 = vpop.f32.mrf.mxu1  ;;  %v1241_v22 = vpop.f32.mrf.mxu0 }
  0xe0   : > { %v499_v23 = vpop.f32.mrf.mxu1  ;;  %v376_v24 = vpop.f32.mrf.mxu0 }
  0xe1   : > { %1274 = vmatprep.mubr.msk.f32.mxu0 %vm285_vm1, %v376_v24 }
  0xe2   : > { %v1264_v25 = vpop.f32.mrf.mxu1  ;;  %v1244_v26 = vpop.f32.mrf.mxu0 }
  0xe4   : > { %v504_v27 = vpop.f32.mrf.mxu1  ;;  %v386_v29 = vpop.f32.mrf.mxu0 }
  0xe5   : > { %1268 = vmatprep.subr.msk.mxu0 %vm285_vm1, %v504_v27 }
  0xe6   : > { %v1267_v28 = vpop.f32.mrf.mxu1  ;;  %1269 = vmatpush3.xpose.msk.msra.mxu0 %vm285_vm1, %v504_v27  ;;  %v1247_v30 = vpop.f32.mrf.mxu0 }
  0xe7   : > { %1270 = vmatprep.subr.msk.mxu0 %vm285_vm1, %v499_v23 }
  0xe8   : > { %v396_v31 = vpop.f32.mrf.mxu0 }
  0xea   : > { %1271 = vmatpush3.xpose.msk.msra.mxu0 %vm285_vm1, %v499_v23  ;;  %v1250_v32 = vpop.f32.mrf.mxu0 }
  0xeb   : > { %1272 = vmatprep.subr.msk.mxu0 %vm285_vm1, %v494_v20 }
  0xec   : > { %v406_v33 = vpop.f32.mrf.mxu0 }
  0xee   : > { %1273 = vmatpush3.xpose.msk.msra.mxu0 %vm285_vm1, %v494_v20 }
  0xef   : > { %1286 = vmatprep.subr.msk.mxu0 %vm759_vm3, %v1603_v16 }
  0xf1   : > { %1275 = vmatmul.mubr.msk.f32.vlgmr.msra.gmra.mxu0 %vm285_vm1, %v1241_v22 }
  0xf2   : > { %1277 = vmatprep.mubr.msk.f32.mxu0 %vm285_vm1, %v386_v29  ;;  %1287 = vmatpush3.msk.msra.mxu0 %vm759_vm3, %v1603_v16  ;;  %v880_v16 = vld [vmem:[%s1797_s4 + $0x28] sm:$0xff] }
  0xf3   : > { %1288 = vmatprep.subr.mxu0 %v1585_v13 }
  0xf4   : > { %1289 = vmatpush3.msra.mxu0 %v1585_v13 }
  0xf5   : > { %1278 = vmatmul.mubr.msk.f32.gmra.mxu0 %vm285_vm1, %v1244_v26  ;;  %1290 = vmatprep.subr.mxu0 %v1570_v9 }
  0xf6   : > { %1280 = vmatprep.mubr.msk.f32.mxu0 %vm285_vm1, %v396_v31  ;;  %1291 = vmatpush3.msra.mxu0 %v1570_v9 }
  0xf9   : > { %1281 = vmatmul.mubr.msk.f32.gmra.mxu0 %vm285_vm1, %v1247_v30 }
  0xfa   : > { %1283 = vmatprep.mubr.msk.f32.mxu0 %vm285_vm1, %v406_v33 }
  0xfd   : > { %1284 = vmatmul.mubr.msk.f32.gmra.mxu0 %vm285_vm1, %v1250_v32 }
 0x1b1   : > { %v1276_v34 = vpop.f32.mrf.mxu0 }
 0x1b2   : > { %v650_v39 = vsel %vm646_vm2, %v1276_v34, -inf }
 0x1b3   : > { %v607_v35 = vpop.f32.mrf.mxu0 }
 0x1b4   : > { %v647_v36 = vsel %vm646_vm2, %v607_v35, -inf }
 0x1b5   : > { %648 = vmax.xlane.f32.xlu0 %v647_v36  ;;  %v1279_v37 = vpop.f32.mrf.mxu0 }
 0x1b6   : > { %v656_v43 = vsel %vm646_vm2, %v1279_v37, -inf }
 0x1b7   : > { %v617_v38 = vpop.f32.mrf.mxu0 }
 0x1b8   : > { %v653_v40 = vsel %vm646_vm2, %v617_v38, -inf }
 0x1b9   : > { %651 = vmax.xlane.f32.xlu0 %v650_v39  ;;  %654 = vmax.xlane.f32.xlu1 %v653_v40  ;;  %v1282_v41 = vpop.f32.mrf.mxu0  ;;  %v881_v39 = vld [vmem:[%s1797_s4 + $0x30] sm:$0xff] }
 0x1ba   : > { %v662_v46 = vsel %vm646_vm2, %v1282_v41, -inf }
 0x1bb   : > { %v627_v42 = vpop.f32.mrf.mxu0 }
 0x1bc   : > { %v659_v44 = vsel %vm646_vm2, %v627_v42, -inf }
 0x1bd   : > { %657 = vmax.xlane.f32.xlu1 %v656_v43  ;;  %660 = vmax.xlane.f32.xlu0 %v659_v44  ;;  %v1285_v45 = vpop.f32.mrf.mxu0 }
 0x1be   : > { %v668_v49 = vsel %vm646_vm2, %v1285_v45, -inf }
 0x1bf   : > { %v637_v47 = vpop.f32.mrf.mxu0 }
 0x1c0   : > { %v665_v48 = vsel %vm646_vm2, %v637_v47, -inf }
 0x1c1   : > { %663 = vmax.xlane.f32.xlu1 %v662_v46  ;;  %666 = vmax.xlane.f32.xlu0 %v665_v48 }
 0x1c5   : > { %669 = vmax.xlane.f32.xlu1 %v668_v49 }
 0x23e   : > { %v649_v50 = vpop.xlane.xlu0 %648 }
 0x23f   : > { %v671_v51 = vsub.f32 %v607_v35, %v649_v50 }
 0x241   : > { %v679_v52 = vmul.f32 1.442695, %v671_v51 }
 0x242   : > { %v652_v53 = vpop.xlane.xlu0 %651  ;;  %v655_v54 = vpop.xlane.xlu1 %654 }
 0x243   : > { %1348 = vpow2.f32 %v679_v52  ;;  %v672_v55 = vsub.f32 %v1276_v34, %v652_v53  ;;  %v673_v56 = vsub.f32 %v617_v38, %v655_v54  ;;  %v882_v38 = vld [vmem:[%s1797_s4 + $0x38] sm:$0xff] }
 0x244   : > { %943 = vmatprep.subr.mxu1 %v882_v38 }
 0x245   : > { %v681_v57 = vmul.f32 1.442695, %v672_v55  ;;  %v683_v58 = vmul.f32 1.442695, %v673_v56  ;;  %944 = vmatpush1.msra.mxu1 %v881_v39 }
 0x246   : > { %v658_v59 = vpop.xlane.xlu1 %657  ;;  %v661_v60 = vpop.xlane.xlu0 %660  ;;  %945 = vmatprep.subr.mxu1 %v880_v16 }
 0x247   : > { %1350 = vpow2.f32 %v681_v57  ;;  %v674_v61 = vsub.f32 %v1279_v37, %v658_v59  ;;  %v675_v62 = vsub.f32 %v627_v42, %v661_v60 }
 0x248   : > { %1352 = vpow2.f32 %v683_v58 }
 0x249   : > { %v685_v63 = vmul.f32 1.442695, %v674_v61  ;;  %v687_v0 = vmul.f32 1.442695, %v675_v62  ;;  %v879_v62 = vld [vmem:[%s1797_s4 + $0x20] sm:$0xff] }
 0x24a   : > { %v664_v2 = vpop.xlane.xlu1 %663  ;;  %v667_v3 = vpop.xlane.xlu0 %666  ;;  %946 = vmatpush1.msra.mxu1 %v879_v62 }
 0x24b   : > { %1354 = vpow2.f32 %v685_v63  ;;  %v676_v4 = vsub.f32 %v1282_v41, %v664_v2  ;;  %v677_v5 = vsub.f32 %v637_v47, %v667_v3  ;;  %v878_v63 = vld [vmem:[%s1797_s4 + $0x18] sm:$0xff]  ;;  %v876_v2 = vld [vmem:[%s1797_s4 + $0x8] sm:$0xff]  ;;  %v875_v3 = vld [vmem:[%s1797_s4] sm:$0xff] }
 0x24c   : > { %1356 = vpow2.f32 %v687_v0  ;;  %947 = vmatprep.subr.mxu1 %v878_v63  ;;  %v877_v0 = vld [vmem:[%s1797_s4 + $0x10] sm:$0xff] }
 0x24d   : > { %v689_v6 = vmul.f32 1.442695, %v676_v4  ;;  %v691_v7 = vmul.f32 1.442695, %v677_v5  ;;  %948 = vmatpush1.msra.mxu1 %v877_v0 }
 0x24e   : > { %v670_v8 = vpop.xlane.xlu1 %669  ;;  %949 = vmatprep.subr.mxu1 %v876_v2 }
 0x24f   : > { %1358 = vpow2.f32 %v689_v6  ;;  %v678_v20 = vsub.f32 %v1285_v45, %v670_v8  ;;  %950 = vmatpush1.msra.mxu1 %v875_v3 }
 0x250   : > { %v1349_v21 = vpop.eup %1348  ;;  %1360 = vpow2.f32 %v691_v7 }
 0x251   : > { %v693_v22 = vmul.f32 1.442695, %v678_v20  ;;  %v695_v23 = vsel %vm646_vm2, %v1349_v21, 0.0 }
 0x252   : > { %696 = vadd.xlane.f32.xlu0 %v695_v23 }
 0x253   : > { %1362 = vpow2.f32 %v693_v22 }
 0x254   : > { %v1351_v24 = vpop.eup %1350 }
 0x255   : > { %v1353_v25 = vpop.eup %1352  ;;  %v698_v26 = vsel %vm646_vm2, %v1351_v24, 0.0 }
 0x256   : > { %699 = vadd.xlane.f32.xlu1 %v698_v26  ;;  %v701_v27 = vsel %vm646_vm2, %v1353_v25, 0.0  ;;  %v885_v26 = vlaneseq }
 0x257   : > { %702 = vadd.xlane.f32.xlu0 %v701_v27 }
 0x258   : > { %v1355_v28 = vpop.eup %1354  ;;  %v886_v27 = vshrl.u32 %v885_v26, 7 }
 0x259   : > { %v1357_v29 = vpop.eup %1356  ;;  %v704_v30 = vsel %vm646_vm2, %v1355_v28, 0.0 }
 0x25a   : > { %705 = vadd.xlane.f32.xlu1 %v704_v30  ;;  %v707_v31 = vsel %vm646_vm2, %v1357_v29, 0.0 }
 0x25b   : > { %708 = vadd.xlane.f32.xlu0 %v707_v31 }
 0x25c   : > { %v1359_v32 = vpop.eup %1358 }
 0x25d   : > { %v1361_v33 = vpop.eup %1360  ;;  %v710_v34 = vsel %vm646_vm2, %v1359_v32, 0.0 }
 0x25e   : > { %711 = vadd.xlane.f32.xlu1 %v710_v34  ;;  %v713_v35 = vsel %vm646_vm2, %v1361_v33, 0.0 }
 0x25f   : > { %714 = vadd.xlane.f32.xlu0 %v713_v35 }
 0x260   : > { %v1363_v36 = vpop.eup %1362 }
 0x261   : > { %v716_v37 = vsel %vm646_vm2, %v1363_v36, 0.0 }
 0x262   : > { %717 = vadd.xlane.f32.xlu1 %v716_v37 }
 0x2db   : > { %v697_v13 = vpop.xlane.xlu0 %696 }
 0x2dc   : > { %1364 = vrcp.f32 %v697_v13 }
 0x2df   : > { %v700_v40 = vpop.xlane.xlu1 %699 }
 0x2e0   : > { %1366 = vrcp.f32 %v700_v40  ;;  %v703_v9 = vpop.xlane.xlu0 %702 }
 0x2e1   : > { %1368 = vrcp.f32 %v703_v9 }
 0x2e3   : > { %v706_v41 = vpop.xlane.xlu1 %705 }
 0x2e4   : > { %1370 = vrcp.f32 %v706_v41  ;;  %v709_v42 = vpop.xlane.xlu0 %708 }
 0x2e5   : > { %1372 = vrcp.f32 %v709_v42 }
 0x2e7   : > { %v712_v43 = vpop.xlane.xlu1 %711 }
 0x2e8   : > { %1374 = vrcp.f32 %v712_v43  ;;  %v715_v44 = vpop.xlane.xlu0 %714 }
 0x2e9   : > { %v1365_v45 = vpop.eup %1364  ;;  %1376 = vrcp.f32 %v715_v44 }
 0x2ea   : > { %v720_v46 = vmul.f32 %v1365_v45, %v1349_v21 }
 0x2eb   : > { %v718_v47 = vpop.xlane.xlu1 %717 }
 0x2ec   : > { %1378 = vrcp.f32 %v718_v47  ;;  %1292 = vmatprep.mubr.msk.f32.mxu0 %vm646_vm2, %v720_v46 }
 0x2ed   : > { %v1367_v48 = vpop.eup %1366 }
 0x2ee   : > { %v1369_v49 = vpop.eup %1368  ;;  %v722_v50 = vmul.f32 %v1367_v48, %v1351_v24 }
 0x2ef   : > { %v724_v51 = vmul.f32 %v1369_v49, %v1353_v25 }
 0x2f0   : > { %1293 = vmatmul.mubr.msk.f32.vlgmr.msra.gmra.mxu0 %vm646_vm2, %v722_v50 }
 0x2f1   : > { %v1371_v52 = vpop.eup %1370  ;;  %1295 = vmatprep.mubr.msk.f32.mxu0 %vm646_vm2, %v724_v51 }
 0x2f2   : > { %v1373_v53 = vpop.eup %1372  ;;  %v726_v54 = vmul.f32 %v1371_v52, %v1355_v28  ;;  %v887_v28 = vsub.s32 0, %v886_v27 }
 0x2f3   : > { %v728_v55 = vmul.f32 %v1373_v53, %v1357_v29  ;;  %v891_v29 = vsub.s32 1, %v886_v27 }
 0x2f4   : > { %1296 = vmatmul.mubr.msk.f32.gmra.mxu0 %vm646_vm2, %v726_v54 }
 0x2f5   : > { %v1375_v56 = vpop.eup %1374  ;;  %1298 = vmatprep.mubr.msk.f32.mxu0 %vm646_vm2, %v728_v55 }
 0x2f6   : > { %v1377_v57 = vpop.eup %1376  ;;  %v730_v58 = vmul.f32 %v1375_v56, %v1359_v32 }
 0x2f7   : > { %v732_v59 = vmul.f32 %v1377_v57, %v1361_v33 }
 0x2f8   : > { %1299 = vmatmul.mubr.msk.f32.gmra.mxu0 %vm646_vm2, %v730_v58 }
 0x2f9   : > { %v1379_v60 = vpop.eup %1378  ;;  %1301 = vmatprep.mubr.msk.f32.mxu0 %vm646_vm2, %v732_v59 }
 0x2fa   : > { %v734_v61 = vmul.f32 %v1379_v60, %v1363_v36 }
 0x2fc   : > { %1302 = vmatmul.mubr.msk.f32.gmra.mxu0 %vm646_vm2, %v734_v61 }
 0x3b0   : > { %v1294_v4 = vpop.f32.mrf.mxu0 }
 0x3b1   : > { %v868_v8 = vadd.f32 %v1294_v4, %v1576_v11 }
 0x3b2   : > { %v828_v5 = vpop.f32.mrf.mxu0 }
 0x3b3   : > { %v867_v6 = vadd.f32 %v828_v5, %v1573_v10 }
 0x3b4   : > { %v1297_v7 = vpop.f32.mrf.mxu0 }
 0x3b5   : > { %1175 = vmatmul.mubr.msk.f32.vlgmr.msra.gmra.mxu1 %vm285_vm1, %v867_v6  ;;  %v870_v10 = vadd.f32 %v1297_v7, %v1594_v14 }
 0x3b6   : > { %989 = vmatprep.mubr.f32.mxu1 %v1442_v1  ;;  %v838_v20 = vpop.f32.mrf.mxu0 }
 0x3b7   : > { %v869_v21 = vadd.f32 %v838_v20, %v1581_v12 }
 0x3b8   : > { %v1300_v22 = vpop.f32.mrf.mxu0 }
 0x3b9   : > { %1176 = vmatmul.mubr.msk.f32.gmra.mxu1 %vm285_vm1, %v868_v8  ;;  %v872_v12 = vadd.f32 %v1300_v22, %v1610_v17  ;;  %v883_v17 = vld [vmem:[%s1798_s5] sm:$0x3] }
 0x3ba   : > { %995 = vmatprep.mubr.f32.mxu1 %v1442_v1  ;;  %v848_v23 = vpop.f32.mrf.mxu0  ;;  %v892_v30 = vrot.slane %v883_v17, %v891_v29 }
 0x3bb   : > { %v871_v11 = vadd.f32 %v848_v23, %v1599_v15 }
 0x3bc   : > { %v1303_v24 = vpop.f32.mrf.mxu0 }
 0x3bd   : > { %1177 = vmatmul.mubr.msk.f32.gmra.mxu1 %vm285_vm1, %v869_v21  ;;  %v874_v15 = vadd.f32 %v1303_v24, %v1623_v19 }
 0x3be   : > { %1001 = vmatprep.mubr.f32.mxu1 %v1442_v1  ;;  %v858_v25 = vpop.f32.mrf.mxu0 }
 0x3bf   : > { %v873_v14 = vadd.f32 %v858_v25, %v1615_v18  ;;  %v888_v18 = vrot.slane %v883_v17, %v887_v28 }
 0x3c1   : > { %1178 = vmatmul.mubr.msk.f32.gmra.mxu1 %vm285_vm1, %v870_v10 }
 0x3c2   : > { %1007 = vmatprep.mubr.f32.mxu1 %v1442_v1 }
 0x3c5   : > { %1179 = vmatmul.mubr.msk.f32.gmra.mxu1 %vm285_vm1, %v871_v11 }
 0x3c6   : > { %1013 = vmatprep.mubr.f32.mxu1 %v1442_v1 }
 0x3c9   : > { %1180 = vmatmul.mubr.msk.f32.gmra.mxu1 %vm285_vm1, %v872_v12 }
 0x3ca   : > { %1019 = vmatprep.mubr.f32.mxu1 %v1442_v1 }
 0x3cd   : > { %1181 = vmatmul.mubr.msk.f32.gmra.mxu1 %vm285_vm1, %v873_v14 }
 0x3ce   : > { %1025 = vmatprep.mubr.f32.mxu1 %v1442_v1 }
 0x3d1   : > { %1182 = vmatmul.mubr.msk.f32.gmra.mxu1 %vm285_vm1, %v874_v15 }
 0x475   : > { %v985_v31 = vpop.f32.mrf.mxu1 }
 0x476   : > { %v986_v32 = vadd.f32 %v985_v31, %v888_v18 }
 0x477   : > { %v987_v1 = vpop.f32.mrf.mxu1 }
 0x478   : > { %1032 = vst [vmem:[%s1724_s9] sm:$0xff] %v986_v32  ;;  %v988_v19 = vadd.f32 %v987_v1, %v892_v30 }
 0x479   : > { %v991_v33 = vpop.f32.mrf.mxu1 }
 0x47a   : > { %1033 = vst [vmem:[%s1724_s9 + $0x8] sm:$0xff] %v988_v19  ;;  %v992_v34 = vadd.f32 %v991_v33, %v888_v18 }
 0x47b   : > { %v993_v35 = vpop.f32.mrf.mxu1 }
 0x47c   : > { %1034 = vst [vmem:[%s1724_s9 + $0x10] sm:$0xff] %v992_v34  ;;  %v994_v36 = vadd.f32 %v993_v35, %v892_v30 }
 0x47d   : > { %v997_v37 = vpop.f32.mrf.mxu1 }
 0x47e   : > { %1035 = vst [vmem:[%s1724_s9 + $0x18] sm:$0xff] %v994_v36  ;;  %v998_v38 = vadd.f32 %v997_v37, %v888_v18 }
 0x47f   : > { %v999_v39 = vpop.f32.mrf.mxu1 }
 0x480   : > { %1036 = vst [vmem:[%s1724_s9 + $0x20] sm:$0xff] %v998_v38  ;;  %v1000_v16 = vadd.f32 %v999_v39, %v892_v30 }
 0x481   : > { %v1003_v13 = vpop.f32.mrf.mxu1 }
 0x482   : > { %1037 = vst [vmem:[%s1724_s9 + $0x28] sm:$0xff] %v1000_v16  ;;  %v1004_v40 = vadd.f32 %v1003_v13, %v888_v18 }
 0x483   : > { %v1005_v9 = vpop.f32.mrf.mxu1 }
 0x484   : > { %1038 = vst [vmem:[%s1724_s9 + $0x30] sm:$0xff] %v1004_v40  ;;  %v1006_v41 = vadd.f32 %v1005_v9, %v892_v30 }
 0x485   : > { %v1009_v42 = vpop.f32.mrf.mxu1 }
 0x486   : > { %1039 = vst [vmem:[%s1724_s9 + $0x38] sm:$0xff] %v1006_v41  ;;  %v1010_v43 = vadd.f32 %v1009_v42, %v888_v18 }
 0x487   : > { %v1011_v44 = vpop.f32.mrf.mxu1 }
 0x488   : > { %1040 = vst [vmem:[%s1724_s9 + $0x40] sm:$0xff] %v1010_v43  ;;  %v1012_v45 = vadd.f32 %v1011_v44, %v892_v30 }
 0x489   : > { %v1015_v46 = vpop.f32.mrf.mxu1 }
 0x48a   : > { %1041 = vst [vmem:[%s1724_s9 + $0x48] sm:$0xff] %v1012_v45  ;;  %v1016_v47 = vadd.f32 %v1015_v46, %v888_v18 }
 0x48b   : > { %v1017_v48 = vpop.f32.mrf.mxu1 }
 0x48c   : > { %1042 = vst [vmem:[%s1724_s9 + $0x50] sm:$0xff] %v1016_v47  ;;  %v1018_v49 = vadd.f32 %v1017_v48, %v892_v30 }
 0x48d   : > { %v1021_v50 = vpop.f32.mrf.mxu1 }
 0x48e   : > { %1043 = vst [vmem:[%s1724_s9 + $0x58] sm:$0xff] %v1018_v49  ;;  %v1022_v51 = vadd.f32 %v1021_v50, %v888_v18 }
 0x48f   : > { %v1023_v52 = vpop.f32.mrf.mxu1 }
 0x490   : > { %1044 = vst [vmem:[%s1724_s9 + $0x60] sm:$0xff] %v1022_v51  ;;  %v1024_v53 = vadd.f32 %v1023_v52, %v892_v30 }
 0x491   : > { %v1027_v54 = vpop.f32.mrf.mxu1 }
 0x492   : > { %1045 = vst [vmem:[%s1724_s9 + $0x68] sm:$0xff] %v1024_v53  ;;  %v1028_v55 = vadd.f32 %v1027_v54, %v888_v18 }
 0x493   : > { %v1029_v56 = vpop.f32.mrf.mxu1 }
 0x494   : > { %1046 = vst [vmem:[%s1724_s9 + $0x70] sm:$0xff] %v1028_v55  ;;  %v1030_v57 = vadd.f32 %v1029_v56, %v892_v30 }
 0x496   : > { %1047 = vst [vmem:[%s1724_s9 + $0x78] sm:$0xff] %v1030_v57 }
 0x497   : > { %1393 = shalt.err (!%p1390_p3)
}
 0x498   : > { %s1394_s19 = scalar_lea.hbm %s1745_s14, 2048  ;;  %s1398_s28 = scalar_lea.hbm %s1799_s6, 4096 }
 0x499   : > { %p1395_p4 = scmp.ne.s32.totalorder %s1745_s14, %s1394_s19  ;;  %p1399_p9 = scmp.lt.s32.totalorder %s1745_s14, %s1799_s6 }
 0x49a   : > { %p1400_p10 = scmp.lt.s32.totalorder %s1398_s28, %s1394_s19 }
 0x49b   : > { %p1396_p7 = pnand %p1395_p4, %p1520_p5 }
 0x49c   : > { %p1401_p11 = por %p1400_p10, %p1399_p9 }
 0x49d   : > { %p1397_p8 = pneg %p1396_p7 }
 0x49f   : > { %p1402_p12 = pnand %p1401_p11, %p1397_p8 }
 0x4a1   : > { %1405 = shalt.err (!%p1402_p12)
}
 0x4a2   : > { %s1445_s10 = smov 256   ;;  %s1446_s12 = smov 16  }
 0x4a3   : > { %1305 = dma.vmem_to_hbm [thread:$0]  (%p1520_p5), %s1747_s11, 2048, %s1745_s14, %s1753_s25, %s1445_s10, %s1445_s10, %s1446_s12  }
 0x4a4 PF: > { %p1311_p13 = scmp.ge.s32.totalorder %s1440_s24, 2  ;;  %s1077_s13 = sand.u32 1, %s1428_s21  }
 0x4a5   : > { %s1078_s15 = scalar_lea.sflag [#allocation3], %s1077_s13 }
 0x4a6   : > { %p1308_p0 = pnand %p1311_p13, %p1524_p6 }
 0x4a8   : > { %p1309_p1 = pneg %p1308_p0 }
 0x4aa   : > { %1423 = dma.done.wait (%p1309_p1), %s1078_s15, 2048  }
 0x4ab   : > { %1425 = vsyncadd (%p1309_p1), %s1078_s15, 4294965248  ;;  %p16_p2 = scmp.ge.s32.totalorder %s1507_s27, 4   ;;  %s1802_s21 = smov %s1432_s22 }
 0x4ac   : > { %s1803_s22 = smov %s1436_s23  ;;  %s1804_s23 = smov %s1518_s30 }
 0x4ad   : > { %s1805_s24 = smov %s1507_s27  ;;  %18 = sbr.rel (!%p16_p2) target bundleno = 3 (0x3), region = 82 }
 0x4b2   :  { %1083 = vsyncpa [#allocation3], 1 }
 0x4b3   :  { %1085 = vsyncpa [#allocation3 + $0x1], 1 }

// kernel: viteff_forward.19
= control target key start
LH: loop header
LB: loop body
LE: loop exit
PB: predicated region body
PF: predicated region fallthrough
CT: control target
= control target key end

     0   :  { %vm18_vm0 = vcmask 261120   ;;  %v228_v0 = vmov 0.0   ;;  %vm53_vm1 = vcmask 130048   ;;  %s394_s1 = inlined_call_operand.vmem [shape: f32[144,32], index: 1, kind: input, shape index: {}]   ;;  %s395_s0 = inlined_call_operand.vmem [shape: f32[32,144], index: 0, kind: input, shape index: {}]   ;;  %s396_s2 = inlined_call_operand.vmem [shape: f32[1,32], index: 2, kind: input, shape index: {}]   ;;  %s397_s3 = inlined_call_operand.vmem [shape: f32[32,32], index: 3, kind: output, shape index: {}]  }
   0x1   :  { %66 = vmatprep.subr.mxu0 %v228_v0  ;;  %191 = vmatprep.subr.mxu1 %v228_v0  ;;  %v50_v1 = vld [vmem:[%s394_s1 + $0x78] sm:$0xff]  ;;  %v49_v2 = vld [vmem:[%s394_s1 + $0x70] sm:$0xff]  ;;  %19 = vst.msk [vmem:[#allocation2] sm:$0xff] %vm18_vm0, %v228_v0  ;;  %20 = vst.msk [vmem:[#allocation2 + $0x8] sm:$0xff] %vm18_vm0, %v228_v0 }
   0x2   :  { %21 = vst.msk [vmem:[#allocation2 + $0x10] sm:$0xff] %vm18_vm0, %v228_v0  ;;  %22 = vst.msk [vmem:[#allocation2 + $0x18] sm:$0xff] %vm18_vm0, %v228_v0  ;;  %67 = vmatpush1.msra.mxu0 %v50_v1  ;;  %209 = vmatpush1.msra.mxu1 %v50_v1  ;;  %v48_v3 = vld [vmem:[%s394_s1 + $0x68] sm:$0xff]  ;;  %v47_v4 = vld [vmem:[%s394_s1 + $0x60] sm:$0xff] }
   0x3   :  { %68 = vmatprep.subr.mxu0 %v228_v0  ;;  %192 = vmatprep.subr.mxu1 %v228_v0  ;;  %v46_v5 = vld [vmem:[%s394_s1 + $0x58] sm:$0xff]  ;;  %v45_v6 = vld [vmem:[%s394_s1 + $0x50] sm:$0xff]  ;;  %v44_v7 = vld [vmem:[%s394_s1 + $0x48] sm:$0xff] }
   0x4   :  { %69 = vmatpush1.msra.mxu0 %v49_v2  ;;  %210 = vmatpush1.msra.mxu1 %v49_v2  ;;  %v43_v8 = vld [vmem:[%s394_s1 + $0x40] sm:$0xff]  ;;  %v42_v9 = vld [vmem:[%s394_s1 + $0x38] sm:$0xff]  ;;  %v41_v10 = vld [vmem:[%s394_s1 + $0x30] sm:$0xff] }
   0x5   :  { %70 = vmatprep.subr.mxu0 %v228_v0  ;;  %193 = vmatprep.subr.mxu1 %v228_v0  ;;  %v40_v11 = vld [vmem:[%s394_s1 + $0x28] sm:$0xff]  ;;  %v39_v12 = vld [vmem:[%s394_s1 + $0x20] sm:$0xff]  ;;  %v38_v13 = vld [vmem:[%s394_s1 + $0x18] sm:$0xff] }
   0x6   :  { %71 = vmatpush1.msra.mxu0 %v48_v3  ;;  %211 = vmatpush1.msra.mxu1 %v48_v3  ;;  %v37_v14 = vld [vmem:[%s394_s1 + $0x10] sm:$0xff]  ;;  %v36_v15 = vld [vmem:[%s394_s1 + $0x8] sm:$0xff]  ;;  %v35_v16 = vld [vmem:[%s394_s1] sm:$0xff] }
   0x7   :  { %72 = vmatprep.subr.mxu0 %v228_v0  ;;  %194 = vmatprep.subr.mxu1 %v228_v0  ;;  %v52_v17 = vld [vmem:[%s394_s1 + $0x88] sm:$0xff]  ;;  %v51_v18 = vld [vmem:[%s394_s1 + $0x80] sm:$0xff]  ;;  %v30_v23 = vld [vmem:[%s395_s0 + $0x18] sm:$0xff] }
   0x8   :  { %73 = vmatpush1.msra.mxu0 %v47_v4  ;;  %212 = vmatpush1.msra.mxu1 %v47_v4  ;;  %v28_v19 = vld [vmem:[%s395_s0 + $0x8] sm:$0xff]  ;;  %v27_v21 = vld [vmem:[%s395_s0] sm:$0xff]  ;;  %v34_v24 = vld [vmem:[%s395_s0 + $0x38] sm:$0xff] }
   0x9   :  { %74 = vmatprep.subr.mxu0 %v228_v0  ;;  %195 = vmatprep.subr.mxu1 %v228_v0  ;;  %v32_v20 = vld [vmem:[%s395_s0 + $0x28] sm:$0xff]  ;;  %v31_v22 = vld [vmem:[%s395_s0 + $0x20] sm:$0xff]  ;;  %v29_v25 = vld [vmem:[%s395_s0 + $0x10] sm:$0xff] }
   0xa   :  { %75 = vmatpush1.msra.mxu0 %v46_v5  ;;  %213 = vmatpush1.msra.mxu1 %v46_v5  ;;  %v33_v26 = vld [vmem:[%s395_s0 + $0x30] sm:$0xff]  ;;  %v23_v27 = vld [vmem:[#allocation2] sm:$0xff]  ;;  %v24_v35 = vld [vmem:[#allocation2 + $0x8] sm:$0xff] }
   0xb   :  { %76 = vmatprep.subr.mxu0 %v228_v0  ;;  %196 = vmatprep.subr.mxu1 %v228_v0  ;;  %v25_v28 = vld [vmem:[#allocation2 + $0x10] sm:$0xff]  ;;  %v26_v36 = vld [vmem:[#allocation2 + $0x18] sm:$0xff]  ;;  %v190_v43 = vld [vmem:[%s396_s2] ss:$0 sm:$0xff] }
   0xc   :  { %77 = vmatpush1.msra.mxu0 %v45_v6  ;;  %214 = vmatpush1.msra.mxu1 %v45_v6 }
   0xd   :  { %78 = vmatprep.subr.mxu0 %v228_v0  ;;  %197 = vmatprep.subr.mxu1 %v228_v0 }
   0xe   :  { %79 = vmatpush1.msra.mxu0 %v44_v7  ;;  %215 = vmatpush1.msra.mxu1 %v44_v7 }
   0xf   :  { %80 = vmatprep.subr.mxu0 %v228_v0  ;;  %198 = vmatprep.subr.mxu1 %v228_v0 }
  0x10   :  { %81 = vmatpush1.msra.mxu0 %v43_v8  ;;  %216 = vmatpush1.msra.mxu1 %v43_v8 }
  0x11   :  { %82 = vmatprep.subr.mxu0 %v228_v0  ;;  %199 = vmatprep.subr.mxu1 %v228_v0 }
  0x12   :  { %83 = vmatpush1.msra.mxu0 %v42_v9  ;;  %217 = vmatpush1.msra.mxu1 %v42_v9 }
  0x13   :  { %84 = vmatprep.subr.mxu0 %v228_v0  ;;  %200 = vmatprep.subr.mxu1 %v228_v0 }
  0x14   :  { %85 = vmatpush1.msra.mxu0 %v41_v10  ;;  %218 = vmatpush1.msra.mxu1 %v41_v10 }
  0x15   :  { %86 = vmatprep.subr.mxu0 %v228_v0  ;;  %201 = vmatprep.subr.mxu1 %v228_v0 }
  0x16   :  { %87 = vmatpush1.msra.mxu0 %v40_v11  ;;  %219 = vmatpush1.msra.mxu1 %v40_v11 }
  0x17   :  { %88 = vmatprep.subr.mxu0 %v228_v0  ;;  %202 = vmatprep.subr.mxu1 %v228_v0 }
  0x18   :  { %89 = vmatpush1.msra.mxu0 %v39_v12  ;;  %220 = vmatpush1.msra.mxu1 %v39_v12 }
  0x19   :  { %90 = vmatprep.subr.mxu0 %v228_v0  ;;  %203 = vmatprep.subr.mxu1 %v228_v0 }
  0x1a   :  { %91 = vmatpush1.msra.mxu0 %v38_v13  ;;  %221 = vmatpush1.msra.mxu1 %v38_v13 }
  0x1b   :  { %92 = vmatprep.subr.mxu0 %v228_v0  ;;  %204 = vmatprep.subr.mxu1 %v228_v0 }
  0x1c   :  { %93 = vmatpush1.msra.mxu0 %v37_v14  ;;  %222 = vmatpush1.msra.mxu1 %v37_v14 }
  0x1d   :  { %94 = vmatprep.subr.mxu0 %v228_v0  ;;  %205 = vmatprep.subr.mxu1 %v228_v0 }
  0x1e   :  { %95 = vmatpush1.msra.mxu0 %v36_v15  ;;  %223 = vmatpush1.msra.mxu1 %v36_v15 }
  0x1f   :  { %96 = vmatprep.subr.mxu0 %v228_v0  ;;  %206 = vmatprep.subr.mxu1 %v228_v0 }
  0x20   :  { %97 = vmatpush1.msra.mxu0 %v35_v16  ;;  %224 = vmatpush1.msra.mxu1 %v35_v16 }
  0x21   :  { %126 = vmatprep.subr.mxu0 %v228_v0  ;;  %207 = vmatprep.subr.mxu1 %v228_v0 }
  0x22   :  { %127 = vmatpush2.msra.mxu0 %v52_v17  ;;  %225 = vmatpush2.msra.mxu1 %v52_v17 }
  0x23   :  { %128 = vmatprep.subr.mxu0 %v228_v0  ;;  %208 = vmatprep.subr.mxu1 %v228_v0 }
  0x24   :  { %129 = vmatpush2.msra.mxu0 %v51_v18  ;;  %226 = vmatpush2.msra.mxu1 %v51_v18 }
  0x25   :  { %186 = vmatprep.mubr.msk.f32.mxu0 %vm53_vm1, %v28_v19  ;;  %188 = vmatprep.mubr.msk.f32.mxu1 %vm53_vm1, %v32_v20 }
  0x26   :  { %131 = vmatmul.mubr.f32.vlgmr.msra.gmra.mxu0 %v27_v21  ;;  %141 = vmatmul.mubr.f32.vlgmr.msra.gmra.mxu1 %v31_v22 }
  0x27   :  { %187 = vmatprep.mubr.msk.f32.mxu0 %vm53_vm1, %v30_v23  ;;  %189 = vmatprep.mubr.msk.f32.mxu1 %vm53_vm1, %v34_v24 }
  0x2a   :  { %136 = vmatmul.mubr.f32.gmra.mxu0 %v29_v25  ;;  %146 = vmatmul.mubr.f32.gmra.mxu1 %v33_v26 }
  0xe6   :  { %v132_v29 = vpop.f32.mrf.mxu0  ;;  %v142_v30 = vpop.f32.mrf.mxu1 }
  0xe7   :  { %v151_v31 = vadd.f32 %v132_v29, %v23_v27  ;;  %v153_v32 = vadd.f32 %v142_v30, %v25_v28 }
  0xe8   :  { %v134_v33 = vpop.f32.mrf.mxu0  ;;  %v144_v34 = vpop.f32.mrf.mxu1 }
  0xe9   :  { %156 = vst.msk [vmem:[#allocation2] sm:$0xff] %vm18_vm0, %v151_v31  ;;  %158 = vst.msk [vmem:[#allocation2 + $0x10] sm:$0xff] %vm18_vm0, %v153_v32 }
  0xea   :  { %v137_v37 = vpop.f32.mrf.mxu0  ;;  %v147_v38 = vpop.f32.mrf.mxu1 }
  0xeb   :  { %v152_v39 = vadd.f32 %v137_v37, %v24_v35  ;;  %v154_v40 = vadd.f32 %v147_v38, %v26_v36 }
  0xec   :  { %v139_v41 = vpop.f32.mrf.mxu0  ;;  %v149_v42 = vpop.f32.mrf.mxu1 }
  0xed   :  { %157 = vst.msk [vmem:[#allocation2 + $0x8] sm:$0xff] %vm18_vm0, %v152_v39  ;;  %159 = vst.msk [vmem:[#allocation2 + $0x18] sm:$0xff] %vm18_vm0, %v154_v40 }
  0xf0   :  { %v163_v44 = vld [vmem:[#allocation2] sm:$0xff]  ;;  %v165_v45 = vld [vmem:[#allocation2 + $0x10] sm:$0xff] }
  0xf1   :  { %v174_v46 = vadd.f32 %v190_v43, %v163_v44  ;;  %v176_v47 = vadd.f32 %v190_v43, %v165_v45 }
  0xf3   :  { %178 = vst.msk [vmem:[%s397_s3] sm:$0xff] %vm18_vm0, %v174_v46  ;;  %180 = vst.msk [vmem:[%s397_s3 + $0x10] sm:$0xff] %vm18_vm0, %v176_v47 }
  0xf4   :  { %v164_v48 = vld [vmem:[#allocation2 + $0x8] sm:$0xff]  ;;  %v166_v49 = vld [vmem:[#allocation2 + $0x18] sm:$0xff] }
  0xf5   :  { %v175_v50 = vadd.f32 %v190_v43, %v164_v48  ;;  %v177_v51 = vadd.f32 %v190_v43, %v166_v49 }
  0xf7   :  { %179 = vst.msk [vmem:[%s397_s3 + $0x8] sm:$0xff] %vm18_vm0, %v175_v50  ;;  %181 = vst.msk [vmem:[%s397_s3 + $0x18] sm:$0xff] %vm18_vm0, %v177_v51 }

// kernel: viteff_forward.16
= control target key start
LH: loop header
LB: loop body
LE: loop exit
PB: predicated region body
PF: predicated region fallthrough
CT: control target
= control target key end

     0   :  { %vm18_vm0 = vcmask 195584   ;;  %v232_v0 = vmov 0.0   ;;  %vm53_vm1 = vcmask 130048   ;;  %s398_s1 = inlined_call_operand.vmem [shape: f32[144,24], index: 1, kind: input, shape index: {}]   ;;  %s399_s0 = inlined_call_operand.vmem [shape: f32[32,144], index: 0, kind: input, shape index: {}]   ;;  %s400_s2 = inlined_call_operand.vmem [shape: f32[1,24], index: 2, kind: input, shape index: {}]   ;;  %s401_s3 = inlined_call_operand.vmem [shape: f32[32,24], index: 3, kind: output, shape index: {}]  }
   0x1   :  { %66 = vmatprep.subr.mxu0 %v232_v0  ;;  %195 = vmatprep.subr.mxu1 %v232_v0  ;;  %v50_v1 = vld [vmem:[%s398_s1 + $0x78] sm:$0xff]  ;;  %v49_v2 = vld [vmem:[%s398_s1 + $0x70] sm:$0xff]  ;;  %19 = vst.msk [vmem:[#allocation2] sm:$0xff] %vm18_vm0, %v232_v0  ;;  %20 = vst.msk [vmem:[#allocation2 + $0x8] sm:$0xff] %vm18_vm0, %v232_v0 }
   0x2   :  { %21 = vst.msk [vmem:[#allocation2 + $0x10] sm:$0xff] %vm18_vm0, %v232_v0  ;;  %22 = vst.msk [vmem:[#allocation2 + $0x18] sm:$0xff] %vm18_vm0, %v232_v0  ;;  %67 = vmatpush1.msra.mxu0 %v50_v1  ;;  %213 = vmatpush1.msra.mxu1 %v50_v1  ;;  %v48_v3 = vld [vmem:[%s398_s1 + $0x68] sm:$0xff]  ;;  %v47_v4 = vld [vmem:[%s398_s1 + $0x60] sm:$0xff] }
   0x3   :  { %68 = vmatprep.subr.mxu0 %v232_v0  ;;  %196 = vmatprep.subr.mxu1 %v232_v0  ;;  %v46_v5 = vld [vmem:[%s398_s1 + $0x58] sm:$0xff]  ;;  %v45_v6 = vld [vmem:[%s398_s1 + $0x50] sm:$0xff]  ;;  %v44_v7 = vld [vmem:[%s398_s1 + $0x48] sm:$0xff] }
   0x4   :  { %69 = vmatpush1.msra.mxu0 %v49_v2  ;;  %214 = vmatpush1.msra.mxu1 %v49_v2  ;;  %v43_v8 = vld [vmem:[%s398_s1 + $0x40] sm:$0xff]  ;;  %v42_v9 = vld [vmem:[%s398_s1 + $0x38] sm:$0xff]  ;;  %v41_v10 = vld [vmem:[%s398_s1 + $0x30] sm:$0xff] }
   0x5   :  { %70 = vmatprep.subr.mxu0 %v232_v0  ;;  %197 = vmatprep.subr.mxu1 %v232_v0  ;;  %v40_v11 = vld [vmem:[%s398_s1 + $0x28] sm:$0xff]  ;;  %v39_v12 = vld [vmem:[%s398_s1 + $0x20] sm:$0xff]  ;;  %v38_v13 = vld [vmem:[%s398_s1 + $0x18] sm:$0xff] }
   0x6   :  { %71 = vmatpush1.msra.mxu0 %v48_v3  ;;  %215 = vmatpush1.msra.mxu1 %v48_v3  ;;  %v37_v14 = vld [vmem:[%s398_s1 + $0x10] sm:$0xff]  ;;  %v36_v15 = vld [vmem:[%s398_s1 + $0x8] sm:$0xff]  ;;  %v35_v16 = vld [vmem:[%s398_s1] sm:$0xff] }
   0x7   :  { %72 = vmatprep.subr.mxu0 %v232_v0  ;;  %198 = vmatprep.subr.mxu1 %v232_v0  ;;  %v52_v17 = vld [vmem:[%s398_s1 + $0x88] sm:$0xff]  ;;  %v51_v18 = vld [vmem:[%s398_s1 + $0x80] sm:$0xff]  ;;  %v30_v23 = vld [vmem:[%s399_s0 + $0x18] sm:$0xff] }
   0x8   :  { %73 = vmatpush1.msra.mxu0 %v47_v4  ;;  %216 = vmatpush1.msra.mxu1 %v47_v4  ;;  %v28_v19 = vld [vmem:[%s399_s0 + $0x8] sm:$0xff]  ;;  %v27_v21 = vld [vmem:[%s399_s0] sm:$0xff]  ;;  %v34_v24 = vld [vmem:[%s399_s0 + $0x38] sm:$0xff] }
   0x9   :  { %74 = vmatprep.subr.mxu0 %v232_v0  ;;  %199 = vmatprep.subr.mxu1 %v232_v0  ;;  %v32_v20 = vld [vmem:[%s399_s0 + $0x28] sm:$0xff]  ;;  %v31_v22 = vld [vmem:[%s399_s0 + $0x20] sm:$0xff]  ;;  %v29_v25 = vld [vmem:[%s399_s0 + $0x10] sm:$0xff] }
   0xa   :  { %75 = vmatpush1.msra.mxu0 %v46_v5  ;;  %217 = vmatpush1.msra.mxu1 %v46_v5  ;;  %v33_v26 = vld [vmem:[%s399_s0 + $0x30] sm:$0xff]  ;;  %v23_v27 = vld [vmem:[#allocation2] sm:$0xff]  ;;  %v24_v35 = vld [vmem:[#allocation2 + $0x8] sm:$0xff] }
   0xb   :  { %76 = vmatprep.subr.mxu0 %v232_v0  ;;  %200 = vmatprep.subr.mxu1 %v232_v0  ;;  %v25_v28 = vld [vmem:[#allocation2 + $0x10] sm:$0xff]  ;;  %v26_v36 = vld [vmem:[#allocation2 + $0x18] sm:$0xff]  ;;  %v194_v43 = vld [vmem:[%s400_s2] ss:$0 sm:$0xff] }
   0xc   :  { %77 = vmatpush1.msra.mxu0 %v45_v6  ;;  %218 = vmatpush1.msra.mxu1 %v45_v6 }
   0xd   :  { %78 = vmatprep.subr.mxu0 %v232_v0  ;;  %201 = vmatprep.subr.mxu1 %v232_v0 }
   0xe   :  { %79 = vmatpush1.msra.mxu0 %v44_v7  ;;  %219 = vmatpush1.msra.mxu1 %v44_v7 }
   0xf   :  { %80 = vmatprep.subr.mxu0 %v232_v0  ;;  %202 = vmatprep.subr.mxu1 %v232_v0 }
  0x10   :  { %81 = vmatpush1.msra.mxu0 %v43_v8  ;;  %220 = vmatpush1.msra.mxu1 %v43_v8 }
  0x11   :  { %82 = vmatprep.subr.mxu0 %v232_v0  ;;  %203 = vmatprep.subr.mxu1 %v232_v0 }
  0x12   :  { %83 = vmatpush1.msra.mxu0 %v42_v9  ;;  %221 = vmatpush1.msra.mxu1 %v42_v9 }
  0x13   :  { %84 = vmatprep.subr.mxu0 %v232_v0  ;;  %204 = vmatprep.subr.mxu1 %v232_v0 }
  0x14   :  { %85 = vmatpush1.msra.mxu0 %v41_v10  ;;  %222 = vmatpush1.msra.mxu1 %v41_v10 }
  0x15   :  { %86 = vmatprep.subr.mxu0 %v232_v0  ;;  %205 = vmatprep.subr.mxu1 %v232_v0 }
  0x16   :  { %87 = vmatpush1.msra.mxu0 %v40_v11  ;;  %223 = vmatpush1.msra.mxu1 %v40_v11 }
  0x17   :  { %88 = vmatprep.subr.mxu0 %v232_v0  ;;  %206 = vmatprep.subr.mxu1 %v232_v0 }
  0x18   :  { %89 = vmatpush1.msra.mxu0 %v39_v12  ;;  %224 = vmatpush1.msra.mxu1 %v39_v12 }
  0x19   :  { %90 = vmatprep.subr.mxu0 %v232_v0  ;;  %207 = vmatprep.subr.mxu1 %v232_v0 }
  0x1a   :  { %91 = vmatpush1.msra.mxu0 %v38_v13  ;;  %225 = vmatpush1.msra.mxu1 %v38_v13 }
  0x1b   :  { %92 = vmatprep.subr.mxu0 %v232_v0  ;;  %208 = vmatprep.subr.mxu1 %v232_v0 }
  0x1c   :  { %93 = vmatpush1.msra.mxu0 %v37_v14  ;;  %226 = vmatpush1.msra.mxu1 %v37_v14 }
  0x1d   :  { %94 = vmatprep.subr.mxu0 %v232_v0  ;;  %209 = vmatprep.subr.mxu1 %v232_v0 }
  0x1e   :  { %95 = vmatpush1.msra.mxu0 %v36_v15  ;;  %227 = vmatpush1.msra.mxu1 %v36_v15 }
  0x1f   :  { %96 = vmatprep.subr.mxu0 %v232_v0  ;;  %210 = vmatprep.subr.mxu1 %v232_v0 }
  0x20   :  { %97 = vmatpush1.msra.mxu0 %v35_v16  ;;  %228 = vmatpush1.msra.mxu1 %v35_v16 }
  0x21   :  { %126 = vmatprep.subr.mxu0 %v232_v0  ;;  %211 = vmatprep.subr.mxu1 %v232_v0 }
  0x22   :  { %127 = vmatpush2.msra.mxu0 %v52_v17  ;;  %229 = vmatpush2.msra.mxu1 %v52_v17 }
  0x23   :  { %128 = vmatprep.subr.mxu0 %v232_v0  ;;  %212 = vmatprep.subr.mxu1 %v232_v0 }
  0x24   :  { %129 = vmatpush2.msra.mxu0 %v51_v18  ;;  %230 = vmatpush2.msra.mxu1 %v51_v18 }
  0x25   :  { %190 = vmatprep.mubr.msk.f32.mxu0 %vm53_vm1, %v28_v19  ;;  %192 = vmatprep.mubr.msk.f32.mxu1 %vm53_vm1, %v32_v20 }
  0x26   :  { %131 = vmatmul.mubr.f32.vlgmr.msra.gmra.mxu0 %v27_v21  ;;  %141 = vmatmul.mubr.f32.vlgmr.msra.gmra.mxu1 %v31_v22 }
  0x27   :  { %191 = vmatprep.mubr.msk.f32.mxu0 %vm53_vm1, %v30_v23  ;;  %193 = vmatprep.mubr.msk.f32.mxu1 %vm53_vm1, %v34_v24 }
  0x2a   :  { %136 = vmatmul.mubr.f32.gmra.mxu0 %v29_v25  ;;  %146 = vmatmul.mubr.f32.gmra.mxu1 %v33_v26 }
  0xe6   :  { %v132_v29 = vpop.f32.mrf.mxu0  ;;  %v142_v30 = vpop.f32.mrf.mxu1 }
  0xe7   :  { %v151_v31 = vadd.f32 %v132_v29, %v23_v27  ;;  %v153_v32 = vadd.f32 %v142_v30, %v25_v28 }
  0xe8   :  { %v134_v33 = vpop.f32.mrf.mxu0  ;;  %v144_v34 = vpop.f32.mrf.mxu1 }
  0xe9   :  { %156 = vst.msk [vmem:[#allocation2] sm:$0xff] %vm18_vm0, %v151_v31  ;;  %158 = vst.msk [vmem:[#allocation2 + $0x10] sm:$0xff] %vm18_vm0, %v153_v32 }
  0xea   :  { %v137_v37 = vpop.f32.mrf.mxu0  ;;  %v147_v38 = vpop.f32.mrf.mxu1 }
  0xeb   :  { %v152_v39 = vadd.f32 %v137_v37, %v24_v35  ;;  %v154_v40 = vadd.f32 %v147_v38, %v26_v36 }
  0xec   :  { %v139_v41 = vpop.f32.mrf.mxu0  ;;  %v149_v42 = vpop.f32.mrf.mxu1 }
  0xed   :  { %157 = vst.msk [vmem:[#allocation2 + $0x8] sm:$0xff] %vm18_vm0, %v152_v39  ;;  %159 = vst.msk [vmem:[#allocation2 + $0x18] sm:$0xff] %vm18_vm0, %v154_v40 }
  0xf0   :  { %v163_v44 = vld [vmem:[#allocation2] sm:$0xff]  ;;  %v165_v45 = vld [vmem:[#allocation2 + $0x10] sm:$0xff] }
  0xf1   :  { %v174_v46 = vadd.f32 %v194_v43, %v163_v44  ;;  %v176_v47 = vadd.f32 %v194_v43, %v165_v45 }
  0xf3   :  { %v178_v48 = vmax.f32 %v174_v46, 0.0  ;;  %v180_v49 = vmax.f32 %v176_v47, 0.0 }
  0xf4   :  { %v164_v50 = vld [vmem:[#allocation2 + $0x8] sm:$0xff]  ;;  %v166_v51 = vld [vmem:[#allocation2 + $0x18] sm:$0xff] }
  0xf5   :  { %182 = vst.msk [vmem:[%s401_s3] sm:$0xff] %vm18_vm0, %v178_v48  ;;  %184 = vst.msk [vmem:[%s401_s3 + $0x10] sm:$0xff] %vm18_vm0, %v180_v49  ;;  %v175_v52 = vadd.f32 %v194_v43, %v164_v50  ;;  %v177_v53 = vadd.f32 %v194_v43, %v166_v51 }
  0xf7   :  { %v179_v54 = vmax.f32 %v175_v52, 0.0  ;;  %v181_v55 = vmax.f32 %v177_v53, 0.0 }
  0xf9   :  { %183 = vst.msk [vmem:[%s401_s3 + $0x8] sm:$0xff] %vm18_vm0, %v179_v54  ;;  %185 = vst.msk [vmem:[%s401_s3 + $0x18] sm:$0xff] %vm18_vm0, %v181_v55 }

// kernel: viteff_forward.17
= control target key start
LH: loop header
LB: loop body
LE: loop exit
PB: predicated region body
PF: predicated region fallthrough
CT: control target
= control target key end

     0   :  { %vm18_vm0 = vcmask 261120   ;;  %v148_v0 = vmov 0.0   ;;  %vm50_vm1 = vcmask 719872   ;;  %s293_s1 = inlined_call_operand.vmem [shape: f32[216,32], index: 1, kind: input, shape index: {}]   ;;  %s294_s0 = inlined_call_operand.vmem [shape: f32[8,216], index: 0, kind: input, shape index: {}]   ;;  %s295_s2 = inlined_call_operand.vmem [shape: f32[1,32], index: 2, kind: input, shape index: {}]   ;;  %s296_s3 = inlined_call_operand.vmem [shape: f32[8,32], index: 3, kind: output, shape index: {}]  }
   0x1   :  { %54 = vmatprep.subr.mxu0 %v148_v0  ;;  %v38_v1 = vld [vmem:[%s293_s1 + $0x78] sm:$0xff]  ;;  %v37_v2 = vld [vmem:[%s293_s1 + $0x70] sm:$0xff]  ;;  %19 = vst.msk [vmem:[#allocation2] sm:$0xff] %vm18_vm0, %v148_v0  ;;  %v36_v3 = vld [vmem:[%s293_s1 + $0x68] sm:$0xff] }
   0x2   :  { %55 = vmatpush1.msra.mxu0 %v38_v1  ;;  %v35_v4 = vld [vmem:[%s293_s1 + $0x60] sm:$0xff]  ;;  %v34_v5 = vld [vmem:[%s293_s1 + $0x58] sm:$0xff]  ;;  %v33_v6 = vld [vmem:[%s293_s1 + $0x50] sm:$0xff] }
   0x3   :  { %56 = vmatprep.subr.mxu0 %v148_v0  ;;  %v22_v7 = vld [vmem:[%s294_s0 + $0x8] sm:$0xff]  ;;  %v31_v9 = vld [vmem:[%s293_s1 + $0x40] sm:$0xff]  ;;  %v30_v10 = vld [vmem:[%s293_s1 + $0x38] sm:$0xff] }
   0x4   :  { %57 = vmatpush1.msra.mxu0 %v37_v2  ;;  %v32_v8 = vld [vmem:[%s293_s1 + $0x48] sm:$0xff]  ;;  %145 = vmatprep.mubr.msk.f32.mxu0 %vm50_vm1, %v22_v7  ;;  %v29_v11 = vld [vmem:[%s293_s1 + $0x30] sm:$0xff]  ;;  %v27_v13 = vld [vmem:[%s293_s1 + $0x20] sm:$0xff] }
   0x5   :  { %58 = vmatprep.subr.mxu0 %v148_v0  ;;  %v28_v12 = vld [vmem:[%s293_s1 + $0x28] sm:$0xff]  ;;  %v26_v14 = vld [vmem:[%s293_s1 + $0x18] sm:$0xff]  ;;  %v25_v15 = vld [vmem:[%s293_s1 + $0x10] sm:$0xff] }
   0x6   :  { %59 = vmatpush1.msra.mxu0 %v36_v3  ;;  %v24_v16 = vld [vmem:[%s293_s1 + $0x8] sm:$0xff]  ;;  %v23_v17 = vld [vmem:[%s293_s1] sm:$0xff]  ;;  %v49_v18 = vld [vmem:[%s293_s1 + $0xd0] sm:$0xff] }
   0x7   :  { %60 = vmatprep.subr.mxu0 %v148_v0  ;;  %v48_v19 = vld [vmem:[%s293_s1 + $0xc8] sm:$0xff]  ;;  %v47_v20 = vld [vmem:[%s293_s1 + $0xc0] sm:$0xff]  ;;  %v46_v21 = vld [vmem:[%s293_s1 + $0xb8] sm:$0xff] }
   0x8   :  { %61 = vmatpush1.msra.mxu0 %v35_v4  ;;  %v45_v22 = vld [vmem:[%s293_s1 + $0xb0] sm:$0xff]  ;;  %v44_v23 = vld [vmem:[%s293_s1 + $0xa8] sm:$0xff]  ;;  %v43_v24 = vld [vmem:[%s293_s1 + $0xa0] sm:$0xff] }
   0x9   :  { %62 = vmatprep.subr.mxu0 %v148_v0  ;;  %v42_v25 = vld [vmem:[%s293_s1 + $0x98] sm:$0xff]  ;;  %v41_v26 = vld [vmem:[%s293_s1 + $0x90] sm:$0xff]  ;;  %v40_v27 = vld [vmem:[%s293_s1 + $0x88] sm:$0xff] }
   0xa   :  { %63 = vmatpush1.msra.mxu0 %v34_v5  ;;  %v39_v28 = vld [vmem:[%s293_s1 + $0x80] sm:$0xff] }
   0xb   :  { %64 = vmatprep.subr.mxu0 %v148_v0  ;;  %v21_v29 = vld [vmem:[%s294_s0] sm:$0xff] }
   0xc   :  { %65 = vmatpush1.msra.mxu0 %v33_v6  ;;  %v20_v30 = vld [vmem:[#allocation2] sm:$0xff] }
   0xd   :  { %66 = vmatprep.subr.mxu0 %v148_v0  ;;  %v146_v34 = vld [vmem:[%s295_s2] ss:$0 sm:$0xff] }
   0xe   :  { %67 = vmatpush1.msra.mxu0 %v32_v8 }
   0xf   :  { %68 = vmatprep.subr.mxu0 %v148_v0 }
  0x10   :  { %69 = vmatpush1.msra.mxu0 %v31_v9 }
  0x11   :  { %70 = vmatprep.subr.mxu0 %v148_v0 }
  0x12   :  { %71 = vmatpush1.msra.mxu0 %v30_v10 }
  0x13   :  { %72 = vmatprep.subr.mxu0 %v148_v0 }
  0x14   :  { %73 = vmatpush1.msra.mxu0 %v29_v11 }
  0x15   :  { %74 = vmatprep.subr.mxu0 %v148_v0 }
  0x16   :  { %75 = vmatpush1.msra.mxu0 %v28_v12 }
  0x17   :  { %76 = vmatprep.subr.mxu0 %v148_v0 }
  0x18   :  { %77 = vmatpush1.msra.mxu0 %v27_v13 }
  0x19   :  { %78 = vmatprep.subr.mxu0 %v148_v0 }
  0x1a   :  { %79 = vmatpush1.msra.mxu0 %v26_v14 }
  0x1b   :  { %80 = vmatprep.subr.mxu0 %v148_v0 }
  0x1c   :  { %81 = vmatpush1.msra.mxu0 %v25_v15 }
  0x1d   :  { %82 = vmatprep.subr.mxu0 %v148_v0 }
  0x1e   :  { %83 = vmatpush1.msra.mxu0 %v24_v16 }
  0x1f   :  { %84 = vmatprep.subr.mxu0 %v148_v0 }
  0x20   :  { %85 = vmatpush1.msra.mxu0 %v23_v17 }
  0x21   :  { %96 = vmatprep.subr.mxu0 %v148_v0 }
  0x22   :  { %97 = vmatpush2.msra.mxu0 %v49_v18 }
  0x23   :  { %98 = vmatprep.subr.mxu0 %v148_v0 }
  0x24   :  { %99 = vmatpush2.msra.mxu0 %v48_v19 }
  0x25   :  { %100 = vmatprep.subr.mxu0 %v148_v0 }
  0x26   :  { %101 = vmatpush2.msra.mxu0 %v47_v20 }
  0x27   :  { %102 = vmatprep.subr.mxu0 %v148_v0 }
  0x28   :  { %103 = vmatpush2.msra.mxu0 %v46_v21 }
  0x29   :  { %104 = vmatprep.subr.mxu0 %v148_v0 }
  0x2a   :  { %105 = vmatpush2.msra.mxu0 %v45_v22 }
  0x2b   :  { %106 = vmatprep.subr.mxu0 %v148_v0 }
  0x2c   :  { %107 = vmatpush2.msra.mxu0 %v44_v23 }
  0x2d   :  { %108 = vmatprep.subr.mxu0 %v148_v0 }
  0x2e   :  { %109 = vmatpush2.msra.mxu0 %v43_v24 }
  0x2f   :  { %110 = vmatprep.subr.mxu0 %v148_v0 }
  0x30   :  { %111 = vmatpush2.msra.mxu0 %v42_v25 }
  0x31   :  { %112 = vmatprep.subr.mxu0 %v148_v0 }
  0x32   :  { %113 = vmatpush2.msra.mxu0 %v41_v26 }
  0x33   :  { %114 = vmatprep.subr.mxu0 %v148_v0 }
  0x34   :  { %115 = vmatpush2.msra.mxu0 %v40_v27 }
  0x35   :  { %116 = vmatprep.subr.mxu0 %v148_v0 }
  0x36   :  { %117 = vmatpush2.msra.mxu0 %v39_v28 }
  0x37   :  { %119 = vmatmul.mubr.f32.vlgmr.msra.gmra.mxu0 %v21_v29 }
  0xf7   :  { %v120_v31 = vpop.f32.mrf.mxu0 }
  0xf8   :  { %v124_v32 = vadd.f32 %v120_v31, %v20_v30 }
  0xf9   :  { %v122_v33 = vpop.f32.mrf.mxu0 }
  0xfa   :  { %126 = vst.msk [vmem:[#allocation2] sm:$0xff] %vm18_vm0, %v124_v32 }
 0x101   :  { %v130_v35 = vld [vmem:[#allocation2] sm:$0xff] }
 0x102   :  { %v138_v36 = vadd.f32 %v146_v34, %v130_v35 }
 0x104   :  { %v139_v37 = vmax.f32 %v138_v36, 0.0 }
 0x106   :  { %140 = vst.msk [vmem:[%s296_s3] sm:$0xff] %vm18_vm0, %v139_v37 }

// kernel: viteff_forward.20
= control target key start
LH: loop header
LB: loop body
LE: loop exit
PB: predicated region body
PF: predicated region fallthrough
CT: control target
= control target key end

     0   :  { %vm18_vm0 = vcmask 261120   ;;  %v147_v0 = vmov 0.0   ;;  %vm50_vm1 = vcmask 719872   ;;  %s292_s1 = inlined_call_operand.vmem [shape: f32[216,32], index: 1, kind: input, shape index: {}]   ;;  %s293_s0 = inlined_call_operand.vmem [shape: f32[8,216], index: 0, kind: input, shape index: {}]   ;;  %s294_s2 = inlined_call_operand.vmem [shape: f32[1,32], index: 2, kind: input, shape index: {}]   ;;  %s295_s3 = inlined_call_operand.vmem [shape: f32[8,32], index: 3, kind: output, shape index: {}]  }
   0x1   :  { %54 = vmatprep.subr.mxu0 %v147_v0  ;;  %v38_v1 = vld [vmem:[%s292_s1 + $0x78] sm:$0xff]  ;;  %v37_v2 = vld [vmem:[%s292_s1 + $0x70] sm:$0xff]  ;;  %19 = vst.msk [vmem:[#allocation2] sm:$0xff] %vm18_vm0, %v147_v0  ;;  %v36_v3 = vld [vmem:[%s292_s1 + $0x68] sm:$0xff] }
   0x2   :  { %55 = vmatpush1.msra.mxu0 %v38_v1  ;;  %v35_v4 = vld [vmem:[%s292_s1 + $0x60] sm:$0xff]  ;;  %v34_v5 = vld [vmem:[%s292_s1 + $0x58] sm:$0xff]  ;;  %v33_v6 = vld [vmem:[%s292_s1 + $0x50] sm:$0xff] }
   0x3   :  { %56 = vmatprep.subr.mxu0 %v147_v0  ;;  %v22_v7 = vld [vmem:[%s293_s0 + $0x8] sm:$0xff]  ;;  %v31_v9 = vld [vmem:[%s292_s1 + $0x40] sm:$0xff]  ;;  %v30_v10 = vld [vmem:[%s292_s1 + $0x38] sm:$0xff] }
   0x4   :  { %57 = vmatpush1.msra.mxu0 %v37_v2  ;;  %v32_v8 = vld [vmem:[%s292_s1 + $0x48] sm:$0xff]  ;;  %144 = vmatprep.mubr.msk.f32.mxu0 %vm50_vm1, %v22_v7  ;;  %v29_v11 = vld [vmem:[%s292_s1 + $0x30] sm:$0xff]  ;;  %v27_v13 = vld [vmem:[%s292_s1 + $0x20] sm:$0xff] }
   0x5   :  { %58 = vmatprep.subr.mxu0 %v147_v0  ;;  %v28_v12 = vld [vmem:[%s292_s1 + $0x28] sm:$0xff]  ;;  %v26_v14 = vld [vmem:[%s292_s1 + $0x18] sm:$0xff]  ;;  %v25_v15 = vld [vmem:[%s292_s1 + $0x10] sm:$0xff] }
   0x6   :  { %59 = vmatpush1.msra.mxu0 %v36_v3  ;;  %v24_v16 = vld [vmem:[%s292_s1 + $0x8] sm:$0xff]  ;;  %v23_v17 = vld [vmem:[%s292_s1] sm:$0xff]  ;;  %v49_v18 = vld [vmem:[%s292_s1 + $0xd0] sm:$0xff] }
   0x7   :  { %60 = vmatprep.subr.mxu0 %v147_v0  ;;  %v48_v19 = vld [vmem:[%s292_s1 + $0xc8] sm:$0xff]  ;;  %v47_v20 = vld [vmem:[%s292_s1 + $0xc0] sm:$0xff]  ;;  %v46_v21 = vld [vmem:[%s292_s1 + $0xb8] sm:$0xff] }
   0x8   :  { %61 = vmatpush1.msra.mxu0 %v35_v4  ;;  %v45_v22 = vld [vmem:[%s292_s1 + $0xb0] sm:$0xff]  ;;  %v44_v23 = vld [vmem:[%s292_s1 + $0xa8] sm:$0xff]  ;;  %v43_v24 = vld [vmem:[%s292_s1 + $0xa0] sm:$0xff] }
   0x9   :  { %62 = vmatprep.subr.mxu0 %v147_v0  ;;  %v42_v25 = vld [vmem:[%s292_s1 + $0x98] sm:$0xff]  ;;  %v41_v26 = vld [vmem:[%s292_s1 + $0x90] sm:$0xff]  ;;  %v40_v27 = vld [vmem:[%s292_s1 + $0x88] sm:$0xff] }
   0xa   :  { %63 = vmatpush1.msra.mxu0 %v34_v5  ;;  %v39_v28 = vld [vmem:[%s292_s1 + $0x80] sm:$0xff] }
   0xb   :  { %64 = vmatprep.subr.mxu0 %v147_v0  ;;  %v21_v29 = vld [vmem:[%s293_s0] sm:$0xff] }
   0xc   :  { %65 = vmatpush1.msra.mxu0 %v33_v6  ;;  %v20_v30 = vld [vmem:[#allocation2] sm:$0xff] }
   0xd   :  { %66 = vmatprep.subr.mxu0 %v147_v0  ;;  %v145_v34 = vld [vmem:[%s294_s2] ss:$0 sm:$0xff] }
   0xe   :  { %67 = vmatpush1.msra.mxu0 %v32_v8 }
   0xf   :  { %68 = vmatprep.subr.mxu0 %v147_v0 }
  0x10   :  { %69 = vmatpush1.msra.mxu0 %v31_v9 }
  0x11   :  { %70 = vmatprep.subr.mxu0 %v147_v0 }
  0x12   :  { %71 = vmatpush1.msra.mxu0 %v30_v10 }
  0x13   :  { %72 = vmatprep.subr.mxu0 %v147_v0 }
  0x14   :  { %73 = vmatpush1.msra.mxu0 %v29_v11 }
  0x15   :  { %74 = vmatprep.subr.mxu0 %v147_v0 }
  0x16   :  { %75 = vmatpush1.msra.mxu0 %v28_v12 }
  0x17   :  { %76 = vmatprep.subr.mxu0 %v147_v0 }
  0x18   :  { %77 = vmatpush1.msra.mxu0 %v27_v13 }
  0x19   :  { %78 = vmatprep.subr.mxu0 %v147_v0 }
  0x1a   :  { %79 = vmatpush1.msra.mxu0 %v26_v14 }
  0x1b   :  { %80 = vmatprep.subr.mxu0 %v147_v0 }
  0x1c   :  { %81 = vmatpush1.msra.mxu0 %v25_v15 }
  0x1d   :  { %82 = vmatprep.subr.mxu0 %v147_v0 }
  0x1e   :  { %83 = vmatpush1.msra.mxu0 %v24_v16 }
  0x1f   :  { %84 = vmatprep.subr.mxu0 %v147_v0 }
  0x20   :  { %85 = vmatpush1.msra.mxu0 %v23_v17 }
  0x21   :  { %96 = vmatprep.subr.mxu0 %v147_v0 }
  0x22   :  { %97 = vmatpush2.msra.mxu0 %v49_v18 }
  0x23   :  { %98 = vmatprep.subr.mxu0 %v147_v0 }
  0x24   :  { %99 = vmatpush2.msra.mxu0 %v48_v19 }
  0x25   :  { %100 = vmatprep.subr.mxu0 %v147_v0 }
  0x26   :  { %101 = vmatpush2.msra.mxu0 %v47_v20 }
  0x27   :  { %102 = vmatprep.subr.mxu0 %v147_v0 }
  0x28   :  { %103 = vmatpush2.msra.mxu0 %v46_v21 }
  0x29   :  { %104 = vmatprep.subr.mxu0 %v147_v0 }
  0x2a   :  { %105 = vmatpush2.msra.mxu0 %v45_v22 }
  0x2b   :  { %106 = vmatprep.subr.mxu0 %v147_v0 }
  0x2c   :  { %107 = vmatpush2.msra.mxu0 %v44_v23 }
  0x2d   :  { %108 = vmatprep.subr.mxu0 %v147_v0 }
  0x2e   :  { %109 = vmatpush2.msra.mxu0 %v43_v24 }
  0x2f   :  { %110 = vmatprep.subr.mxu0 %v147_v0 }
  0x30   :  { %111 = vmatpush2.msra.mxu0 %v42_v25 }
  0x31   :  { %112 = vmatprep.subr.mxu0 %v147_v0 }
  0x32   :  { %113 = vmatpush2.msra.mxu0 %v41_v26 }
  0x33   :  { %114 = vmatprep.subr.mxu0 %v147_v0 }
  0x34   :  { %115 = vmatpush2.msra.mxu0 %v40_v27 }
  0x35   :  { %116 = vmatprep.subr.mxu0 %v147_v0 }
  0x36   :  { %117 = vmatpush2.msra.mxu0 %v39_v28 }
  0x37   :  { %119 = vmatmul.mubr.f32.vlgmr.msra.gmra.mxu0 %v21_v29 }
  0xf7   :  { %v120_v31 = vpop.f32.mrf.mxu0 }
  0xf8   :  { %v124_v32 = vadd.f32 %v120_v31, %v20_v30 }
  0xf9   :  { %v122_v33 = vpop.f32.mrf.mxu0 }
  0xfa   :  { %126 = vst.msk [vmem:[#allocation2] sm:$0xff] %vm18_vm0, %v124_v32 }
 0x101   :  { %v130_v35 = vld [vmem:[#allocation2] sm:$0xff] }
 0x102   :  { %v138_v36 = vadd.f32 %v145_v34, %v130_v35 }
 0x104   :  { %139 = vst.msk [vmem:[%s295_s3] sm:$0xff] %vm18_vm0, %v138_v36 }

// kernel: viteff_forward.21
= control target key start
LH: loop header
LB: loop body
LE: loop exit
PB: predicated region body
PF: predicated region fallthrough
CT: control target
= control target key end

     0   :  { %v297_v3 = vmov 0.0   ;;  %v298_v4 = vmov 1983009808   ;;  %v63_v6 = vlaneseq  ;;  %vm299_vm0 = vmmov 0   ;;  %s446_s1 = inlined_call_operand.vmem [shape: f32[288,32], index: 1, kind: input, shape index: {}]   ;;  %s447_s0 = inlined_call_operand.vmem [shape: f32[2,288], index: 0, kind: input, shape index: {}]   ;;  %s448_s2 = inlined_call_operand.vmem [shape: f32[1,32], index: 2, kind: input, shape index: {}]   ;;  %s449_s3 = inlined_call_operand.vmem [shape: f32[2,32], index: 3, kind: output, shape index: {}]  }
   0x1   :  { %v53_v0 = vld [vmem:[%s446_s1 + $0xf8] sm:$0xff]  ;;  %v52_v2 = vld [vmem:[%s446_s1 + $0xf0] sm:$0xff]  ;;  %282 = vmatprep.subr.mxu1 %v297_v3  ;;  %v61_v5 = vunpack.c.l.s4 %v298_v4  ;;  %290 = vmatprep.mubr.msk.f32.mxu1 %vm299_vm0, %v297_v3  ;;  %v51_v8 = vld [vmem:[%s446_s1 + $0xe8] sm:$0xff]  ;;  %vm77_vm1 = vcmask 261120   ;;  %vm18_vm2 = vcmask 254976  }
   0x2   :  { %v37_v1 = vld [vmem:[%s446_s1 + $0x78] sm:$0xff]  ;;  %242 = vmatprep.subr.mxu0 %v53_v0  ;;  %v36_v7 = vld [vmem:[%s446_s1 + $0x70] sm:$0xff]  ;;  %v35_v9 = vld [vmem:[%s446_s1 + $0x68] sm:$0xff]  ;;  %v64_v12 = vshrl.u32 %v63_v6, 7  ;;  %19 = vst.msk [vmem:[#allocation2] sm:$0x3] %vm18_vm2, %v297_v3 }
   0x3   :  { %243 = vmatpush3.msra.mxu0 %v37_v1  ;;  %v50_v10 = vld [vmem:[%s446_s1 + $0xe0] sm:$0xff]  ;;  %v62_v11 = vunpack.c.0.s8 %v61_v5  ;;  %v49_v14 = vld [vmem:[%s446_s1 + $0xd8] sm:$0xff]  ;;  %v48_v16 = vld [vmem:[%s446_s1 + $0xd0] sm:$0xff] }
   0x4   :  { %244 = vmatprep.subr.mxu0 %v52_v2  ;;  %v34_v13 = vld [vmem:[%s446_s1 + $0x60] sm:$0xff]  ;;  %v33_v15 = vld [vmem:[%s446_s1 + $0x58] sm:$0xff]  ;;  %v32_v18 = vld [vmem:[%s446_s1 + $0x50] sm:$0xff] }
   0x5   :  { %245 = vmatpush3.msra.mxu0 %v36_v7  ;;  %v65_v17 = vsub.s32 %v62_v11, %v64_v12  ;;  %v57_v19 = vld [vmem:[%s446_s1 + $0x118] sm:$0xff]  ;;  %v47_v20 = vld [vmem:[%s446_s1 + $0xc8] sm:$0xff]  ;;  %v56_v21 = vld [vmem:[%s446_s1 + $0x110] sm:$0xff] }
   0x6   :  { %246 = vmatprep.subr.mxu0 %v51_v8  ;;  %283 = vmatpush3.msra.mxu1 %v57_v19  ;;  %v31_v22 = vld [vmem:[%s446_s1 + $0x48] sm:$0xff]  ;;  %v21_v23 = vld [vmem:[%s447_s0] sm:$0x3f]  ;;  %v45_v29 = vld [vmem:[%s446_s1 + $0xb8] sm:$0xff] }
   0x7   :  { %247 = vmatpush3.msra.mxu0 %v35_v9  ;;  %284 = vmatprep.subr.mxu1 %v297_v3  ;;  %v55_v24 = vld [vmem:[%s446_s1 + $0x108] sm:$0xff]  ;;  %v46_v25 = vld [vmem:[%s446_s1 + $0xc0] sm:$0xff]  ;;  %v59_v26 = vcombine.high %v21_v23, %v21_v23  ;;  %v66_v27 = vrot.slane %v21_v23, %v65_v17  ;;  %v29_v33 = vld [vmem:[%s446_s1 + $0x38] sm:$0xff] }
   0x8   :  { %248 = vmatprep.subr.mxu0 %v50_v10  ;;  %285 = vmatpush3.msra.mxu1 %v56_v21  ;;  %v30_v28 = vld [vmem:[%s446_s1 + $0x40] sm:$0xff]  ;;  %v44_v34 = vld [vmem:[%s446_s1 + $0xb0] sm:$0xff]  ;;  %v43_v36 = vld [vmem:[%s446_s1 + $0xa8] sm:$0xff] }
   0x9   :  { %249 = vmatpush3.msra.mxu0 %v34_v13  ;;  %286 = vmatprep.subr.mxu1 %v297_v3  ;;  %v73_v30 = vrot.slane %v59_v26, %v65_v17  ;;  %v74_v31 = vcombine.high %v66_v27, %v66_v27  ;;  %v54_v32 = vld [vmem:[%s446_s1 + $0x100] sm:$0xff]  ;;  %v28_v35 = vld [vmem:[%s446_s1 + $0x30] sm:$0xff]  ;;  %v27_v37 = vld [vmem:[%s446_s1 + $0x28] sm:$0xff] }
   0xa   :  { %250 = vmatprep.subr.mxu0 %v49_v14  ;;  %287 = vmatpush3.msra.mxu1 %v55_v24  ;;  %v42_v38 = vld [vmem:[%s446_s1 + $0xa0] sm:$0xff]  ;;  %v41_v40 = vld [vmem:[%s446_s1 + $0x98] sm:$0xff]  ;;  %v40_v42 = vld [vmem:[%s446_s1 + $0x90] sm:$0xff] }
   0xb   :  { %251 = vmatpush3.msra.mxu0 %v33_v15  ;;  %288 = vmatprep.subr.mxu1 %v297_v3  ;;  %v26_v39 = vld [vmem:[%s446_s1 + $0x20] sm:$0xff]  ;;  %v25_v41 = vld [vmem:[%s446_s1 + $0x18] sm:$0xff]  ;;  %v24_v43 = vld [vmem:[%s446_s1 + $0x10] sm:$0xff] }
   0xc   :  { %252 = vmatprep.subr.mxu0 %v48_v16  ;;  %144 = vmatprep.mubr.f32.mxu0 %v74_v31  ;;  %v39_v44 = vld [vmem:[%s446_s1 + $0x88] sm:$0xff]  ;;  %v38_v46 = vld [vmem:[%s446_s1 + $0x80] sm:$0xff] }
   0xd   :  { %253 = vmatpush3.msra.mxu0 %v32_v18  ;;  %289 = vmatpush3.msra.mxu1 %v54_v32  ;;  %v23_v45 = vld [vmem:[%s446_s1 + $0x8] sm:$0xff]  ;;  %v22_v47 = vld [vmem:[%s446_s1] sm:$0xff] }
   0xe   :  { %254 = vmatprep.subr.mxu0 %v47_v20  ;;  %291 = vmatmul.mubr.msk.f32.vlgmr.msra.gmra.mxu1 %vm77_vm1, %v73_v30  ;;  %v20_v53 = vld [vmem:[#allocation2] sm:$0x3] }
   0xf   :  { %255 = vmatpush3.msra.mxu0 %v31_v22  ;;  %v241_v56 = vld [vmem:[%s448_s2] ss:$0 sm:$0xff] }
  0x10   :  { %256 = vmatprep.subr.mxu0 %v46_v25 }
  0x11   :  { %257 = vmatpush3.msra.mxu0 %v30_v28 }
  0x12   :  { %258 = vmatprep.subr.mxu0 %v45_v29 }
  0x13   :  { %259 = vmatpush3.msra.mxu0 %v29_v33 }
  0x14   :  { %260 = vmatprep.subr.mxu0 %v44_v34 }
  0x15   :  { %261 = vmatpush3.msra.mxu0 %v28_v35 }
  0x16   :  { %262 = vmatprep.subr.mxu0 %v43_v36 }
  0x17   :  { %263 = vmatpush3.msra.mxu0 %v27_v37 }
  0x18   :  { %264 = vmatprep.subr.mxu0 %v42_v38 }
  0x19   :  { %265 = vmatpush3.msra.mxu0 %v26_v39 }
  0x1a   :  { %266 = vmatprep.subr.mxu0 %v41_v40 }
  0x1b   :  { %267 = vmatpush3.msra.mxu0 %v25_v41 }
  0x1c   :  { %268 = vmatprep.subr.mxu0 %v40_v42 }
  0x1d   :  { %269 = vmatpush3.msra.mxu0 %v24_v43 }
  0x1e   :  { %270 = vmatprep.subr.mxu0 %v39_v44 }
  0x1f   :  { %271 = vmatpush3.msra.mxu0 %v23_v45 }
  0x20   :  { %272 = vmatprep.subr.mxu0 %v38_v46 }
  0x21   :  { %273 = vmatpush3.msra.mxu0 %v22_v47 }
  0x22   :  { %145 = vmatmul.mubr.f32.vlgmr.msra.gmra.mxu0 %v66_v27 }
  0xce   :  { %v216_v48 = vpop.f32.mrf.mxu1 }
  0xd0   :  { %v292_v49 = vpop.f32.mrf.mxu1 }
  0xe2   :  { %v274_v50 = vpop.f32.mrf.mxu0 }
  0xe4   :  { %v275_v51 = vpop.f32.mrf.mxu0 }
  0xe5   :  { %v276_v52 = vadd.f32 %v275_v51, %v274_v50 }
  0xe7   :  { %v217_v54 = vadd.f32 %v276_v52, %v216_v48 }
  0xe9   :  { %v220_v55 = vadd.f32 %v217_v54, %v20_v53 }
  0xeb   :  { %222 = vst.msk [vmem:[#allocation2] sm:$0x3] %vm18_vm2, %v220_v55 }
  0xf2   :  { %v226_v57 = vld [vmem:[#allocation2] sm:$0x3] }
  0xf3   :  { %v234_v58 = vadd.f32 %v241_v56, %v226_v57 }
  0xf5   :  { %235 = vst.msk [vmem:[%s449_s3] sm:$0x3] %vm18_vm2, %v234_v58 }

// kernel: viteff_forward.26
= control target key start
LH: loop header
LB: loop body
LE: loop exit
PB: predicated region body
PF: predicated region fallthrough
CT: control target
= control target key end

     0   :  { %s1227_s21 = smov 0   ;;  %s1421_s0 = inlined_call_operand.vmem [shape: f32[2,4,32], index: 0, kind: input, shape index: {}]   ;;  %s1422_s1 = inlined_call_operand.vmem [shape: f32[5,2,17,32], index: 1, kind: input, shape index: {}]   ;;  %s1423_s2 = inlined_call_operand.vmem [shape: f32[32,32], index: 2, kind: input, shape index: {}]   ;;  %s1424_s3 = inlined_call_operand.vmem [shape: f32[32,32], index: 3, kind: input, shape index: {}]   ;;  %s1425_s4 = inlined_call_operand.vmem [shape: f32[32,1024], index: 4, kind: input, shape index: {}]   ;;  %s1426_s5 = inlined_call_operand.vmem [shape: f32[1,1024], index: 5, kind: input, shape index: {}]   ;;  %s1427_s6 = inlined_call_operand.vmem [shape: f32[2,4,1024], index: 6, kind: output, shape index: {}]  }
   0x1 LB: > { %s1073_s22 = sadd.s32 4294967295, %s1188_s21   ;;  %p1077_p0 = scmp.ge.s32.totalorder %s1188_s21, 1  ;;  %s1188_s21 = sphi %s1227_s21, %s16_s21  }
   0x2   : > { %p222_p1 = scmp.lt.s32.totalorder %s1188_s21, 3 }
   0x4   : > { %p223_p2 = pnand %p1077_p0, %p222_p1 }
   0x5   : > { %p257_p3 = scmp.lt.s32.totalorder (!%p223_p2), %s1073_s22, 1 }
   0x6   : > { %226 = sbr.rel (%p223_p2) target bundleno = 1141 (0x475), region = 44 }
   0xb   : > { %v357_v0 = vld [vmem:[%s1424_s3 + $0x18] sm:$0xff]  ;;  %v1190_v1 = vmov 0.0   ;;  %v356_v2 = vld [vmem:[%s1424_s3 + $0x10] sm:$0xff]  ;;  %vm1191_vm0 = vmmov 0   ;;  %s1429_s22 = smov (!%p257_p3, %s1073_s22), 1  ;;  %v355_v5 = vld [vmem:[%s1424_s3 + $0x8] sm:$0xff] }
   0xc   : > { %1133 = vmatprep.subr.mxu1 %v1190_v1  ;;  %1141 = vmatprep.mubr.msk.f32.mxu1 %vm1191_vm0, %v1190_v1  ;;  %v279_v3 = vld [vmem:[%s1423_s2 + $0x18] sm:$0xff]  ;;  %v278_v4 = vld [vmem:[%s1423_s2 + $0x10] sm:$0xff]  ;;  %s1079_s9 = smul.u32 24, %s1429_s22  ;;  %v277_v6 = vld [vmem:[%s1423_s2 + $0x8] sm:$0xff]  ;;  %s1078_s12 = sshll.u32 %s1429_s22, 2  ;;  %vm280_vm1 = vcmask 261120  }
   0xd   : > { %1134 = vmatpush3.msra.mxu1 %v357_v0  ;;  %1122 = vmatprep.subr.mxu0 %v1190_v1  ;;  %v354_v7 = vld [vmem:[%s1424_s3] sm:$0xff]  ;;  %s260_s17 = scalar_lea.vmem %s1421_s0, %s1078_s12  ;;  %vm529_vm2 = vcmask 134144   ;;  %vm545_vm3 = vcmask 1040384   ;;  %v644_v29 = vld [vmem:[%s1425_s4 + $0xc8] sm:$0xff]  ;;  %v646_v30 = vld [vmem:[%s1425_s4 + $0xd8] sm:$0xff]  ;;  %vm541_vm4 = vcmask 138240  }
   0xe   : > { %1135 = vmatprep.subr.mxu1 %v1190_v1  ;;  %1123 = vmatpush3.msra.mxu0 %v279_v3  ;;  %s1039_s20 = scalar_lea.vmem %s1422_s1, %s1079_s9  ;;  %v276_v8 = vld [vmem:[%s1423_s2] sm:$0xff]  ;;  %v636_v32 = vld [vmem:[%s1425_s4 + $0x88] sm:$0xff]  ;;  %v645_v39 = vld [vmem:[%s1425_s4 + $0xd0] sm:$0xff]  ;;  %s1101_s25 = sshll.u32 %s1429_s22, 5 }
   0xf   : > { %1136 = vmatpush3.msra.mxu1 %v356_v2  ;;  %1124 = vmatprep.subr.mxu0 %v1190_v1  ;;  %v1082_v9 = vld [vmem:[%s1039_s20 + $0x60] sm:$0xff]  ;;  %v1083_v11 = vld [vmem:[%s1039_s20 + $0x68] sm:$0xff]  ;;  %v1084_v12 = vld [vmem:[%s1039_s20 + $0x70] sm:$0x1]  ;;  %s271_s28 = scalar_lea.vmem %s1427_s6, %s1101_s25 }
  0x10   : > { %1137 = vmatprep.subr.mxu1 %v1190_v1  ;;  %1125 = vmatpush3.msra.mxu0 %v278_v4  ;;  %v1279_v10 = vld [vmem:[%s260_s17] sm:$0xf]  ;;  %v628_v34 = vld [vmem:[%s1425_s4 + $0x48] sm:$0xff]  ;;  %v638_v40 = vld [vmem:[%s1425_s4 + $0x98] sm:$0xff]  ;;  %v653_v4 = vlaneseq }
  0x11   : > { %1138 = vmatpush3.msra.mxu1 %v355_v5  ;;  %1126 = vmatprep.subr.mxu0 %v1190_v1  ;;  %v643_v31 = vld [vmem:[%s1425_s4 + $0xc0] sm:$0xff]  ;;  %v637_v41 = vld [vmem:[%s1425_s4 + $0x90] sm:$0xff]  ;;  %v630_v42 = vld [vmem:[%s1425_s4 + $0x58] sm:$0xff] }
  0x12   : > { %1139 = vmatprep.subr.mxu1 %v1190_v1  ;;  %1127 = vmatpush3.msra.mxu0 %v277_v6  ;;  %v635_v33 = vld [vmem:[%s1425_s4 + $0x80] sm:$0xff]  ;;  %v629_v43 = vld [vmem:[%s1425_s4 + $0x50] sm:$0xff]  ;;  %v620_v44 = vld [vmem:[%s1425_s4 + $0x8] sm:$0xff]  ;;  %v654_v5 = vshrl.u32 %v653_v4, 7 }
  0x13   : > { %1140 = vmatpush3.msra.mxu1 %v354_v7  ;;  %1128 = vmatprep.subr.mxu0 %v1190_v1  ;;  %v627_v35 = vld [vmem:[%s1425_s4 + $0x40] sm:$0xff]  ;;  %v622_v45 = vld [vmem:[%s1425_s4 + $0x18] sm:$0xff]  ;;  %v621_v47 = vld [vmem:[%s1425_s4 + $0x10] sm:$0xff] }
  0x14   : > { %1142 = vmatmul.mubr.msk.f32.vlgmr.msra.gmra.mxu1 %vm280_vm1, %v1082_v9  ;;  %1129 = vmatpush3.msra.mxu0 %v276_v8  ;;  %v619_v46 = vld [vmem:[%s1425_s4] sm:$0xff]  ;;  %v648_v48 = vld [vmem:[%s1425_s4 + $0xe8] sm:$0xff]  ;;  %v650_v49 = vld [vmem:[%s1425_s4 + $0xf8] sm:$0xff]  ;;  %v655_v6 = vsub.s32 0, %v654_v5  ;;  %v663_v7 = vsub.s32 2, %v654_v5  ;;  %v659_v8 = vsub.s32 1, %v654_v5 }
  0x15   : > { %1144 = vmatprep.mubr.msk.f32.mxu1 %vm1191_vm0, %v1190_v1  ;;  %1130 = vmatprep.mubr.msk.f32.mxu0 %vm1191_vm0, %v1190_v1  ;;  %v647_v52 = vld [vmem:[%s1425_s4 + $0xe0] sm:$0xff]  ;;  %v649_v53 = vld [vmem:[%s1425_s4 + $0xf0] sm:$0xff]  ;;  %v640_v55 = vld [vmem:[%s1425_s4 + $0xa8] sm:$0xff] }
  0x16   : > { %1131 = vmatmul.mubr.msk.f32.vlgmr.msra.gmra.mxu0 %vm280_vm1, %v1279_v10  ;;  %1150 = vmatprep.subr.mxu0 %v1190_v1  ;;  %v642_v56 = vld [vmem:[%s1425_s4 + $0xb8] sm:$0xff]  ;;  %v639_v57 = vld [vmem:[%s1425_s4 + $0xa0] sm:$0xff]  ;;  %v641_v58 = vld [vmem:[%s1425_s4 + $0xb0] sm:$0xff] }
  0x17   : > { %1156 = vmatprep.mubr.msk.f32.mxu0 %vm1191_vm0, %v1190_v1  ;;  %1159 = vmatprep.subr.mxu1 %v1190_v1  ;;  %v632_v59 = vld [vmem:[%s1425_s4 + $0x68] sm:$0xff]  ;;  %v634_v60 = vld [vmem:[%s1425_s4 + $0x78] sm:$0xff]  ;;  %v631_v61 = vld [vmem:[%s1425_s4 + $0x60] sm:$0xff] }
  0x18   : > { %1145 = vmatmul.mubr.msk.f32.gmra.mxu1 %vm280_vm1, %v1083_v11  ;;  %v633_v62 = vld [vmem:[%s1425_s4 + $0x70] sm:$0xff]  ;;  %v624_v63 = vld [vmem:[%s1425_s4 + $0x28] sm:$0xff]  ;;  %v626_v0 = vld [vmem:[%s1425_s4 + $0x38] sm:$0xff] }
  0x19   : > { %1147 = vmatprep.mubr.msk.f32.mxu1 %vm1191_vm0, %v1190_v1  ;;  %1160 = vmatpush3.msk.msra.mxu1 %vm545_vm3, %v1084_v12  ;;  %v623_v2 = vld [vmem:[%s1425_s4 + $0x20] sm:$0xff]  ;;  %v625_v3 = vld [vmem:[%s1425_s4 + $0x30] sm:$0xff] }
  0x1a   : > { %1161 = vmatprep.subr.mxu1 %v1190_v1 }
  0x1b   : > { %1162 = vmatpush3.msra.mxu1 %v1083_v11 }
  0x1c   : > { %1148 = vmatmul.mubr.msk.f32.gmra.mxu1 %vm280_vm1, %v1084_v12  ;;  %1163 = vmatprep.subr.mxu1 %v1190_v1 }
  0x1d   : > { %1165 = vmatprep.mubr.msk.f32.mxu1 %vm1191_vm0, %v1190_v1  ;;  %1164 = vmatpush3.msra.mxu1 %v1082_v9  ;;  %v667_v9 = vsub.s32 3, %v654_v5 }
  0x1e   : > { %791 = vmatprep.subr.mxu1 %v646_v30 }
  0xd4   : > { %v433_v13 = vpop.f32.mrf.mxu1 }
  0xd6   : > { %v1143_v14 = vpop.f32.mrf.mxu1  ;;  %v350_v15 = vpop.f32.mrf.mxu0 }
  0xd8   : > { %v438_v16 = vpop.f32.mrf.mxu1  ;;  %v1132_v17 = vpop.f32.mrf.mxu0 }
  0xda   : > { %v1146_v18 = vpop.f32.mrf.mxu1 }
  0xdc   : > { %v443_v19 = vpop.f32.mrf.mxu1 }
  0xdd   : > { %1151 = vmatpush3.xpose.msk.msra.mxu0 %vm280_vm1, %v443_v19 }
  0xde   : > { %v1149_v20 = vpop.f32.mrf.mxu1  ;;  %1152 = vmatprep.subr.mxu0 %v1190_v1 }
  0xe1   : > { %1153 = vmatpush3.xpose.msk.msra.mxu0 %vm280_vm1, %v438_v16 }
  0xe2   : > { %1154 = vmatprep.subr.mxu0 %v1190_v1 }
  0xe5   : > { %1155 = vmatpush3.xpose.msk.msra.mxu0 %vm280_vm1, %v433_v13 }
  0xe6   : > { %720 = vmatprep.subr.mxu0 %v644_v29 }
  0xe8   : > { %1157 = vmatmul.mubr.msk.f32.vlgmr.msra.gmra.mxu0 %vm280_vm1, %v350_v15 }
  0xe9   : > { %760 = vmatprep.mubr.f32.mxu0 %v1190_v1  ;;  %721 = vmatpush1.msra.mxu0 %v643_v31 }
  0xea   : > { %722 = vmatprep.subr.mxu0 %v636_v32 }
  0xeb   : > { %723 = vmatpush1.msra.mxu0 %v635_v33 }
  0xec   : > { %724 = vmatprep.subr.mxu0 %v628_v34 }
  0xed   : > { %725 = vmatpush1.msra.mxu0 %v627_v35 }
  0xee   : > { %726 = vmatprep.subr.mxu0 %v620_v44 }
  0xef   : > { %727 = vmatpush1.msra.mxu0 %v619_v46 }
  0xf0   : > { %862 = vmatprep.subr.mxu0 %v648_v48 }
 0x1a8   : > { %v525_v21 = vpop.f32.mrf.mxu0 }
 0x1a9   : > { %v530_v22 = vsel %vm529_vm2, %v525_v21, -inf }
 0x1aa   : > { %531 = vmax.xlane.f32.xlu0 %v530_v22  ;;  %v1158_v23 = vpop.f32.mrf.mxu0  ;;  %v671_v22 = vsub.s32 4, %v654_v5 }
 0x1ab   : > { %v679_v23 = vsub.s32 6, %v654_v5 }
 0x233   : > { %v532_v24 = vpop.xlane.xlu0 %531 }
 0x234   : > { %v533_v25 = vsub.f32 %v525_v21, %v532_v24  ;;  %v675_v24 = vsub.s32 5, %v654_v5 }
 0x236   : > { %v534_v26 = vmul.f32 1.442695, %v533_v25  ;;  %v683_v25 = vsub.s32 7, %v654_v5 }
 0x238   : > { %1178 = vpow2.f32 %v534_v26 }
 0x245   : > { %v1179_v27 = vpop.eup %1178 }
 0x246   : > { %v536_v28 = vsel %vm529_vm2, %v1179_v27, 0.0 }
 0x247   : > { %537 = vadd.xlane.f32.xlu0 %v536_v28 }
 0x2d0   : > { %v538_v36 = vpop.xlane.xlu0 %537 }
 0x2d1   : > { %1180 = vrcp.f32 %v538_v36 }
 0x2de   : > { %v1181_v37 = vpop.eup %1180 }
 0x2df   : > { %v540_v38 = vmul.f32 %v1181_v37, %v1179_v27 }
 0x2e1   : > { %1166 = vmatmul.mubr.msk.f32.vlgmr.msra.gmra.mxu1 %vm541_vm4, %v540_v38 }
 0x2e2   : > { %792 = vmatpush1.msra.mxu1 %v645_v39  ;;  %831 = vmatprep.mubr.f32.mxu1 %v1190_v1 }
 0x2e3   : > { %793 = vmatprep.subr.mxu1 %v638_v40 }
 0x2e4   : > { %794 = vmatpush1.msra.mxu1 %v637_v41 }
 0x2e5   : > { %795 = vmatprep.subr.mxu1 %v630_v42 }
 0x2e6   : > { %796 = vmatpush1.msra.mxu1 %v629_v43 }
 0x2e7   : > { %797 = vmatprep.subr.mxu1 %v622_v45 }
 0x2e8   : > { %798 = vmatpush1.msra.mxu1 %v621_v47 }
 0x2e9   : > { %933 = vmatprep.subr.mxu1 %v650_v49 }
 0x3a1   : > { %v614_v50 = vpop.f32.mrf.mxu1 }
 0x3a2   : > { %v618_v51 = vadd.f32 %v614_v50, %v1279_v10  ;;  %v651_v10 = vld [vmem:[%s1426_s5] sm:$0xff] }
 0x3a3   : > { %v1167_v54 = vpop.f32.mrf.mxu1  ;;  %v656_v11 = vrot.slane %v651_v10, %v655_v6  ;;  %v664_v12 = vrot.slane %v651_v10, %v663_v7  ;;  %v660_v13 = vrot.slane %v651_v10, %v659_v8  ;;  %v668_v14 = vrot.slane %v651_v10, %v667_v9 }
 0x3a4   : > { %1095 = vmatmul.mubr.msk.f32.vlgmr.msra.gmra.mxu0 %vm280_vm1, %v618_v51  ;;  %1096 = vmatmul.mubr.msk.f32.vlgmr.msra.gmra.mxu1 %vm280_vm1, %v618_v51  ;;  %v672_v28 = vrot.slane %v651_v10, %v671_v22  ;;  %v680_v29 = vrot.slane %v651_v10, %v679_v23  ;;  %v676_v30 = vrot.slane %v651_v10, %v675_v24 }
 0x3a5   : > { %863 = vmatpush1.msra.mxu0 %v647_v52  ;;  %934 = vmatpush1.msra.mxu1 %v649_v53  ;;  %v684_v31 = vrot.slane %v651_v10, %v683_v25 }
 0x3a6   : > { %864 = vmatprep.subr.mxu0 %v640_v55  ;;  %935 = vmatprep.subr.mxu1 %v642_v56 }
 0x3a7   : > { %865 = vmatpush1.msra.mxu0 %v639_v57  ;;  %936 = vmatpush1.msra.mxu1 %v641_v58 }
 0x3a8   : > { %866 = vmatprep.subr.mxu0 %v632_v59  ;;  %937 = vmatprep.subr.mxu1 %v634_v60 }
 0x3a9   : > { %867 = vmatpush1.msra.mxu0 %v631_v61  ;;  %938 = vmatpush1.msra.mxu1 %v633_v62 }
 0x3aa   : > { %868 = vmatprep.subr.mxu0 %v624_v63  ;;  %939 = vmatprep.subr.mxu1 %v626_v0 }
 0x3ab   : > { %869 = vmatpush1.msra.mxu0 %v623_v2  ;;  %902 = vmatprep.mubr.f32.mxu0 %v1190_v1 }
 0x3ac   : > { %940 = vmatpush1.msra.mxu1 %v625_v3  ;;  %973 = vmatprep.mubr.f32.mxu1 %v1190_v1 }
 0x3ad   : > { %1097 = vmatmul.mubr.msk.f32.vlgmr.msra.gmra.mxu0 %vm280_vm1, %v618_v51  ;;  %1098 = vmatmul.mubr.msk.f32.vlgmr.msra.gmra.mxu1 %vm280_vm1, %v618_v51 }
 0x464   : > { %v762_v1 = vpop.f32.mrf.mxu0  ;;  %v833_v15 = vpop.f32.mrf.mxu1 }
 0x465   : > { %v763_v18 = vadd.f32 %v762_v1, %v656_v11  ;;  %v834_v19 = vadd.f32 %v833_v15, %v664_v12 }
 0x466   : > { %v764_v16 = vpop.f32.mrf.mxu0  ;;  %v835_v17 = vpop.f32.mrf.mxu1 }
 0x467   : > { %v765_v20 = vadd.f32 %v764_v16, %v660_v13  ;;  %v836_v21 = vadd.f32 %v835_v17, %v668_v14 }
 0x469   : > { %v988_v26 = vcombine.low %v763_v18, %v765_v20  ;;  %v989_v27 = vcombine.low %v834_v19, %v836_v21 }
 0x46b   : > { %996 = vst [vmem:[%s271_s28] sm:$0xff] %v988_v26  ;;  %997 = vst [vmem:[%s271_s28 + $0x8] sm:$0xff] %v989_v27 }
 0x46d   : > { %v904_v32 = vpop.f32.mrf.mxu0  ;;  %v975_v33 = vpop.f32.mrf.mxu1 }
 0x46e   : > { %v905_v36 = vadd.f32 %v904_v32, %v672_v28  ;;  %v976_v37 = vadd.f32 %v975_v33, %v680_v29 }
 0x46f   : > { %v906_v34 = vpop.f32.mrf.mxu0  ;;  %v977_v35 = vpop.f32.mrf.mxu1 }
 0x470   : > { %v907_v38 = vadd.f32 %v906_v34, %v676_v30  ;;  %v978_v39 = vadd.f32 %v977_v35, %v684_v31 }
 0x472   : > { %v990_v40 = vcombine.low %v905_v36, %v907_v38  ;;  %v991_v41 = vcombine.low %v976_v37, %v978_v39 }
 0x474   : > { %998 = vst [vmem:[%s271_s28 + $0x10] sm:$0xff] %v990_v40  ;;  %999 = vst [vmem:[%s271_s28 + $0x18] sm:$0xff] %v991_v41 }
 0x475 PF: > { %s16_s21 = sadd.s32 1, %s1188_s21  }
 0x476   : > { %p13_p4 = scmp.ge.s32.totalorder %s16_s21, 4  }
 0x478   :  { %15 = sbr.rel (!%p13_p4) target bundleno = 1 (0x1), region = 77 }

// kernel: viteff_forward.27
= control target key start
LH: loop header
LB: loop body
LE: loop exit
PB: predicated region body
PF: predicated region fallthrough
CT: control target
= control target key end

     0   :  { %11 = vsyncpa [#allocation3], 0  ;;  %s2196_s0 = inlined_call_operand.vmem [shape: f32[2,1,32], index: 0, kind: input, shape index: {}]   ;;  %s2197_s1 = inlined_call_operand.vmem [shape: f32[5,2,17,32], index: 1, kind: input, shape index: {}]   ;;  %s2198_s2 = inlined_call_operand.vmem [shape: f32[32,32], index: 2, kind: input, shape index: {}]   ;;  %s2199_s3 = inlined_call_operand.vmem [shape: f32[32,32], index: 3, kind: input, shape index: {}]   ;;  %s2200_s4 = inlined_call_operand.vmem [shape: f32[32,2048], index: 4, kind: input, shape index: {}]   ;;  %s2201_s5 = inlined_call_operand.vmem [shape: f32[1,2048], index: 5, kind: input, shape index: {}]   ;;  %s2202_s6 = inlined_call_operand.hbm [shape: f32[2,1,2048], index: 6, kind: output, shape index: {}]  }
   0x1   :  { %13 = vsyncpa [#allocation3 + $0x1], 0  ;;  %s1786_s21 = smov 0   ;;  %s1788_s22 = smov 0  }
   0x2   :  { %s1790_s23 = smov 0   ;;  %s1792_s24 = smov 0  }
   0x3 LB: > { %s1807_s25 = sadd.s32 4294967295, %s1745_s24   ;;  %s1540_s26 = sadd.s32 4294967294, %s1745_s24   ;;  %s1745_s24 = sphi %s1792_s24, %s2208_s24   ;;  %s1741_s23 = sphi %s1790_s23, %s2207_s23   ;;  %s1737_s22 = sphi %s1788_s22, %s2206_s22   ;;  %s1733_s21 = sphi %s1786_s21, %s2205_s21  }
   0x4   : > { %s1811_s27 = sadd.s32 1, %s1745_s24   ;;  %s162_s28 = sadd.s32 1, %s1741_s23 }
   0x5   : > { %s159_s29 = ssub.s32 %s1745_s24, %s1811_s27  ;;  %p172_p0 = scmp.ne.s32.totalorder %s1741_s23, %s1737_s22 }
   0x6   : > { %p160_p1 = scmp.eq.s32.totalorder %s159_s29, 0  ;;  %p173_p2 = scmp.eq.s32.totalorder %s1807_s25, 1 }
   0x7   : > { %p178_p3 = scmp.ne.s32.totalorder %s1737_s22, %s1733_s21  ;;  %p179_p4 = scmp.eq.s32.totalorder %s1540_s26, 1 }
   0x8   : > { %s1822_s30 = scalar_select %p160_p1, %s1741_s23, %s162_s28  }
   0x9   : > { %p1824_p5 = por %p173_p2, %p172_p0  ;;  %p1828_p6 = por %p179_p4, %p178_p3 }
   0xa   : > { %p1543_p7 = scmp.ge.s32.totalorder %s1745_s24, 1  ;;  %p224_p8 = scmp.lt.s32.totalorder %s1745_s24, 3 }
   0xc   : > { %p225_p9 = pnand %p1543_p7, %p224_p8 }
   0xd   : > { %p258_p10 = scmp.lt.s32.totalorder (!%p225_p9), %s1807_s25, 1  ;;  %s255_s13 = sand.u32 (!%p225_p9), 1, %s1737_s22  }
   0xe   : > { %228 = sbr.rel (%p225_p9) target bundleno = 1189 (0x4a5), region = 44  ;;  %s1544_s17 = sshll.u32 (!%p225_p9), %s255_s13, 4 }
   0xf   : > { %s2150_s18 = scalar_lea.vmem (!%p225_p9), [#allocation2], %s1544_s17  ;;  %s1452_s29 = scalar_lea.sflag (!%p225_p9), [#allocation3], %s255_s13 }
  0x10   : > { %s1466_s19 = sshll.u32 (!%p225_p9), %s2150_s18, 4  ;;  %s1467_s19 = int_to_ptr.vmem [resolvable:$true] %s1466_s19 }
  0x11   : > { %s1685_s9 = scalar_lea.vmem (!%p225_p9), %s1467_s19, 256 }
  0x12   : > { %p1686_p11 = scmp.ne.s32.totalorder (!%p225_p9), %s1467_s19, %s1685_s9 }
  0x13   : > { %v352_v0 = vld [vmem:[%s2199_s3 + $0x18] sm:$0xff]  ;;  %v1747_v1 = vmov 0.0   ;;  %v351_v2 = vld [vmem:[%s2199_s3 + $0x10] sm:$0xff]  ;;  %vm1748_vm0 = vmmov 0   ;;  %s259_s15 = scalar_select %p258_p10, %s1807_s25, 1  ;;  %v350_v5 = vld [vmem:[%s2199_s3 + $0x8] sm:$0xff] }
  0x14   : > { %1604 = vmatprep.subr.mxu1 %v1747_v1  ;;  %1612 = vmatprep.mubr.msk.f32.mxu1 %vm1748_vm0, %v1747_v1  ;;  %v274_v3 = vld [vmem:[%s2198_s2 + $0x18] sm:$0xff]  ;;  %v273_v4 = vld [vmem:[%s2198_s2 + $0x10] sm:$0xff]  ;;  %v272_v6 = vld [vmem:[%s2198_s2 + $0x8] sm:$0xff]  ;;  %vm275_vm1 = vcmask 261120   ;;  %vm524_vm2 = vcmask 131072   ;;  %vm540_vm3 = vcmask 1040384   ;;  %p1687_p12 = pnand %p1686_p11, %p1824_p5 }
  0x15   : > { %1605 = vmatpush3.msra.mxu1 %v352_v0  ;;  %1593 = vmatprep.subr.mxu0 %v1747_v1  ;;  %s1545_s20 = smul.u32 24, %s259_s15  ;;  %v349_v7 = vld [vmem:[%s2199_s3] sm:$0xff]  ;;  %s260_s12 = scalar_lea.vmem %s2196_s0, %s259_s15  ;;  %v663_v29 = vld [vmem:[%s2200_s4 + $0x188] sm:$0xff]  ;;  %v665_v30 = vld [vmem:[%s2200_s4 + $0x198] sm:$0xff]  ;;  %vm536_vm4 = vcmask 138240  }
  0x16   : > { %1606 = vmatprep.subr.mxu1 %v1747_v1  ;;  %1594 = vmatpush3.msra.mxu0 %v274_v3  ;;  %v271_v8 = vld [vmem:[%s2198_s2] sm:$0xff]  ;;  %v647_v32 = vld [vmem:[%s2200_s4 + $0x108] sm:$0xff]  ;;  %v664_v39 = vld [vmem:[%s2200_s4 + $0x190] sm:$0xff]  ;;  %s1572_s15 = sshll.u32 %s1807_s25, 8  ;;  %p1688_p13 = pneg %p1687_p12 }
  0x17   : > { %1607 = vmatpush3.msra.mxu1 %v351_v2  ;;  %1595 = vmatprep.subr.mxu0 %v1747_v1  ;;  %s1503_s16 = scalar_lea.vmem %s2197_s1, %s1545_s20  ;;  %v1876_v10 = vld [vmem:[%s260_s12] sm:$0x1]  ;;  %v631_v34 = vld [vmem:[%s2200_s4 + $0x88] sm:$0xff]  ;;  %v649_v40 = vld [vmem:[%s2200_s4 + $0x118] sm:$0xff]  ;;  %s1464_s28 = scalar_lea.hbm %s2202_s6, %s1572_s15 }
  0x18   : > { %1608 = vmatprep.subr.mxu1 %v1747_v1  ;;  %1596 = vmatpush3.msra.mxu0 %v273_v4  ;;  %v1546_v9 = vld [vmem:[%s1503_s16 + $0x90] sm:$0xff]  ;;  %v1547_v11 = vld [vmem:[%s1503_s16 + $0x98] sm:$0xff]  ;;  %v1548_v12 = vld [vmem:[%s1503_s16 + $0xa0] sm:$0x1]  ;;  %s1750_s25 = smov [#allocation2]  }
  0x19   : > { %1609 = vmatpush3.msra.mxu1 %v350_v5  ;;  %1597 = vmatprep.subr.mxu0 %v1747_v1  ;;  %v662_v31 = vld [vmem:[%s2200_s4 + $0x180] sm:$0xff]  ;;  %v648_v41 = vld [vmem:[%s2200_s4 + $0x110] sm:$0xff]  ;;  %v633_v42 = vld [vmem:[%s2200_s4 + $0x98] sm:$0xff]  ;;  %s1689_s10 = sshll.u32 %s1750_s25, 4  ;;  %s1690_s10 = int_to_ptr.vmem [resolvable:$false] %s1689_s10 }
  0x1a   : > { %1610 = vmatprep.subr.mxu1 %v1747_v1  ;;  %1598 = vmatpush3.msra.mxu0 %v272_v6  ;;  %v646_v33 = vld [vmem:[%s2200_s4 + $0x100] sm:$0xff]  ;;  %v632_v43 = vld [vmem:[%s2200_s4 + $0x90] sm:$0xff]  ;;  %v615_v44 = vld [vmem:[%s2200_s4 + $0x8] sm:$0xff]  ;;  %s1691_s11 = scalar_lea.vmem %s1690_s10, 512  ;;  %p1692_p0 = scmp.lt.s32.totalorder %s1467_s19, %s1690_s10 }
  0x1b   : > { %1611 = vmatpush3.msra.mxu1 %v349_v7  ;;  %1599 = vmatprep.subr.mxu0 %v1747_v1  ;;  %v630_v35 = vld [vmem:[%s2200_s4 + $0x80] sm:$0xff]  ;;  %v617_v45 = vld [vmem:[%s2200_s4 + $0x18] sm:$0xff]  ;;  %v616_v47 = vld [vmem:[%s2200_s4 + $0x10] sm:$0xff]  ;;  %p1693_p1 = scmp.lt.s32.totalorder %s1691_s11, %s1685_s9 }
  0x1c   : > { %1613 = vmatmul.mubr.msk.f32.vlgmr.msra.gmra.mxu1 %vm275_vm1, %v1546_v9  ;;  %1600 = vmatpush3.msra.mxu0 %v271_v8  ;;  %v614_v46 = vld [vmem:[%s2200_s4] sm:$0xff]  ;;  %v667_v48 = vld [vmem:[%s2200_s4 + $0x1a8] sm:$0xff]  ;;  %v669_v49 = vld [vmem:[%s2200_s4 + $0x1b8] sm:$0xff] }
  0x1d   : > { %1615 = vmatprep.mubr.msk.f32.mxu1 %vm1748_vm0, %v1747_v1  ;;  %1601 = vmatprep.mubr.msk.f32.mxu0 %vm1748_vm0, %v1747_v1  ;;  %v666_v52 = vld [vmem:[%s2200_s4 + $0x1a0] sm:$0xff]  ;;  %v668_v53 = vld [vmem:[%s2200_s4 + $0x1b0] sm:$0xff]  ;;  %v651_v55 = vld [vmem:[%s2200_s4 + $0x128] sm:$0xff]  ;;  %p1694_p2 = por %p1693_p1, %p1692_p0 }
  0x1e   : > { %1602 = vmatmul.mubr.msk.f32.vlgmr.msra.gmra.mxu0 %vm275_vm1, %v1876_v10  ;;  %1621 = vmatprep.subr.mxu0 %v1747_v1  ;;  %v653_v56 = vld [vmem:[%s2200_s4 + $0x138] sm:$0xff]  ;;  %v650_v57 = vld [vmem:[%s2200_s4 + $0x120] sm:$0xff]  ;;  %v652_v58 = vld [vmem:[%s2200_s4 + $0x130] sm:$0xff] }
  0x1f   : > { %1627 = vmatprep.mubr.msk.f32.mxu0 %vm1748_vm0, %v1747_v1  ;;  %1630 = vmatprep.subr.mxu1 %v1747_v1  ;;  %v635_v59 = vld [vmem:[%s2200_s4 + $0xa8] sm:$0xff]  ;;  %v637_v60 = vld [vmem:[%s2200_s4 + $0xb8] sm:$0xff]  ;;  %v634_v61 = vld [vmem:[%s2200_s4 + $0xa0] sm:$0xff]  ;;  %p1695_p3 = pnand %p1694_p2, %p1688_p13 }
  0x20   : > { %1616 = vmatmul.mubr.msk.f32.gmra.mxu1 %vm275_vm1, %v1547_v11  ;;  %v636_v62 = vld [vmem:[%s2200_s4 + $0xb0] sm:$0xff]  ;;  %v619_v63 = vld [vmem:[%s2200_s4 + $0x28] sm:$0xff]  ;;  %v621_v0 = vld [vmem:[%s2200_s4 + $0x38] sm:$0xff] }
  0x21   : > { %1618 = vmatprep.mubr.msk.f32.mxu1 %vm1748_vm0, %v1747_v1  ;;  %1631 = vmatpush3.msk.msra.mxu1 %vm540_vm3, %v1548_v12  ;;  %v618_v2 = vld [vmem:[%s2200_s4 + $0x20] sm:$0xff]  ;;  %v620_v3 = vld [vmem:[%s2200_s4 + $0x30] sm:$0xff]  ;;  %v671_v4 = vld [vmem:[%s2200_s4 + $0x1c8] sm:$0xff] }
  0x22   : > { %1632 = vmatprep.subr.mxu1 %v1747_v1  ;;  %v673_v5 = vld [vmem:[%s2200_s4 + $0x1d8] sm:$0xff]  ;;  %v670_v6 = vld [vmem:[%s2200_s4 + $0x1c0] sm:$0xff]  ;;  %v672_v7 = vld [vmem:[%s2200_s4 + $0x1d0] sm:$0xff] }
  0x23   : > { %1633 = vmatpush3.msra.mxu1 %v1547_v11  ;;  %v655_v8 = vld [vmem:[%s2200_s4 + $0x148] sm:$0xff]  ;;  %v656_v11 = vld [vmem:[%s2200_s4 + $0x150] sm:$0xff] }
  0x24   : > { %1619 = vmatmul.mubr.msk.f32.gmra.mxu1 %vm275_vm1, %v1548_v12  ;;  %1634 = vmatprep.subr.mxu1 %v1747_v1  ;;  %v639_v12 = vld [vmem:[%s2200_s4 + $0xc8] sm:$0xff] }
  0x25   : > { %1636 = vmatprep.mubr.msk.f32.mxu1 %vm1748_vm0, %v1747_v1  ;;  %1635 = vmatpush3.msra.mxu1 %v1546_v9  ;;  %v657_v9 = vld [vmem:[%s2200_s4 + $0x158] sm:$0xff] }
  0x26   : > { %860 = vmatprep.subr.mxu1 %v665_v30  ;;  %v642_v30 = vld [vmem:[%s2200_s4 + $0xe0] sm:$0xff] }
  0xdc   : > { %v428_v13 = vpop.f32.mrf.mxu1 }
  0xde   : > { %v1614_v14 = vpop.f32.mrf.mxu1  ;;  %v345_v15 = vpop.f32.mrf.mxu0 }
  0xdf   : > { %v638_v14 = vld [vmem:[%s2200_s4 + $0xc0] sm:$0xff] }
  0xe0   : > { %v433_v16 = vpop.f32.mrf.mxu1  ;;  %v1603_v17 = vpop.f32.mrf.mxu0 }
  0xe1   : > { %v625_v17 = vld [vmem:[%s2200_s4 + $0x58] sm:$0xff] }
  0xe2   : > { %v1617_v18 = vpop.f32.mrf.mxu1 }
  0xe3   : > { %v622_v18 = vld [vmem:[%s2200_s4 + $0x40] sm:$0xff] }
  0xe4   : > { %v438_v19 = vpop.f32.mrf.mxu1 }
  0xe5   : > { %1622 = vmatpush3.xpose.msk.msra.mxu0 %vm275_vm1, %v438_v19  ;;  %v624_v19 = vld [vmem:[%s2200_s4 + $0x50] sm:$0xff] }
  0xe6   : > { %v1620_v20 = vpop.f32.mrf.mxu1  ;;  %1623 = vmatprep.subr.mxu0 %v1747_v1 }
  0xe7   : > { %v675_v20 = vld [vmem:[%s2200_s4 + $0x1e8] sm:$0xff] }
  0xe9   : > { %1624 = vmatpush3.xpose.msk.msra.mxu0 %vm275_vm1, %v433_v16  ;;  %v623_v16 = vld [vmem:[%s2200_s4 + $0x48] sm:$0xff] }
  0xea   : > { %1625 = vmatprep.subr.mxu0 %v1747_v1 }
  0xed   : > { %1626 = vmatpush3.xpose.msk.msra.mxu0 %vm275_vm1, %v428_v13  ;;  %v641_v13 = vld [vmem:[%s2200_s4 + $0xd8] sm:$0xff] }
  0xee   : > { %789 = vmatprep.subr.mxu0 %v663_v29  ;;  %v645_v29 = vld [vmem:[%s2200_s4 + $0xf8] sm:$0xff] }
  0xf0   : > { %1628 = vmatmul.mubr.msk.f32.vlgmr.msra.gmra.mxu0 %vm275_vm1, %v345_v15  ;;  %v640_v15 = vld [vmem:[%s2200_s4 + $0xd0] sm:$0xff] }
  0xf1   : > { %829 = vmatprep.mubr.f32.mxu0 %v1747_v1  ;;  %790 = vmatpush1.msra.mxu0 %v662_v31  ;;  %v644_v31 = vld [vmem:[%s2200_s4 + $0xf0] sm:$0xff] }
  0xf2   : > { %791 = vmatprep.subr.mxu0 %v647_v32  ;;  %v627_v32 = vld [vmem:[%s2200_s4 + $0x68] sm:$0xff] }
  0xf3   : > { %792 = vmatpush1.msra.mxu0 %v646_v33  ;;  %v629_v33 = vld [vmem:[%s2200_s4 + $0x78] sm:$0xff] }
  0xf4   : > { %793 = vmatprep.subr.mxu0 %v631_v34  ;;  %v626_v34 = vld [vmem:[%s2200_s4 + $0x60] sm:$0xff] }
  0xf5   : > { %794 = vmatpush1.msra.mxu0 %v630_v35  ;;  %v628_v35 = vld [vmem:[%s2200_s4 + $0x70] sm:$0xff] }
  0xf6   : > { %795 = vmatprep.subr.mxu0 %v615_v44 }
  0xf7   : > { %796 = vmatpush1.msra.mxu0 %v614_v46 }
  0xf8   : > { %931 = vmatprep.subr.mxu0 %v667_v48 }
 0x1b0   : > { %v520_v21 = vpop.f32.mrf.mxu0 }
 0x1b1   : > { %v525_v22 = vsel %vm524_vm2, %v520_v21, -inf }
 0x1b2   : > { %526 = vmax.xlane.f32.xlu0 %v525_v22  ;;  %v1629_v23 = vpop.f32.mrf.mxu0  ;;  %v674_v22 = vld [vmem:[%s2200_s4 + $0x1e0] sm:$0xff] }
 0x1b3   : > { %v676_v23 = vld [vmem:[%s2200_s4 + $0x1f0] sm:$0xff] }
 0x23b   : > { %v527_v24 = vpop.xlane.xlu0 %526 }
 0x23c   : > { %v528_v25 = vsub.f32 %v520_v21, %v527_v24  ;;  %v677_v21 = vld [vmem:[%s2200_s4 + $0x1f8] sm:$0xff]  ;;  %v659_v24 = vld [vmem:[%s2200_s4 + $0x168] sm:$0xff] }
 0x23e   : > { %v529_v26 = vmul.f32 1.442695, %v528_v25  ;;  %v661_v25 = vld [vmem:[%s2200_s4 + $0x178] sm:$0xff] }
 0x240   : > { %1681 = vpow2.f32 %v529_v26  ;;  %v658_v26 = vld [vmem:[%s2200_s4 + $0x160] sm:$0xff] }
 0x24d   : > { %v1682_v27 = vpop.eup %1681 }
 0x24e   : > { %v531_v28 = vsel %vm524_vm2, %v1682_v27, 0.0 }
 0x24f   : > { %532 = vadd.xlane.f32.xlu0 %v531_v28  ;;  %v643_v28 = vld [vmem:[%s2200_s4 + $0xe8] sm:$0xff] }
 0x2d8   : > { %v533_v36 = vpop.xlane.xlu0 %532 }
 0x2d9   : > { %1683 = vrcp.f32 %v533_v36  ;;  %v682_v36 = vlaneseq }
 0x2e6   : > { %v1684_v37 = vpop.eup %1683 }
 0x2e7   : > { %v535_v38 = vmul.f32 %v1684_v37, %v1682_v27  ;;  %v660_v27 = vld [vmem:[%s2200_s4 + $0x170] sm:$0xff]  ;;  %v2122_v37 = vshrl.u32 %v682_v36, 7 }
 0x2e9   : > { %1637 = vmatmul.mubr.msk.f32.vlgmr.msra.gmra.mxu1 %vm536_vm4, %v535_v38  ;;  %v688_v38 = vsub.s32 1, %v2122_v37 }
 0x2ea   : > { %861 = vmatpush1.msra.mxu1 %v664_v39  ;;  %900 = vmatprep.mubr.f32.mxu1 %v1747_v1  ;;  %v696_v39 = vsub.s32 3, %v2122_v37 }
 0x2eb   : > { %862 = vmatprep.subr.mxu1 %v649_v40  ;;  %v684_v40 = vsub.s32 0, %v2122_v37 }
 0x2ec   : > { %863 = vmatpush1.msra.mxu1 %v648_v41  ;;  %v692_v41 = vsub.s32 2, %v2122_v37 }
 0x2ed   : > { %864 = vmatprep.subr.mxu1 %v633_v42 }
 0x2ee   : > { %865 = vmatpush1.msra.mxu1 %v632_v43  ;;  %v1749_v43 = vmov 1966171168  }
 0x2ef   : > { %866 = vmatprep.subr.mxu1 %v617_v45  ;;  %v1354_v44 = vunpack.c.l.s4 %v1749_v43 }
 0x2f0   : > { %867 = vmatpush1.msra.mxu1 %v616_v47 }
 0x2f1   : > { %1002 = vmatprep.subr.mxu1 %v669_v49 }
 0x3a9   : > { %v609_v50 = vpop.f32.mrf.mxu1 }
 0x3aa   : > { %v1960_v51 = vadd.f32 %v609_v50, %v1876_v10  ;;  %v654_v10 = vld [vmem:[%s2200_s4 + $0x140] sm:$0xff] }
 0x3ab   : > { %v1638_v54 = vpop.f32.mrf.mxu1 }
 0x3ac   : > { %1559 = vmatmul.mubr.msk.f32.vlgmr.msra.gmra.mxu0 %vm275_vm1, %v1960_v51  ;;  %1560 = vmatmul.mubr.msk.f32.vlgmr.msra.gmra.mxu1 %vm275_vm1, %v1960_v51 }
 0x3ad   : > { %932 = vmatpush1.msra.mxu0 %v666_v52  ;;  %1003 = vmatpush1.msra.mxu1 %v668_v53  ;;  %v1355_v53 = vunpack.c.0.s8 %v1354_v44 }
 0x3ae   : > { %933 = vmatprep.subr.mxu0 %v651_v55  ;;  %1004 = vmatprep.subr.mxu1 %v653_v56  ;;  %v700_v55 = vsub.s32 4, %v2122_v37  ;;  %v708_v56 = vsub.s32 6, %v2122_v37 }
 0x3af   : > { %934 = vmatpush1.msra.mxu0 %v650_v57  ;;  %1005 = vmatpush1.msra.mxu1 %v652_v58  ;;  %v704_v57 = vsub.s32 5, %v2122_v37  ;;  %v712_v58 = vsub.s32 7, %v2122_v37 }
 0x3b0   : > { %935 = vmatprep.subr.mxu0 %v635_v59  ;;  %1006 = vmatprep.subr.mxu1 %v637_v60 }
 0x3b1   : > { %936 = vmatpush1.msra.mxu0 %v634_v61  ;;  %1007 = vmatpush1.msra.mxu1 %v636_v62  ;;  %v2136_v62 = vsub.s32 %v1355_v53, %v2122_v37 }
 0x3b2   : > { %937 = vmatprep.subr.mxu0 %v619_v63  ;;  %1008 = vmatprep.subr.mxu1 %v621_v0 }
 0x3b3   : > { %938 = vmatpush1.msra.mxu0 %v618_v2  ;;  %971 = vmatprep.mubr.f32.mxu0 %v1747_v1 }
 0x3b4   : > { %1009 = vmatpush1.msra.mxu1 %v620_v3  ;;  %1042 = vmatprep.mubr.f32.mxu1 %v1747_v1 }
 0x3b5   : > { %1561 = vmatmul.mubr.msk.f32.vlgmr.msra.gmra.mxu0 %vm275_vm1, %v1960_v51  ;;  %1562 = vmatmul.mubr.msk.f32.vlgmr.msra.gmra.mxu1 %vm275_vm1, %v1960_v51 }
 0x3b6   : > { %1073 = vmatprep.subr.mxu0 %v671_v4  ;;  %1144 = vmatprep.subr.mxu1 %v673_v5 }
 0x3b7   : > { %1074 = vmatpush1.msra.mxu0 %v670_v6  ;;  %1145 = vmatpush1.msra.mxu1 %v672_v7 }
 0x3b8   : > { %1075 = vmatprep.subr.mxu0 %v655_v8  ;;  %1146 = vmatprep.subr.mxu1 %v657_v9 }
 0x3b9   : > { %1076 = vmatpush1.msra.mxu0 %v654_v10  ;;  %1147 = vmatpush1.msra.mxu1 %v656_v11 }
 0x3ba   : > { %1077 = vmatprep.subr.mxu0 %v639_v12  ;;  %1148 = vmatprep.subr.mxu1 %v641_v13 }
 0x3bb   : > { %1078 = vmatpush1.msra.mxu0 %v638_v14  ;;  %1149 = vmatpush1.msra.mxu1 %v640_v15 }
 0x3bc   : > { %1079 = vmatprep.subr.mxu0 %v623_v16  ;;  %1150 = vmatprep.subr.mxu1 %v625_v17 }
 0x3bd   : > { %1080 = vmatpush1.msra.mxu0 %v622_v18  ;;  %1113 = vmatprep.mubr.f32.mxu0 %v1747_v1 }
 0x3be   : > { %1151 = vmatpush1.msra.mxu1 %v624_v19  ;;  %1184 = vmatprep.mubr.f32.mxu1 %v1747_v1 }
 0x3bf   : > { %1563 = vmatmul.mubr.msk.f32.vlgmr.msra.gmra.mxu0 %vm275_vm1, %v1960_v51  ;;  %1564 = vmatmul.mubr.msk.f32.vlgmr.msra.gmra.mxu1 %vm275_vm1, %v1960_v51 }
 0x3c0   : > { %1215 = vmatprep.subr.mxu0 %v675_v20  ;;  %1286 = vmatprep.subr.mxu1 %v677_v21  ;;  %v679_v21 = vld [vmem:[%s2201_s5 + $0x8] sm:$0xff] }
 0x3c1   : > { %1216 = vmatpush1.msra.mxu0 %v674_v22  ;;  %1287 = vmatpush1.msra.mxu1 %v676_v23  ;;  %v745_v43 = vrot.slane %v679_v21, %v712_v58 }
 0x3c2   : > { %1217 = vmatprep.subr.mxu0 %v659_v24  ;;  %1288 = vmatprep.subr.mxu1 %v661_v25  ;;  %v721_v24 = vrot.slane %v679_v21, %v688_v38  ;;  %v729_v25 = vrot.slane %v679_v21, %v696_v39 }
 0x3c3   : > { %1218 = vmatpush1.msra.mxu0 %v658_v26  ;;  %1289 = vmatpush1.msra.mxu1 %v660_v27 }
 0x3c4   : > { %1219 = vmatprep.subr.mxu0 %v643_v28  ;;  %1290 = vmatprep.subr.mxu1 %v645_v29  ;;  %v717_v28 = vrot.slane %v679_v21, %v684_v40  ;;  %v725_v29 = vrot.slane %v679_v21, %v692_v41 }
 0x3c5   : > { %1220 = vmatpush1.msra.mxu0 %v642_v30  ;;  %1291 = vmatpush1.msra.mxu1 %v644_v31 }
 0x3c6   : > { %1221 = vmatprep.subr.mxu0 %v627_v32  ;;  %1292 = vmatprep.subr.mxu1 %v629_v33 }
 0x3c7   : > { %1222 = vmatpush1.msra.mxu0 %v626_v34  ;;  %1255 = vmatprep.mubr.f32.mxu0 %v1747_v1 }
 0x3c8   : > { %1293 = vmatpush1.msra.mxu1 %v628_v35  ;;  %1326 = vmatprep.mubr.f32.mxu1 %v1747_v1  ;;  %v678_v1 = vld [vmem:[%s2201_s5] sm:$0xff] }
 0x3c9   : > { %1565 = vmatmul.mubr.msk.f32.vlgmr.msra.gmra.mxu0 %vm275_vm1, %v1960_v51  ;;  %1566 = vmatmul.mubr.msk.f32.vlgmr.msra.gmra.mxu1 %vm275_vm1, %v1960_v51  ;;  %v689_v42 = vrot.slane %v678_v1, %v688_v38  ;;  %v697_v45 = vrot.slane %v678_v1, %v696_v39  ;;  %v685_v48 = vrot.slane %v678_v1, %v684_v40 }
 0x3ca   : > { %v693_v49 = vrot.slane %v678_v1, %v692_v41  ;;  %v701_v0 = vrot.slane %v678_v1, %v700_v55  ;;  %v709_v2 = vrot.slane %v678_v1, %v708_v56  ;;  %v705_v3 = vrot.slane %v678_v1, %v704_v57 }
 0x3cb   : > { %v713_v4 = vrot.slane %v678_v1, %v712_v58  ;;  %v733_v39 = vrot.slane %v679_v21, %v700_v55  ;;  %v741_v1 = vrot.slane %v679_v21, %v708_v56 }
 0x46c   : > { %v831_v46 = vpop.f32.mrf.mxu0  ;;  %v902_v47 = vpop.f32.mrf.mxu1 }
 0x46d   : > { %v832_v59 = vadd.f32 %v831_v46, %v685_v48  ;;  %v903_v60 = vadd.f32 %v902_v47, %v693_v49 }
 0x46e   : > { %v833_v50 = vpop.f32.mrf.mxu0  ;;  %v904_v51 = vpop.f32.mrf.mxu1 }
 0x46f   : > { %v834_v52 = vadd.f32 %v833_v50, %v689_v42  ;;  %v905_v54 = vadd.f32 %v904_v51, %v697_v45  ;;  %v737_v42 = vrot.slane %v679_v21, %v704_v57 }
 0x471   : > { %v1349_v61 = vcombine.low %v832_v59, %v834_v52  ;;  %v1350_v63 = vcombine.low %v903_v60, %v905_v54 }
 0x473   : > { %v1359_v7 = vrot.slane %v1349_v61, %v2136_v62  ;;  %v1366_v8 = vrot.slane %v1350_v63, %v2136_v62 }
 0x475   : > { %v973_v5 = vpop.f32.mrf.mxu0  ;;  %v1044_v6 = vpop.f32.mrf.mxu1  ;;  %v1381_v17 = vcombine.low %v1359_v7, %v1366_v8 }
 0x476   : > { %v974_v11 = vadd.f32 %v973_v5, %v701_v0  ;;  %v1045_v12 = vadd.f32 %v1044_v6, %v709_v2 }
 0x477   : > { %v975_v9 = vpop.f32.mrf.mxu0  ;;  %v1046_v10 = vpop.f32.mrf.mxu1  ;;  %v1389_v26 = vrot.slane %v1381_v17, %v2136_v62 }
 0x478   : > { %v976_v13 = vadd.f32 %v975_v9, %v705_v3  ;;  %v1047_v14 = vadd.f32 %v1046_v10, %v713_v4 }
 0x47a   : > { %v1351_v15 = vcombine.low %v974_v11, %v976_v13  ;;  %v1352_v16 = vcombine.low %v1045_v12, %v1047_v14 }
 0x47c   : > { %v1373_v18 = vrot.slane %v1351_v15, %v2136_v62  ;;  %v1380_v19 = vrot.slane %v1352_v16, %v2136_v62 }
 0x47e   : > { %v1382_v20 = vcombine.low %v1373_v18, %v1380_v19 }
 0x47f   : > { %v1115_v22 = vpop.f32.mrf.mxu0  ;;  %v1186_v23 = vpop.f32.mrf.mxu1 }
 0x480   : > { %v1396_v27 = vrot.slane %v1382_v20, %v2136_v62  ;;  %v1116_v35 = vadd.f32 %v1115_v22, %v717_v28  ;;  %v1187_v36 = vadd.f32 %v1186_v23, %v725_v29 }
 0x481   : > { %v1117_v30 = vpop.f32.mrf.mxu0  ;;  %v1188_v31 = vpop.f32.mrf.mxu1 }
 0x482   : > { %v1397_v32 = vcombine.low %v1389_v26, %v1396_v27  ;;  %v1118_v33 = vadd.f32 %v1117_v30, %v721_v24  ;;  %v1189_v34 = vadd.f32 %v1188_v31, %v729_v25 }
 0x484   : > { %1449 = vst [vmem:[%s2150_s18] sm:$0xff] %v1397_v32  ;;  %v1398_v37 = vcombine.low %v1116_v35, %v1118_v33  ;;  %v1399_v38 = vcombine.low %v1187_v36, %v1189_v34 }
 0x486   : > { %v1408_v41 = vrot.slane %v1398_v37, %v2136_v62  ;;  %v1415_v45 = vrot.slane %v1399_v38, %v2136_v62 }
 0x488   : > { %v1430_v54 = vcombine.low %v1408_v41, %v1415_v45 }
 0x489   : > { %v1257_v44 = vpop.f32.mrf.mxu0  ;;  %v1328_v40 = vpop.f32.mrf.mxu1 }
 0x48a   : > { %v1258_v48 = vadd.f32 %v1257_v44, %v733_v39  ;;  %v1329_v49 = vadd.f32 %v1328_v40, %v741_v1  ;;  %v1438_v58 = vrot.slane %v1430_v54, %v2136_v62 }
 0x48b   : > { %v1259_v46 = vpop.f32.mrf.mxu0  ;;  %v1330_v47 = vpop.f32.mrf.mxu1 }
 0x48c   : > { %v1260_v50 = vadd.f32 %v1259_v46, %v737_v42  ;;  %v1331_v51 = vadd.f32 %v1330_v47, %v745_v43 }
 0x48e   : > { %v1400_v52 = vcombine.low %v1258_v48, %v1260_v50  ;;  %v1401_v53 = vcombine.low %v1329_v49, %v1331_v51 }
 0x490   : > { %v1422_v55 = vrot.slane %v1400_v52, %v2136_v62  ;;  %v1429_v56 = vrot.slane %v1401_v53, %v2136_v62 }
 0x492   : > { %v1431_v57 = vcombine.low %v1422_v55, %v1429_v56 }
 0x494   : > { %v1445_v59 = vrot.slane %v1431_v57, %v2136_v62 }
 0x496   : > { %v1446_v60 = vcombine.low %v1438_v58, %v1445_v59 }
 0x498   : > { %1450 = vst [vmem:[%s2150_s18 + $0x8] sm:$0xff] %v1446_v60 }
 0x499   : > { %1698 = shalt.err (!%p1695_p3)
}
 0x49a   : > { %s1699_s12 = scalar_lea.hbm %s1464_s28, 256  ;;  %s1703_s16 = scalar_lea.hbm %s2202_s6, 512 }
 0x49b   : > { %p1700_p4 = scmp.ne.s32.totalorder %s1464_s28, %s1699_s12  ;;  %p1704_p9 = scmp.lt.s32.totalorder %s1464_s28, %s2202_s6 }
 0x49c   : > { %p1705_p10 = scmp.lt.s32.totalorder %s1703_s16, %s1699_s12 }
 0x49d   : > { %p1701_p7 = pnand %p1700_p4, %p1824_p5 }
 0x49e   : > { %p1706_p11 = por %p1705_p10, %p1704_p9 }
 0x49f   : > { %p1702_p8 = pneg %p1701_p7 }
 0x4a1   : > { %p1707_p12 = pnand %p1706_p11, %p1702_p8 }
 0x4a3   : > { %1710 = shalt.err (!%p1707_p12)
}
 0x4a4   : > { %1639 = dma.vmem_to_hbm [thread:$0]  (%p1824_p5), %s1467_s19, 256, %s1464_s28, %s1452_s29  }
 0x4a5 PF: > { %p1645_p13 = scmp.ge.s32.totalorder %s1745_s24, 2  ;;  %s1478_s15 = sand.u32 1, %s1733_s21  }
 0x4a6   : > { %s1479_s20 = scalar_lea.sflag [#allocation3], %s1478_s15 }
 0x4a7   : > { %p1642_p0 = pnand %p1645_p13, %p1828_p6 }
 0x4a9   : > { %p1643_p1 = pneg %p1642_p0 }
 0x4ab   : > { %1728 = dma.done.wait (%p1643_p1), %s1479_s20, 256  }
 0x4ac   : > { %1730 = vsyncadd (%p1643_p1), %s1479_s20, 4294967040  ;;  %p16_p2 = scmp.ge.s32.totalorder %s1811_s27, 4   ;;  %s2205_s21 = smov %s1737_s22 }
 0x4ad   : > { %s2206_s22 = smov %s1741_s23  ;;  %s2207_s23 = smov %s1822_s30 }
 0x4ae   : > { %s2208_s24 = smov %s1811_s27  ;;  %18 = sbr.rel (!%p16_p2) target bundleno = 3 (0x3), region = 82 }
 0x4b3   :  { %1484 = vsyncpa [#allocation3], 1 }
 0x4b4   :  { %1486 = vsyncpa [#allocation3 + $0x1], 1 }

// kernel: viteff_forward.25
= control target key start
LH: loop header
LB: loop body
LE: loop exit
PB: predicated region body
PF: predicated region fallthrough
CT: control target
= control target key end

     0   :  { %s1103_s21 = smov 0   ;;  %s1248_s0 = inlined_call_operand.vmem [shape: f32[2,16,32], index: 0, kind: input, shape index: {}]   ;;  %s1249_s1 = inlined_call_operand.vmem [shape: f32[5,2,17,32], index: 1, kind: input, shape index: {}]   ;;  %s1250_s2 = inlined_call_operand.vmem [shape: f32[32,32], index: 2, kind: input, shape index: {}]   ;;  %s1251_s3 = inlined_call_operand.vmem [shape: f32[32,32], index: 3, kind: input, shape index: {}]   ;;  %s1252_s4 = inlined_call_operand.vmem [shape: f32[32,512], index: 4, kind: input, shape index: {}]   ;;  %s1253_s5 = inlined_call_operand.vmem [shape: f32[1,512], index: 5, kind: input, shape index: {}]   ;;  %s1254_s6 = inlined_call_operand.vmem [shape: f32[2,16,512], index: 6, kind: output, shape index: {}]  }
   0x1 LB: > { %s937_s22 = sadd.s32 4294967295, %s1064_s21   ;;  %p941_p0 = scmp.ge.s32.totalorder %s1064_s21, 1  ;;  %s1064_s21 = sphi %s1103_s21, %s16_s21  }
   0x2   : > { %p223_p1 = scmp.lt.s32.totalorder %s1064_s21, 3 }
   0x4   : > { %p224_p2 = pnand %p941_p0, %p223_p1 }
   0x5   : > { %p259_p3 = scmp.lt.s32.totalorder (!%p224_p2), %s937_s22, 1 }
   0x6   : > { %227 = sbr.rel (%p224_p2) target bundleno = 1143 (0x477), region = 44 }
   0xb   : > { %v369_v0 = vld [vmem:[%s1251_s3 + $0x18] sm:$0xff]  ;;  %v1066_v1 = vmov 0.0   ;;  %v368_v2 = vld [vmem:[%s1251_s3 + $0x10] sm:$0xff]  ;;  %vm1067_vm0 = vmmov 0   ;;  %s1256_s22 = smov (!%p259_p3, %s937_s22), 1  ;;  %v367_v5 = vld [vmem:[%s1251_s3 + $0x8] sm:$0xff]  ;;  %v676_v62 = vlaneseq }
   0xc   : > { %1005 = vmatprep.subr.mxu1 %v1066_v1  ;;  %1013 = vmatprep.mubr.msk.f32.mxu1 %vm1067_vm0, %v1066_v1  ;;  %v283_v3 = vld [vmem:[%s1250_s2 + $0x18] sm:$0xff]  ;;  %v282_v4 = vld [vmem:[%s1250_s2 + $0x10] sm:$0xff]  ;;  %v281_v6 = vld [vmem:[%s1250_s2 + $0x8] sm:$0xff]  ;;  %s944_s11 = smul.u32 24, %s1256_s22  ;;  %s969_s16 = sshll.u32 %s1256_s22, 4  ;;  %vm284_vm1 = vcmask 261120  }
   0xd   : > { %1006 = vmatpush3.msra.mxu1 %v369_v0  ;;  %994 = vmatprep.subr.mxu0 %v283_v3  ;;  %v366_v7 = vld [vmem:[%s1251_s3] sm:$0xff]  ;;  %s263_s24 = scalar_lea.vmem %s1248_s0, %s969_s16  ;;  %vm549_vm2 = vcmask 138240   ;;  %vm578_vm3 = vcmask 1040384   ;;  %v671_v36 = vld [vmem:[%s1252_s4 + $0x68] sm:$0xff]  ;;  %v673_v37 = vld [vmem:[%s1252_s4 + $0x78] sm:$0xff]  ;;  %v677_v63 = vshrl.u32 %v676_v62, 7 }
   0xe   : > { %1007 = vmatprep.subr.mxu1 %v1066_v1  ;;  %995 = vmatpush3.msra.mxu0 %v283_v3  ;;  %v280_v8 = vld [vmem:[%s1250_s2] sm:$0xff]  ;;  %s903_s19 = scalar_lea.vmem %s1249_s1, %s944_s11  ;;  %v1153_v11 = vld [vmem:[%s263_s24 + $0x8] sm:$0xff]  ;;  %v672_v46 = vld [vmem:[%s1252_s4 + $0x70] sm:$0xff]  ;;  %s970_s13 = sshll.u32 %s1256_s22, 6 }
   0xf   : > { %1008 = vmatpush3.msra.mxu1 %v368_v2  ;;  %996 = vmatprep.subr.mxu0 %v282_v4  ;;  %v947_v9 = vld [vmem:[%s903_s19 + $0x30] sm:$0xff]  ;;  %v1151_v10 = vld [vmem:[%s263_s24] sm:$0xff]  ;;  %v948_v12 = vld [vmem:[%s903_s19 + $0x38] sm:$0xff]  ;;  %v678_v0 = vsub.s32 0, %v677_v63  ;;  %v686_v2 = vsub.s32 2, %v677_v63  ;;  %s274_s16 = scalar_lea.vmem %s1254_s6, %s970_s13 }
  0x10   : > { %1009 = vmatprep.subr.mxu1 %v1066_v1  ;;  %997 = vmatpush3.msra.mxu0 %v282_v4  ;;  %v949_v13 = vld [vmem:[%s903_s19 + $0x40] sm:$0x1]  ;;  %v667_v39 = vld [vmem:[%s1252_s4 + $0x48] sm:$0xff]  ;;  %v669_v47 = vld [vmem:[%s1252_s4 + $0x58] sm:$0xff]  ;;  %v682_v4 = vsub.s32 1, %v677_v63 }
  0x11   : > { %1010 = vmatpush3.msra.mxu1 %v367_v5  ;;  %998 = vmatprep.subr.mxu0 %v281_v6  ;;  %v670_v38 = vld [vmem:[%s1252_s4 + $0x60] sm:$0xff]  ;;  %v668_v49 = vld [vmem:[%s1252_s4 + $0x50] sm:$0xff]  ;;  %v663_v50 = vld [vmem:[%s1252_s4 + $0x28] sm:$0xff]  ;;  %v690_v5 = vsub.s32 3, %v677_v63 }
  0x12   : > { %1011 = vmatprep.subr.mxu1 %v1066_v1  ;;  %999 = vmatpush3.msra.mxu0 %v281_v6  ;;  %v666_v48 = vld [vmem:[%s1252_s4 + $0x40] sm:$0xff]  ;;  %v665_v51 = vld [vmem:[%s1252_s4 + $0x38] sm:$0xff]  ;;  %v664_v53 = vld [vmem:[%s1252_s4 + $0x30] sm:$0xff] }
  0x13   : > { %1012 = vmatpush3.msra.mxu1 %v366_v7  ;;  %1000 = vmatprep.subr.mxu0 %v280_v8  ;;  %v662_v52 = vld [vmem:[%s1252_s4 + $0x20] sm:$0xff]  ;;  %v659_v54 = vld [vmem:[%s1252_s4 + $0x8] sm:$0xff]  ;;  %v661_v55 = vld [vmem:[%s1252_s4 + $0x18] sm:$0xff] }
  0x14   : > { %1014 = vmatmul.mubr.msk.f32.vlgmr.msra.gmra.mxu1 %vm284_vm1, %v947_v9  ;;  %1001 = vmatpush3.msra.mxu0 %v280_v8  ;;  %v658_v56 = vld [vmem:[%s1252_s4] sm:$0xff]  ;;  %v660_v57 = vld [vmem:[%s1252_s4 + $0x10] sm:$0xff] }
  0x15   : > { %1016 = vmatprep.mubr.msk.f32.mxu1 %vm1067_vm0, %v1066_v1  ;;  %1002 = vmatprep.mubr.msk.f32.mxu0 %vm284_vm1, %v1151_v10  ;;  %v674_v3 = vld [vmem:[%s1253_s5] sm:$0xf] }
  0x16   : > { %1003 = vmatmul.mubr.msk.f32.vlgmr.msra.gmra.mxu0 %vm284_vm1, %v1153_v11  ;;  %1031 = vmatprep.subr.msk.mxu1 %vm578_vm3, %v949_v13  ;;  %v679_v6 = vrot.slane %v674_v3, %v678_v0  ;;  %v687_v7 = vrot.slane %v674_v3, %v686_v2  ;;  %v691_v8 = vrot.slane %v674_v3, %v690_v5 }
  0x17   : > { %1032 = vmatpush3.msk.msra.mxu1 %vm578_vm3, %v949_v13 }
  0x18   : > { %1017 = vmatmul.mubr.msk.f32.gmra.mxu1 %vm284_vm1, %v948_v12  ;;  %1033 = vmatprep.subr.mxu1 %v948_v12 }
  0x19   : > { %1019 = vmatprep.mubr.msk.f32.mxu1 %vm1067_vm0, %v1066_v1  ;;  %1034 = vmatpush3.msra.mxu1 %v948_v12 }
  0x1a   : > { %1035 = vmatprep.subr.mxu1 %v947_v9 }
  0x1b   : > { %1036 = vmatpush3.msra.mxu1 %v947_v9 }
  0x1c   : > { %1020 = vmatmul.mubr.msk.f32.gmra.mxu1 %vm284_vm1, %v949_v13  ;;  %803 = vmatprep.subr.mxu1 %v673_v37 }
  0xd4   : > { %v445_v14 = vpop.f32.mrf.mxu1 }
  0xd6   : > { %v1015_v15 = vpop.f32.mrf.mxu1  ;;  %v1004_v16 = vpop.f32.mrf.mxu0 }
  0xd8   : > { %v450_v17 = vpop.f32.mrf.mxu1  ;;  %v357_v18 = vpop.f32.mrf.mxu0 }
  0xd9   : > { %1028 = vmatprep.mubr.msk.f32.mxu0 %vm284_vm1, %v357_v18 }
  0xda   : > { %v1018_v19 = vpop.f32.mrf.mxu1 }
  0xdc   : > { %v455_v20 = vpop.f32.mrf.mxu1 }
  0xdd   : > { %1022 = vmatprep.subr.msk.mxu0 %vm284_vm1, %v455_v20 }
  0xde   : > { %v1021_v21 = vpop.f32.mrf.mxu1  ;;  %1023 = vmatpush3.xpose.msk.msra.mxu0 %vm284_vm1, %v455_v20 }
  0xdf   : > { %1024 = vmatprep.subr.msk.mxu0 %vm284_vm1, %v450_v17 }
  0xe2   : > { %1025 = vmatpush3.xpose.msk.msra.mxu0 %vm284_vm1, %v450_v17 }
  0xe3   : > { %1026 = vmatprep.subr.msk.mxu0 %vm284_vm1, %v445_v14 }
  0xe6   : > { %1027 = vmatpush3.xpose.msk.msra.mxu0 %vm284_vm1, %v445_v14 }
  0xe7   : > { %726 = vmatprep.subr.mxu0 %v671_v36 }
  0xe9   : > { %1029 = vmatmul.mubr.msk.f32.vlgmr.msra.gmra.mxu0 %vm284_vm1, %v1004_v16 }
  0xea   : > { %766 = vmatprep.mubr.f32.mxu0 %v1066_v1  ;;  %727 = vmatpush1.msra.mxu0 %v670_v38 }
  0xeb   : > { %728 = vmatprep.subr.mxu0 %v667_v39 }
  0xec   : > { %729 = vmatpush1.msra.mxu0 %v666_v48 }
  0xed   : > { %730 = vmatprep.subr.mxu0 %v663_v50 }
  0xee   : > { %731 = vmatpush1.msra.mxu0 %v662_v52 }
  0xef   : > { %732 = vmatprep.subr.mxu0 %v659_v54 }
  0xf0   : > { %733 = vmatpush1.msra.mxu0 %v658_v56 }
 0x1a9   : > { %v1030_v22 = vpop.f32.mrf.mxu0 }
 0x1aa   : > { %v553_v25 = vsel %vm549_vm2, %v1030_v22, -inf }
 0x1ab   : > { %v540_v23 = vpop.f32.mrf.mxu0 }
 0x1ac   : > { %v550_v24 = vsel %vm549_vm2, %v540_v23, -inf }
 0x1ad   : > { %551 = vmax.xlane.f32.xlu0 %v550_v24 }
 0x1b1   : > { %554 = vmax.xlane.f32.xlu0 %v553_v25 }
 0x236   : > { %v552_v26 = vpop.xlane.xlu0 %551 }
 0x237   : > { %v556_v27 = vsub.f32 %v540_v23, %v552_v26 }
 0x239   : > { %v558_v28 = vmul.f32 1.442695, %v556_v27 }
 0x23a   : > { %v555_v29 = vpop.xlane.xlu0 %554 }
 0x23b   : > { %1050 = vpow2.f32 %v558_v28  ;;  %v557_v30 = vsub.f32 %v1030_v22, %v555_v29 }
 0x23d   : > { %v560_v31 = vmul.f32 1.442695, %v557_v30 }
 0x23f   : > { %1052 = vpow2.f32 %v560_v31 }
 0x248   : > { %v1051_v32 = vpop.eup %1050 }
 0x249   : > { %v562_v33 = vsel %vm549_vm2, %v1051_v32, 0.0 }
 0x24a   : > { %563 = vadd.xlane.f32.xlu1 %v562_v33 }
 0x24c   : > { %v1053_v34 = vpop.eup %1052 }
 0x24d   : > { %v565_v35 = vsel %vm549_vm2, %v1053_v34, 0.0 }
 0x24e   : > { %566 = vadd.xlane.f32.xlu1 %v565_v35 }
 0x2d3   : > { %v564_v40 = vpop.xlane.xlu1 %563 }
 0x2d4   : > { %1054 = vrcp.f32 %v564_v40 }
 0x2d7   : > { %v567_v41 = vpop.xlane.xlu1 %566 }
 0x2d8   : > { %1056 = vrcp.f32 %v567_v41 }
 0x2e1   : > { %v1055_v42 = vpop.eup %1054 }
 0x2e2   : > { %v569_v43 = vmul.f32 %v1055_v42, %v1051_v32 }
 0x2e4   : > { %1037 = vmatprep.mubr.msk.f32.mxu1 %vm549_vm2, %v569_v43 }
 0x2e5   : > { %v1057_v44 = vpop.eup %1056 }
 0x2e6   : > { %v571_v45 = vmul.f32 %v1057_v44, %v1053_v34 }
 0x2e8   : > { %1038 = vmatmul.mubr.msk.f32.vlgmr.msra.gmra.mxu1 %vm549_vm2, %v571_v45 }
 0x2e9   : > { %804 = vmatpush1.msra.mxu1 %v672_v46  ;;  %843 = vmatprep.mubr.f32.mxu1 %v1066_v1 }
 0x2ea   : > { %805 = vmatprep.subr.mxu1 %v669_v47 }
 0x2eb   : > { %806 = vmatpush1.msra.mxu1 %v668_v49 }
 0x2ec   : > { %807 = vmatprep.subr.mxu1 %v665_v51 }
 0x2ed   : > { %808 = vmatpush1.msra.mxu1 %v664_v53 }
 0x2ee   : > { %809 = vmatprep.subr.mxu1 %v661_v55 }
 0x2ef   : > { %810 = vmatpush1.msra.mxu1 %v660_v57 }
 0x3a8   : > { %v1039_v58 = vpop.f32.mrf.mxu1 }
 0x3a9   : > { %v657_v61 = vadd.f32 %v1039_v58, %v1153_v11 }
 0x3aa   : > { %v647_v59 = vpop.f32.mrf.mxu1 }
 0x3ab   : > { %v656_v60 = vadd.f32 %v647_v59, %v1151_v10 }
 0x3ad   : > { %963 = vmatmul.mubr.msk.f32.vlgmr.msra.gmra.mxu0 %vm284_vm1, %v656_v60  ;;  %965 = vmatmul.mubr.msk.f32.vlgmr.msra.gmra.mxu1 %vm284_vm1, %v656_v60 }
 0x3ae   : > { %772 = vmatprep.mubr.f32.mxu0 %v1066_v1  ;;  %849 = vmatprep.mubr.f32.mxu1 %v1066_v1  ;;  %v683_v1 = vrot.slane %v674_v3, %v682_v4 }
 0x3b1   : > { %964 = vmatmul.mubr.msk.f32.gmra.mxu0 %vm284_vm1, %v657_v61  ;;  %966 = vmatmul.mubr.msk.f32.gmra.mxu1 %vm284_vm1, %v657_v61 }
 0x46d   : > { %v768_v9 = vpop.f32.mrf.mxu0  ;;  %v845_v10 = vpop.f32.mrf.mxu1 }
 0x46e   : > { %v769_v11 = vadd.f32 %v768_v9, %v679_v6  ;;  %v846_v12 = vadd.f32 %v845_v10, %v687_v7 }
 0x46f   : > { %v770_v13 = vpop.f32.mrf.mxu0  ;;  %v847_v14 = vpop.f32.mrf.mxu1 }
 0x470   : > { %856 = vst [vmem:[%s274_s16] sm:$0xff] %v769_v11  ;;  %858 = vst [vmem:[%s274_s16 + $0x10] sm:$0xff] %v846_v12  ;;  %v771_v15 = vadd.f32 %v770_v13, %v683_v1  ;;  %v848_v16 = vadd.f32 %v847_v14, %v691_v8 }
 0x471   : > { %v774_v17 = vpop.f32.mrf.mxu0  ;;  %v851_v18 = vpop.f32.mrf.mxu1 }
 0x472   : > { %857 = vst [vmem:[%s274_s16 + $0x8] sm:$0xff] %v771_v15  ;;  %859 = vst [vmem:[%s274_s16 + $0x18] sm:$0xff] %v848_v16  ;;  %v775_v19 = vadd.f32 %v774_v17, %v679_v6  ;;  %v852_v20 = vadd.f32 %v851_v18, %v687_v7 }
 0x473   : > { %v776_v21 = vpop.f32.mrf.mxu0  ;;  %v853_v22 = vpop.f32.mrf.mxu1 }
 0x474   : > { %860 = vst [vmem:[%s274_s16 + $0x20] sm:$0xff] %v775_v19  ;;  %862 = vst [vmem:[%s274_s16 + $0x30] sm:$0xff] %v852_v20  ;;  %v777_v23 = vadd.f32 %v776_v21, %v683_v1  ;;  %v854_v24 = vadd.f32 %v853_v22, %v691_v8 }
 0x476   : > { %861 = vst [vmem:[%s274_s16 + $0x28] sm:$0xff] %v777_v23  ;;  %863 = vst [vmem:[%s274_s16 + $0x38] sm:$0xff] %v854_v24 }
 0x477 PF: > { %s16_s21 = sadd.s32 1, %s1064_s21  }
 0x478   : > { %p13_p4 = scmp.ge.s32.totalorder %s16_s21, 4  }
 0x47a   :  { %15 = sbr.rel (!%p13_p4) target bundleno = 1 (0x1), region = 77 }

</bundles_post_ra>
